<compile_context>
chip_gen: v7x
topology: tpu7x:2x2x1
jax: 0.10.0
libtpu: 0.0.40
codegen_flags: <defaults>
</compile_context>

<pallas_src>
import math
import sys
from functools import partial

import jax
import jax.numpy as jnp
from jax import lax
from jax.experimental import pallas as pl
from jax.experimental.pallas import tpu as pltpu

GN_EPS = 1e-5
_SQRT2 = math.sqrt(2.0)

# bf16 MXU operands: native MXU rate + half the operand VMEM/DMA traffic.
# Accumulation (preferred_element_type) and the GN/GELU epilogue are f32.
# Set to None for exact-f32 operands (debug / parity checks).
MXU_DTYPE = jnp.bfloat16


def _mxu(x, mxu_dtype):
    return x if mxu_dtype is None else x.astype(mxu_dtype)


def _gelu_exact(x):
    # PyTorch nn.GELU() default: exact erf-based gelu (kept for parity; the
    # tanh approximation would shift this load to the EUP, mainly a v5e win).
    return 0.5 * x * (1.0 + lax.erf(x / _SQRT2))


def _bytes(shape, dtype):
    return math.prod(shape) * jnp.dtype(dtype).itemsize


def _mosaic_params(step_bytes):
    # Generation-aware scoped-VMEM budget: cap at ~3/4 of physical per-core
    # VMEM (v5e/v6e: 128 MiB, v7x: 64 MiB) so double-buffered blocks and
    # compiler scratch keep headroom; never request less than 16 MiB.
    try:
        phys = int(pltpu.get_tpu_info().vmem_capacity_bytes)
    except Exception:                         # no info -> assume smallest (v7x)
        phys = 64 * 1024 * 1024
    cap = (3 * phys) // 4
    limit = int(min(cap, max(16 * 1024 * 1024, 6 * step_bytes)))
    return pltpu.CompilerParams(dimension_semantics=("parallel",),
                                vmem_limit_bytes=limit)


# ---------------------------------------------------------------------------
# Fused per-image kernel:
#   [ConvTranspose2d(2,2) over cat(x, skip) + in-VMEM pixel shuffle]   (opt.)
#   -> 4 x [Conv2d 3x3 pad1 -> GroupNorm(G, C) -> GELU]
# Everything after the input DMA stays VMEM-resident.
# ---------------------------------------------------------------------------
def _make_unet_up_kernel(H, W, Ch, C, G, n_stages, fuse_deconv, mxu_dtype):
    H2, W2 = 2 * H, 2 * W
    M = H2 * W2
    gsize = C // G
    inv_cnt = 1.0 / float(gsize * M)

    def _group_fold(row):                     # row: (1, C) per-channel sums
        if gsize == 1:                        # GroupNorm(C, C): identity fold
            return row
        g = jnp.sum(row.reshape(G, gsize), axis=1, keepdims=True)     # (G, 1)
        return jnp.broadcast_to(g, (G, gsize)).reshape(1, C)

    def kernel(*refs):
        if fuse_deconv:
            (x_ref, s_ref, wup_ref, bup_ref, w_ref, b_ref, gm_ref, bt_ref,
             o_ref, xpad_ref) = refs
        else:
            (up_ref, w_ref, b_ref, gm_ref, bt_ref, o_ref, xpad_ref) = refs

        # ---- zero padding -------------------------------------------------
        if fuse_deconv:
            # Only the 1-pixel border is zeroed (interior is fully overwritten
            # every stage).  Done every grid step: on megacore parts the
            # scratch is per-core, so this must NOT be gated on program_id.
            zrow = jnp.zeros((1, W2 + 2, C), jnp.float32)
            zcol = jnp.zeros((H2 + 2, 1, C), jnp.float32)
            xpad_ref[0:1, :, :] = zrow
            xpad_ref[H2 + 1:H2 + 2, :, :] = zrow
            xpad_ref[:, 0:1, :] = zcol
            xpad_ref[:, W2 + 1:W2 + 2, :] = zcol
        else:
            xpad_ref[...] = jnp.zeros_like(xpad_ref)

        # ---- ConvTranspose2d(2, 2) over cat((x, skip), ch) + pixel shuffle --
        if fuse_deconv:
            M0 = H * W
            x2 = _mxu(x_ref[0].reshape(M0, Ch), mxu_dtype)
            s2 = _mxu(s_ref[0].reshape(M0, Ch), mxu_dtype)
            for ki in range(2):
                # columns ordered (kj, co); x/skip halves of the channel concat
                # are two matmuls so the concat is never materialized.
                acc = jnp.dot(x2, wup_ref[ki, :Ch, :],
                              preferred_element_type=jnp.float32)
                acc = acc + jnp.dot(s2, wup_ref[ki, Ch:, :],
                                    preferred_element_type=jnp.float32)
                acc = acc + bup_ref[...]                       # (M0, 2*C)
                # row i of `rows` is upsampled output row 2*i + ki
                rows = acc.reshape(H, W2, C)
                for i in range(H):
                    xpad_ref[1 + 2 * i + ki, 1:1 + W2, :] = rows[i]
        else:
            xpad_ref[1:1 + H2, 1:1 + W2, :] = up_ref[0].astype(jnp.float32)

        # ---- 4 x (Conv2d 3x3 pad1 -> GroupNorm -> GELU), VMEM resident ------
        y = None
        for s in range(n_stages):
            if s > 0:
                xpad_ref[1:1 + H2, 1:1 + W2, :] = y.reshape(H2, W2, C)

            # TODO(synk): the 9 K=C tap matmuls underfill the 256-deep v6e/v7x
            # MXU; packing them into one K=9*C im2col matmul needs a lane-dim
            # concat of C-wide taps, left out here for lowering robustness.
            acc = jnp.zeros((M, C), jnp.float32)
            for ky in range(3):
                for kx in range(3):
                    patch = xpad_ref[ky:ky + H2, kx:kx + W2, :].reshape(M, C)
                    acc = acc + jnp.dot(_mxu(patch, mxu_dtype),
                                        w_ref[s, ky, kx],
                                        preferred_element_type=jnp.float32)
            acc = acc + b_ref[s]                               # (1, C) bcast

            # GroupNorm: two-pass (centered) biased variance, eps inside rsqrt
            ch_sum = jnp.sum(acc, axis=0, keepdims=True)
            mean_c = _group_fold(ch_sum) * inv_cnt
            d = acc - mean_c
            sq_sum = jnp.sum(d * d, axis=0, keepdims=True)
            var_c = _group_fold(sq_sum) * inv_cnt
            y = d * lax.rsqrt(var_c + GN_EPS) * gm_ref[s] + bt_ref[s]

            y = _gelu_exact(y)                                 # (M, C)

        o_ref[0] = y.astype(o_ref.dtype)

    return kernel


# ---------------------------------------------------------------------------
# Parameter repacking (PyTorch layouts -> kernel operand layouts; all tiny)
# ---------------------------------------------------------------------------
def _prep_params(params, mxu_dtype):
    ct_w, ct_b = params["ct_w"], params["ct_b"]     # (2*Ch, C, 2, 2), (C,)
    Cin, C = ct_w.shape[0], ct_w.shape[1]
    # wup[ki, ci, kj*C + co]; rows 0:Ch are the x half, Ch:2Ch the skip half
    wup = jnp.transpose(ct_w, (2, 0, 3, 1)).reshape(2, Cin, 2 * C)
    bup = jnp.tile(ct_b, 2).reshape(1, 2 * C).astype(jnp.float32)

    convs = [params[blk][cv] for blk in ("rb1", "rb2") for cv in ("c1", "c2")]
    w_all = jnp.stack([jnp.transpose(p["w"], (2, 3, 1, 0)) for p in convs])
    b_all = jnp.stack([p["b"].reshape(1, C) for p in convs]).astype(jnp.float32)
    gm_all = jnp.stack([p["gamma"].reshape(1, C) for p in convs]).astype(jnp.float32)
    bt_all = jnp.stack([p["beta"].reshape(1, C) for p in convs]).astype(jnp.float32)
    return (_mxu(wup, mxu_dtype), bup, _mxu(w_all, mxu_dtype),
            b_all, gm_all, bt_all)


# ---------------------------------------------------------------------------
# Fallback-only: standalone deconv kernel + XLA pixel shuffle (the fused path
# does this inside the main kernel instead).
# ---------------------------------------------------------------------------
def _deconv_2x2_split(x_nhwc, skip_nhwc, wup, bup, mxu_dtype):
    N, H, W, Ch = x_nhwc.shape
    C2 = wup.shape[2]
    C = C2 // 2
    M0 = H * W

    def kernel(x_ref, s_ref, wup_ref, bup_ref, o_ref):
        x2 = _mxu(x_ref[0].reshape(M0, Ch), mxu_dtype)
        s2 = _mxu(s_ref[0].reshape(M0, Ch), mxu_dtype)
        for ki in range(2):
            acc = jnp.dot(x2, wup_ref[ki, :Ch, :],
                          preferred_element_type=jnp.float32)
            acc = acc + jnp.dot(s2, wup_ref[ki, Ch:, :],
                                preferred_element_type=jnp.float32)
            acc = acc + bup_ref[...]
            o_ref[0, ki] = acc.astype(o_ref.dtype)

    step_bytes = (2 * _bytes((1, H, W, Ch), x_nhwc.dtype)
                  + _bytes(wup.shape, wup.dtype) + _bytes(bup.shape, bup.dtype)
                  + _bytes((1, 2, M0, C2), x_nhwc.dtype))

    out = pl.pallas_call(
        kernel,
        out_shape=jax.ShapeDtypeStruct((N, 2, M0, C2), x_nhwc.dtype),
        grid=(N,),
        in_specs=[
            pl.BlockSpec((1, H, W, Ch), lambda n: (n, 0, 0, 0)),
            pl.BlockSpec((1, H, W, Ch), lambda n: (n, 0, 0, 0)),
            pl.BlockSpec((2, 2 * Ch, C2), lambda n: (0, 0, 0)),
            pl.BlockSpec((1, C2), lambda n: (0, 0)),
        ],
        out_specs=pl.BlockSpec((1, 2, M0, C2), lambda n: (n, 0, 0, 0)),
        compiler_params=_mosaic_params(step_bytes),
    )(x_nhwc, skip_nhwc, wup, bup)

    # TODO(synk): XLA 2x2 pixel shuffle exists only on this fallback path.
    up = out.reshape(N, 2, H, W, 2, C)
    return jnp.transpose(up, (0, 2, 1, 3, 4, 5)).reshape(N, 2 * H, 2 * W, C)


# ---------------------------------------------------------------------------
# UnetUp forward (NCHW in / NCHW out, like the PyTorch module)
# ---------------------------------------------------------------------------
def unet_up_forward(x_nchw, skip_nchw, params, *, num_groups=32,
                    fuse_deconv=True):
    N, Ch, H, W = x_nchw.shape
    C = params["ct_w"].shape[1]                     # out_channels
    assert params["ct_w"].shape[0] == 2 * Ch and skip_nchw.shape == x_nchw.shape
    assert C % num_groups == 0
    H2, W2 = 2 * H, 2 * W
    M = H2 * W2
    assert M % 8 == 0

    wup, bup, w_all, b_all, gm_all, bt_all = _prep_params(params, MXU_DTYPE)
    S = w_all.shape[0]                              # 4 conv/GN/GELU stages

    # boundary layout changes only (kernels work NHWC internally)
    x = jnp.transpose(x_nchw, (0, 2, 3, 1))
    sk = jnp.transpose(skip_nchw, (0, 2, 3, 1))

    common_bytes = (_bytes(w_all.shape, w_all.dtype)
                    + 3 * _bytes(b_all.shape, jnp.float32)
                    + _bytes((1, M, C), x.dtype)
                    + _bytes((H2 + 2, W2 + 2, C), jnp.float32))
    kernel_kwargs = dict(
        out_shape=jax.ShapeDtypeStruct((N, M, C), x.dtype),
        grid=(N,),
        out_specs=pl.BlockSpec((1, M, C), lambda n: (n, 0, 0)),
        scratch_shapes=[pltpu.VMEM((H2 + 2, W2 + 2, C), jnp.float32)],
    )
    w_specs = [
        pl.BlockSpec((S, 3, 3, C, C), lambda n: (0, 0, 0, 0, 0)),
        pl.BlockSpec((S, 1, C), lambda n: (0, 0, 0)),
        pl.BlockSpec((S, 1, C), lambda n: (0, 0, 0)),
        pl.BlockSpec((S, 1, C), lambda n: (0, 0, 0)),
    ]

    if fuse_deconv:
        step_bytes = (2 * _bytes((1, H, W, Ch), x.dtype)
                      + _bytes(wup.shape, wup.dtype)
                      + _bytes(bup.shape, bup.dtype) + common_bytes)
        out = pl.pallas_call(
            _make_unet_up_kernel(H, W, Ch, C, num_groups, S, True, MXU_DTYPE),
            in_specs=[
                pl.BlockSpec((1, H, W, Ch), lambda n: (n, 0, 0, 0)),
                pl.BlockSpec((1, H, W, Ch), lambda n: (n, 0, 0, 0)),
                pl.BlockSpec((2, 2 * Ch, 2 * C), lambda n: (0, 0, 0)),
                pl.BlockSpec((1, 2 * C), lambda n: (0, 0)),
            ] + w_specs,
            compiler_params=_mosaic_params(step_bytes),
            **kernel_kwargs,
        )(x, sk, wup, bup, w_all, b_all, gm_all, bt_all)
    else:
        up = _deconv_2x2_split(x, sk, wup, bup, MXU_DTYPE)   # (N, H2, W2, C)
        step_bytes = _bytes((1, H2, W2, C), up.dtype) + common_bytes
        out = pl.pallas_call(
            _make_unet_up_kernel(H, W, Ch, C, num_groups, S, False, MXU_DTYPE),
            in_specs=[pl.BlockSpec((1, H2, W2, C),
                                   lambda n: (n, 0, 0, 0))] + w_specs,
            compiler_params=_mosaic_params(step_bytes),
            **kernel_kwargs,
        )(up, w_all, b_all, gm_all, bt_all)

    out = out.reshape(N, H2, W2, C)                 # free (same memory order)
    return jnp.transpose(out, (0, 3, 1, 2))         # NHWC -> NCHW


def init_params(key, in_channels, out_channels):
    ks = jax.random.split(key, 20)
    it = iter(range(20))

    def nrm(k, shape, scale):
        return (scale * jax.random.normal(k, shape)).astype(jnp.float32)

    params = {
        "ct_w": nrm(ks[next(it)], (in_channels, out_channels, 2, 2), 0.1),
        "ct_b": nrm(ks[next(it)], (out_channels,), 0.05),
    }
    for blk in ("rb1", "rb2"):
        params[blk] = {}
        for cv in ("c1", "c2"):
            params[blk][cv] = {
                "w": nrm(ks[next(it)], (out_channels, out_channels, 3, 3), 0.1),
                "b": nrm(ks[next(it)], (out_channels,), 0.05),
                "gamma": 1.0 + nrm(ks[next(it)], (out_channels,), 0.05),
                "beta": nrm(ks[next(it)], (out_channels,), 0.05),
            }
    return params


if __name__ == "__main__":
    # UnetUp(in_channels=64, out_channels=32); x and skip each carry 32
    # channels so cat((x, skip), 1) has 64; GroupNorm(32, 32) stays valid.
    N, C_half, H, W = 2, 32, 8, 8
    in_channels, out_channels = 2 * C_half, 32

    key = jax.random.PRNGKey(0)
    kx, kskip, kparam = jax.random.split(key, 3)
    x = jax.random.normal(kx, (N, C_half, H, W), dtype=jnp.float32)
    skip = jax.random.normal(kskip, (N, C_half, H, W), dtype=jnp.float32)
    params = init_params(kparam, in_channels, out_channels)

    try:
        fwd = jax.jit(partial(unet_up_forward, fuse_deconv=True))
        out = jax.block_until_ready(fwd(x, skip, params))
    except Exception as e:      # lowering safety net -> proven split pipeline
        print("fused path unavailable (%s); using split fallback"
              % type(e).__name__, file=sys.stderr)
        fwd = jax.jit(partial(unet_up_forward, fuse_deconv=False))
        out = jax.block_until_ready(fwd(x, skip, params))

    assert out.shape == (N, out_channels, 2 * H, 2 * W), out.shape
    assert bool(jnp.all(jnp.isfinite(out)))
    print("KERNEL_OK")
</pallas_src>

<mosaic_0001>
module attributes {stable_mosaic.version = 11 : i64} {
  func.func @kernel(%arg0: i32, %arg1: memref<1x8x8x32xf32, #tpu.memory_space<vmem>>, %arg2: memref<1x8x8x32xf32, #tpu.memory_space<vmem>>, %arg3: memref<2x64x64xbf16, #tpu.memory_space<vmem>>, %arg4: memref<1x64xf32, #tpu.memory_space<vmem>>, %arg5: memref<4x3x3x32x32xbf16, #tpu.memory_space<vmem>>, %arg6: memref<4x1x32xf32, #tpu.memory_space<vmem>>, %arg7: memref<4x1x32xf32, #tpu.memory_space<vmem>>, %arg8: memref<4x1x32xf32, #tpu.memory_space<vmem>>, %arg9: memref<1x256x32xf32, #tpu.memory_space<vmem>>, %arg10: memref<18x18x32xf32, #tpu.memory_space<vmem>>) attributes {dimension_semantics = [#tpu.dimension_semantics<parallel>], iteration_bounds = array<i64: 2>, scalar_prefetch = 0 : i64, scratch_operands = 1 : i64, tpu.core_type = #tpu.core_type<tc>, window_params = [{transform_indices = @transform_0, window_bounds = array<i64: 1, 8, 8, 32>}, {transform_indices = @transform_1, window_bounds = array<i64: 1, 8, 8, 32>}, {pipeline_mode = #tpu.pipeline_mode<synchronous>, transform_indices = @transform_2, window_bounds = array<i64: 2, 64, 64>}, {pipeline_mode = #tpu.pipeline_mode<synchronous>, transform_indices = @transform_3, window_bounds = array<i64: 1, 64>}, {pipeline_mode = #tpu.pipeline_mode<synchronous>, transform_indices = @transform_4, window_bounds = array<i64: 4, 3, 3, 32, 32>}, {pipeline_mode = #tpu.pipeline_mode<synchronous>, transform_indices = @transform_5, window_bounds = array<i64: 4, 1, 32>}, {pipeline_mode = #tpu.pipeline_mode<synchronous>, transform_indices = @transform_6, window_bounds = array<i64: 4, 1, 32>}, {pipeline_mode = #tpu.pipeline_mode<synchronous>, transform_indices = @transform_7, window_bounds = array<i64: 4, 1, 32>}, {transform_indices = @transform_8, window_bounds = array<i64: 1, 256, 32>}]} {
    %cst = arith.constant 0.000000e+00 : f32
    %0 = vector.broadcast %cst : f32 to vector<1x18x32xf32>
    %cst_0 = arith.constant 0.000000e+00 : f32
    %1 = vector.broadcast %cst_0 : f32 to vector<18x1x32xf32>
    %c0 = arith.constant 0 : index
    %c0_1 = arith.constant 0 : index
    %c0_2 = arith.constant 0 : index
    %2 = vector.load %arg10[%c0, %c0_1, %c0_2] : memref<18x18x32xf32, #tpu.memory_space<vmem>>, vector<1x18x32xf32>
    tpu.vector_store %arg10[%c0, %c0_1, %c0_2], %0 {strides = array<i32>} : memref<18x18x32xf32, #tpu.memory_space<vmem>>, vector<1x18x32xf32>,
    %c17 = arith.constant 17 : index
    %c0_3 = arith.constant 0 : index
    %c0_4 = arith.constant 0 : index
    %3 = vector.load %arg10[%c17, %c0_3, %c0_4] : memref<18x18x32xf32, #tpu.memory_space<vmem>>, vector<1x18x32xf32>
    tpu.vector_store %arg10[%c17, %c0_3, %c0_4], %0 {strides = array<i32>} : memref<18x18x32xf32, #tpu.memory_space<vmem>>, vector<1x18x32xf32>,
    %c0_5 = arith.constant 0 : index
    %c0_6 = arith.constant 0 : index
    %c0_7 = arith.constant 0 : index
    %4 = vector.load %arg10[%c0_5, %c0_6, %c0_7] : memref<18x18x32xf32, #tpu.memory_space<vmem>>, vector<18x1x32xf32>
    tpu.vector_store %arg10[%c0_5, %c0_6, %c0_7], %1 {strides = array<i32>} : memref<18x18x32xf32, #tpu.memory_space<vmem>>, vector<18x1x32xf32>,
    %c0_8 = arith.constant 0 : index
    %c17_9 = arith.constant 17 : index
    %c0_10 = arith.constant 0 : index
    %5 = vector.load %arg10[%c0_8, %c17_9, %c0_10] : memref<18x18x32xf32, #tpu.memory_space<vmem>>, vector<18x1x32xf32>
    tpu.vector_store %arg10[%c0_8, %c17_9, %c0_10], %1 {strides = array<i32>} : memref<18x18x32xf32, #tpu.memory_space<vmem>>, vector<18x1x32xf32>,
    %c0_11 = arith.constant 0 : index
    %c0_12 = arith.constant 0 : index
    %c0_13 = arith.constant 0 : index
    %c0_14 = arith.constant 0 : index
    %6 = vector.load %arg1[%c0_11, %c0_12, %c0_13, %c0_14] : memref<1x8x8x32xf32, #tpu.memory_space<vmem>>, vector<1x8x8x32xf32>
    %7 = vector.shape_cast %6 : vector<1x8x8x32xf32> to vector<8x8x32xf32>
    %8 = vector.shape_cast %7 : vector<8x8x32xf32> to vector<64x32xf32>
    %9 = arith.truncf %8 : vector<64x32xf32> to vector<64x32xbf16>
    %c0_15 = arith.constant 0 : index
    %c0_16 = arith.constant 0 : index
    %c0_17 = arith.constant 0 : index
    %c0_18 = arith.constant 0 : index
    %10 = vector.load %arg2[%c0_15, %c0_16, %c0_17, %c0_18] : memref<1x8x8x32xf32, #tpu.memory_space<vmem>>, vector<1x8x8x32xf32>
    %11 = vector.shape_cast %10 : vector<1x8x8x32xf32> to vector<8x8x32xf32>
    %12 = vector.shape_cast %11 : vector<8x8x32xf32> to vector<64x32xf32>
    %13 = arith.truncf %12 : vector<64x32xf32> to vector<64x32xbf16>
    %c0_19 = arith.constant 0 : index
    %c0_20 = arith.constant 0 : index
    %c0_21 = arith.constant 0 : index
    %14 = vector.load %arg3[%c0_19, %c0_20, %c0_21] : memref<2x64x64xbf16, #tpu.memory_space<vmem>>, vector<1x32x64xbf16>
    %15 = vector.shape_cast %14 : vector<1x32x64xbf16> to vector<32x64xbf16>
    %cst_22 = arith.constant dense<0.000000e+00> : vector<64x64xf32>
    %16 = tpu.matmul %9, %15, %cst_22 {dimension_numbers = #tpu.dot_dimension_numbers<[1], [0], [0], [1], [0, 0, 1, 1], [], []>} : vector<64x32xbf16>, vector<32x64xbf16>, vector<64x64xf32> -> vector<64x64xf32>
    %c0_23 = arith.constant 0 : index
    %c32 = arith.constant 32 : index
    %c0_24 = arith.constant 0 : index
    %17 = vector.load %arg3[%c0_23, %c32, %c0_24] : memref<2x64x64xbf16, #tpu.memory_space<vmem>>, vector<1x32x64xbf16>
    %18 = vector.shape_cast %17 : vector<1x32x64xbf16> to vector<32x64xbf16>
    %cst_25 = arith.constant dense<0.000000e+00> : vector<64x64xf32>
    %19 = tpu.matmul %13, %18, %cst_25 {dimension_numbers = #tpu.dot_dimension_numbers<[1], [0], [0], [1], [0, 0, 1, 1], [], []>} : vector<64x32xbf16>, vector<32x64xbf16>, vector<64x64xf32> -> vector<64x64xf32>
    %20 = arith.addf %16, %19 : vector<64x64xf32>
    %c0_26 = arith.constant 0 : index
    %c0_27 = arith.constant 0 : index
    %21 = vector.load %arg4[%c0_26, %c0_27] : memref<1x64xf32, #tpu.memory_space<vmem>>, vector<1x64xf32>
    %22 = vector.broadcast %21 : vector<1x64xf32> to vector<64x64xf32>
    %23 = arith.addf %20, %22 : vector<64x64xf32>
    %24 = vector.shape_cast %23 : vector<64x64xf32> to vector<8x16x32xf32>
    %25 = vector.extract_strided_slice %24 {offsets = [0, 0, 0], sizes = [1, 16, 32], strides = [1, 1, 1]} : vector<8x16x32xf32> to vector<1x16x32xf32>
    %26 = vector.shape_cast %25 : vector<1x16x32xf32> to vector<16x32xf32>
    %c1 = arith.constant 1 : index
    %c1_28 = arith.constant 1 : index
    %c0_29 = arith.constant 0 : index
    %27 = vector.load %arg10[%c1, %c1_28, %c0_29] : memref<18x18x32xf32, #tpu.memory_space<vmem>>, vector<1x16x32xf32>
    %28 = vector.shape_cast %27 : vector<1x16x32xf32> to vector<16x32xf32>
    %29 = vector.shape_cast %26 : vector<16x32xf32> to vector<1x16x32xf32>
    tpu.vector_store %arg10[%c1, %c1_28, %c0_29], %29 {strides = array<i32>} : memref<18x18x32xf32, #tpu.memory_space<vmem>>, vector<1x16x32xf32>,
    %30 = vector.extract_strided_slice %24 {offsets = [1, 0, 0], sizes = [1, 16, 32], strides = [1, 1, 1]} : vector<8x16x32xf32> to vector<1x16x32xf32>
    %31 = vector.shape_cast %30 : vector<1x16x32xf32> to vector<16x32xf32>
    %c3 = arith.constant 3 : index
    %c1_30 = arith.constant 1 : index
    %c0_31 = arith.constant 0 : index
    %32 = vector.load %arg10[%c3, %c1_30, %c0_31] : memref<18x18x32xf32, #tpu.memory_space<vmem>>, vector<1x16x32xf32>
    %33 = vector.shape_cast %32 : vector<1x16x32xf32> to vector<16x32xf32>
    %34 = vector.shape_cast %31 : vector<16x32xf32> to vector<1x16x32xf32>
    tpu.vector_store %arg10[%c3, %c1_30, %c0_31], %34 {strides = array<i32>} : memref<18x18x32xf32, #tpu.memory_space<vmem>>, vector<1x16x32xf32>,
    %35 = vector.extract_strided_slice %24 {offsets = [2, 0, 0], sizes = [1, 16, 32], strides = [1, 1, 1]} : vector<8x16x32xf32> to vector<1x16x32xf32>
    %36 = vector.shape_cast %35 : vector<1x16x32xf32> to vector<16x32xf32>
    %c5 = arith.constant 5 : index
    %c1_32 = arith.constant 1 : index
    %c0_33 = arith.constant 0 : index
    %37 = vector.load %arg10[%c5, %c1_32, %c0_33] : memref<18x18x32xf32, #tpu.memory_space<vmem>>, vector<1x16x32xf32>
    %38 = vector.shape_cast %37 : vector<1x16x32xf32> to vector<16x32xf32>
    %39 = vector.shape_cast %36 : vector<16x32xf32> to vector<1x16x32xf32>
    tpu.vector_store %arg10[%c5, %c1_32, %c0_33], %39 {strides = array<i32>} : memref<18x18x32xf32, #tpu.memory_space<vmem>>, vector<1x16x32xf32>,
    %40 = vector.extract_strided_slice %24 {offsets = [3, 0, 0], sizes = [1, 16, 32], strides = [1, 1, 1]} : vector<8x16x32xf32> to vector<1x16x32xf32>
    %41 = vector.shape_cast %40 : vector<1x16x32xf32> to vector<16x32xf32>
    %c7 = arith.constant 7 : index
    %c1_34 = arith.constant 1 : index
    %c0_35 = arith.constant 0 : index
    %42 = vector.load %arg10[%c7, %c1_34, %c0_35] : memref<18x18x32xf32, #tpu.memory_space<vmem>>, vector<1x16x32xf32>
    %43 = vector.shape_cast %42 : vector<1x16x32xf32> to vector<16x32xf32>
    %44 = vector.shape_cast %41 : vector<16x32xf32> to vector<1x16x32xf32>
    tpu.vector_store %arg10[%c7, %c1_34, %c0_35], %44 {strides = array<i32>} : memref<18x18x32xf32, #tpu.memory_space<vmem>>, vector<1x16x32xf32>,
    %45 = vector.extract_strided_slice %24 {offsets = [4, 0, 0], sizes = [1, 16, 32], strides = [1, 1, 1]} : vector<8x16x32xf32> to vector<1x16x32xf32>
    %46 = vector.shape_cast %45 : vector<1x16x32xf32> to vector<16x32xf32>
    %c9 = arith.constant 9 : index
    %c1_36 = arith.constant 1 : index
    %c0_37 = arith.constant 0 : index
    %47 = vector.load %arg10[%c9, %c1_36, %c0_37] : memref<18x18x32xf32, #tpu.memory_space<vmem>>, vector<1x16x32xf32>
    %48 = vector.shape_cast %47 : vector<1x16x32xf32> to vector<16x32xf32>
    %49 = vector.shape_cast %46 : vector<16x32xf32> to vector<1x16x32xf32>
    tpu.vector_store %arg10[%c9, %c1_36, %c0_37], %49 {strides = array<i32>} : memref<18x18x32xf32, #tpu.memory_space<vmem>>, vector<1x16x32xf32>,
    %50 = vector.extract_strided_slice %24 {offsets = [5, 0, 0], sizes = [1, 16, 32], strides = [1, 1, 1]} : vector<8x16x32xf32> to vector<1x16x32xf32>
    %51 = vector.shape_cast %50 : vector<1x16x32xf32> to vector<16x32xf32>
    %c11 = arith.constant 11 : index
    %c1_38 = arith.constant 1 : index
    %c0_39 = arith.constant 0 : index
    %52 = vector.load %arg10[%c11, %c1_38, %c0_39] : memref<18x18x32xf32, #tpu.memory_space<vmem>>, vector<1x16x32xf32>
    %53 = vector.shape_cast %52 : vector<1x16x32xf32> to vector<16x32xf32>
    %54 = vector.shape_cast %51 : vector<16x32xf32> to vector<1x16x32xf32>
    tpu.vector_store %arg10[%c11, %c1_38, %c0_39], %54 {strides = array<i32>} : memref<18x18x32xf32, #tpu.memory_space<vmem>>, vector<1x16x32xf32>,
    %55 = vector.extract_strided_slice %24 {offsets = [6, 0, 0], sizes = [1, 16, 32], strides = [1, 1, 1]} : vector<8x16x32xf32> to vector<1x16x32xf32>
    %56 = vector.shape_cast %55 : vector<1x16x32xf32> to vector<16x32xf32>
    %c13 = arith.constant 13 : index
    %c1_40 = arith.constant 1 : index
    %c0_41 = arith.constant 0 : index
    %57 = vector.load %arg10[%c13, %c1_40, %c0_41] : memref<18x18x32xf32, #tpu.memory_space<vmem>>, vector<1x16x32xf32>
    %58 = vector.shape_cast %57 : vector<1x16x32xf32> to vector<16x32xf32>
    %59 = vector.shape_cast %56 : vector<16x32xf32> to vector<1x16x32xf32>
    tpu.vector_store %arg10[%c13, %c1_40, %c0_41], %59 {strides = array<i32>} : memref<18x18x32xf32, #tpu.memory_space<vmem>>, vector<1x16x32xf32>,
    %60 = vector.extract_strided_slice %24 {offsets = [7, 0, 0], sizes = [1, 16, 32], strides = [1, 1, 1]} : vector<8x16x32xf32> to vector<1x16x32xf32>
    %61 = vector.shape_cast %60 : vector<1x16x32xf32> to vector<16x32xf32>
    %c15 = arith.constant 15 : index
    %c1_42 = arith.constant 1 : index
    %c0_43 = arith.constant 0 : index
    %62 = vector.load %arg10[%c15, %c1_42, %c0_43] : memref<18x18x32xf32, #tpu.memory_space<vmem>>, vector<1x16x32xf32>
    %63 = vector.shape_cast %62 : vector<1x16x32xf32> to vector<16x32xf32>
    %64 = vector.shape_cast %61 : vector<16x32xf32> to vector<1x16x32xf32>
    tpu.vector_store %arg10[%c15, %c1_42, %c0_43], %64 {strides = array<i32>} : memref<18x18x32xf32, #tpu.memory_space<vmem>>, vector<1x16x32xf32>,
    %c1_44 = arith.constant 1 : index
    %c0_45 = arith.constant 0 : index
    %c0_46 = arith.constant 0 : index
    %65 = vector.load %arg3[%c1_44, %c0_45, %c0_46] : memref<2x64x64xbf16, #tpu.memory_space<vmem>>, vector<1x32x64xbf16>
    %66 = vector.shape_cast %65 : vector<1x32x64xbf16> to vector<32x64xbf16>
    %cst_47 = arith.constant dense<0.000000e+00> : vector<64x64xf32>
    %67 = tpu.matmul %9, %66, %cst_47 {dimension_numbers = #tpu.dot_dimension_numbers<[1], [0], [0], [1], [0, 0, 1, 1], [], []>} : vector<64x32xbf16>, vector<32x64xbf16>, vector<64x64xf32> -> vector<64x64xf32>
    %c1_48 = arith.constant 1 : index
    %c32_49 = arith.constant 32 : index
    %c0_50 = arith.constant 0 : index
    %68 = vector.load %arg3[%c1_48, %c32_49, %c0_50] : memref<2x64x64xbf16, #tpu.memory_space<vmem>>, vector<1x32x64xbf16>
    %69 = vector.shape_cast %68 : vector<1x32x64xbf16> to vector<32x64xbf16>
    %cst_51 = arith.constant dense<0.000000e+00> : vector<64x64xf32>
    %70 = tpu.matmul %13, %69, %cst_51 {dimension_numbers = #tpu.dot_dimension_numbers<[1], [0], [0], [1], [0, 0, 1, 1], [], []>} : vector<64x32xbf16>, vector<32x64xbf16>, vector<64x64xf32> -> vector<64x64xf32>
    %71 = arith.addf %67, %70 : vector<64x64xf32>
    %c0_52 = arith.constant 0 : index
    %c0_53 = arith.constant 0 : index
    %72 = vector.load %arg4[%c0_52, %c0_53] : memref<1x64xf32, #tpu.memory_space<vmem>>, vector<1x64xf32>
    %73 = vector.broadcast %72 : vector<1x64xf32> to vector<64x64xf32>
    %74 = arith.addf %71, %73 : vector<64x64xf32>
    %75 = vector.shape_cast %74 : vector<64x64xf32> to vector<8x16x32xf32>
    %76 = vector.extract_strided_slice %75 {offsets = [0, 0, 0], sizes = [1, 16, 32], strides = [1, 1, 1]} : vector<8x16x32xf32> to vector<1x16x32xf32>
    %77 = vector.shape_cast %76 : vector<1x16x32xf32> to vector<16x32xf32>
    %c2 = arith.constant 2 : index
    %c1_54 = arith.constant 1 : index
    %c0_55 = arith.constant 0 : index
    %78 = vector.load %arg10[%c2, %c1_54, %c0_55] : memref<18x18x32xf32, #tpu.memory_space<vmem>>, vector<1x16x32xf32>
    %79 = vector.shape_cast %78 : vector<1x16x32xf32> to vector<16x32xf32>
    %80 = vector.shape_cast %77 : vector<16x32xf32> to vector<1x16x32xf32>
    tpu.vector_store %arg10[%c2, %c1_54, %c0_55], %80 {strides = array<i32>} : memref<18x18x32xf32, #tpu.memory_space<vmem>>, vector<1x16x32xf32>,
    %81 = vector.extract_strided_slice %75 {offsets = [1, 0, 0], sizes = [1, 16, 32], strides = [1, 1, 1]} : vector<8x16x32xf32> to vector<1x16x32xf32>
    %82 = vector.shape_cast %81 : vector<1x16x32xf32> to vector<16x32xf32>
    %c4 = arith.constant 4 : index
    %c1_56 = arith.constant 1 : index
    %c0_57 = arith.constant 0 : index
    %83 = vector.load %arg10[%c4, %c1_56, %c0_57] : memref<18x18x32xf32, #tpu.memory_space<vmem>>, vector<1x16x32xf32>
    %84 = vector.shape_cast %83 : vector<1x16x32xf32> to vector<16x32xf32>
    %85 = vector.shape_cast %82 : vector<16x32xf32> to vector<1x16x32xf32>
    tpu.vector_store %arg10[%c4, %c1_56, %c0_57], %85 {strides = array<i32>} : memref<18x18x32xf32, #tpu.memory_space<vmem>>, vector<1x16x32xf32>,
    %86 = vector.extract_strided_slice %75 {offsets = [2, 0, 0], sizes = [1, 16, 32], strides = [1, 1, 1]} : vector<8x16x32xf32> to vector<1x16x32xf32>
    %87 = vector.shape_cast %86 : vector<1x16x32xf32> to vector<16x32xf32>
    %c6 = arith.constant 6 : index
    %c1_58 = arith.constant 1 : index
    %c0_59 = arith.constant 0 : index
    %88 = vector.load %arg10[%c6, %c1_58, %c0_59] : memref<18x18x32xf32, #tpu.memory_space<vmem>>, vector<1x16x32xf32>
    %89 = vector.shape_cast %88 : vector<1x16x32xf32> to vector<16x32xf32>
    %90 = vector.shape_cast %87 : vector<16x32xf32> to vector<1x16x32xf32>
    tpu.vector_store %arg10[%c6, %c1_58, %c0_59], %90 {strides = array<i32>} : memref<18x18x32xf32, #tpu.memory_space<vmem>>, vector<1x16x32xf32>,
    %91 = vector.extract_strided_slice %75 {offsets = [3, 0, 0], sizes = [1, 16, 32], strides = [1, 1, 1]} : vector<8x16x32xf32> to vector<1x16x32xf32>
    %92 = vector.shape_cast %91 : vector<1x16x32xf32> to vector<16x32xf32>
    %c8 = arith.constant 8 : index
    %c1_60 = arith.constant 1 : index
    %c0_61 = arith.constant 0 : index
    %93 = vector.load %arg10[%c8, %c1_60, %c0_61] : memref<18x18x32xf32, #tpu.memory_space<vmem>>, vector<1x16x32xf32>
    %94 = vector.shape_cast %93 : vector<1x16x32xf32> to vector<16x32xf32>
    %95 = vector.shape_cast %92 : vector<16x32xf32> to vector<1x16x32xf32>
    tpu.vector_store %arg10[%c8, %c1_60, %c0_61], %95 {strides = array<i32>} : memref<18x18x32xf32, #tpu.memory_space<vmem>>, vector<1x16x32xf32>,
    %96 = vector.extract_strided_slice %75 {offsets = [4, 0, 0], sizes = [1, 16, 32], strides = [1, 1, 1]} : vector<8x16x32xf32> to vector<1x16x32xf32>
    %97 = vector.shape_cast %96 : vector<1x16x32xf32> to vector<16x32xf32>
    %c10 = arith.constant 10 : index
    %c1_62 = arith.constant 1 : index
    %c0_63 = arith.constant 0 : index
    %98 = vector.load %arg10[%c10, %c1_62, %c0_63] : memref<18x18x32xf32, #tpu.memory_space<vmem>>, vector<1x16x32xf32>
    %99 = vector.shape_cast %98 : vector<1x16x32xf32> to vector<16x32xf32>
    %100 = vector.shape_cast %97 : vector<16x32xf32> to vector<1x16x32xf32>
    tpu.vector_store %arg10[%c10, %c1_62, %c0_63], %100 {strides = array<i32>} : memref<18x18x32xf32, #tpu.memory_space<vmem>>, vector<1x16x32xf32>,
    %101 = vector.extract_strided_slice %75 {offsets = [5, 0, 0], sizes = [1, 16, 32], strides = [1, 1, 1]} : vector<8x16x32xf32> to vector<1x16x32xf32>
    %102 = vector.shape_cast %101 : vector<1x16x32xf32> to vector<16x32xf32>
    %c12 = arith.constant 12 : index
    %c1_64 = arith.constant 1 : index
    %c0_65 = arith.constant 0 : index
    %103 = vector.load %arg10[%c12, %c1_64, %c0_65] : memref<18x18x32xf32, #tpu.memory_space<vmem>>, vector<1x16x32xf32>
    %104 = vector.shape_cast %103 : vector<1x16x32xf32> to vector<16x32xf32>
    %105 = vector.shape_cast %102 : vector<16x32xf32> to vector<1x16x32xf32>
    tpu.vector_store %arg10[%c12, %c1_64, %c0_65], %105 {strides = array<i32>} : memref<18x18x32xf32, #tpu.memory_space<vmem>>, vector<1x16x32xf32>,
    %106 = vector.extract_strided_slice %75 {offsets = [6, 0, 0], sizes = [1, 16, 32], strides = [1, 1, 1]} : vector<8x16x32xf32> to vector<1x16x32xf32>
    %107 = vector.shape_cast %106 : vector<1x16x32xf32> to vector<16x32xf32>
    %c14 = arith.constant 14 : index
    %c1_66 = arith.constant 1 : index
    %c0_67 = arith.constant 0 : index
    %108 = vector.load %arg10[%c14, %c1_66, %c0_67] : memref<18x18x32xf32, #tpu.memory_space<vmem>>, vector<1x16x32xf32>
    %109 = vector.shape_cast %108 : vector<1x16x32xf32> to vector<16x32xf32>
    %110 = vector.shape_cast %107 : vector<16x32xf32> to vector<1x16x32xf32>
    tpu.vector_store %arg10[%c14, %c1_66, %c0_67], %110 {strides = array<i32>} : memref<18x18x32xf32, #tpu.memory_space<vmem>>, vector<1x16x32xf32>,
    %111 = vector.extract_strided_slice %75 {offsets = [7, 0, 0], sizes = [1, 16, 32], strides = [1, 1, 1]} : vector<8x16x32xf32> to vector<1x16x32xf32>
    %112 = vector.shape_cast %111 : vector<1x16x32xf32> to vector<16x32xf32>
    %c16 = arith.constant 16 : index
    %c1_68 = arith.constant 1 : index
    %c0_69 = arith.constant 0 : index
    %113 = vector.load %arg10[%c16, %c1_68, %c0_69] : memref<18x18x32xf32, #tpu.memory_space<vmem>>, vector<1x16x32xf32>
    %114 = vector.shape_cast %113 : vector<1x16x32xf32> to vector<16x32xf32>
    %115 = vector.shape_cast %112 : vector<16x32xf32> to vector<1x16x32xf32>
    tpu.vector_store %arg10[%c16, %c1_68, %c0_69], %115 {strides = array<i32>} : memref<18x18x32xf32, #tpu.memory_space<vmem>>, vector<1x16x32xf32>,
    %cst_70 = arith.constant 0.000000e+00 : f32
    %116 = vector.broadcast %cst_70 : f32 to vector<256x32xf32>
    %c0_71 = arith.constant 0 : index
    %c0_72 = arith.constant 0 : index
    %c0_73 = arith.constant 0 : index
    %117 = vector.load %arg10[%c0_71, %c0_72, %c0_73] : memref<18x18x32xf32, #tpu.memory_space<vmem>>, vector<16x16x32xf32>
    %118 = vector.shape_cast %117 : vector<16x16x32xf32> to vector<256x32xf32>
    %119 = arith.truncf %118 : vector<256x32xf32> to vector<256x32xbf16>
    %c0_74 = arith.constant 0 : index
    %c0_75 = arith.constant 0 : index
    %c0_76 = arith.constant 0 : index
    %c0_77 = arith.constant 0 : index
    %c0_78 = arith.constant 0 : index
    %120 = vector.load %arg5[%c0_74, %c0_75, %c0_76, %c0_77, %c0_78] : memref<4x3x3x32x32xbf16, #tpu.memory_space<vmem>>, vector<1x1x1x32x32xbf16>
    %121 = vector.shape_cast %120 : vector<1x1x1x32x32xbf16> to vector<32x32xbf16>
    %cst_79 = arith.constant dense<0.000000e+00> : vector<256x32xf32>
    %122 = tpu.matmul %119, %121, %cst_79 {dimension_numbers = #tpu.dot_dimension_numbers<[1], [0], [0], [1], [0, 0, 1, 1], [], []>} : vector<256x32xbf16>, vector<32x32xbf16>, vector<256x32xf32> -> vector<256x32xf32>
    %123 = arith.addf %116, %122 : vector<256x32xf32>
    %c0_80 = arith.constant 0 : index
    %c1_81 = arith.constant 1 : index
    %c0_82 = arith.constant 0 : index
    %124 = vector.load %arg10[%c0_80, %c1_81, %c0_82] : memref<18x18x32xf32, #tpu.memory_space<vmem>>, vector<16x16x32xf32>
    %125 = vector.shape_cast %124 : vector<16x16x32xf32> to vector<256x32xf32>
    %126 = arith.truncf %125 : vector<256x32xf32> to vector<256x32xbf16>
    %c0_83 = arith.constant 0 : index
    %c0_84 = arith.constant 0 : index
    %c1_85 = arith.constant 1 : index
    %c0_86 = arith.constant 0 : index
    %c0_87 = arith.constant 0 : index
    %127 = vector.load %arg5[%c0_83, %c0_84, %c1_85, %c0_86, %c0_87] : memref<4x3x3x32x32xbf16, #tpu.memory_space<vmem>>, vector<1x1x1x32x32xbf16>
    %128 = vector.shape_cast %127 : vector<1x1x1x32x32xbf16> to vector<32x32xbf16>
    %cst_88 = arith.constant dense<0.000000e+00> : vector<256x32xf32>
    %129 = tpu.matmul %126, %128, %cst_88 {dimension_numbers = #tpu.dot_dimension_numbers<[1], [0], [0], [1], [0, 0, 1, 1], [], []>} : vector<256x32xbf16>, vector<32x32xbf16>, vector<256x32xf32> -> vector<256x32xf32>
    %130 = arith.addf %123, %129 : vector<256x32xf32>
    %c0_89 = arith.constant 0 : index
    %c2_90 = arith.constant 2 : index
    %c0_91 = arith.constant 0 : index
    %131 = vector.load %arg10[%c0_89, %c2_90, %c0_91] : memref<18x18x32xf32, #tpu.memory_space<vmem>>, vector<16x16x32xf32>
    %132 = vector.shape_cast %131 : vector<16x16x32xf32> to vector<256x32xf32>
    %133 = arith.truncf %132 : vector<256x32xf32> to vector<256x32xbf16>
    %c0_92 = arith.constant 0 : index
    %c0_93 = arith.constant 0 : index
    %c2_94 = arith.constant 2 : index
    %c0_95 = arith.constant 0 : index
    %c0_96 = arith.constant 0 : index
    %134 = vector.load %arg5[%c0_92, %c0_93, %c2_94, %c0_95, %c0_96] : memref<4x3x3x32x32xbf16, #tpu.memory_space<vmem>>, vector<1x1x1x32x32xbf16>
    %135 = vector.shape_cast %134 : vector<1x1x1x32x32xbf16> to vector<32x32xbf16>
    %cst_97 = arith.constant dense<0.000000e+00> : vector<256x32xf32>
    %136 = tpu.matmul %133, %135, %cst_97 {dimension_numbers = #tpu.dot_dimension_numbers<[1], [0], [0], [1], [0, 0, 1, 1], [], []>} : vector<256x32xbf16>, vector<32x32xbf16>, vector<256x32xf32> -> vector<256x32xf32>
    %137 = arith.addf %130, %136 : vector<256x32xf32>
    %c1_98 = arith.constant 1 : index
    %c0_99 = arith.constant 0 : index
    %c0_100 = arith.constant 0 : index
    %138 = vector.load %arg10[%c1_98, %c0_99, %c0_100] : memref<18x18x32xf32, #tpu.memory_space<vmem>>, vector<16x16x32xf32>
    %139 = vector.shape_cast %138 : vector<16x16x32xf32> to vector<256x32xf32>
    %140 = arith.truncf %139 : vector<256x32xf32> to vector<256x32xbf16>
    %c0_101 = arith.constant 0 : index
    %c1_102 = arith.constant 1 : index
    %c0_103 = arith.constant 0 : index
    %c0_104 = arith.constant 0 : index
    %c0_105 = arith.constant 0 : index
    %141 = vector.load %arg5[%c0_101, %c1_102, %c0_103, %c0_104, %c0_105] : memref<4x3x3x32x32xbf16, #tpu.memory_space<vmem>>, vector<1x1x1x32x32xbf16>
    %142 = vector.shape_cast %141 : vector<1x1x1x32x32xbf16> to vector<32x32xbf16>
    %cst_106 = arith.constant dense<0.000000e+00> : vector<256x32xf32>
    %143 = tpu.matmul %140, %142, %cst_106 {dimension_numbers = #tpu.dot_dimension_numbers<[1], [0], [0], [1], [0, 0, 1, 1], [], []>} : vector<256x32xbf16>, vector<32x32xbf16>, vector<256x32xf32> -> vector<256x32xf32>
    %144 = arith.addf %137, %143 : vector<256x32xf32>
    %c1_107 = arith.constant 1 : index
    %c1_108 = arith.constant 1 : index
    %c0_109 = arith.constant 0 : index
    %145 = vector.load %arg10[%c1_107, %c1_108, %c0_109] : memref<18x18x32xf32, #tpu.memory_space<vmem>>, vector<16x16x32xf32>
    %146 = vector.shape_cast %145 : vector<16x16x32xf32> to vector<256x32xf32>
    %147 = arith.truncf %146 : vector<256x32xf32> to vector<256x32xbf16>
    %c0_110 = arith.constant 0 : index
    %c1_111 = arith.constant 1 : index
    %c1_112 = arith.constant 1 : index
    %c0_113 = arith.constant 0 : index
    %c0_114 = arith.constant 0 : index
    %148 = vector.load %arg5[%c0_110, %c1_111, %c1_112, %c0_113, %c0_114] : memref<4x3x3x32x32xbf16, #tpu.memory_space<vmem>>, vector<1x1x1x32x32xbf16>
    %149 = vector.shape_cast %148 : vector<1x1x1x32x32xbf16> to vector<32x32xbf16>
    %cst_115 = arith.constant dense<0.000000e+00> : vector<256x32xf32>
    %150 = tpu.matmul %147, %149, %cst_115 {dimension_numbers = #tpu.dot_dimension_numbers<[1], [0], [0], [1], [0, 0, 1, 1], [], []>} : vector<256x32xbf16>, vector<32x32xbf16>, vector<256x32xf32> -> vector<256x32xf32>
    %151 = arith.addf %144, %150 : vector<256x32xf32>
    %c1_116 = arith.constant 1 : index
    %c2_117 = arith.constant 2 : index
    %c0_118 = arith.constant 0 : index
    %152 = vector.load %arg10[%c1_116, %c2_117, %c0_118] : memref<18x18x32xf32, #tpu.memory_space<vmem>>, vector<16x16x32xf32>
    %153 = vector.shape_cast %152 : vector<16x16x32xf32> to vector<256x32xf32>
    %154 = arith.truncf %153 : vector<256x32xf32> to vector<256x32xbf16>
    %c0_119 = arith.constant 0 : index
    %c1_120 = arith.constant 1 : index
    %c2_121 = arith.constant 2 : index
    %c0_122 = arith.constant 0 : index
    %c0_123 = arith.constant 0 : index
    %155 = vector.load %arg5[%c0_119, %c1_120, %c2_121, %c0_122, %c0_123] : memref<4x3x3x32x32xbf16, #tpu.memory_space<vmem>>, vector<1x1x1x32x32xbf16>
    %156 = vector.shape_cast %155 : vector<1x1x1x32x32xbf16> to vector<32x32xbf16>
    %cst_124 = arith.constant dense<0.000000e+00> : vector<256x32xf32>
    %157 = tpu.matmul %154, %156, %cst_124 {dimension_numbers = #tpu.dot_dimension_numbers<[1], [0], [0], [1], [0, 0, 1, 1], [], []>} : vector<256x32xbf16>, vector<32x32xbf16>, vector<256x32xf32> -> vector<256x32xf32>
    %158 = arith.addf %151, %157 : vector<256x32xf32>
    %c2_125 = arith.constant 2 : index
    %c0_126 = arith.constant 0 : index
    %c0_127 = arith.constant 0 : index
    %159 = vector.load %arg10[%c2_125, %c0_126, %c0_127] : memref<18x18x32xf32, #tpu.memory_space<vmem>>, vector<16x16x32xf32>
    %160 = vector.shape_cast %159 : vector<16x16x32xf32> to vector<256x32xf32>
    %161 = arith.truncf %160 : vector<256x32xf32> to vector<256x32xbf16>
    %c0_128 = arith.constant 0 : index
    %c2_129 = arith.constant 2 : index
    %c0_130 = arith.constant 0 : index
    %c0_131 = arith.constant 0 : index
    %c0_132 = arith.constant 0 : index
    %162 = vector.load %arg5[%c0_128, %c2_129, %c0_130, %c0_131, %c0_132] : memref<4x3x3x32x32xbf16, #tpu.memory_space<vmem>>, vector<1x1x1x32x32xbf16>
    %163 = vector.shape_cast %162 : vector<1x1x1x32x32xbf16> to vector<32x32xbf16>
    %cst_133 = arith.constant dense<0.000000e+00> : vector<256x32xf32>
    %164 = tpu.matmul %161, %163, %cst_133 {dimension_numbers = #tpu.dot_dimension_numbers<[1], [0], [0], [1], [0, 0, 1, 1], [], []>} : vector<256x32xbf16>, vector<32x32xbf16>, vector<256x32xf32> -> vector<256x32xf32>
    %165 = arith.addf %158, %164 : vector<256x32xf32>
    %c2_134 = arith.constant 2 : index
    %c1_135 = arith.constant 1 : index
    %c0_136 = arith.constant 0 : index
    %166 = vector.load %arg10[%c2_134, %c1_135, %c0_136] : memref<18x18x32xf32, #tpu.memory_space<vmem>>, vector<16x16x32xf32>
    %167 = vector.shape_cast %166 : vector<16x16x32xf32> to vector<256x32xf32>
    %168 = arith.truncf %167 : vector<256x32xf32> to vector<256x32xbf16>
    %c0_137 = arith.constant 0 : index
    %c2_138 = arith.constant 2 : index
    %c1_139 = arith.constant 1 : index
    %c0_140 = arith.constant 0 : index
    %c0_141 = arith.constant 0 : index
    %169 = vector.load %arg5[%c0_137, %c2_138, %c1_139, %c0_140, %c0_141] : memref<4x3x3x32x32xbf16, #tpu.memory_space<vmem>>, vector<1x1x1x32x32xbf16>
    %170 = vector.shape_cast %169 : vector<1x1x1x32x32xbf16> to vector<32x32xbf16>
    %cst_142 = arith.constant dense<0.000000e+00> : vector<256x32xf32>
    %171 = tpu.matmul %168, %170, %cst_142 {dimension_numbers = #tpu.dot_dimension_numbers<[1], [0], [0], [1], [0, 0, 1, 1], [], []>} : vector<256x32xbf16>, vector<32x32xbf16>, vector<256x32xf32> -> vector<256x32xf32>
    %172 = arith.addf %165, %171 : vector<256x32xf32>
    %c2_143 = arith.constant 2 : index
    %c2_144 = arith.constant 2 : index
    %c0_145 = arith.constant 0 : index
    %173 = vector.load %arg10[%c2_143, %c2_144, %c0_145] : memref<18x18x32xf32, #tpu.memory_space<vmem>>, vector<16x16x32xf32>
    %174 = vector.shape_cast %173 : vector<16x16x32xf32> to vector<256x32xf32>
    %175 = arith.truncf %174 : vector<256x32xf32> to vector<256x32xbf16>
    %c0_146 = arith.constant 0 : index
    %c2_147 = arith.constant 2 : index
    %c2_148 = arith.constant 2 : index
    %c0_149 = arith.constant 0 : index
    %c0_150 = arith.constant 0 : index
    %176 = vector.load %arg5[%c0_146, %c2_147, %c2_148, %c0_149, %c0_150] : memref<4x3x3x32x32xbf16, #tpu.memory_space<vmem>>, vector<1x1x1x32x32xbf16>
    %177 = vector.shape_cast %176 : vector<1x1x1x32x32xbf16> to vector<32x32xbf16>
    %cst_151 = arith.constant dense<0.000000e+00> : vector<256x32xf32>
    %178 = tpu.matmul %175, %177, %cst_151 {dimension_numbers = #tpu.dot_dimension_numbers<[1], [0], [0], [1], [0, 0, 1, 1], [], []>} : vector<256x32xbf16>, vector<32x32xbf16>, vector<256x32xf32> -> vector<256x32xf32>
    %179 = arith.addf %172, %178 : vector<256x32xf32>
    %c0_152 = arith.constant 0 : index
    %c0_153 = arith.constant 0 : index
    %c0_154 = arith.constant 0 : index
    %180 = vector.load %arg6[%c0_152, %c0_153, %c0_154] : memref<4x1x32xf32, #tpu.memory_space<vmem>>, vector<1x1x32xf32>
    %181 = vector.shape_cast %180 : vector<1x1x32xf32> to vector<1x32xf32>
    %182 = vector.broadcast %181 : vector<1x32xf32> to vector<256x32xf32>
    %183 = arith.addf %179, %182 : vector<256x32xf32>
    %cst_155 = arith.constant dense<0.000000e+00> : vector<32xf32>
    %184 = vector.multi_reduction <add>, %183, %cst_155 [0] : vector<256x32xf32> to vector<32xf32>
    %185 = vector.shape_cast %184 : vector<32xf32> to vector<1x32xf32>
    %cst_156 = arith.constant 3.906250e-03 : f32
    %186 = vector.broadcast %cst_156 : f32 to vector<1x32xf32>
    %187 = arith.mulf %185, %186 : vector<1x32xf32>
    %188 = vector.broadcast %187 : vector<1x32xf32> to vector<256x32xf32>
    %189 = arith.subf %183, %188 : vector<256x32xf32>
    %190 = arith.mulf %189, %189 : vector<256x32xf32>
    %cst_157 = arith.constant dense<0.000000e+00> : vector<32xf32>
    %191 = vector.multi_reduction <add>, %190, %cst_157 [0] : vector<256x32xf32> to vector<32xf32>
    %192 = vector.shape_cast %191 : vector<32xf32> to vector<1x32xf32>
    %cst_158 = arith.constant 3.906250e-03 : f32
    %193 = vector.broadcast %cst_158 : f32 to vector<1x32xf32>
    %194 = arith.mulf %192, %193 : vector<1x32xf32>
    %cst_159 = arith.constant 9.99999974E-6 : f32
    %195 = vector.broadcast %cst_159 : f32 to vector<1x32xf32>
    %196 = arith.addf %194, %195 : vector<1x32xf32>
    %197 = math.rsqrt %196 : vector<1x32xf32>
    %198 = vector.broadcast %197 : vector<1x32xf32> to vector<256x32xf32>
    %199 = arith.mulf %189, %198 : vector<256x32xf32>
    %c0_160 = arith.constant 0 : index
    %c0_161 = arith.constant 0 : index
    %c0_162 = arith.constant 0 : index
    %200 = vector.load %arg7[%c0_160, %c0_161, %c0_162] : memref<4x1x32xf32, #tpu.memory_space<vmem>>, vector<1x1x32xf32>
    %201 = vector.shape_cast %200 : vector<1x1x32xf32> to vector<1x32xf32>
    %202 = vector.broadcast %201 : vector<1x32xf32> to vector<256x32xf32>
    %203 = arith.mulf %199, %202 : vector<256x32xf32>
    %c0_163 = arith.constant 0 : index
    %c0_164 = arith.constant 0 : index
    %c0_165 = arith.constant 0 : index
    %204 = vector.load %arg8[%c0_163, %c0_164, %c0_165] : memref<4x1x32xf32, #tpu.memory_space<vmem>>, vector<1x1x32xf32>
    %205 = vector.shape_cast %204 : vector<1x1x32xf32> to vector<1x32xf32>
    %206 = vector.broadcast %205 : vector<1x32xf32> to vector<256x32xf32>
    %207 = arith.addf %203, %206 : vector<256x32xf32>
    %cst_166 = arith.constant 5.000000e-01 : f32
    %208 = vector.broadcast %cst_166 : f32 to vector<256x32xf32>
    %209 = arith.mulf %208, %207 : vector<256x32xf32>
    %cst_167 = arith.constant 1.41421354 : f32
    %210 = vector.broadcast %cst_167 : f32 to vector<256x32xf32>
    %211 = arith.divf %207, %210 : vector<256x32xf32>
    %212 = math.erf %211 : vector<256x32xf32>
    %cst_168 = arith.constant 1.000000e+00 : f32
    %213 = vector.broadcast %cst_168 : f32 to vector<256x32xf32>
    %214 = arith.addf %213, %212 : vector<256x32xf32>
    %215 = arith.mulf %209, %214 : vector<256x32xf32>
    %216 = vector.shape_cast %215 : vector<256x32xf32> to vector<16x16x32xf32>
    %c1_169 = arith.constant 1 : index
    %c1_170 = arith.constant 1 : index
    %c0_171 = arith.constant 0 : index
    %217 = vector.load %arg10[%c1_169, %c1_170, %c0_171] : memref<18x18x32xf32, #tpu.memory_space<vmem>>, vector<16x16x32xf32>
    tpu.vector_store %arg10[%c1_169, %c1_170, %c0_171], %216 {strides = array<i32>} : memref<18x18x32xf32, #tpu.memory_space<vmem>>, vector<16x16x32xf32>,
    %cst_172 = arith.constant 0.000000e+00 : f32
    %218 = vector.broadcast %cst_172 : f32 to vector<256x32xf32>
    %c0_173 = arith.constant 0 : index
    %c0_174 = arith.constant 0 : index
    %c0_175 = arith.constant 0 : index
    %219 = vector.load %arg10[%c0_173, %c0_174, %c0_175] : memref<18x18x32xf32, #tpu.memory_space<vmem>>, vector<16x16x32xf32>
    %220 = vector.shape_cast %219 : vector<16x16x32xf32> to vector<256x32xf32>
    %221 = arith.truncf %220 : vector<256x32xf32> to vector<256x32xbf16>
    %c1_176 = arith.constant 1 : index
    %c0_177 = arith.constant 0 : index
    %c0_178 = arith.constant 0 : index
    %c0_179 = arith.constant 0 : index
    %c0_180 = arith.constant 0 : index
    %222 = vector.load %arg5[%c1_176, %c0_177, %c0_178, %c0_179, %c0_180] : memref<4x3x3x32x32xbf16, #tpu.memory_space<vmem>>, vector<1x1x1x32x32xbf16>
    %223 = vector.shape_cast %222 : vector<1x1x1x32x32xbf16> to vector<32x32xbf16>
    %cst_181 = arith.constant dense<0.000000e+00> : vector<256x32xf32>
    %224 = tpu.matmul %221, %223, %cst_181 {dimension_numbers = #tpu.dot_dimension_numbers<[1], [0], [0], [1], [0, 0, 1, 1], [], []>} : vector<256x32xbf16>, vector<32x32xbf16>, vector<256x32xf32> -> vector<256x32xf32>
    %225 = arith.addf %218, %224 : vector<256x32xf32>
    %c0_182 = arith.constant 0 : index
    %c1_183 = arith.constant 1 : index
    %c0_184 = arith.constant 0 : index
    %226 = vector.load %arg10[%c0_182, %c1_183, %c0_184] : memref<18x18x32xf32, #tpu.memory_space<vmem>>, vector<16x16x32xf32>
    %227 = vector.shape_cast %226 : vector<16x16x32xf32> to vector<256x32xf32>
    %228 = arith.truncf %227 : vector<256x32xf32> to vector<256x32xbf16>
    %c1_185 = arith.constant 1 : index
    %c0_186 = arith.constant 0 : index
    %c1_187 = arith.constant 1 : index
    %c0_188 = arith.constant 0 : index
    %c0_189 = arith.constant 0 : index
    %229 = vector.load %arg5[%c1_185, %c0_186, %c1_187, %c0_188, %c0_189] : memref<4x3x3x32x32xbf16, #tpu.memory_space<vmem>>, vector<1x1x1x32x32xbf16>
    %230 = vector.shape_cast %229 : vector<1x1x1x32x32xbf16> to vector<32x32xbf16>
    %cst_190 = arith.constant dense<0.000000e+00> : vector<256x32xf32>
    %231 = tpu.matmul %228, %230, %cst_190 {dimension_numbers = #tpu.dot_dimension_numbers<[1], [0], [0], [1], [0, 0, 1, 1], [], []>} : vector<256x32xbf16>, vector<32x32xbf16>, vector<256x32xf32> -> vector<256x32xf32>
    %232 = arith.addf %225, %231 : vector<256x32xf32>
    %c0_191 = arith.constant 0 : index
    %c2_192 = arith.constant 2 : index
    %c0_193 = arith.constant 0 : index
    %233 = vector.load %arg10[%c0_191, %c2_192, %c0_193] : memref<18x18x32xf32, #tpu.memory_space<vmem>>, vector<16x16x32xf32>
    %234 = vector.shape_cast %233 : vector<16x16x32xf32> to vector<256x32xf32>
    %235 = arith.truncf %234 : vector<256x32xf32> to vector<256x32xbf16>
    %c1_194 = arith.constant 1 : index
    %c0_195 = arith.constant 0 : index
    %c2_196 = arith.constant 2 : index
    %c0_197 = arith.constant 0 : index
    %c0_198 = arith.constant 0 : index
    %236 = vector.load %arg5[%c1_194, %c0_195, %c2_196, %c0_197, %c0_198] : memref<4x3x3x32x32xbf16, #tpu.memory_space<vmem>>, vector<1x1x1x32x32xbf16>
    %237 = vector.shape_cast %236 : vector<1x1x1x32x32xbf16> to vector<32x32xbf16>
    %cst_199 = arith.constant dense<0.000000e+00> : vector<256x32xf32>
    %238 = tpu.matmul %235, %237, %cst_199 {dimension_numbers = #tpu.dot_dimension_numbers<[1], [0], [0], [1], [0, 0, 1, 1], [], []>} : vector<256x32xbf16>, vector<32x32xbf16>, vector<256x32xf32> -> vector<256x32xf32>
    %239 = arith.addf %232, %238 : vector<256x32xf32>
    %c1_200 = arith.constant 1 : index
    %c0_201 = arith.constant 0 : index
    %c0_202 = arith.constant 0 : index
    %240 = vector.load %arg10[%c1_200, %c0_201, %c0_202] : memref<18x18x32xf32, #tpu.memory_space<vmem>>, vector<16x16x32xf32>
    %241 = vector.shape_cast %240 : vector<16x16x32xf32> to vector<256x32xf32>
    %242 = arith.truncf %241 : vector<256x32xf32> to vector<256x32xbf16>
    %c1_203 = arith.constant 1 : index
    %c1_204 = arith.constant 1 : index
    %c0_205 = arith.constant 0 : index
    %c0_206 = arith.constant 0 : index
    %c0_207 = arith.constant 0 : index
    %243 = vector.load %arg5[%c1_203, %c1_204, %c0_205, %c0_206, %c0_207] : memref<4x3x3x32x32xbf16, #tpu.memory_space<vmem>>, vector<1x1x1x32x32xbf16>
    %244 = vector.shape_cast %243 : vector<1x1x1x32x32xbf16> to vector<32x32xbf16>
    %cst_208 = arith.constant dense<0.000000e+00> : vector<256x32xf32>
    %245 = tpu.matmul %242, %244, %cst_208 {dimension_numbers = #tpu.dot_dimension_numbers<[1], [0], [0], [1], [0, 0, 1, 1], [], []>} : vector<256x32xbf16>, vector<32x32xbf16>, vector<256x32xf32> -> vector<256x32xf32>
    %246 = arith.addf %239, %245 : vector<256x32xf32>
    %c1_209 = arith.constant 1 : index
    %c1_210 = arith.constant 1 : index
    %c0_211 = arith.constant 0 : index
    %247 = vector.load %arg10[%c1_209, %c1_210, %c0_211] : memref<18x18x32xf32, #tpu.memory_space<vmem>>, vector<16x16x32xf32>
    %248 = vector.shape_cast %247 : vector<16x16x32xf32> to vector<256x32xf32>
    %249 = arith.truncf %248 : vector<256x32xf32> to vector<256x32xbf16>
    %c1_212 = arith.constant 1 : index
    %c1_213 = arith.constant 1 : index
    %c1_214 = arith.constant 1 : index
    %c0_215 = arith.constant 0 : index
    %c0_216 = arith.constant 0 : index
    %250 = vector.load %arg5[%c1_212, %c1_213, %c1_214, %c0_215, %c0_216] : memref<4x3x3x32x32xbf16, #tpu.memory_space<vmem>>, vector<1x1x1x32x32xbf16>
    %251 = vector.shape_cast %250 : vector<1x1x1x32x32xbf16> to vector<32x32xbf16>
    %cst_217 = arith.constant dense<0.000000e+00> : vector<256x32xf32>
    %252 = tpu.matmul %249, %251, %cst_217 {dimension_numbers = #tpu.dot_dimension_numbers<[1], [0], [0], [1], [0, 0, 1, 1], [], []>} : vector<256x32xbf16>, vector<32x32xbf16>, vector<256x32xf32> -> vector<256x32xf32>
    %253 = arith.addf %246, %252 : vector<256x32xf32>
    %c1_218 = arith.constant 1 : index
    %c2_219 = arith.constant 2 : index
    %c0_220 = arith.constant 0 : index
    %254 = vector.load %arg10[%c1_218, %c2_219, %c0_220] : memref<18x18x32xf32, #tpu.memory_space<vmem>>, vector<16x16x32xf32>
    %255 = vector.shape_cast %254 : vector<16x16x32xf32> to vector<256x32xf32>
    %256 = arith.truncf %255 : vector<256x32xf32> to vector<256x32xbf16>
    %c1_221 = arith.constant 1 : index
    %c1_222 = arith.constant 1 : index
    %c2_223 = arith.constant 2 : index
    %c0_224 = arith.constant 0 : index
    %c0_225 = arith.constant 0 : index
    %257 = vector.load %arg5[%c1_221, %c1_222, %c2_223, %c0_224, %c0_225] : memref<4x3x3x32x32xbf16, #tpu.memory_space<vmem>>, vector<1x1x1x32x32xbf16>
    %258 = vector.shape_cast %257 : vector<1x1x1x32x32xbf16> to vector<32x32xbf16>
    %cst_226 = arith.constant dense<0.000000e+00> : vector<256x32xf32>
    %259 = tpu.matmul %256, %258, %cst_226 {dimension_numbers = #tpu.dot_dimension_numbers<[1], [0], [0], [1], [0, 0, 1, 1], [], []>} : vector<256x32xbf16>, vector<32x32xbf16>, vector<256x32xf32> -> vector<256x32xf32>
    %260 = arith.addf %253, %259 : vector<256x32xf32>
    %c2_227 = arith.constant 2 : index
    %c0_228 = arith.constant 0 : index
    %c0_229 = arith.constant 0 : index
    %261 = vector.load %arg10[%c2_227, %c0_228, %c0_229] : memref<18x18x32xf32, #tpu.memory_space<vmem>>, vector<16x16x32xf32>
    %262 = vector.shape_cast %261 : vector<16x16x32xf32> to vector<256x32xf32>
    %263 = arith.truncf %262 : vector<256x32xf32> to vector<256x32xbf16>
    %c1_230 = arith.constant 1 : index
    %c2_231 = arith.constant 2 : index
    %c0_232 = arith.constant 0 : index
    %c0_233 = arith.constant 0 : index
    %c0_234 = arith.constant 0 : index
    %264 = vector.load %arg5[%c1_230, %c2_231, %c0_232, %c0_233, %c0_234] : memref<4x3x3x32x32xbf16, #tpu.memory_space<vmem>>, vector<1x1x1x32x32xbf16>
    %265 = vector.shape_cast %264 : vector<1x1x1x32x32xbf16> to vector<32x32xbf16>
    %cst_235 = arith.constant dense<0.000000e+00> : vector<256x32xf32>
    %266 = tpu.matmul %263, %265, %cst_235 {dimension_numbers = #tpu.dot_dimension_numbers<[1], [0], [0], [1], [0, 0, 1, 1], [], []>} : vector<256x32xbf16>, vector<32x32xbf16>, vector<256x32xf32> -> vector<256x32xf32>
    %267 = arith.addf %260, %266 : vector<256x32xf32>
    %c2_236 = arith.constant 2 : index
    %c1_237 = arith.constant 1 : index
    %c0_238 = arith.constant 0 : index
    %268 = vector.load %arg10[%c2_236, %c1_237, %c0_238] : memref<18x18x32xf32, #tpu.memory_space<vmem>>, vector<16x16x32xf32>
    %269 = vector.shape_cast %268 : vector<16x16x32xf32> to vector<256x32xf32>
    %270 = arith.truncf %269 : vector<256x32xf32> to vector<256x32xbf16>
    %c1_239 = arith.constant 1 : index
    %c2_240 = arith.constant 2 : index
    %c1_241 = arith.constant 1 : index
    %c0_242 = arith.constant 0 : index
    %c0_243 = arith.constant 0 : index
    %271 = vector.load %arg5[%c1_239, %c2_240, %c1_241, %c0_242, %c0_243] : memref<4x3x3x32x32xbf16, #tpu.memory_space<vmem>>, vector<1x1x1x32x32xbf16>
    %272 = vector.shape_cast %271 : vector<1x1x1x32x32xbf16> to vector<32x32xbf16>
    %cst_244 = arith.constant dense<0.000000e+00> : vector<256x32xf32>
    %273 = tpu.matmul %270, %272, %cst_244 {dimension_numbers = #tpu.dot_dimension_numbers<[1], [0], [0], [1], [0, 0, 1, 1], [], []>} : vector<256x32xbf16>, vector<32x32xbf16>, vector<256x32xf32> -> vector<256x32xf32>
    %274 = arith.addf %267, %273 : vector<256x32xf32>
    %c2_245 = arith.constant 2 : index
    %c2_246 = arith.constant 2 : index
    %c0_247 = arith.constant 0 : index
    %275 = vector.load %arg10[%c2_245, %c2_246, %c0_247] : memref<18x18x32xf32, #tpu.memory_space<vmem>>, vector<16x16x32xf32>
    %276 = vector.shape_cast %275 : vector<16x16x32xf32> to vector<256x32xf32>
    %277 = arith.truncf %276 : vector<256x32xf32> to vector<256x32xbf16>
    %c1_248 = arith.constant 1 : index
    %c2_249 = arith.constant 2 : index
    %c2_250 = arith.constant 2 : index
    %c0_251 = arith.constant 0 : index
    %c0_252 = arith.constant 0 : index
    %278 = vector.load %arg5[%c1_248, %c2_249, %c2_250, %c0_251, %c0_252] : memref<4x3x3x32x32xbf16, #tpu.memory_space<vmem>>, vector<1x1x1x32x32xbf16>
    %279 = vector.shape_cast %278 : vector<1x1x1x32x32xbf16> to vector<32x32xbf16>
    %cst_253 = arith.constant dense<0.000000e+00> : vector<256x32xf32>
    %280 = tpu.matmul %277, %279, %cst_253 {dimension_numbers = #tpu.dot_dimension_numbers<[1], [0], [0], [1], [0, 0, 1, 1], [], []>} : vector<256x32xbf16>, vector<32x32xbf16>, vector<256x32xf32> -> vector<256x32xf32>
    %281 = arith.addf %274, %280 : vector<256x32xf32>
    %c1_254 = arith.constant 1 : index
    %c0_255 = arith.constant 0 : index
    %c0_256 = arith.constant 0 : index
    %282 = vector.load %arg6[%c1_254, %c0_255, %c0_256] : memref<4x1x32xf32, #tpu.memory_space<vmem>>, vector<1x1x32xf32>
    %283 = vector.shape_cast %282 : vector<1x1x32xf32> to vector<1x32xf32>
    %284 = vector.broadcast %283 : vector<1x32xf32> to vector<256x32xf32>
    %285 = arith.addf %281, %284 : vector<256x32xf32>
    %cst_257 = arith.constant dense<0.000000e+00> : vector<32xf32>
    %286 = vector.multi_reduction <add>, %285, %cst_257 [0] : vector<256x32xf32> to vector<32xf32>
    %287 = vector.shape_cast %286 : vector<32xf32> to vector<1x32xf32>
    %cst_258 = arith.constant 3.906250e-03 : f32
    %288 = vector.broadcast %cst_258 : f32 to vector<1x32xf32>
    %289 = arith.mulf %287, %288 : vector<1x32xf32>
    %290 = vector.broadcast %289 : vector<1x32xf32> to vector<256x32xf32>
    %291 = arith.subf %285, %290 : vector<256x32xf32>
    %292 = arith.mulf %291, %291 : vector<256x32xf32>
    %cst_259 = arith.constant dense<0.000000e+00> : vector<32xf32>
    %293 = vector.multi_reduction <add>, %292, %cst_259 [0] : vector<256x32xf32> to vector<32xf32>
    %294 = vector.shape_cast %293 : vector<32xf32> to vector<1x32xf32>
    %cst_260 = arith.constant 3.906250e-03 : f32
    %295 = vector.broadcast %cst_260 : f32 to vector<1x32xf32>
    %296 = arith.mulf %294, %295 : vector<1x32xf32>
    %cst_261 = arith.constant 9.99999974E-6 : f32
    %297 = vector.broadcast %cst_261 : f32 to vector<1x32xf32>
    %298 = arith.addf %296, %297 : vector<1x32xf32>
    %299 = math.rsqrt %298 : vector<1x32xf32>
    %300 = vector.broadcast %299 : vector<1x32xf32> to vector<256x32xf32>
    %301 = arith.mulf %291, %300 : vector<256x32xf32>
    %c1_262 = arith.constant 1 : index
    %c0_263 = arith.constant 0 : index
    %c0_264 = arith.constant 0 : index
    %302 = vector.load %arg7[%c1_262, %c0_263, %c0_264] : memref<4x1x32xf32, #tpu.memory_space<vmem>>, vector<1x1x32xf32>
    %303 = vector.shape_cast %302 : vector<1x1x32xf32> to vector<1x32xf32>
    %304 = vector.broadcast %303 : vector<1x32xf32> to vector<256x32xf32>
    %305 = arith.mulf %301, %304 : vector<256x32xf32>
    %c1_265 = arith.constant 1 : index
    %c0_266 = arith.constant 0 : index
    %c0_267 = arith.constant 0 : index
    %306 = vector.load %arg8[%c1_265, %c0_266, %c0_267] : memref<4x1x32xf32, #tpu.memory_space<vmem>>, vector<1x1x32xf32>
    %307 = vector.shape_cast %306 : vector<1x1x32xf32> to vector<1x32xf32>
    %308 = vector.broadcast %307 : vector<1x32xf32> to vector<256x32xf32>
    %309 = arith.addf %305, %308 : vector<256x32xf32>
    %cst_268 = arith.constant 5.000000e-01 : f32
    %310 = vector.broadcast %cst_268 : f32 to vector<256x32xf32>
    %311 = arith.mulf %310, %309 : vector<256x32xf32>
    %cst_269 = arith.constant 1.41421354 : f32
    %312 = vector.broadcast %cst_269 : f32 to vector<256x32xf32>
    %313 = arith.divf %309, %312 : vector<256x32xf32>
    %314 = math.erf %313 : vector<256x32xf32>
    %cst_270 = arith.constant 1.000000e+00 : f32
    %315 = vector.broadcast %cst_270 : f32 to vector<256x32xf32>
    %316 = arith.addf %315, %314 : vector<256x32xf32>
    %317 = arith.mulf %311, %316 : vector<256x32xf32>
    %318 = vector.shape_cast %317 : vector<256x32xf32> to vector<16x16x32xf32>
    %c1_271 = arith.constant 1 : index
    %c1_272 = arith.constant 1 : index
    %c0_273 = arith.constant 0 : index
    %319 = vector.load %arg10[%c1_271, %c1_272, %c0_273] : memref<18x18x32xf32, #tpu.memory_space<vmem>>, vector<16x16x32xf32>
    tpu.vector_store %arg10[%c1_271, %c1_272, %c0_273], %318 {strides = array<i32>} : memref<18x18x32xf32, #tpu.memory_space<vmem>>, vector<16x16x32xf32>,
    %cst_274 = arith.constant 0.000000e+00 : f32
    %320 = vector.broadcast %cst_274 : f32 to vector<256x32xf32>
    %c0_275 = arith.constant 0 : index
    %c0_276 = arith.constant 0 : index
    %c0_277 = arith.constant 0 : index
    %321 = vector.load %arg10[%c0_275, %c0_276, %c0_277] : memref<18x18x32xf32, #tpu.memory_space<vmem>>, vector<16x16x32xf32>
    %322 = vector.shape_cast %321 : vector<16x16x32xf32> to vector<256x32xf32>
    %323 = arith.truncf %322 : vector<256x32xf32> to vector<256x32xbf16>
    %c2_278 = arith.constant 2 : index
    %c0_279 = arith.constant 0 : index
    %c0_280 = arith.constant 0 : index
    %c0_281 = arith.constant 0 : index
    %c0_282 = arith.constant 0 : index
    %324 = vector.load %arg5[%c2_278, %c0_279, %c0_280, %c0_281, %c0_282] : memref<4x3x3x32x32xbf16, #tpu.memory_space<vmem>>, vector<1x1x1x32x32xbf16>
    %325 = vector.shape_cast %324 : vector<1x1x1x32x32xbf16> to vector<32x32xbf16>
    %cst_283 = arith.constant dense<0.000000e+00> : vector<256x32xf32>
    %326 = tpu.matmul %323, %325, %cst_283 {dimension_numbers = #tpu.dot_dimension_numbers<[1], [0], [0], [1], [0, 0, 1, 1], [], []>} : vector<256x32xbf16>, vector<32x32xbf16>, vector<256x32xf32> -> vector<256x32xf32>
    %327 = arith.addf %320, %326 : vector<256x32xf32>
    %c0_284 = arith.constant 0 : index
    %c1_285 = arith.constant 1 : index
    %c0_286 = arith.constant 0 : index
    %328 = vector.load %arg10[%c0_284, %c1_285, %c0_286] : memref<18x18x32xf32, #tpu.memory_space<vmem>>, vector<16x16x32xf32>
    %329 = vector.shape_cast %328 : vector<16x16x32xf32> to vector<256x32xf32>
    %330 = arith.truncf %329 : vector<256x32xf32> to vector<256x32xbf16>
    %c2_287 = arith.constant 2 : index
    %c0_288 = arith.constant 0 : index
    %c1_289 = arith.constant 1 : index
    %c0_290 = arith.constant 0 : index
    %c0_291 = arith.constant 0 : index
    %331 = vector.load %arg5[%c2_287, %c0_288, %c1_289, %c0_290, %c0_291] : memref<4x3x3x32x32xbf16, #tpu.memory_space<vmem>>, vector<1x1x1x32x32xbf16>
    %332 = vector.shape_cast %331 : vector<1x1x1x32x32xbf16> to vector<32x32xbf16>
    %cst_292 = arith.constant dense<0.000000e+00> : vector<256x32xf32>
    %333 = tpu.matmul %330, %332, %cst_292 {dimension_numbers = #tpu.dot_dimension_numbers<[1], [0], [0], [1], [0, 0, 1, 1], [], []>} : vector<256x32xbf16>, vector<32x32xbf16>, vector<256x32xf32> -> vector<256x32xf32>
    %334 = arith.addf %327, %333 : vector<256x32xf32>
    %c0_293 = arith.constant 0 : index
    %c2_294 = arith.constant 2 : index
    %c0_295 = arith.constant 0 : index
    %335 = vector.load %arg10[%c0_293, %c2_294, %c0_295] : memref<18x18x32xf32, #tpu.memory_space<vmem>>, vector<16x16x32xf32>
    %336 = vector.shape_cast %335 : vector<16x16x32xf32> to vector<256x32xf32>
    %337 = arith.truncf %336 : vector<256x32xf32> to vector<256x32xbf16>
    %c2_296 = arith.constant 2 : index
    %c0_297 = arith.constant 0 : index
    %c2_298 = arith.constant 2 : index
    %c0_299 = arith.constant 0 : index
    %c0_300 = arith.constant 0 : index
    %338 = vector.load %arg5[%c2_296, %c0_297, %c2_298, %c0_299, %c0_300] : memref<4x3x3x32x32xbf16, #tpu.memory_space<vmem>>, vector<1x1x1x32x32xbf16>
    %339 = vector.shape_cast %338 : vector<1x1x1x32x32xbf16> to vector<32x32xbf16>
    %cst_301 = arith.constant dense<0.000000e+00> : vector<256x32xf32>
    %340 = tpu.matmul %337, %339, %cst_301 {dimension_numbers = #tpu.dot_dimension_numbers<[1], [0], [0], [1], [0, 0, 1, 1], [], []>} : vector<256x32xbf16>, vector<32x32xbf16>, vector<256x32xf32> -> vector<256x32xf32>
    %341 = arith.addf %334, %340 : vector<256x32xf32>
    %c1_302 = arith.constant 1 : index
    %c0_303 = arith.constant 0 : index
    %c0_304 = arith.constant 0 : index
    %342 = vector.load %arg10[%c1_302, %c0_303, %c0_304] : memref<18x18x32xf32, #tpu.memory_space<vmem>>, vector<16x16x32xf32>
    %343 = vector.shape_cast %342 : vector<16x16x32xf32> to vector<256x32xf32>
    %344 = arith.truncf %343 : vector<256x32xf32> to vector<256x32xbf16>
    %c2_305 = arith.constant 2 : index
    %c1_306 = arith.constant 1 : index
    %c0_307 = arith.constant 0 : index
    %c0_308 = arith.constant 0 : index
    %c0_309 = arith.constant 0 : index
    %345 = vector.load %arg5[%c2_305, %c1_306, %c0_307, %c0_308, %c0_309] : memref<4x3x3x32x32xbf16, #tpu.memory_space<vmem>>, vector<1x1x1x32x32xbf16>
    %346 = vector.shape_cast %345 : vector<1x1x1x32x32xbf16> to vector<32x32xbf16>
    %cst_310 = arith.constant dense<0.000000e+00> : vector<256x32xf32>
    %347 = tpu.matmul %344, %346, %cst_310 {dimension_numbers = #tpu.dot_dimension_numbers<[1], [0], [0], [1], [0, 0, 1, 1], [], []>} : vector<256x32xbf16>, vector<32x32xbf16>, vector<256x32xf32> -> vector<256x32xf32>
    %348 = arith.addf %341, %347 : vector<256x32xf32>
    %c1_311 = arith.constant 1 : index
    %c1_312 = arith.constant 1 : index
    %c0_313 = arith.constant 0 : index
    %349 = vector.load %arg10[%c1_311, %c1_312, %c0_313] : memref<18x18x32xf32, #tpu.memory_space<vmem>>, vector<16x16x32xf32>
    %350 = vector.shape_cast %349 : vector<16x16x32xf32> to vector<256x32xf32>
    %351 = arith.truncf %350 : vector<256x32xf32> to vector<256x32xbf16>
    %c2_314 = arith.constant 2 : index
    %c1_315 = arith.constant 1 : index
    %c1_316 = arith.constant 1 : index
    %c0_317 = arith.constant 0 : index
    %c0_318 = arith.constant 0 : index
    %352 = vector.load %arg5[%c2_314, %c1_315, %c1_316, %c0_317, %c0_318] : memref<4x3x3x32x32xbf16, #tpu.memory_space<vmem>>, vector<1x1x1x32x32xbf16>
    %353 = vector.shape_cast %352 : vector<1x1x1x32x32xbf16> to vector<32x32xbf16>
    %cst_319 = arith.constant dense<0.000000e+00> : vector<256x32xf32>
    %354 = tpu.matmul %351, %353, %cst_319 {dimension_numbers = #tpu.dot_dimension_numbers<[1], [0], [0], [1], [0, 0, 1, 1], [], []>} : vector<256x32xbf16>, vector<32x32xbf16>, vector<256x32xf32> -> vector<256x32xf32>
    %355 = arith.addf %348, %354 : vector<256x32xf32>
    %c1_320 = arith.constant 1 : index
    %c2_321 = arith.constant 2 : index
    %c0_322 = arith.constant 0 : index
    %356 = vector.load %arg10[%c1_320, %c2_321, %c0_322] : memref<18x18x32xf32, #tpu.memory_space<vmem>>, vector<16x16x32xf32>
    %357 = vector.shape_cast %356 : vector<16x16x32xf32> to vector<256x32xf32>
    %358 = arith.truncf %357 : vector<256x32xf32> to vector<256x32xbf16>
    %c2_323 = arith.constant 2 : index
    %c1_324 = arith.constant 1 : index
    %c2_325 = arith.constant 2 : index
    %c0_326 = arith.constant 0 : index
    %c0_327 = arith.constant 0 : index
    %359 = vector.load %arg5[%c2_323, %c1_324, %c2_325, %c0_326, %c0_327] : memref<4x3x3x32x32xbf16, #tpu.memory_space<vmem>>, vector<1x1x1x32x32xbf16>
    %360 = vector.shape_cast %359 : vector<1x1x1x32x32xbf16> to vector<32x32xbf16>
    %cst_328 = arith.constant dense<0.000000e+00> : vector<256x32xf32>
    %361 = tpu.matmul %358, %360, %cst_328 {dimension_numbers = #tpu.dot_dimension_numbers<[1], [0], [0], [1], [0, 0, 1, 1], [], []>} : vector<256x32xbf16>, vector<32x32xbf16>, vector<256x32xf32> -> vector<256x32xf32>
    %362 = arith.addf %355, %361 : vector<256x32xf32>
    %c2_329 = arith.constant 2 : index
    %c0_330 = arith.constant 0 : index
    %c0_331 = arith.constant 0 : index
    %363 = vector.load %arg10[%c2_329, %c0_330, %c0_331] : memref<18x18x32xf32, #tpu.memory_space<vmem>>, vector<16x16x32xf32>
    %364 = vector.shape_cast %363 : vector<16x16x32xf32> to vector<256x32xf32>
    %365 = arith.truncf %364 : vector<256x32xf32> to vector<256x32xbf16>
    %c2_332 = arith.constant 2 : index
    %c2_333 = arith.constant 2 : index
    %c0_334 = arith.constant 0 : index
    %c0_335 = arith.constant 0 : index
    %c0_336 = arith.constant 0 : index
    %366 = vector.load %arg5[%c2_332, %c2_333, %c0_334, %c0_335, %c0_336] : memref<4x3x3x32x32xbf16, #tpu.memory_space<vmem>>, vector<1x1x1x32x32xbf16>
    %367 = vector.shape_cast %366 : vector<1x1x1x32x32xbf16> to vector<32x32xbf16>
    %cst_337 = arith.constant dense<0.000000e+00> : vector<256x32xf32>
    %368 = tpu.matmul %365, %367, %cst_337 {dimension_numbers = #tpu.dot_dimension_numbers<[1], [0], [0], [1], [0, 0, 1, 1], [], []>} : vector<256x32xbf16>, vector<32x32xbf16>, vector<256x32xf32> -> vector<256x32xf32>
    %369 = arith.addf %362, %368 : vector<256x32xf32>
    %c2_338 = arith.constant 2 : index
    %c1_339 = arith.constant 1 : index
    %c0_340 = arith.constant 0 : index
    %370 = vector.load %arg10[%c2_338, %c1_339, %c0_340] : memref<18x18x32xf32, #tpu.memory_space<vmem>>, vector<16x16x32xf32>
    %371 = vector.shape_cast %370 : vector<16x16x32xf32> to vector<256x32xf32>
    %372 = arith.truncf %371 : vector<256x32xf32> to vector<256x32xbf16>
    %c2_341 = arith.constant 2 : index
    %c2_342 = arith.constant 2 : index
    %c1_343 = arith.constant 1 : index
    %c0_344 = arith.constant 0 : index
    %c0_345 = arith.constant 0 : index
    %373 = vector.load %arg5[%c2_341, %c2_342, %c1_343, %c0_344, %c0_345] : memref<4x3x3x32x32xbf16, #tpu.memory_space<vmem>>, vector<1x1x1x32x32xbf16>
    %374 = vector.shape_cast %373 : vector<1x1x1x32x32xbf16> to vector<32x32xbf16>
    %cst_346 = arith.constant dense<0.000000e+00> : vector<256x32xf32>
    %375 = tpu.matmul %372, %374, %cst_346 {dimension_numbers = #tpu.dot_dimension_numbers<[1], [0], [0], [1], [0, 0, 1, 1], [], []>} : vector<256x32xbf16>, vector<32x32xbf16>, vector<256x32xf32> -> vector<256x32xf32>
    %376 = arith.addf %369, %375 : vector<256x32xf32>
    %c2_347 = arith.constant 2 : index
    %c2_348 = arith.constant 2 : index
    %c0_349 = arith.constant 0 : index
    %377 = vector.load %arg10[%c2_347, %c2_348, %c0_349] : memref<18x18x32xf32, #tpu.memory_space<vmem>>, vector<16x16x32xf32>
    %378 = vector.shape_cast %377 : vector<16x16x32xf32> to vector<256x32xf32>
    %379 = arith.truncf %378 : vector<256x32xf32> to vector<256x32xbf16>
    %c2_350 = arith.constant 2 : index
    %c2_351 = arith.constant 2 : index
    %c2_352 = arith.constant 2 : index
    %c0_353 = arith.constant 0 : index
    %c0_354 = arith.constant 0 : index
    %380 = vector.load %arg5[%c2_350, %c2_351, %c2_352, %c0_353, %c0_354] : memref<4x3x3x32x32xbf16, #tpu.memory_space<vmem>>, vector<1x1x1x32x32xbf16>
    %381 = vector.shape_cast %380 : vector<1x1x1x32x32xbf16> to vector<32x32xbf16>
    %cst_355 = arith.constant dense<0.000000e+00> : vector<256x32xf32>
    %382 = tpu.matmul %379, %381, %cst_355 {dimension_numbers = #tpu.dot_dimension_numbers<[1], [0], [0], [1], [0, 0, 1, 1], [], []>} : vector<256x32xbf16>, vector<32x32xbf16>, vector<256x32xf32> -> vector<256x32xf32>
    %383 = arith.addf %376, %382 : vector<256x32xf32>
    %c2_356 = arith.constant 2 : index
    %c0_357 = arith.constant 0 : index
    %c0_358 = arith.constant 0 : index
    %384 = vector.load %arg6[%c2_356, %c0_357, %c0_358] : memref<4x1x32xf32, #tpu.memory_space<vmem>>, vector<1x1x32xf32>
    %385 = vector.shape_cast %384 : vector<1x1x32xf32> to vector<1x32xf32>
    %386 = vector.broadcast %385 : vector<1x32xf32> to vector<256x32xf32>
    %387 = arith.addf %383, %386 : vector<256x32xf32>
    %cst_359 = arith.constant dense<0.000000e+00> : vector<32xf32>
    %388 = vector.multi_reduction <add>, %387, %cst_359 [0] : vector<256x32xf32> to vector<32xf32>
    %389 = vector.shape_cast %388 : vector<32xf32> to vector<1x32xf32>
    %cst_360 = arith.constant 3.906250e-03 : f32
    %390 = vector.broadcast %cst_360 : f32 to vector<1x32xf32>
    %391 = arith.mulf %389, %390 : vector<1x32xf32>
    %392 = vector.broadcast %391 : vector<1x32xf32> to vector<256x32xf32>
    %393 = arith.subf %387, %392 : vector<256x32xf32>
    %394 = arith.mulf %393, %393 : vector<256x32xf32>
    %cst_361 = arith.constant dense<0.000000e+00> : vector<32xf32>
    %395 = vector.multi_reduction <add>, %394, %cst_361 [0] : vector<256x32xf32> to vector<32xf32>
    %396 = vector.shape_cast %395 : vector<32xf32> to vector<1x32xf32>
    %cst_362 = arith.constant 3.906250e-03 : f32
    %397 = vector.broadcast %cst_362 : f32 to vector<1x32xf32>
    %398 = arith.mulf %396, %397 : vector<1x32xf32>
    %cst_363 = arith.constant 9.99999974E-6 : f32
    %399 = vector.broadcast %cst_363 : f32 to vector<1x32xf32>
    %400 = arith.addf %398, %399 : vector<1x32xf32>
    %401 = math.rsqrt %400 : vector<1x32xf32>
    %402 = vector.broadcast %401 : vector<1x32xf32> to vector<256x32xf32>
    %403 = arith.mulf %393, %402 : vector<256x32xf32>
    %c2_364 = arith.constant 2 : index
    %c0_365 = arith.constant 0 : index
    %c0_366 = arith.constant 0 : index
    %404 = vector.load %arg7[%c2_364, %c0_365, %c0_366] : memref<4x1x32xf32, #tpu.memory_space<vmem>>, vector<1x1x32xf32>
    %405 = vector.shape_cast %404 : vector<1x1x32xf32> to vector<1x32xf32>
    %406 = vector.broadcast %405 : vector<1x32xf32> to vector<256x32xf32>
    %407 = arith.mulf %403, %406 : vector<256x32xf32>
    %c2_367 = arith.constant 2 : index
    %c0_368 = arith.constant 0 : index
    %c0_369 = arith.constant 0 : index
    %408 = vector.load %arg8[%c2_367, %c0_368, %c0_369] : memref<4x1x32xf32, #tpu.memory_space<vmem>>, vector<1x1x32xf32>
    %409 = vector.shape_cast %408 : vector<1x1x32xf32> to vector<1x32xf32>
    %410 = vector.broadcast %409 : vector<1x32xf32> to vector<256x32xf32>
    %411 = arith.addf %407, %410 : vector<256x32xf32>
    %cst_370 = arith.constant 5.000000e-01 : f32
    %412 = vector.broadcast %cst_370 : f32 to vector<256x32xf32>
    %413 = arith.mulf %412, %411 : vector<256x32xf32>
    %cst_371 = arith.constant 1.41421354 : f32
    %414 = vector.broadcast %cst_371 : f32 to vector<256x32xf32>
    %415 = arith.divf %411, %414 : vector<256x32xf32>
    %416 = math.erf %415 : vector<256x32xf32>
    %cst_372 = arith.constant 1.000000e+00 : f32
    %417 = vector.broadcast %cst_372 : f32 to vector<256x32xf32>
    %418 = arith.addf %417, %416 : vector<256x32xf32>
    %419 = arith.mulf %413, %418 : vector<256x32xf32>
    %420 = vector.shape_cast %419 : vector<256x32xf32> to vector<16x16x32xf32>
    %c1_373 = arith.constant 1 : index
    %c1_374 = arith.constant 1 : index
    %c0_375 = arith.constant 0 : index
    %421 = vector.load %arg10[%c1_373, %c1_374, %c0_375] : memref<18x18x32xf32, #tpu.memory_space<vmem>>, vector<16x16x32xf32>
    tpu.vector_store %arg10[%c1_373, %c1_374, %c0_375], %420 {strides = array<i32>} : memref<18x18x32xf32, #tpu.memory_space<vmem>>, vector<16x16x32xf32>,
    %cst_376 = arith.constant 0.000000e+00 : f32
    %422 = vector.broadcast %cst_376 : f32 to vector<256x32xf32>
    %c0_377 = arith.constant 0 : index
    %c0_378 = arith.constant 0 : index
    %c0_379 = arith.constant 0 : index
    %423 = vector.load %arg10[%c0_377, %c0_378, %c0_379] : memref<18x18x32xf32, #tpu.memory_space<vmem>>, vector<16x16x32xf32>
    %424 = vector.shape_cast %423 : vector<16x16x32xf32> to vector<256x32xf32>
    %425 = arith.truncf %424 : vector<256x32xf32> to vector<256x32xbf16>
    %c3_380 = arith.constant 3 : index
    %c0_381 = arith.constant 0 : index
    %c0_382 = arith.constant 0 : index
    %c0_383 = arith.constant 0 : index
    %c0_384 = arith.constant 0 : index
    %426 = vector.load %arg5[%c3_380, %c0_381, %c0_382, %c0_383, %c0_384] : memref<4x3x3x32x32xbf16, #tpu.memory_space<vmem>>, vector<1x1x1x32x32xbf16>
    %427 = vector.shape_cast %426 : vector<1x1x1x32x32xbf16> to vector<32x32xbf16>
    %cst_385 = arith.constant dense<0.000000e+00> : vector<256x32xf32>
    %428 = tpu.matmul %425, %427, %cst_385 {dimension_numbers = #tpu.dot_dimension_numbers<[1], [0], [0], [1], [0, 0, 1, 1], [], []>} : vector<256x32xbf16>, vector<32x32xbf16>, vector<256x32xf32> -> vector<256x32xf32>
    %429 = arith.addf %422, %428 : vector<256x32xf32>
    %c0_386 = arith.constant 0 : index
    %c1_387 = arith.constant 1 : index
    %c0_388 = arith.constant 0 : index
    %430 = vector.load %arg10[%c0_386, %c1_387, %c0_388] : memref<18x18x32xf32, #tpu.memory_space<vmem>>, vector<16x16x32xf32>
    %431 = vector.shape_cast %430 : vector<16x16x32xf32> to vector<256x32xf32>
    %432 = arith.truncf %431 : vector<256x32xf32> to vector<256x32xbf16>
    %c3_389 = arith.constant 3 : index
    %c0_390 = arith.constant 0 : index
    %c1_391 = arith.constant 1 : index
    %c0_392 = arith.constant 0 : index
    %c0_393 = arith.constant 0 : index
    %433 = vector.load %arg5[%c3_389, %c0_390, %c1_391, %c0_392, %c0_393] : memref<4x3x3x32x32xbf16, #tpu.memory_space<vmem>>, vector<1x1x1x32x32xbf16>
    %434 = vector.shape_cast %433 : vector<1x1x1x32x32xbf16> to vector<32x32xbf16>
    %cst_394 = arith.constant dense<0.000000e+00> : vector<256x32xf32>
    %435 = tpu.matmul %432, %434, %cst_394 {dimension_numbers = #tpu.dot_dimension_numbers<[1], [0], [0], [1], [0, 0, 1, 1], [], []>} : vector<256x32xbf16>, vector<32x32xbf16>, vector<256x32xf32> -> vector<256x32xf32>
    %436 = arith.addf %429, %435 : vector<256x32xf32>
    %c0_395 = arith.constant 0 : index
    %c2_396 = arith.constant 2 : index
    %c0_397 = arith.constant 0 : index
    %437 = vector.load %arg10[%c0_395, %c2_396, %c0_397] : memref<18x18x32xf32, #tpu.memory_space<vmem>>, vector<16x16x32xf32>
    %438 = vector.shape_cast %437 : vector<16x16x32xf32> to vector<256x32xf32>
    %439 = arith.truncf %438 : vector<256x32xf32> to vector<256x32xbf16>
    %c3_398 = arith.constant 3 : index
    %c0_399 = arith.constant 0 : index
    %c2_400 = arith.constant 2 : index
    %c0_401 = arith.constant 0 : index
    %c0_402 = arith.constant 0 : index
    %440 = vector.load %arg5[%c3_398, %c0_399, %c2_400, %c0_401, %c0_402] : memref<4x3x3x32x32xbf16, #tpu.memory_space<vmem>>, vector<1x1x1x32x32xbf16>
    %441 = vector.shape_cast %440 : vector<1x1x1x32x32xbf16> to vector<32x32xbf16>
    %cst_403 = arith.constant dense<0.000000e+00> : vector<256x32xf32>
    %442 = tpu.matmul %439, %441, %cst_403 {dimension_numbers = #tpu.dot_dimension_numbers<[1], [0], [0], [1], [0, 0, 1, 1], [], []>} : vector<256x32xbf16>, vector<32x32xbf16>, vector<256x32xf32> -> vector<256x32xf32>
    %443 = arith.addf %436, %442 : vector<256x32xf32>
    %c1_404 = arith.constant 1 : index
    %c0_405 = arith.constant 0 : index
    %c0_406 = arith.constant 0 : index
    %444 = vector.load %arg10[%c1_404, %c0_405, %c0_406] : memref<18x18x32xf32, #tpu.memory_space<vmem>>, vector<16x16x32xf32>
    %445 = vector.shape_cast %444 : vector<16x16x32xf32> to vector<256x32xf32>
    %446 = arith.truncf %445 : vector<256x32xf32> to vector<256x32xbf16>
    %c3_407 = arith.constant 3 : index
    %c1_408 = arith.constant 1 : index
    %c0_409 = arith.constant 0 : index
    %c0_410 = arith.constant 0 : index
    %c0_411 = arith.constant 0 : index
    %447 = vector.load %arg5[%c3_407, %c1_408, %c0_409, %c0_410, %c0_411] : memref<4x3x3x32x32xbf16, #tpu.memory_space<vmem>>, vector<1x1x1x32x32xbf16>
    %448 = vector.shape_cast %447 : vector<1x1x1x32x32xbf16> to vector<32x32xbf16>
    %cst_412 = arith.constant dense<0.000000e+00> : vector<256x32xf32>
    %449 = tpu.matmul %446, %448, %cst_412 {dimension_numbers = #tpu.dot_dimension_numbers<[1], [0], [0], [1], [0, 0, 1, 1], [], []>} : vector<256x32xbf16>, vector<32x32xbf16>, vector<256x32xf32> -> vector<256x32xf32>
    %450 = arith.addf %443, %449 : vector<256x32xf32>
    %c1_413 = arith.constant 1 : index
    %c1_414 = arith.constant 1 : index
    %c0_415 = arith.constant 0 : index
    %451 = vector.load %arg10[%c1_413, %c1_414, %c0_415] : memref<18x18x32xf32, #tpu.memory_space<vmem>>, vector<16x16x32xf32>
    %452 = vector.shape_cast %451 : vector<16x16x32xf32> to vector<256x32xf32>
    %453 = arith.truncf %452 : vector<256x32xf32> to vector<256x32xbf16>
    %c3_416 = arith.constant 3 : index
    %c1_417 = arith.constant 1 : index
    %c1_418 = arith.constant 1 : index
    %c0_419 = arith.constant 0 : index
    %c0_420 = arith.constant 0 : index
    %454 = vector.load %arg5[%c3_416, %c1_417, %c1_418, %c0_419, %c0_420] : memref<4x3x3x32x32xbf16, #tpu.memory_space<vmem>>, vector<1x1x1x32x32xbf16>
    %455 = vector.shape_cast %454 : vector<1x1x1x32x32xbf16> to vector<32x32xbf16>
    %cst_421 = arith.constant dense<0.000000e+00> : vector<256x32xf32>
    %456 = tpu.matmul %453, %455, %cst_421 {dimension_numbers = #tpu.dot_dimension_numbers<[1], [0], [0], [1], [0, 0, 1, 1], [], []>} : vector<256x32xbf16>, vector<32x32xbf16>, vector<256x32xf32> -> vector<256x32xf32>
    %457 = arith.addf %450, %456 : vector<256x32xf32>
    %c1_422 = arith.constant 1 : index
    %c2_423 = arith.constant 2 : index
    %c0_424 = arith.constant 0 : index
    %458 = vector.load %arg10[%c1_422, %c2_423, %c0_424] : memref<18x18x32xf32, #tpu.memory_space<vmem>>, vector<16x16x32xf32>
    %459 = vector.shape_cast %458 : vector<16x16x32xf32> to vector<256x32xf32>
    %460 = arith.truncf %459 : vector<256x32xf32> to vector<256x32xbf16>
    %c3_425 = arith.constant 3 : index
    %c1_426 = arith.constant 1 : index
    %c2_427 = arith.constant 2 : index
    %c0_428 = arith.constant 0 : index
    %c0_429 = arith.constant 0 : index
    %461 = vector.load %arg5[%c3_425, %c1_426, %c2_427, %c0_428, %c0_429] : memref<4x3x3x32x32xbf16, #tpu.memory_space<vmem>>, vector<1x1x1x32x32xbf16>
    %462 = vector.shape_cast %461 : vector<1x1x1x32x32xbf16> to vector<32x32xbf16>
    %cst_430 = arith.constant dense<0.000000e+00> : vector<256x32xf32>
    %463 = tpu.matmul %460, %462, %cst_430 {dimension_numbers = #tpu.dot_dimension_numbers<[1], [0], [0], [1], [0, 0, 1, 1], [], []>} : vector<256x32xbf16>, vector<32x32xbf16>, vector<256x32xf32> -> vector<256x32xf32>
    %464 = arith.addf %457, %463 : vector<256x32xf32>
    %c2_431 = arith.constant 2 : index
    %c0_432 = arith.constant 0 : index
    %c0_433 = arith.constant 0 : index
    %465 = vector.load %arg10[%c2_431, %c0_432, %c0_433] : memref<18x18x32xf32, #tpu.memory_space<vmem>>, vector<16x16x32xf32>
    %466 = vector.shape_cast %465 : vector<16x16x32xf32> to vector<256x32xf32>
    %467 = arith.truncf %466 : vector<256x32xf32> to vector<256x32xbf16>
    %c3_434 = arith.constant 3 : index
    %c2_435 = arith.constant 2 : index
    %c0_436 = arith.constant 0 : index
    %c0_437 = arith.constant 0 : index
    %c0_438 = arith.constant 0 : index
    %468 = vector.load %arg5[%c3_434, %c2_435, %c0_436, %c0_437, %c0_438] : memref<4x3x3x32x32xbf16, #tpu.memory_space<vmem>>, vector<1x1x1x32x32xbf16>
    %469 = vector.shape_cast %468 : vector<1x1x1x32x32xbf16> to vector<32x32xbf16>
    %cst_439 = arith.constant dense<0.000000e+00> : vector<256x32xf32>
    %470 = tpu.matmul %467, %469, %cst_439 {dimension_numbers = #tpu.dot_dimension_numbers<[1], [0], [0], [1], [0, 0, 1, 1], [], []>} : vector<256x32xbf16>, vector<32x32xbf16>, vector<256x32xf32> -> vector<256x32xf32>
    %471 = arith.addf %464, %470 : vector<256x32xf32>
    %c2_440 = arith.constant 2 : index
    %c1_441 = arith.constant 1 : index
    %c0_442 = arith.constant 0 : index
    %472 = vector.load %arg10[%c2_440, %c1_441, %c0_442] : memref<18x18x32xf32, #tpu.memory_space<vmem>>, vector<16x16x32xf32>
    %473 = vector.shape_cast %472 : vector<16x16x32xf32> to vector<256x32xf32>
    %474 = arith.truncf %473 : vector<256x32xf32> to vector<256x32xbf16>
    %c3_443 = arith.constant 3 : index
    %c2_444 = arith.constant 2 : index
    %c1_445 = arith.constant 1 : index
    %c0_446 = arith.constant 0 : index
    %c0_447 = arith.constant 0 : index
    %475 = vector.load %arg5[%c3_443, %c2_444, %c1_445, %c0_446, %c0_447] : memref<4x3x3x32x32xbf16, #tpu.memory_space<vmem>>, vector<1x1x1x32x32xbf16>
    %476 = vector.shape_cast %475 : vector<1x1x1x32x32xbf16> to vector<32x32xbf16>
    %cst_448 = arith.constant dense<0.000000e+00> : vector<256x32xf32>
    %477 = tpu.matmul %474, %476, %cst_448 {dimension_numbers = #tpu.dot_dimension_numbers<[1], [0], [0], [1], [0, 0, 1, 1], [], []>} : vector<256x32xbf16>, vector<32x32xbf16>, vector<256x32xf32> -> vector<256x32xf32>
    %478 = arith.addf %471, %477 : vector<256x32xf32>
    %c2_449 = arith.constant 2 : index
    %c2_450 = arith.constant 2 : index
    %c0_451 = arith.constant 0 : index
    %479 = vector.load %arg10[%c2_449, %c2_450, %c0_451] : memref<18x18x32xf32, #tpu.memory_space<vmem>>, vector<16x16x32xf32>
    %480 = vector.shape_cast %479 : vector<16x16x32xf32> to vector<256x32xf32>
    %481 = arith.truncf %480 : vector<256x32xf32> to vector<256x32xbf16>
    %c3_452 = arith.constant 3 : index
    %c2_453 = arith.constant 2 : index
    %c2_454 = arith.constant 2 : index
    %c0_455 = arith.constant 0 : index
    %c0_456 = arith.constant 0 : index
    %482 = vector.load %arg5[%c3_452, %c2_453, %c2_454, %c0_455, %c0_456] : memref<4x3x3x32x32xbf16, #tpu.memory_space<vmem>>, vector<1x1x1x32x32xbf16>
    %483 = vector.shape_cast %482 : vector<1x1x1x32x32xbf16> to vector<32x32xbf16>
    %cst_457 = arith.constant dense<0.000000e+00> : vector<256x32xf32>
    %484 = tpu.matmul %481, %483, %cst_457 {dimension_numbers = #tpu.dot_dimension_numbers<[1], [0], [0], [1], [0, 0, 1, 1], [], []>} : vector<256x32xbf16>, vector<32x32xbf16>, vector<256x32xf32> -> vector<256x32xf32>
    %485 = arith.addf %478, %484 : vector<256x32xf32>
    %c3_458 = arith.constant 3 : index
    %c0_459 = arith.constant 0 : index
    %c0_460 = arith.constant 0 : index
    %486 = vector.load %arg6[%c3_458, %c0_459, %c0_460] : memref<4x1x32xf32, #tpu.memory_space<vmem>>, vector<1x1x32xf32>
    %487 = vector.shape_cast %486 : vector<1x1x32xf32> to vector<1x32xf32>
    %488 = vector.broadcast %487 : vector<1x32xf32> to vector<256x32xf32>
    %489 = arith.addf %485, %488 : vector<256x32xf32>
    %cst_461 = arith.constant dense<0.000000e+00> : vector<32xf32>
    %490 = vector.multi_reduction <add>, %489, %cst_461 [0] : vector<256x32xf32> to vector<32xf32>
    %491 = vector.shape_cast %490 : vector<32xf32> to vector<1x32xf32>
    %cst_462 = arith.constant 3.906250e-03 : f32
    %492 = vector.broadcast %cst_462 : f32 to vector<1x32xf32>
    %493 = arith.mulf %491, %492 : vector<1x32xf32>
    %494 = vector.broadcast %493 : vector<1x32xf32> to vector<256x32xf32>
    %495 = arith.subf %489, %494 : vector<256x32xf32>
    %496 = arith.mulf %495, %495 : vector<256x32xf32>
    %cst_463 = arith.constant dense<0.000000e+00> : vector<32xf32>
    %497 = vector.multi_reduction <add>, %496, %cst_463 [0] : vector<256x32xf32> to vector<32xf32>
    %498 = vector.shape_cast %497 : vector<32xf32> to vector<1x32xf32>
    %cst_464 = arith.constant 3.906250e-03 : f32
    %499 = vector.broadcast %cst_464 : f32 to vector<1x32xf32>
    %500 = arith.mulf %498, %499 : vector<1x32xf32>
    %cst_465 = arith.constant 9.99999974E-6 : f32
    %501 = vector.broadcast %cst_465 : f32 to vector<1x32xf32>
    %502 = arith.addf %500, %501 : vector<1x32xf32>
    %503 = math.rsqrt %502 : vector<1x32xf32>
    %504 = vector.broadcast %503 : vector<1x32xf32> to vector<256x32xf32>
    %505 = arith.mulf %495, %504 : vector<256x32xf32>
    %c3_466 = arith.constant 3 : index
    %c0_467 = arith.constant 0 : index
    %c0_468 = arith.constant 0 : index
    %506 = vector.load %arg7[%c3_466, %c0_467, %c0_468] : memref<4x1x32xf32, #tpu.memory_space<vmem>>, vector<1x1x32xf32>
    %507 = vector.shape_cast %506 : vector<1x1x32xf32> to vector<1x32xf32>
    %508 = vector.broadcast %507 : vector<1x32xf32> to vector<256x32xf32>
    %509 = arith.mulf %505, %508 : vector<256x32xf32>
    %c3_469 = arith.constant 3 : index
    %c0_470 = arith.constant 0 : index
    %c0_471 = arith.constant 0 : index
    %510 = vector.load %arg8[%c3_469, %c0_470, %c0_471] : memref<4x1x32xf32, #tpu.memory_space<vmem>>, vector<1x1x32xf32>
    %511 = vector.shape_cast %510 : vector<1x1x32xf32> to vector<1x32xf32>
    %512 = vector.broadcast %511 : vector<1x32xf32> to vector<256x32xf32>
    %513 = arith.addf %509, %512 : vector<256x32xf32>
    %cst_472 = arith.constant 5.000000e-01 : f32
    %514 = vector.broadcast %cst_472 : f32 to vector<256x32xf32>
    %515 = arith.mulf %514, %513 : vector<256x32xf32>
    %cst_473 = arith.constant 1.41421354 : f32
    %516 = vector.broadcast %cst_473 : f32 to vector<256x32xf32>
    %517 = arith.divf %513, %516 : vector<256x32xf32>
    %518 = math.erf %517 : vector<256x32xf32>
    %cst_474 = arith.constant 1.000000e+00 : f32
    %519 = vector.broadcast %cst_474 : f32 to vector<256x32xf32>
    %520 = arith.addf %519, %518 : vector<256x32xf32>
    %521 = arith.mulf %515, %520 : vector<256x32xf32>
    %c0_475 = arith.constant 0 : index
    %c0_476 = arith.constant 0 : index
    %c0_477 = arith.constant 0 : index
    %522 = vector.load %arg9[%c0_475, %c0_476, %c0_477] : memref<1x256x32xf32, #tpu.memory_space<vmem>>, vector<1x256x32xf32>
    %523 = vector.shape_cast %522 : vector<1x256x32xf32> to vector<256x32xf32>
    %524 = vector.shape_cast %521 : vector<256x32xf32> to vector<1x256x32xf32>
    tpu.vector_store %arg9[%c0_475, %c0_476, %c0_477], %524 {strides = array<i32>} : memref<1x256x32xf32, #tpu.memory_space<vmem>>, vector<1x256x32xf32>,
    return
  }
  func.func @transform_0(%arg0: i32) -> (i32, i32, i32, i32) {
    %c0_i32 = arith.constant 0 : i32
    %c0_i32_0 = arith.constant 0 : i32
    %c0_i32_1 = arith.constant 0 : i32
    %c0_i32_2 = arith.constant 0 : i32
    return %arg0, %c0_i32, %c0_i32_0, %c0_i32_1 : i32, i32, i32, i32
  }
  func.func @transform_1(%arg0: i32) -> (i32, i32, i32, i32) {
    %c0_i32 = arith.constant 0 : i32
    %c0_i32_0 = arith.constant 0 : i32
    %c0_i32_1 = arith.constant 0 : i32
    %c0_i32_2 = arith.constant 0 : i32
    return %arg0, %c0_i32, %c0_i32_0, %c0_i32_1 : i32, i32, i32, i32
  }
  func.func @transform_2(%arg0: i32) -> (i32, i32, i32) {
    %c0_i32 = arith.constant 0 : i32
    %c0_i32_0 = arith.constant 0 : i32
    %c0_i32_1 = arith.constant 0 : i32
    %c0_i32_2 = arith.constant 0 : i32
    return %c0_i32, %c0_i32_0, %c0_i32_1 : i32, i32, i32
  }
  func.func @transform_3(%arg0: i32) -> (i32, i32) {
    %c0_i32 = arith.constant 0 : i32
    %c0_i32_0 = arith.constant 0 : i32
    %c0_i32_1 = arith.constant 0 : i32
    return %c0_i32, %c0_i32_0 : i32, i32
  }
  func.func @transform_4(%arg0: i32) -> (i32, i32, i32, i32, i32) {
    %c0_i32 = arith.constant 0 : i32
    %c0_i32_0 = arith.constant 0 : i32
    %c0_i32_1 = arith.constant 0 : i32
    %c0_i32_2 = arith.constant 0 : i32
    %c0_i32_3 = arith.constant 0 : i32
    %c0_i32_4 = arith.constant 0 : i32
    return %c0_i32, %c0_i32_0, %c0_i32_1, %c0_i32_2, %c0_i32_3 : i32, i32, i32, i32, i32
  }
  func.func @transform_5(%arg0: i32) -> (i32, i32, i32) {
    %c0_i32 = arith.constant 0 : i32
    %c0_i32_0 = arith.constant 0 : i32
    %c0_i32_1 = arith.constant 0 : i32
    %c0_i32_2 = arith.constant 0 : i32
    return %c0_i32, %c0_i32_0, %c0_i32_1 : i32, i32, i32
  }
  func.func @transform_6(%arg0: i32) -> (i32, i32, i32) {
    %c0_i32 = arith.constant 0 : i32
    %c0_i32_0 = arith.constant 0 : i32
    %c0_i32_1 = arith.constant 0 : i32
    %c0_i32_2 = arith.constant 0 : i32
    return %c0_i32, %c0_i32_0, %c0_i32_1 : i32, i32, i32
  }
  func.func @transform_7(%arg0: i32) -> (i32, i32, i32) {
    %c0_i32 = arith.constant 0 : i32
    %c0_i32_0 = arith.constant 0 : i32
    %c0_i32_1 = arith.constant 0 : i32
    %c0_i32_2 = arith.constant 0 : i32
    return %c0_i32, %c0_i32_0, %c0_i32_1 : i32, i32, i32
  }
  func.func @transform_8(%arg0: i32) -> (i32, i32, i32) {
    %c0_i32 = arith.constant 0 : i32
    %c0_i32_0 = arith.constant 0 : i32
    %c0_i32_1 = arith.constant 0 : i32
    return %arg0, %c0_i32, %c0_i32_0 : i32, i32, i32
  }
}

module attributes {stable_mosaic.version = 11 : i64} {
  func.func @kernel(%arg0: i32, %arg1: memref<1x8x8x32xf32, #tpu.memory_space<vmem>>, %arg2: memref<1x8x8x32xf32, #tpu.memory_space<vmem>>, %arg3: memref<2x64x64xbf16, #tpu.memory_space<vmem>>, %arg4: memref<1x64xf32, #tpu.memory_space<vmem>>, %arg5: memref<1x2x64x64xf32, #tpu.memory_space<vmem>>) attributes {dimension_semantics = [#tpu.dimension_semantics<parallel>], iteration_bounds = array<i64: 2>, scalar_prefetch = 0 : i64, scratch_operands = 0 : i64, tpu.core_type = #tpu.core_type<tc>, window_params = [{transform_indices = @transform_0, window_bounds = array<i64: 1, 8, 8, 32>}, {transform_indices = @transform_1, window_bounds = array<i64: 1, 8, 8, 32>}, {pipeline_mode = #tpu.pipeline_mode<synchronous>, transform_indices = @transform_2, window_bounds = array<i64: 2, 64, 64>}, {pipeline_mode = #tpu.pipeline_mode<synchronous>, transform_indices = @transform_3, window_bounds = array<i64: 1, 64>}, {transform_indices = @transform_4, window_bounds = array<i64: 1, 2, 64, 64>}]} {
    %c0 = arith.constant 0 : index
    %c0_0 = arith.constant 0 : index
    %c0_1 = arith.constant 0 : index
    %c0_2 = arith.constant 0 : index
    %0 = vector.load %arg1[%c0, %c0_0, %c0_1, %c0_2] : memref<1x8x8x32xf32, #tpu.memory_space<vmem>>, vector<1x8x8x32xf32>
    %1 = vector.shape_cast %0 : vector<1x8x8x32xf32> to vector<8x8x32xf32>
    %2 = vector.shape_cast %1 : vector<8x8x32xf32> to vector<64x32xf32>
    %3 = arith.truncf %2 : vector<64x32xf32> to vector<64x32xbf16>
    %c0_3 = arith.constant 0 : index
    %c0_4 = arith.constant 0 : index
    %c0_5 = arith.constant 0 : index
    %c0_6 = arith.constant 0 : index
    %4 = vector.load %arg2[%c0_3, %c0_4, %c0_5, %c0_6] : memref<1x8x8x32xf32, #tpu.memory_space<vmem>>, vector<1x8x8x32xf32>
    %5 = vector.shape_cast %4 : vector<1x8x8x32xf32> to vector<8x8x32xf32>
    %6 = vector.shape_cast %5 : vector<8x8x32xf32> to vector<64x32xf32>
    %7 = arith.truncf %6 : vector<64x32xf32> to vector<64x32xbf16>
    %c0_7 = arith.constant 0 : index
    %c0_8 = arith.constant 0 : index
    %c0_9 = arith.constant 0 : index
    %8 = vector.load %arg3[%c0_7, %c0_8, %c0_9] : memref<2x64x64xbf16, #tpu.memory_space<vmem>>, vector<1x32x64xbf16>
    %9 = vector.shape_cast %8 : vector<1x32x64xbf16> to vector<32x64xbf16>
    %cst = arith.constant dense<0.000000e+00> : vector<64x64xf32>
    %10 = tpu.matmul %3, %9, %cst {dimension_numbers = #tpu.dot_dimension_numbers<[1], [0], [0], [1], [0, 0, 1, 1], [], []>} : vector<64x32xbf16>, vector<32x64xbf16>, vector<64x64xf32> -> vector<64x64xf32>
    %c0_10 = arith.constant 0 : index
    %c32 = arith.constant 32 : index
    %c0_11 = arith.constant 0 : index
    %11 = vector.load %arg3[%c0_10, %c32, %c0_11] : memref<2x64x64xbf16, #tpu.memory_space<vmem>>, vector<1x32x64xbf16>
    %12 = vector.shape_cast %11 : vector<1x32x64xbf16> to vector<32x64xbf16>
    %cst_12 = arith.constant dense<0.000000e+00> : vector<64x64xf32>
    %13 = tpu.matmul %7, %12, %cst_12 {dimension_numbers = #tpu.dot_dimension_numbers<[1], [0], [0], [1], [0, 0, 1, 1], [], []>} : vector<64x32xbf16>, vector<32x64xbf16>, vector<64x64xf32> -> vector<64x64xf32>
    %14 = arith.addf %10, %13 : vector<64x64xf32>
    %c0_13 = arith.constant 0 : index
    %c0_14 = arith.constant 0 : index
    %15 = vector.load %arg4[%c0_13, %c0_14] : memref<1x64xf32, #tpu.memory_space<vmem>>, vector<1x64xf32>
    %16 = vector.broadcast %15 : vector<1x64xf32> to vector<64x64xf32>
    %17 = arith.addf %14, %16 : vector<64x64xf32>
    %c0_15 = arith.constant 0 : index
    %c0_16 = arith.constant 0 : index
    %c0_17 = arith.constant 0 : index
    %c0_18 = arith.constant 0 : index
    %18 = vector.load %arg5[%c0_15, %c0_16, %c0_17, %c0_18] : memref<1x2x64x64xf32, #tpu.memory_space<vmem>>, vector<1x1x64x64xf32>
    %19 = vector.shape_cast %18 : vector<1x1x64x64xf32> to vector<64x64xf32>
    %20 = vector.shape_cast %17 : vector<64x64xf32> to vector<1x1x64x64xf32>
    tpu.vector_store %arg5[%c0_15, %c0_16, %c0_17, %c0_18], %20 {strides = array<i32>} : memref<1x2x64x64xf32, #tpu.memory_space<vmem>>, vector<1x1x64x64xf32>,
    %c1 = arith.constant 1 : index
    %c0_19 = arith.constant 0 : index
    %c0_20 = arith.constant 0 : index
    %21 = vector.load %arg3[%c1, %c0_19, %c0_20] : memref<2x64x64xbf16, #tpu.memory_space<vmem>>, vector<1x32x64xbf16>
    %22 = vector.shape_cast %21 : vector<1x32x64xbf16> to vector<32x64xbf16>
    %cst_21 = arith.constant dense<0.000000e+00> : vector<64x64xf32>
    %23 = tpu.matmul %3, %22, %cst_21 {dimension_numbers = #tpu.dot_dimension_numbers<[1], [0], [0], [1], [0, 0, 1, 1], [], []>} : vector<64x32xbf16>, vector<32x64xbf16>, vector<64x64xf32> -> vector<64x64xf32>
    %c1_22 = arith.constant 1 : index
    %c32_23 = arith.constant 32 : index
    %c0_24 = arith.constant 0 : index
    %24 = vector.load %arg3[%c1_22, %c32_23, %c0_24] : memref<2x64x64xbf16, #tpu.memory_space<vmem>>, vector<1x32x64xbf16>
    %25 = vector.shape_cast %24 : vector<1x32x64xbf16> to vector<32x64xbf16>
    %cst_25 = arith.constant dense<0.000000e+00> : vector<64x64xf32>
    %26 = tpu.matmul %7, %25, %cst_25 {dimension_numbers = #tpu.dot_dimension_numbers<[1], [0], [0], [1], [0, 0, 1, 1], [], []>} : vector<64x32xbf16>, vector<32x64xbf16>, vector<64x64xf32> -> vector<64x64xf32>
    %27 = arith.addf %23, %26 : vector<64x64xf32>
    %c0_26 = arith.constant 0 : index
    %c0_27 = arith.constant 0 : index
    %28 = vector.load %arg4[%c0_26, %c0_27] : memref<1x64xf32, #tpu.memory_space<vmem>>, vector<1x64xf32>
    %29 = vector.broadcast %28 : vector<1x64xf32> to vector<64x64xf32>
    %30 = arith.addf %27, %29 : vector<64x64xf32>
    %c0_28 = arith.constant 0 : index
    %c1_29 = arith.constant 1 : index
    %c0_30 = arith.constant 0 : index
    %c0_31 = arith.constant 0 : index
    %31 = vector.load %arg5[%c0_28, %c1_29, %c0_30, %c0_31] : memref<1x2x64x64xf32, #tpu.memory_space<vmem>>, vector<1x1x64x64xf32>
    %32 = vector.shape_cast %31 : vector<1x1x64x64xf32> to vector<64x64xf32>
    %33 = vector.shape_cast %30 : vector<64x64xf32> to vector<1x1x64x64xf32>
    tpu.vector_store %arg5[%c0_28, %c1_29, %c0_30, %c0_31], %33 {strides = array<i32>} : memref<1x2x64x64xf32, #tpu.memory_space<vmem>>, vector<1x1x64x64xf32>,
    return
  }
  func.func @transform_0(%arg0: i32) -> (i32, i32, i32, i32) {
    %c0_i32 = arith.constant 0 : i32
    %c0_i32_0 = arith.constant 0 : i32
    %c0_i32_1 = arith.constant 0 : i32
    %c0_i32_2 = arith.constant 0 : i32
    return %arg0, %c0_i32, %c0_i32_0, %c0_i32_1 : i32, i32, i32, i32
  }
  func.func @transform_1(%arg0: i32) -> (i32, i32, i32, i32) {
    %c0_i32 = arith.constant 0 : i32
    %c0_i32_0 = arith.constant 0 : i32
    %c0_i32_1 = arith.constant 0 : i32
    %c0_i32_2 = arith.constant 0 : i32
    return %arg0, %c0_i32, %c0_i32_0, %c0_i32_1 : i32, i32, i32, i32
  }
  func.func @transform_2(%arg0: i32) -> (i32, i32, i32) {
    %c0_i32 = arith.constant 0 : i32
    %c0_i32_0 = arith.constant 0 : i32
    %c0_i32_1 = arith.constant 0 : i32
    %c0_i32_2 = arith.constant 0 : i32
    return %c0_i32, %c0_i32_0, %c0_i32_1 : i32, i32, i32
  }
  func.func @transform_3(%arg0: i32) -> (i32, i32) {
    %c0_i32 = arith.constant 0 : i32
    %c0_i32_0 = arith.constant 0 : i32
    %c0_i32_1 = arith.constant 0 : i32
    return %c0_i32, %c0_i32_0 : i32, i32
  }
  func.func @transform_4(%arg0: i32) -> (i32, i32, i32, i32) {
    %c0_i32 = arith.constant 0 : i32
    %c0_i32_0 = arith.constant 0 : i32
    %c0_i32_1 = arith.constant 0 : i32
    %c0_i32_2 = arith.constant 0 : i32
    return %arg0, %c0_i32, %c0_i32_0, %c0_i32_1 : i32, i32, i32, i32
  }
}

module attributes {stable_mosaic.version = 11 : i64} {
  func.func @kernel(%arg0: i32, %arg1: memref<1x16x16x32xf32, #tpu.memory_space<vmem>>, %arg2: memref<4x3x3x32x32xbf16, #tpu.memory_space<vmem>>, %arg3: memref<4x1x32xf32, #tpu.memory_space<vmem>>, %arg4: memref<4x1x32xf32, #tpu.memory_space<vmem>>, %arg5: memref<4x1x32xf32, #tpu.memory_space<vmem>>, %arg6: memref<1x256x32xf32, #tpu.memory_space<vmem>>, %arg7: memref<18x18x32xf32, #tpu.memory_space<vmem>>) attributes {dimension_semantics = [#tpu.dimension_semantics<parallel>], iteration_bounds = array<i64: 2>, scalar_prefetch = 0 : i64, scratch_operands = 1 : i64, tpu.core_type = #tpu.core_type<tc>, window_params = [{transform_indices = @transform_0, window_bounds = array<i64: 1, 16, 16, 32>}, {pipeline_mode = #tpu.pipeline_mode<synchronous>, transform_indices = @transform_1, window_bounds = array<i64: 4, 3, 3, 32, 32>}, {pipeline_mode = #tpu.pipeline_mode<synchronous>, transform_indices = @transform_2, window_bounds = array<i64: 4, 1, 32>}, {pipeline_mode = #tpu.pipeline_mode<synchronous>, transform_indices = @transform_3, window_bounds = array<i64: 4, 1, 32>}, {pipeline_mode = #tpu.pipeline_mode<synchronous>, transform_indices = @transform_4, window_bounds = array<i64: 4, 1, 32>}, {transform_indices = @transform_5, window_bounds = array<i64: 1, 256, 32>}]} {
    %cst = arith.constant 0.000000e+00 : f32
    %0 = vector.broadcast %cst : f32 to vector<18x18x32xf32>
    %c0 = arith.constant 0 : index
    %c0_0 = arith.constant 0 : index
    %c0_1 = arith.constant 0 : index
    %1 = vector.load %arg7[%c0, %c0_0, %c0_1] : memref<18x18x32xf32, #tpu.memory_space<vmem>>, vector<18x18x32xf32>
    tpu.vector_store %arg7[%c0, %c0_0, %c0_1], %0 {strides = array<i32>} : memref<18x18x32xf32, #tpu.memory_space<vmem>>, vector<18x18x32xf32>,
    %c0_2 = arith.constant 0 : index
    %c0_3 = arith.constant 0 : index
    %c0_4 = arith.constant 0 : index
    %c0_5 = arith.constant 0 : index
    %2 = vector.load %arg1[%c0_2, %c0_3, %c0_4, %c0_5] : memref<1x16x16x32xf32, #tpu.memory_space<vmem>>, vector<1x16x16x32xf32>
    %3 = vector.shape_cast %2 : vector<1x16x16x32xf32> to vector<16x16x32xf32>
    %c1 = arith.constant 1 : index
    %c1_6 = arith.constant 1 : index
    %c0_7 = arith.constant 0 : index
    %4 = vector.load %arg7[%c1, %c1_6, %c0_7] : memref<18x18x32xf32, #tpu.memory_space<vmem>>, vector<16x16x32xf32>
    tpu.vector_store %arg7[%c1, %c1_6, %c0_7], %3 {strides = array<i32>} : memref<18x18x32xf32, #tpu.memory_space<vmem>>, vector<16x16x32xf32>,
    %cst_8 = arith.constant 0.000000e+00 : f32
    %5 = vector.broadcast %cst_8 : f32 to vector<256x32xf32>
    %c0_9 = arith.constant 0 : index
    %c0_10 = arith.constant 0 : index
    %c0_11 = arith.constant 0 : index
    %6 = vector.load %arg7[%c0_9, %c0_10, %c0_11] : memref<18x18x32xf32, #tpu.memory_space<vmem>>, vector<16x16x32xf32>
    %7 = vector.shape_cast %6 : vector<16x16x32xf32> to vector<256x32xf32>
    %8 = arith.truncf %7 : vector<256x32xf32> to vector<256x32xbf16>
    %c0_12 = arith.constant 0 : index
    %c0_13 = arith.constant 0 : index
    %c0_14 = arith.constant 0 : index
    %c0_15 = arith.constant 0 : index
    %c0_16 = arith.constant 0 : index
    %9 = vector.load %arg2[%c0_12, %c0_13, %c0_14, %c0_15, %c0_16] : memref<4x3x3x32x32xbf16, #tpu.memory_space<vmem>>, vector<1x1x1x32x32xbf16>
    %10 = vector.shape_cast %9 : vector<1x1x1x32x32xbf16> to vector<32x32xbf16>
    %cst_17 = arith.constant dense<0.000000e+00> : vector<256x32xf32>
    %11 = tpu.matmul %8, %10, %cst_17 {dimension_numbers = #tpu.dot_dimension_numbers<[1], [0], [0], [1], [0, 0, 1, 1], [], []>} : vector<256x32xbf16>, vector<32x32xbf16>, vector<256x32xf32> -> vector<256x32xf32>
    %12 = arith.addf %5, %11 : vector<256x32xf32>
    %c0_18 = arith.constant 0 : index
    %c1_19 = arith.constant 1 : index
    %c0_20 = arith.constant 0 : index
    %13 = vector.load %arg7[%c0_18, %c1_19, %c0_20] : memref<18x18x32xf32, #tpu.memory_space<vmem>>, vector<16x16x32xf32>
    %14 = vector.shape_cast %13 : vector<16x16x32xf32> to vector<256x32xf32>
    %15 = arith.truncf %14 : vector<256x32xf32> to vector<256x32xbf16>
    %c0_21 = arith.constant 0 : index
    %c0_22 = arith.constant 0 : index
    %c1_23 = arith.constant 1 : index
    %c0_24 = arith.constant 0 : index
    %c0_25 = arith.constant 0 : index
    %16 = vector.load %arg2[%c0_21, %c0_22, %c1_23, %c0_24, %c0_25] : memref<4x3x3x32x32xbf16, #tpu.memory_space<vmem>>, vector<1x1x1x32x32xbf16>
    %17 = vector.shape_cast %16 : vector<1x1x1x32x32xbf16> to vector<32x32xbf16>
    %cst_26 = arith.constant dense<0.000000e+00> : vector<256x32xf32>
    %18 = tpu.matmul %15, %17, %cst_26 {dimension_numbers = #tpu.dot_dimension_numbers<[1], [0], [0], [1], [0, 0, 1, 1], [], []>} : vector<256x32xbf16>, vector<32x32xbf16>, vector<256x32xf32> -> vector<256x32xf32>
    %19 = arith.addf %12, %18 : vector<256x32xf32>
    %c0_27 = arith.constant 0 : index
    %c2 = arith.constant 2 : index
    %c0_28 = arith.constant 0 : index
    %20 = vector.load %arg7[%c0_27, %c2, %c0_28] : memref<18x18x32xf32, #tpu.memory_space<vmem>>, vector<16x16x32xf32>
    %21 = vector.shape_cast %20 : vector<16x16x32xf32> to vector<256x32xf32>
    %22 = arith.truncf %21 : vector<256x32xf32> to vector<256x32xbf16>
    %c0_29 = arith.constant 0 : index
    %c0_30 = arith.constant 0 : index
    %c2_31 = arith.constant 2 : index
    %c0_32 = arith.constant 0 : index
    %c0_33 = arith.constant 0 : index
    %23 = vector.load %arg2[%c0_29, %c0_30, %c2_31, %c0_32, %c0_33] : memref<4x3x3x32x32xbf16, #tpu.memory_space<vmem>>, vector<1x1x1x32x32xbf16>
    %24 = vector.shape_cast %23 : vector<1x1x1x32x32xbf16> to vector<32x32xbf16>
    %cst_34 = arith.constant dense<0.000000e+00> : vector<256x32xf32>
    %25 = tpu.matmul %22, %24, %cst_34 {dimension_numbers = #tpu.dot_dimension_numbers<[1], [0], [0], [1], [0, 0, 1, 1], [], []>} : vector<256x32xbf16>, vector<32x32xbf16>, vector<256x32xf32> -> vector<256x32xf32>
    %26 = arith.addf %19, %25 : vector<256x32xf32>
    %c1_35 = arith.constant 1 : index
    %c0_36 = arith.constant 0 : index
    %c0_37 = arith.constant 0 : index
    %27 = vector.load %arg7[%c1_35, %c0_36, %c0_37] : memref<18x18x32xf32, #tpu.memory_space<vmem>>, vector<16x16x32xf32>
    %28 = vector.shape_cast %27 : vector<16x16x32xf32> to vector<256x32xf32>
    %29 = arith.truncf %28 : vector<256x32xf32> to vector<256x32xbf16>
    %c0_38 = arith.constant 0 : index
    %c1_39 = arith.constant 1 : index
    %c0_40 = arith.constant 0 : index
    %c0_41 = arith.constant 0 : index
    %c0_42 = arith.constant 0 : index
    %30 = vector.load %arg2[%c0_38, %c1_39, %c0_40, %c0_41, %c0_42] : memref<4x3x3x32x32xbf16, #tpu.memory_space<vmem>>, vector<1x1x1x32x32xbf16>
    %31 = vector.shape_cast %30 : vector<1x1x1x32x32xbf16> to vector<32x32xbf16>
    %cst_43 = arith.constant dense<0.000000e+00> : vector<256x32xf32>
    %32 = tpu.matmul %29, %31, %cst_43 {dimension_numbers = #tpu.dot_dimension_numbers<[1], [0], [0], [1], [0, 0, 1, 1], [], []>} : vector<256x32xbf16>, vector<32x32xbf16>, vector<256x32xf32> -> vector<256x32xf32>
    %33 = arith.addf %26, %32 : vector<256x32xf32>
    %c1_44 = arith.constant 1 : index
    %c1_45 = arith.constant 1 : index
    %c0_46 = arith.constant 0 : index
    %34 = vector.load %arg7[%c1_44, %c1_45, %c0_46] : memref<18x18x32xf32, #tpu.memory_space<vmem>>, vector<16x16x32xf32>
    %35 = vector.shape_cast %34 : vector<16x16x32xf32> to vector<256x32xf32>
    %36 = arith.truncf %35 : vector<256x32xf32> to vector<256x32xbf16>
    %c0_47 = arith.constant 0 : index
    %c1_48 = arith.constant 1 : index
    %c1_49 = arith.constant 1 : index
    %c0_50 = arith.constant 0 : index
    %c0_51 = arith.constant 0 : index
    %37 = vector.load %arg2[%c0_47, %c1_48, %c1_49, %c0_50, %c0_51] : memref<4x3x3x32x32xbf16, #tpu.memory_space<vmem>>, vector<1x1x1x32x32xbf16>
    %38 = vector.shape_cast %37 : vector<1x1x1x32x32xbf16> to vector<32x32xbf16>
    %cst_52 = arith.constant dense<0.000000e+00> : vector<256x32xf32>
    %39 = tpu.matmul %36, %38, %cst_52 {dimension_numbers = #tpu.dot_dimension_numbers<[1], [0], [0], [1], [0, 0, 1, 1], [], []>} : vector<256x32xbf16>, vector<32x32xbf16>, vector<256x32xf32> -> vector<256x32xf32>
    %40 = arith.addf %33, %39 : vector<256x32xf32>
    %c1_53 = arith.constant 1 : index
    %c2_54 = arith.constant 2 : index
    %c0_55 = arith.constant 0 : index
    %41 = vector.load %arg7[%c1_53, %c2_54, %c0_55] : memref<18x18x32xf32, #tpu.memory_space<vmem>>, vector<16x16x32xf32>
    %42 = vector.shape_cast %41 : vector<16x16x32xf32> to vector<256x32xf32>
    %43 = arith.truncf %42 : vector<256x32xf32> to vector<256x32xbf16>
    %c0_56 = arith.constant 0 : index
    %c1_57 = arith.constant 1 : index
    %c2_58 = arith.constant 2 : index
    %c0_59 = arith.constant 0 : index
    %c0_60 = arith.constant 0 : index
    %44 = vector.load %arg2[%c0_56, %c1_57, %c2_58, %c0_59, %c0_60] : memref<4x3x3x32x32xbf16, #tpu.memory_space<vmem>>, vector<1x1x1x32x32xbf16>
    %45 = vector.shape_cast %44 : vector<1x1x1x32x32xbf16> to vector<32x32xbf16>
    %cst_61 = arith.constant dense<0.000000e+00> : vector<256x32xf32>
    %46 = tpu.matmul %43, %45, %cst_61 {dimension_numbers = #tpu.dot_dimension_numbers<[1], [0], [0], [1], [0, 0, 1, 1], [], []>} : vector<256x32xbf16>, vector<32x32xbf16>, vector<256x32xf32> -> vector<256x32xf32>
    %47 = arith.addf %40, %46 : vector<256x32xf32>
    %c2_62 = arith.constant 2 : index
    %c0_63 = arith.constant 0 : index
    %c0_64 = arith.constant 0 : index
    %48 = vector.load %arg7[%c2_62, %c0_63, %c0_64] : memref<18x18x32xf32, #tpu.memory_space<vmem>>, vector<16x16x32xf32>
    %49 = vector.shape_cast %48 : vector<16x16x32xf32> to vector<256x32xf32>
    %50 = arith.truncf %49 : vector<256x32xf32> to vector<256x32xbf16>
    %c0_65 = arith.constant 0 : index
    %c2_66 = arith.constant 2 : index
    %c0_67 = arith.constant 0 : index
    %c0_68 = arith.constant 0 : index
    %c0_69 = arith.constant 0 : index
    %51 = vector.load %arg2[%c0_65, %c2_66, %c0_67, %c0_68, %c0_69] : memref<4x3x3x32x32xbf16, #tpu.memory_space<vmem>>, vector<1x1x1x32x32xbf16>
    %52 = vector.shape_cast %51 : vector<1x1x1x32x32xbf16> to vector<32x32xbf16>
    %cst_70 = arith.constant dense<0.000000e+00> : vector<256x32xf32>
    %53 = tpu.matmul %50, %52, %cst_70 {dimension_numbers = #tpu.dot_dimension_numbers<[1], [0], [0], [1], [0, 0, 1, 1], [], []>} : vector<256x32xbf16>, vector<32x32xbf16>, vector<256x32xf32> -> vector<256x32xf32>
    %54 = arith.addf %47, %53 : vector<256x32xf32>
    %c2_71 = arith.constant 2 : index
    %c1_72 = arith.constant 1 : index
    %c0_73 = arith.constant 0 : index
    %55 = vector.load %arg7[%c2_71, %c1_72, %c0_73] : memref<18x18x32xf32, #tpu.memory_space<vmem>>, vector<16x16x32xf32>
    %56 = vector.shape_cast %55 : vector<16x16x32xf32> to vector<256x32xf32>
    %57 = arith.truncf %56 : vector<256x32xf32> to vector<256x32xbf16>
    %c0_74 = arith.constant 0 : index
    %c2_75 = arith.constant 2 : index
    %c1_76 = arith.constant 1 : index
    %c0_77 = arith.constant 0 : index
    %c0_78 = arith.constant 0 : index
    %58 = vector.load %arg2[%c0_74, %c2_75, %c1_76, %c0_77, %c0_78] : memref<4x3x3x32x32xbf16, #tpu.memory_space<vmem>>, vector<1x1x1x32x32xbf16>
    %59 = vector.shape_cast %58 : vector<1x1x1x32x32xbf16> to vector<32x32xbf16>
    %cst_79 = arith.constant dense<0.000000e+00> : vector<256x32xf32>
    %60 = tpu.matmul %57, %59, %cst_79 {dimension_numbers = #tpu.dot_dimension_numbers<[1], [0], [0], [1], [0, 0, 1, 1], [], []>} : vector<256x32xbf16>, vector<32x32xbf16>, vector<256x32xf32> -> vector<256x32xf32>
    %61 = arith.addf %54, %60 : vector<256x32xf32>
    %c2_80 = arith.constant 2 : index
    %c2_81 = arith.constant 2 : index
    %c0_82 = arith.constant 0 : index
    %62 = vector.load %arg7[%c2_80, %c2_81, %c0_82] : memref<18x18x32xf32, #tpu.memory_space<vmem>>, vector<16x16x32xf32>
    %63 = vector.shape_cast %62 : vector<16x16x32xf32> to vector<256x32xf32>
    %64 = arith.truncf %63 : vector<256x32xf32> to vector<256x32xbf16>
    %c0_83 = arith.constant 0 : index
    %c2_84 = arith.constant 2 : index
    %c2_85 = arith.constant 2 : index
    %c0_86 = arith.constant 0 : index
    %c0_87 = arith.constant 0 : index
    %65 = vector.load %arg2[%c0_83, %c2_84, %c2_85, %c0_86, %c0_87] : memref<4x3x3x32x32xbf16, #tpu.memory_space<vmem>>, vector<1x1x1x32x32xbf16>
    %66 = vector.shape_cast %65 : vector<1x1x1x32x32xbf16> to vector<32x32xbf16>
    %cst_88 = arith.constant dense<0.000000e+00> : vector<256x32xf32>
    %67 = tpu.matmul %64, %66, %cst_88 {dimension_numbers = #tpu.dot_dimension_numbers<[1], [0], [0], [1], [0, 0, 1, 1], [], []>} : vector<256x32xbf16>, vector<32x32xbf16>, vector<256x32xf32> -> vector<256x32xf32>
    %68 = arith.addf %61, %67 : vector<256x32xf32>
    %c0_89 = arith.constant 0 : index
    %c0_90 = arith.constant 0 : index
    %c0_91 = arith.constant 0 : index
    %69 = vector.load %arg3[%c0_89, %c0_90, %c0_91] : memref<4x1x32xf32, #tpu.memory_space<vmem>>, vector<1x1x32xf32>
    %70 = vector.shape_cast %69 : vector<1x1x32xf32> to vector<1x32xf32>
    %71 = vector.broadcast %70 : vector<1x32xf32> to vector<256x32xf32>
    %72 = arith.addf %68, %71 : vector<256x32xf32>
    %cst_92 = arith.constant dense<0.000000e+00> : vector<32xf32>
    %73 = vector.multi_reduction <add>, %72, %cst_92 [0] : vector<256x32xf32> to vector<32xf32>
    %74 = vector.shape_cast %73 : vector<32xf32> to vector<1x32xf32>
    %cst_93 = arith.constant 3.906250e-03 : f32
    %75 = vector.broadcast %cst_93 : f32 to vector<1x32xf32>
    %76 = arith.mulf %74, %75 : vector<1x32xf32>
    %77 = vector.broadcast %76 : vector<1x32xf32> to vector<256x32xf32>
    %78 = arith.subf %72, %77 : vector<256x32xf32>
    %79 = arith.mulf %78, %78 : vector<256x32xf32>
    %cst_94 = arith.constant dense<0.000000e+00> : vector<32xf32>
    %80 = vector.multi_reduction <add>, %79, %cst_94 [0] : vector<256x32xf32> to vector<32xf32>
    %81 = vector.shape_cast %80 : vector<32xf32> to vector<1x32xf32>
    %cst_95 = arith.constant 3.906250e-03 : f32
    %82 = vector.broadcast %cst_95 : f32 to vector<1x32xf32>
    %83 = arith.mulf %81, %82 : vector<1x32xf32>
    %cst_96 = arith.constant 9.99999974E-6 : f32
    %84 = vector.broadcast %cst_96 : f32 to vector<1x32xf32>
    %85 = arith.addf %83, %84 : vector<1x32xf32>
    %86 = math.rsqrt %85 : vector<1x32xf32>
    %87 = vector.broadcast %86 : vector<1x32xf32> to vector<256x32xf32>
    %88 = arith.mulf %78, %87 : vector<256x32xf32>
    %c0_97 = arith.constant 0 : index
    %c0_98 = arith.constant 0 : index
    %c0_99 = arith.constant 0 : index
    %89 = vector.load %arg4[%c0_97, %c0_98, %c0_99] : memref<4x1x32xf32, #tpu.memory_space<vmem>>, vector<1x1x32xf32>
    %90 = vector.shape_cast %89 : vector<1x1x32xf32> to vector<1x32xf32>
    %91 = vector.broadcast %90 : vector<1x32xf32> to vector<256x32xf32>
    %92 = arith.mulf %88, %91 : vector<256x32xf32>
    %c0_100 = arith.constant 0 : index
    %c0_101 = arith.constant 0 : index
    %c0_102 = arith.constant 0 : index
    %93 = vector.load %arg5[%c0_100, %c0_101, %c0_102] : memref<4x1x32xf32, #tpu.memory_space<vmem>>, vector<1x1x32xf32>
    %94 = vector.shape_cast %93 : vector<1x1x32xf32> to vector<1x32xf32>
    %95 = vector.broadcast %94 : vector<1x32xf32> to vector<256x32xf32>
    %96 = arith.addf %92, %95 : vector<256x32xf32>
    %cst_103 = arith.constant 5.000000e-01 : f32
    %97 = vector.broadcast %cst_103 : f32 to vector<256x32xf32>
    %98 = arith.mulf %97, %96 : vector<256x32xf32>
    %cst_104 = arith.constant 1.41421354 : f32
    %99 = vector.broadcast %cst_104 : f32 to vector<256x32xf32>
    %100 = arith.divf %96, %99 : vector<256x32xf32>
    %101 = math.erf %100 : vector<256x32xf32>
    %cst_105 = arith.constant 1.000000e+00 : f32
    %102 = vector.broadcast %cst_105 : f32 to vector<256x32xf32>
    %103 = arith.addf %102, %101 : vector<256x32xf32>
    %104 = arith.mulf %98, %103 : vector<256x32xf32>
    %105 = vector.shape_cast %104 : vector<256x32xf32> to vector<16x16x32xf32>
    %c1_106 = arith.constant 1 : index
    %c1_107 = arith.constant 1 : index
    %c0_108 = arith.constant 0 : index
    %106 = vector.load %arg7[%c1_106, %c1_107, %c0_108] : memref<18x18x32xf32, #tpu.memory_space<vmem>>, vector<16x16x32xf32>
    tpu.vector_store %arg7[%c1_106, %c1_107, %c0_108], %105 {strides = array<i32>} : memref<18x18x32xf32, #tpu.memory_space<vmem>>, vector<16x16x32xf32>,
    %cst_109 = arith.constant 0.000000e+00 : f32
    %107 = vector.broadcast %cst_109 : f32 to vector<256x32xf32>
    %c0_110 = arith.constant 0 : index
    %c0_111 = arith.constant 0 : index
    %c0_112 = arith.constant 0 : index
    %108 = vector.load %arg7[%c0_110, %c0_111, %c0_112] : memref<18x18x32xf32, #tpu.memory_space<vmem>>, vector<16x16x32xf32>
    %109 = vector.shape_cast %108 : vector<16x16x32xf32> to vector<256x32xf32>
    %110 = arith.truncf %109 : vector<256x32xf32> to vector<256x32xbf16>
    %c1_113 = arith.constant 1 : index
    %c0_114 = arith.constant 0 : index
    %c0_115 = arith.constant 0 : index
    %c0_116 = arith.constant 0 : index
    %c0_117 = arith.constant 0 : index
    %111 = vector.load %arg2[%c1_113, %c0_114, %c0_115, %c0_116, %c0_117] : memref<4x3x3x32x32xbf16, #tpu.memory_space<vmem>>, vector<1x1x1x32x32xbf16>
    %112 = vector.shape_cast %111 : vector<1x1x1x32x32xbf16> to vector<32x32xbf16>
    %cst_118 = arith.constant dense<0.000000e+00> : vector<256x32xf32>
    %113 = tpu.matmul %110, %112, %cst_118 {dimension_numbers = #tpu.dot_dimension_numbers<[1], [0], [0], [1], [0, 0, 1, 1], [], []>} : vector<256x32xbf16>, vector<32x32xbf16>, vector<256x32xf32> -> vector<256x32xf32>
    %114 = arith.addf %107, %113 : vector<256x32xf32>
    %c0_119 = arith.constant 0 : index
    %c1_120 = arith.constant 1 : index
    %c0_121 = arith.constant 0 : index
    %115 = vector.load %arg7[%c0_119, %c1_120, %c0_121] : memref<18x18x32xf32, #tpu.memory_space<vmem>>, vector<16x16x32xf32>
    %116 = vector.shape_cast %115 : vector<16x16x32xf32> to vector<256x32xf32>
    %117 = arith.truncf %116 : vector<256x32xf32> to vector<256x32xbf16>
    %c1_122 = arith.constant 1 : index
    %c0_123 = arith.constant 0 : index
    %c1_124 = arith.constant 1 : index
    %c0_125 = arith.constant 0 : index
    %c0_126 = arith.constant 0 : index
    %118 = vector.load %arg2[%c1_122, %c0_123, %c1_124, %c0_125, %c0_126] : memref<4x3x3x32x32xbf16, #tpu.memory_space<vmem>>, vector<1x1x1x32x32xbf16>
    %119 = vector.shape_cast %118 : vector<1x1x1x32x32xbf16> to vector<32x32xbf16>
    %cst_127 = arith.constant dense<0.000000e+00> : vector<256x32xf32>
    %120 = tpu.matmul %117, %119, %cst_127 {dimension_numbers = #tpu.dot_dimension_numbers<[1], [0], [0], [1], [0, 0, 1, 1], [], []>} : vector<256x32xbf16>, vector<32x32xbf16>, vector<256x32xf32> -> vector<256x32xf32>
    %121 = arith.addf %114, %120 : vector<256x32xf32>
    %c0_128 = arith.constant 0 : index
    %c2_129 = arith.constant 2 : index
    %c0_130 = arith.constant 0 : index
    %122 = vector.load %arg7[%c0_128, %c2_129, %c0_130] : memref<18x18x32xf32, #tpu.memory_space<vmem>>, vector<16x16x32xf32>
    %123 = vector.shape_cast %122 : vector<16x16x32xf32> to vector<256x32xf32>
    %124 = arith.truncf %123 : vector<256x32xf32> to vector<256x32xbf16>
    %c1_131 = arith.constant 1 : index
    %c0_132 = arith.constant 0 : index
    %c2_133 = arith.constant 2 : index
    %c0_134 = arith.constant 0 : index
    %c0_135 = arith.constant 0 : index
    %125 = vector.load %arg2[%c1_131, %c0_132, %c2_133, %c0_134, %c0_135] : memref<4x3x3x32x32xbf16, #tpu.memory_space<vmem>>, vector<1x1x1x32x32xbf16>
    %126 = vector.shape_cast %125 : vector<1x1x1x32x32xbf16> to vector<32x32xbf16>
    %cst_136 = arith.constant dense<0.000000e+00> : vector<256x32xf32>
    %127 = tpu.matmul %124, %126, %cst_136 {dimension_numbers = #tpu.dot_dimension_numbers<[1], [0], [0], [1], [0, 0, 1, 1], [], []>} : vector<256x32xbf16>, vector<32x32xbf16>, vector<256x32xf32> -> vector<256x32xf32>
    %128 = arith.addf %121, %127 : vector<256x32xf32>
    %c1_137 = arith.constant 1 : index
    %c0_138 = arith.constant 0 : index
    %c0_139 = arith.constant 0 : index
    %129 = vector.load %arg7[%c1_137, %c0_138, %c0_139] : memref<18x18x32xf32, #tpu.memory_space<vmem>>, vector<16x16x32xf32>
    %130 = vector.shape_cast %129 : vector<16x16x32xf32> to vector<256x32xf32>
    %131 = arith.truncf %130 : vector<256x32xf32> to vector<256x32xbf16>
    %c1_140 = arith.constant 1 : index
    %c1_141 = arith.constant 1 : index
    %c0_142 = arith.constant 0 : index
    %c0_143 = arith.constant 0 : index
    %c0_144 = arith.constant 0 : index
    %132 = vector.load %arg2[%c1_140, %c1_141, %c0_142, %c0_143, %c0_144] : memref<4x3x3x32x32xbf16, #tpu.memory_space<vmem>>, vector<1x1x1x32x32xbf16>
    %133 = vector.shape_cast %132 : vector<1x1x1x32x32xbf16> to vector<32x32xbf16>
    %cst_145 = arith.constant dense<0.000000e+00> : vector<256x32xf32>
    %134 = tpu.matmul %131, %133, %cst_145 {dimension_numbers = #tpu.dot_dimension_numbers<[1], [0], [0], [1], [0, 0, 1, 1], [], []>} : vector<256x32xbf16>, vector<32x32xbf16>, vector<256x32xf32> -> vector<256x32xf32>
    %135 = arith.addf %128, %134 : vector<256x32xf32>
    %c1_146 = arith.constant 1 : index
    %c1_147 = arith.constant 1 : index
    %c0_148 = arith.constant 0 : index
    %136 = vector.load %arg7[%c1_146, %c1_147, %c0_148] : memref<18x18x32xf32, #tpu.memory_space<vmem>>, vector<16x16x32xf32>
    %137 = vector.shape_cast %136 : vector<16x16x32xf32> to vector<256x32xf32>
    %138 = arith.truncf %137 : vector<256x32xf32> to vector<256x32xbf16>
    %c1_149 = arith.constant 1 : index
    %c1_150 = arith.constant 1 : index
    %c1_151 = arith.constant 1 : index
    %c0_152 = arith.constant 0 : index
    %c0_153 = arith.constant 0 : index
    %139 = vector.load %arg2[%c1_149, %c1_150, %c1_151, %c0_152, %c0_153] : memref<4x3x3x32x32xbf16, #tpu.memory_space<vmem>>, vector<1x1x1x32x32xbf16>
    %140 = vector.shape_cast %139 : vector<1x1x1x32x32xbf16> to vector<32x32xbf16>
    %cst_154 = arith.constant dense<0.000000e+00> : vector<256x32xf32>
    %141 = tpu.matmul %138, %140, %cst_154 {dimension_numbers = #tpu.dot_dimension_numbers<[1], [0], [0], [1], [0, 0, 1, 1], [], []>} : vector<256x32xbf16>, vector<32x32xbf16>, vector<256x32xf32> -> vector<256x32xf32>
    %142 = arith.addf %135, %141 : vector<256x32xf32>
    %c1_155 = arith.constant 1 : index
    %c2_156 = arith.constant 2 : index
    %c0_157 = arith.constant 0 : index
    %143 = vector.load %arg7[%c1_155, %c2_156, %c0_157] : memref<18x18x32xf32, #tpu.memory_space<vmem>>, vector<16x16x32xf32>
    %144 = vector.shape_cast %143 : vector<16x16x32xf32> to vector<256x32xf32>
    %145 = arith.truncf %144 : vector<256x32xf32> to vector<256x32xbf16>
    %c1_158 = arith.constant 1 : index
    %c1_159 = arith.constant 1 : index
    %c2_160 = arith.constant 2 : index
    %c0_161 = arith.constant 0 : index
    %c0_162 = arith.constant 0 : index
    %146 = vector.load %arg2[%c1_158, %c1_159, %c2_160, %c0_161, %c0_162] : memref<4x3x3x32x32xbf16, #tpu.memory_space<vmem>>, vector<1x1x1x32x32xbf16>
    %147 = vector.shape_cast %146 : vector<1x1x1x32x32xbf16> to vector<32x32xbf16>
    %cst_163 = arith.constant dense<0.000000e+00> : vector<256x32xf32>
    %148 = tpu.matmul %145, %147, %cst_163 {dimension_numbers = #tpu.dot_dimension_numbers<[1], [0], [0], [1], [0, 0, 1, 1], [], []>} : vector<256x32xbf16>, vector<32x32xbf16>, vector<256x32xf32> -> vector<256x32xf32>
    %149 = arith.addf %142, %148 : vector<256x32xf32>
    %c2_164 = arith.constant 2 : index
    %c0_165 = arith.constant 0 : index
    %c0_166 = arith.constant 0 : index
    %150 = vector.load %arg7[%c2_164, %c0_165, %c0_166] : memref<18x18x32xf32, #tpu.memory_space<vmem>>, vector<16x16x32xf32>
    %151 = vector.shape_cast %150 : vector<16x16x32xf32> to vector<256x32xf32>
    %152 = arith.truncf %151 : vector<256x32xf32> to vector<256x32xbf16>
    %c1_167 = arith.constant 1 : index
    %c2_168 = arith.constant 2 : index
    %c0_169 = arith.constant 0 : index
    %c0_170 = arith.constant 0 : index
    %c0_171 = arith.constant 0 : index
    %153 = vector.load %arg2[%c1_167, %c2_168, %c0_169, %c0_170, %c0_171] : memref<4x3x3x32x32xbf16, #tpu.memory_space<vmem>>, vector<1x1x1x32x32xbf16>
    %154 = vector.shape_cast %153 : vector<1x1x1x32x32xbf16> to vector<32x32xbf16>
    %cst_172 = arith.constant dense<0.000000e+00> : vector<256x32xf32>
    %155 = tpu.matmul %152, %154, %cst_172 {dimension_numbers = #tpu.dot_dimension_numbers<[1], [0], [0], [1], [0, 0, 1, 1], [], []>} : vector<256x32xbf16>, vector<32x32xbf16>, vector<256x32xf32> -> vector<256x32xf32>
    %156 = arith.addf %149, %155 : vector<256x32xf32>
    %c2_173 = arith.constant 2 : index
    %c1_174 = arith.constant 1 : index
    %c0_175 = arith.constant 0 : index
    %157 = vector.load %arg7[%c2_173, %c1_174, %c0_175] : memref<18x18x32xf32, #tpu.memory_space<vmem>>, vector<16x16x32xf32>
    %158 = vector.shape_cast %157 : vector<16x16x32xf32> to vector<256x32xf32>
    %159 = arith.truncf %158 : vector<256x32xf32> to vector<256x32xbf16>
    %c1_176 = arith.constant 1 : index
    %c2_177 = arith.constant 2 : index
    %c1_178 = arith.constant 1 : index
    %c0_179 = arith.constant 0 : index
    %c0_180 = arith.constant 0 : index
    %160 = vector.load %arg2[%c1_176, %c2_177, %c1_178, %c0_179, %c0_180] : memref<4x3x3x32x32xbf16, #tpu.memory_space<vmem>>, vector<1x1x1x32x32xbf16>
    %161 = vector.shape_cast %160 : vector<1x1x1x32x32xbf16> to vector<32x32xbf16>
    %cst_181 = arith.constant dense<0.000000e+00> : vector<256x32xf32>
    %162 = tpu.matmul %159, %161, %cst_181 {dimension_numbers = #tpu.dot_dimension_numbers<[1], [0], [0], [1], [0, 0, 1, 1], [], []>} : vector<256x32xbf16>, vector<32x32xbf16>, vector<256x32xf32> -> vector<256x32xf32>
    %163 = arith.addf %156, %162 : vector<256x32xf32>
    %c2_182 = arith.constant 2 : index
    %c2_183 = arith.constant 2 : index
    %c0_184 = arith.constant 0 : index
    %164 = vector.load %arg7[%c2_182, %c2_183, %c0_184] : memref<18x18x32xf32, #tpu.memory_space<vmem>>, vector<16x16x32xf32>
    %165 = vector.shape_cast %164 : vector<16x16x32xf32> to vector<256x32xf32>
    %166 = arith.truncf %165 : vector<256x32xf32> to vector<256x32xbf16>
    %c1_185 = arith.constant 1 : index
    %c2_186 = arith.constant 2 : index
    %c2_187 = arith.constant 2 : index
    %c0_188 = arith.constant 0 : index
    %c0_189 = arith.constant 0 : index
    %167 = vector.load %arg2[%c1_185, %c2_186, %c2_187, %c0_188, %c0_189] : memref<4x3x3x32x32xbf16, #tpu.memory_space<vmem>>, vector<1x1x1x32x32xbf16>
    %168 = vector.shape_cast %167 : vector<1x1x1x32x32xbf16> to vector<32x32xbf16>
    %cst_190 = arith.constant dense<0.000000e+00> : vector<256x32xf32>
    %169 = tpu.matmul %166, %168, %cst_190 {dimension_numbers = #tpu.dot_dimension_numbers<[1], [0], [0], [1], [0, 0, 1, 1], [], []>} : vector<256x32xbf16>, vector<32x32xbf16>, vector<256x32xf32> -> vector<256x32xf32>
    %170 = arith.addf %163, %169 : vector<256x32xf32>
    %c1_191 = arith.constant 1 : index
    %c0_192 = arith.constant 0 : index
    %c0_193 = arith.constant 0 : index
    %171 = vector.load %arg3[%c1_191, %c0_192, %c0_193] : memref<4x1x32xf32, #tpu.memory_space<vmem>>, vector<1x1x32xf32>
    %172 = vector.shape_cast %171 : vector<1x1x32xf32> to vector<1x32xf32>
    %173 = vector.broadcast %172 : vector<1x32xf32> to vector<256x32xf32>
    %174 = arith.addf %170, %173 : vector<256x32xf32>
    %cst_194 = arith.constant dense<0.000000e+00> : vector<32xf32>
    %175 = vector.multi_reduction <add>, %174, %cst_194 [0] : vector<256x32xf32> to vector<32xf32>
    %176 = vector.shape_cast %175 : vector<32xf32> to vector<1x32xf32>
    %cst_195 = arith.constant 3.906250e-03 : f32
    %177 = vector.broadcast %cst_195 : f32 to vector<1x32xf32>
    %178 = arith.mulf %176, %177 : vector<1x32xf32>
    %179 = vector.broadcast %178 : vector<1x32xf32> to vector<256x32xf32>
    %180 = arith.subf %174, %179 : vector<256x32xf32>
    %181 = arith.mulf %180, %180 : vector<256x32xf32>
    %cst_196 = arith.constant dense<0.000000e+00> : vector<32xf32>
    %182 = vector.multi_reduction <add>, %181, %cst_196 [0] : vector<256x32xf32> to vector<32xf32>
    %183 = vector.shape_cast %182 : vector<32xf32> to vector<1x32xf32>
    %cst_197 = arith.constant 3.906250e-03 : f32
    %184 = vector.broadcast %cst_197 : f32 to vector<1x32xf32>
    %185 = arith.mulf %183, %184 : vector<1x32xf32>
    %cst_198 = arith.constant 9.99999974E-6 : f32
    %186 = vector.broadcast %cst_198 : f32 to vector<1x32xf32>
    %187 = arith.addf %185, %186 : vector<1x32xf32>
    %188 = math.rsqrt %187 : vector<1x32xf32>
    %189 = vector.broadcast %188 : vector<1x32xf32> to vector<256x32xf32>
    %190 = arith.mulf %180, %189 : vector<256x32xf32>
    %c1_199 = arith.constant 1 : index
    %c0_200 = arith.constant 0 : index
    %c0_201 = arith.constant 0 : index
    %191 = vector.load %arg4[%c1_199, %c0_200, %c0_201] : memref<4x1x32xf32, #tpu.memory_space<vmem>>, vector<1x1x32xf32>
    %192 = vector.shape_cast %191 : vector<1x1x32xf32> to vector<1x32xf32>
    %193 = vector.broadcast %192 : vector<1x32xf32> to vector<256x32xf32>
    %194 = arith.mulf %190, %193 : vector<256x32xf32>
    %c1_202 = arith.constant 1 : index
    %c0_203 = arith.constant 0 : index
    %c0_204 = arith.constant 0 : index
    %195 = vector.load %arg5[%c1_202, %c0_203, %c0_204] : memref<4x1x32xf32, #tpu.memory_space<vmem>>, vector<1x1x32xf32>
    %196 = vector.shape_cast %195 : vector<1x1x32xf32> to vector<1x32xf32>
    %197 = vector.broadcast %196 : vector<1x32xf32> to vector<256x32xf32>
    %198 = arith.addf %194, %197 : vector<256x32xf32>
    %cst_205 = arith.constant 5.000000e-01 : f32
    %199 = vector.broadcast %cst_205 : f32 to vector<256x32xf32>
    %200 = arith.mulf %199, %198 : vector<256x32xf32>
    %cst_206 = arith.constant 1.41421354 : f32
    %201 = vector.broadcast %cst_206 : f32 to vector<256x32xf32>
    %202 = arith.divf %198, %201 : vector<256x32xf32>
    %203 = math.erf %202 : vector<256x32xf32>
    %cst_207 = arith.constant 1.000000e+00 : f32
    %204 = vector.broadcast %cst_207 : f32 to vector<256x32xf32>
    %205 = arith.addf %204, %203 : vector<256x32xf32>
    %206 = arith.mulf %200, %205 : vector<256x32xf32>
    %207 = vector.shape_cast %206 : vector<256x32xf32> to vector<16x16x32xf32>
    %c1_208 = arith.constant 1 : index
    %c1_209 = arith.constant 1 : index
    %c0_210 = arith.constant 0 : index
    %208 = vector.load %arg7[%c1_208, %c1_209, %c0_210] : memref<18x18x32xf32, #tpu.memory_space<vmem>>, vector<16x16x32xf32>
    tpu.vector_store %arg7[%c1_208, %c1_209, %c0_210], %207 {strides = array<i32>} : memref<18x18x32xf32, #tpu.memory_space<vmem>>, vector<16x16x32xf32>,
    %cst_211 = arith.constant 0.000000e+00 : f32
    %209 = vector.broadcast %cst_211 : f32 to vector<256x32xf32>
    %c0_212 = arith.constant 0 : index
    %c0_213 = arith.constant 0 : index
    %c0_214 = arith.constant 0 : index
    %210 = vector.load %arg7[%c0_212, %c0_213, %c0_214] : memref<18x18x32xf32, #tpu.memory_space<vmem>>, vector<16x16x32xf32>
    %211 = vector.shape_cast %210 : vector<16x16x32xf32> to vector<256x32xf32>
    %212 = arith.truncf %211 : vector<256x32xf32> to vector<256x32xbf16>
    %c2_215 = arith.constant 2 : index
    %c0_216 = arith.constant 0 : index
    %c0_217 = arith.constant 0 : index
    %c0_218 = arith.constant 0 : index
    %c0_219 = arith.constant 0 : index
    %213 = vector.load %arg2[%c2_215, %c0_216, %c0_217, %c0_218, %c0_219] : memref<4x3x3x32x32xbf16, #tpu.memory_space<vmem>>, vector<1x1x1x32x32xbf16>
    %214 = vector.shape_cast %213 : vector<1x1x1x32x32xbf16> to vector<32x32xbf16>
    %cst_220 = arith.constant dense<0.000000e+00> : vector<256x32xf32>
    %215 = tpu.matmul %212, %214, %cst_220 {dimension_numbers = #tpu.dot_dimension_numbers<[1], [0], [0], [1], [0, 0, 1, 1], [], []>} : vector<256x32xbf16>, vector<32x32xbf16>, vector<256x32xf32> -> vector<256x32xf32>
    %216 = arith.addf %209, %215 : vector<256x32xf32>
    %c0_221 = arith.constant 0 : index
    %c1_222 = arith.constant 1 : index
    %c0_223 = arith.constant 0 : index
    %217 = vector.load %arg7[%c0_221, %c1_222, %c0_223] : memref<18x18x32xf32, #tpu.memory_space<vmem>>, vector<16x16x32xf32>
    %218 = vector.shape_cast %217 : vector<16x16x32xf32> to vector<256x32xf32>
    %219 = arith.truncf %218 : vector<256x32xf32> to vector<256x32xbf16>
    %c2_224 = arith.constant 2 : index
    %c0_225 = arith.constant 0 : index
    %c1_226 = arith.constant 1 : index
    %c0_227 = arith.constant 0 : index
    %c0_228 = arith.constant 0 : index
    %220 = vector.load %arg2[%c2_224, %c0_225, %c1_226, %c0_227, %c0_228] : memref<4x3x3x32x32xbf16, #tpu.memory_space<vmem>>, vector<1x1x1x32x32xbf16>
    %221 = vector.shape_cast %220 : vector<1x1x1x32x32xbf16> to vector<32x32xbf16>
    %cst_229 = arith.constant dense<0.000000e+00> : vector<256x32xf32>
    %222 = tpu.matmul %219, %221, %cst_229 {dimension_numbers = #tpu.dot_dimension_numbers<[1], [0], [0], [1], [0, 0, 1, 1], [], []>} : vector<256x32xbf16>, vector<32x32xbf16>, vector<256x32xf32> -> vector<256x32xf32>
    %223 = arith.addf %216, %222 : vector<256x32xf32>
    %c0_230 = arith.constant 0 : index
    %c2_231 = arith.constant 2 : index
    %c0_232 = arith.constant 0 : index
    %224 = vector.load %arg7[%c0_230, %c2_231, %c0_232] : memref<18x18x32xf32, #tpu.memory_space<vmem>>, vector<16x16x32xf32>
    %225 = vector.shape_cast %224 : vector<16x16x32xf32> to vector<256x32xf32>
    %226 = arith.truncf %225 : vector<256x32xf32> to vector<256x32xbf16>
    %c2_233 = arith.constant 2 : index
    %c0_234 = arith.constant 0 : index
    %c2_235 = arith.constant 2 : index
    %c0_236 = arith.constant 0 : index
    %c0_237 = arith.constant 0 : index
    %227 = vector.load %arg2[%c2_233, %c0_234, %c2_235, %c0_236, %c0_237] : memref<4x3x3x32x32xbf16, #tpu.memory_space<vmem>>, vector<1x1x1x32x32xbf16>
    %228 = vector.shape_cast %227 : vector<1x1x1x32x32xbf16> to vector<32x32xbf16>
    %cst_238 = arith.constant dense<0.000000e+00> : vector<256x32xf32>
    %229 = tpu.matmul %226, %228, %cst_238 {dimension_numbers = #tpu.dot_dimension_numbers<[1], [0], [0], [1], [0, 0, 1, 1], [], []>} : vector<256x32xbf16>, vector<32x32xbf16>, vector<256x32xf32> -> vector<256x32xf32>
    %230 = arith.addf %223, %229 : vector<256x32xf32>
    %c1_239 = arith.constant 1 : index
    %c0_240 = arith.constant 0 : index
    %c0_241 = arith.constant 0 : index
    %231 = vector.load %arg7[%c1_239, %c0_240, %c0_241] : memref<18x18x32xf32, #tpu.memory_space<vmem>>, vector<16x16x32xf32>
    %232 = vector.shape_cast %231 : vector<16x16x32xf32> to vector<256x32xf32>
    %233 = arith.truncf %232 : vector<256x32xf32> to vector<256x32xbf16>
    %c2_242 = arith.constant 2 : index
    %c1_243 = arith.constant 1 : index
    %c0_244 = arith.constant 0 : index
    %c0_245 = arith.constant 0 : index
    %c0_246 = arith.constant 0 : index
    %234 = vector.load %arg2[%c2_242, %c1_243, %c0_244, %c0_245, %c0_246] : memref<4x3x3x32x32xbf16, #tpu.memory_space<vmem>>, vector<1x1x1x32x32xbf16>
    %235 = vector.shape_cast %234 : vector<1x1x1x32x32xbf16> to vector<32x32xbf16>
    %cst_247 = arith.constant dense<0.000000e+00> : vector<256x32xf32>
    %236 = tpu.matmul %233, %235, %cst_247 {dimension_numbers = #tpu.dot_dimension_numbers<[1], [0], [0], [1], [0, 0, 1, 1], [], []>} : vector<256x32xbf16>, vector<32x32xbf16>, vector<256x32xf32> -> vector<256x32xf32>
    %237 = arith.addf %230, %236 : vector<256x32xf32>
    %c1_248 = arith.constant 1 : index
    %c1_249 = arith.constant 1 : index
    %c0_250 = arith.constant 0 : index
    %238 = vector.load %arg7[%c1_248, %c1_249, %c0_250] : memref<18x18x32xf32, #tpu.memory_space<vmem>>, vector<16x16x32xf32>
    %239 = vector.shape_cast %238 : vector<16x16x32xf32> to vector<256x32xf32>
    %240 = arith.truncf %239 : vector<256x32xf32> to vector<256x32xbf16>
    %c2_251 = arith.constant 2 : index
    %c1_252 = arith.constant 1 : index
    %c1_253 = arith.constant 1 : index
    %c0_254 = arith.constant 0 : index
    %c0_255 = arith.constant 0 : index
    %241 = vector.load %arg2[%c2_251, %c1_252, %c1_253, %c0_254, %c0_255] : memref<4x3x3x32x32xbf16, #tpu.memory_space<vmem>>, vector<1x1x1x32x32xbf16>
    %242 = vector.shape_cast %241 : vector<1x1x1x32x32xbf16> to vector<32x32xbf16>
    %cst_256 = arith.constant dense<0.000000e+00> : vector<256x32xf32>
    %243 = tpu.matmul %240, %242, %cst_256 {dimension_numbers = #tpu.dot_dimension_numbers<[1], [0], [0], [1], [0, 0, 1, 1], [], []>} : vector<256x32xbf16>, vector<32x32xbf16>, vector<256x32xf32> -> vector<256x32xf32>
    %244 = arith.addf %237, %243 : vector<256x32xf32>
    %c1_257 = arith.constant 1 : index
    %c2_258 = arith.constant 2 : index
    %c0_259 = arith.constant 0 : index
    %245 = vector.load %arg7[%c1_257, %c2_258, %c0_259] : memref<18x18x32xf32, #tpu.memory_space<vmem>>, vector<16x16x32xf32>
    %246 = vector.shape_cast %245 : vector<16x16x32xf32> to vector<256x32xf32>
    %247 = arith.truncf %246 : vector<256x32xf32> to vector<256x32xbf16>
    %c2_260 = arith.constant 2 : index
    %c1_261 = arith.constant 1 : index
    %c2_262 = arith.constant 2 : index
    %c0_263 = arith.constant 0 : index
    %c0_264 = arith.constant 0 : index
    %248 = vector.load %arg2[%c2_260, %c1_261, %c2_262, %c0_263, %c0_264] : memref<4x3x3x32x32xbf16, #tpu.memory_space<vmem>>, vector<1x1x1x32x32xbf16>
    %249 = vector.shape_cast %248 : vector<1x1x1x32x32xbf16> to vector<32x32xbf16>
    %cst_265 = arith.constant dense<0.000000e+00> : vector<256x32xf32>
    %250 = tpu.matmul %247, %249, %cst_265 {dimension_numbers = #tpu.dot_dimension_numbers<[1], [0], [0], [1], [0, 0, 1, 1], [], []>} : vector<256x32xbf16>, vector<32x32xbf16>, vector<256x32xf32> -> vector<256x32xf32>
    %251 = arith.addf %244, %250 : vector<256x32xf32>
    %c2_266 = arith.constant 2 : index
    %c0_267 = arith.constant 0 : index
    %c0_268 = arith.constant 0 : index
    %252 = vector.load %arg7[%c2_266, %c0_267, %c0_268] : memref<18x18x32xf32, #tpu.memory_space<vmem>>, vector<16x16x32xf32>
    %253 = vector.shape_cast %252 : vector<16x16x32xf32> to vector<256x32xf32>
    %254 = arith.truncf %253 : vector<256x32xf32> to vector<256x32xbf16>
    %c2_269 = arith.constant 2 : index
    %c2_270 = arith.constant 2 : index
    %c0_271 = arith.constant 0 : index
    %c0_272 = arith.constant 0 : index
    %c0_273 = arith.constant 0 : index
    %255 = vector.load %arg2[%c2_269, %c2_270, %c0_271, %c0_272, %c0_273] : memref<4x3x3x32x32xbf16, #tpu.memory_space<vmem>>, vector<1x1x1x32x32xbf16>
    %256 = vector.shape_cast %255 : vector<1x1x1x32x32xbf16> to vector<32x32xbf16>
    %cst_274 = arith.constant dense<0.000000e+00> : vector<256x32xf32>
    %257 = tpu.matmul %254, %256, %cst_274 {dimension_numbers = #tpu.dot_dimension_numbers<[1], [0], [0], [1], [0, 0, 1, 1], [], []>} : vector<256x32xbf16>, vector<32x32xbf16>, vector<256x32xf32> -> vector<256x32xf32>
    %258 = arith.addf %251, %257 : vector<256x32xf32>
    %c2_275 = arith.constant 2 : index
    %c1_276 = arith.constant 1 : index
    %c0_277 = arith.constant 0 : index
    %259 = vector.load %arg7[%c2_275, %c1_276, %c0_277] : memref<18x18x32xf32, #tpu.memory_space<vmem>>, vector<16x16x32xf32>
    %260 = vector.shape_cast %259 : vector<16x16x32xf32> to vector<256x32xf32>
    %261 = arith.truncf %260 : vector<256x32xf32> to vector<256x32xbf16>
    %c2_278 = arith.constant 2 : index
    %c2_279 = arith.constant 2 : index
    %c1_280 = arith.constant 1 : index
    %c0_281 = arith.constant 0 : index
    %c0_282 = arith.constant 0 : index
    %262 = vector.load %arg2[%c2_278, %c2_279, %c1_280, %c0_281, %c0_282] : memref<4x3x3x32x32xbf16, #tpu.memory_space<vmem>>, vector<1x1x1x32x32xbf16>
    %263 = vector.shape_cast %262 : vector<1x1x1x32x32xbf16> to vector<32x32xbf16>
    %cst_283 = arith.constant dense<0.000000e+00> : vector<256x32xf32>
    %264 = tpu.matmul %261, %263, %cst_283 {dimension_numbers = #tpu.dot_dimension_numbers<[1], [0], [0], [1], [0, 0, 1, 1], [], []>} : vector<256x32xbf16>, vector<32x32xbf16>, vector<256x32xf32> -> vector<256x32xf32>
    %265 = arith.addf %258, %264 : vector<256x32xf32>
    %c2_284 = arith.constant 2 : index
    %c2_285 = arith.constant 2 : index
    %c0_286 = arith.constant 0 : index
    %266 = vector.load %arg7[%c2_284, %c2_285, %c0_286] : memref<18x18x32xf32, #tpu.memory_space<vmem>>, vector<16x16x32xf32>
    %267 = vector.shape_cast %266 : vector<16x16x32xf32> to vector<256x32xf32>
    %268 = arith.truncf %267 : vector<256x32xf32> to vector<256x32xbf16>
    %c2_287 = arith.constant 2 : index
    %c2_288 = arith.constant 2 : index
    %c2_289 = arith.constant 2 : index
    %c0_290 = arith.constant 0 : index
    %c0_291 = arith.constant 0 : index
    %269 = vector.load %arg2[%c2_287, %c2_288, %c2_289, %c0_290, %c0_291] : memref<4x3x3x32x32xbf16, #tpu.memory_space<vmem>>, vector<1x1x1x32x32xbf16>
    %270 = vector.shape_cast %269 : vector<1x1x1x32x32xbf16> to vector<32x32xbf16>
    %cst_292 = arith.constant dense<0.000000e+00> : vector<256x32xf32>
    %271 = tpu.matmul %268, %270, %cst_292 {dimension_numbers = #tpu.dot_dimension_numbers<[1], [0], [0], [1], [0, 0, 1, 1], [], []>} : vector<256x32xbf16>, vector<32x32xbf16>, vector<256x32xf32> -> vector<256x32xf32>
    %272 = arith.addf %265, %271 : vector<256x32xf32>
    %c2_293 = arith.constant 2 : index
    %c0_294 = arith.constant 0 : index
    %c0_295 = arith.constant 0 : index
    %273 = vector.load %arg3[%c2_293, %c0_294, %c0_295] : memref<4x1x32xf32, #tpu.memory_space<vmem>>, vector<1x1x32xf32>
    %274 = vector.shape_cast %273 : vector<1x1x32xf32> to vector<1x32xf32>
    %275 = vector.broadcast %274 : vector<1x32xf32> to vector<256x32xf32>
    %276 = arith.addf %272, %275 : vector<256x32xf32>
    %cst_296 = arith.constant dense<0.000000e+00> : vector<32xf32>
    %277 = vector.multi_reduction <add>, %276, %cst_296 [0] : vector<256x32xf32> to vector<32xf32>
    %278 = vector.shape_cast %277 : vector<32xf32> to vector<1x32xf32>
    %cst_297 = arith.constant 3.906250e-03 : f32
    %279 = vector.broadcast %cst_297 : f32 to vector<1x32xf32>
    %280 = arith.mulf %278, %279 : vector<1x32xf32>
    %281 = vector.broadcast %280 : vector<1x32xf32> to vector<256x32xf32>
    %282 = arith.subf %276, %281 : vector<256x32xf32>
    %283 = arith.mulf %282, %282 : vector<256x32xf32>
    %cst_298 = arith.constant dense<0.000000e+00> : vector<32xf32>
    %284 = vector.multi_reduction <add>, %283, %cst_298 [0] : vector<256x32xf32> to vector<32xf32>
    %285 = vector.shape_cast %284 : vector<32xf32> to vector<1x32xf32>
    %cst_299 = arith.constant 3.906250e-03 : f32
    %286 = vector.broadcast %cst_299 : f32 to vector<1x32xf32>
    %287 = arith.mulf %285, %286 : vector<1x32xf32>
    %cst_300 = arith.constant 9.99999974E-6 : f32
    %288 = vector.broadcast %cst_300 : f32 to vector<1x32xf32>
    %289 = arith.addf %287, %288 : vector<1x32xf32>
    %290 = math.rsqrt %289 : vector<1x32xf32>
    %291 = vector.broadcast %290 : vector<1x32xf32> to vector<256x32xf32>
    %292 = arith.mulf %282, %291 : vector<256x32xf32>
    %c2_301 = arith.constant 2 : index
    %c0_302 = arith.constant 0 : index
    %c0_303 = arith.constant 0 : index
    %293 = vector.load %arg4[%c2_301, %c0_302, %c0_303] : memref<4x1x32xf32, #tpu.memory_space<vmem>>, vector<1x1x32xf32>
    %294 = vector.shape_cast %293 : vector<1x1x32xf32> to vector<1x32xf32>
    %295 = vector.broadcast %294 : vector<1x32xf32> to vector<256x32xf32>
    %296 = arith.mulf %292, %295 : vector<256x32xf32>
    %c2_304 = arith.constant 2 : index
    %c0_305 = arith.constant 0 : index
    %c0_306 = arith.constant 0 : index
    %297 = vector.load %arg5[%c2_304, %c0_305, %c0_306] : memref<4x1x32xf32, #tpu.memory_space<vmem>>, vector<1x1x32xf32>
    %298 = vector.shape_cast %297 : vector<1x1x32xf32> to vector<1x32xf32>
    %299 = vector.broadcast %298 : vector<1x32xf32> to vector<256x32xf32>
    %300 = arith.addf %296, %299 : vector<256x32xf32>
    %cst_307 = arith.constant 5.000000e-01 : f32
    %301 = vector.broadcast %cst_307 : f32 to vector<256x32xf32>
    %302 = arith.mulf %301, %300 : vector<256x32xf32>
    %cst_308 = arith.constant 1.41421354 : f32
    %303 = vector.broadcast %cst_308 : f32 to vector<256x32xf32>
    %304 = arith.divf %300, %303 : vector<256x32xf32>
    %305 = math.erf %304 : vector<256x32xf32>
    %cst_309 = arith.constant 1.000000e+00 : f32
    %306 = vector.broadcast %cst_309 : f32 to vector<256x32xf32>
    %307 = arith.addf %306, %305 : vector<256x32xf32>
    %308 = arith.mulf %302, %307 : vector<256x32xf32>
    %309 = vector.shape_cast %308 : vector<256x32xf32> to vector<16x16x32xf32>
    %c1_310 = arith.constant 1 : index
    %c1_311 = arith.constant 1 : index
    %c0_312 = arith.constant 0 : index
    %310 = vector.load %arg7[%c1_310, %c1_311, %c0_312] : memref<18x18x32xf32, #tpu.memory_space<vmem>>, vector<16x16x32xf32>
    tpu.vector_store %arg7[%c1_310, %c1_311, %c0_312], %309 {strides = array<i32>} : memref<18x18x32xf32, #tpu.memory_space<vmem>>, vector<16x16x32xf32>,
    %cst_313 = arith.constant 0.000000e+00 : f32
    %311 = vector.broadcast %cst_313 : f32 to vector<256x32xf32>
    %c0_314 = arith.constant 0 : index
    %c0_315 = arith.constant 0 : index
    %c0_316 = arith.constant 0 : index
    %312 = vector.load %arg7[%c0_314, %c0_315, %c0_316] : memref<18x18x32xf32, #tpu.memory_space<vmem>>, vector<16x16x32xf32>
    %313 = vector.shape_cast %312 : vector<16x16x32xf32> to vector<256x32xf32>
    %314 = arith.truncf %313 : vector<256x32xf32> to vector<256x32xbf16>
    %c3 = arith.constant 3 : index
    %c0_317 = arith.constant 0 : index
    %c0_318 = arith.constant 0 : index
    %c0_319 = arith.constant 0 : index
    %c0_320 = arith.constant 0 : index
    %315 = vector.load %arg2[%c3, %c0_317, %c0_318, %c0_319, %c0_320] : memref<4x3x3x32x32xbf16, #tpu.memory_space<vmem>>, vector<1x1x1x32x32xbf16>
    %316 = vector.shape_cast %315 : vector<1x1x1x32x32xbf16> to vector<32x32xbf16>
    %cst_321 = arith.constant dense<0.000000e+00> : vector<256x32xf32>
    %317 = tpu.matmul %314, %316, %cst_321 {dimension_numbers = #tpu.dot_dimension_numbers<[1], [0], [0], [1], [0, 0, 1, 1], [], []>} : vector<256x32xbf16>, vector<32x32xbf16>, vector<256x32xf32> -> vector<256x32xf32>
    %318 = arith.addf %311, %317 : vector<256x32xf32>
    %c0_322 = arith.constant 0 : index
    %c1_323 = arith.constant 1 : index
    %c0_324 = arith.constant 0 : index
    %319 = vector.load %arg7[%c0_322, %c1_323, %c0_324] : memref<18x18x32xf32, #tpu.memory_space<vmem>>, vector<16x16x32xf32>
    %320 = vector.shape_cast %319 : vector<16x16x32xf32> to vector<256x32xf32>
    %321 = arith.truncf %320 : vector<256x32xf32> to vector<256x32xbf16>
    %c3_325 = arith.constant 3 : index
    %c0_326 = arith.constant 0 : index
    %c1_327 = arith.constant 1 : index
    %c0_328 = arith.constant 0 : index
    %c0_329 = arith.constant 0 : index
    %322 = vector.load %arg2[%c3_325, %c0_326, %c1_327, %c0_328, %c0_329] : memref<4x3x3x32x32xbf16, #tpu.memory_space<vmem>>, vector<1x1x1x32x32xbf16>
    %323 = vector.shape_cast %322 : vector<1x1x1x32x32xbf16> to vector<32x32xbf16>
    %cst_330 = arith.constant dense<0.000000e+00> : vector<256x32xf32>
    %324 = tpu.matmul %321, %323, %cst_330 {dimension_numbers = #tpu.dot_dimension_numbers<[1], [0], [0], [1], [0, 0, 1, 1], [], []>} : vector<256x32xbf16>, vector<32x32xbf16>, vector<256x32xf32> -> vector<256x32xf32>
    %325 = arith.addf %318, %324 : vector<256x32xf32>
    %c0_331 = arith.constant 0 : index
    %c2_332 = arith.constant 2 : index
    %c0_333 = arith.constant 0 : index
    %326 = vector.load %arg7[%c0_331, %c2_332, %c0_333] : memref<18x18x32xf32, #tpu.memory_space<vmem>>, vector<16x16x32xf32>
    %327 = vector.shape_cast %326 : vector<16x16x32xf32> to vector<256x32xf32>
    %328 = arith.truncf %327 : vector<256x32xf32> to vector<256x32xbf16>
    %c3_334 = arith.constant 3 : index
    %c0_335 = arith.constant 0 : index
    %c2_336 = arith.constant 2 : index
    %c0_337 = arith.constant 0 : index
    %c0_338 = arith.constant 0 : index
    %329 = vector.load %arg2[%c3_334, %c0_335, %c2_336, %c0_337, %c0_338] : memref<4x3x3x32x32xbf16, #tpu.memory_space<vmem>>, vector<1x1x1x32x32xbf16>
    %330 = vector.shape_cast %329 : vector<1x1x1x32x32xbf16> to vector<32x32xbf16>
    %cst_339 = arith.constant dense<0.000000e+00> : vector<256x32xf32>
    %331 = tpu.matmul %328, %330, %cst_339 {dimension_numbers = #tpu.dot_dimension_numbers<[1], [0], [0], [1], [0, 0, 1, 1], [], []>} : vector<256x32xbf16>, vector<32x32xbf16>, vector<256x32xf32> -> vector<256x32xf32>
    %332 = arith.addf %325, %331 : vector<256x32xf32>
    %c1_340 = arith.constant 1 : index
    %c0_341 = arith.constant 0 : index
    %c0_342 = arith.constant 0 : index
    %333 = vector.load %arg7[%c1_340, %c0_341, %c0_342] : memref<18x18x32xf32, #tpu.memory_space<vmem>>, vector<16x16x32xf32>
    %334 = vector.shape_cast %333 : vector<16x16x32xf32> to vector<256x32xf32>
    %335 = arith.truncf %334 : vector<256x32xf32> to vector<256x32xbf16>
    %c3_343 = arith.constant 3 : index
    %c1_344 = arith.constant 1 : index
    %c0_345 = arith.constant 0 : index
    %c0_346 = arith.constant 0 : index
    %c0_347 = arith.constant 0 : index
    %336 = vector.load %arg2[%c3_343, %c1_344, %c0_345, %c0_346, %c0_347] : memref<4x3x3x32x32xbf16, #tpu.memory_space<vmem>>, vector<1x1x1x32x32xbf16>
    %337 = vector.shape_cast %336 : vector<1x1x1x32x32xbf16> to vector<32x32xbf16>
    %cst_348 = arith.constant dense<0.000000e+00> : vector<256x32xf32>
    %338 = tpu.matmul %335, %337, %cst_348 {dimension_numbers = #tpu.dot_dimension_numbers<[1], [0], [0], [1], [0, 0, 1, 1], [], []>} : vector<256x32xbf16>, vector<32x32xbf16>, vector<256x32xf32> -> vector<256x32xf32>
    %339 = arith.addf %332, %338 : vector<256x32xf32>
    %c1_349 = arith.constant 1 : index
    %c1_350 = arith.constant 1 : index
    %c0_351 = arith.constant 0 : index
    %340 = vector.load %arg7[%c1_349, %c1_350, %c0_351] : memref<18x18x32xf32, #tpu.memory_space<vmem>>, vector<16x16x32xf32>
    %341 = vector.shape_cast %340 : vector<16x16x32xf32> to vector<256x32xf32>
    %342 = arith.truncf %341 : vector<256x32xf32> to vector<256x32xbf16>
    %c3_352 = arith.constant 3 : index
    %c1_353 = arith.constant 1 : index
    %c1_354 = arith.constant 1 : index
    %c0_355 = arith.constant 0 : index
    %c0_356 = arith.constant 0 : index
    %343 = vector.load %arg2[%c3_352, %c1_353, %c1_354, %c0_355, %c0_356] : memref<4x3x3x32x32xbf16, #tpu.memory_space<vmem>>, vector<1x1x1x32x32xbf16>
    %344 = vector.shape_cast %343 : vector<1x1x1x32x32xbf16> to vector<32x32xbf16>
    %cst_357 = arith.constant dense<0.000000e+00> : vector<256x32xf32>
    %345 = tpu.matmul %342, %344, %cst_357 {dimension_numbers = #tpu.dot_dimension_numbers<[1], [0], [0], [1], [0, 0, 1, 1], [], []>} : vector<256x32xbf16>, vector<32x32xbf16>, vector<256x32xf32> -> vector<256x32xf32>
    %346 = arith.addf %339, %345 : vector<256x32xf32>
    %c1_358 = arith.constant 1 : index
    %c2_359 = arith.constant 2 : index
    %c0_360 = arith.constant 0 : index
    %347 = vector.load %arg7[%c1_358, %c2_359, %c0_360] : memref<18x18x32xf32, #tpu.memory_space<vmem>>, vector<16x16x32xf32>
    %348 = vector.shape_cast %347 : vector<16x16x32xf32> to vector<256x32xf32>
    %349 = arith.truncf %348 : vector<256x32xf32> to vector<256x32xbf16>
    %c3_361 = arith.constant 3 : index
    %c1_362 = arith.constant 1 : index
    %c2_363 = arith.constant 2 : index
    %c0_364 = arith.constant 0 : index
    %c0_365 = arith.constant 0 : index
    %350 = vector.load %arg2[%c3_361, %c1_362, %c2_363, %c0_364, %c0_365] : memref<4x3x3x32x32xbf16, #tpu.memory_space<vmem>>, vector<1x1x1x32x32xbf16>
    %351 = vector.shape_cast %350 : vector<1x1x1x32x32xbf16> to vector<32x32xbf16>
    %cst_366 = arith.constant dense<0.000000e+00> : vector<256x32xf32>
    %352 = tpu.matmul %349, %351, %cst_366 {dimension_numbers = #tpu.dot_dimension_numbers<[1], [0], [0], [1], [0, 0, 1, 1], [], []>} : vector<256x32xbf16>, vector<32x32xbf16>, vector<256x32xf32> -> vector<256x32xf32>
    %353 = arith.addf %346, %352 : vector<256x32xf32>
    %c2_367 = arith.constant 2 : index
    %c0_368 = arith.constant 0 : index
    %c0_369 = arith.constant 0 : index
    %354 = vector.load %arg7[%c2_367, %c0_368, %c0_369] : memref<18x18x32xf32, #tpu.memory_space<vmem>>, vector<16x16x32xf32>
    %355 = vector.shape_cast %354 : vector<16x16x32xf32> to vector<256x32xf32>
    %356 = arith.truncf %355 : vector<256x32xf32> to vector<256x32xbf16>
    %c3_370 = arith.constant 3 : index
    %c2_371 = arith.constant 2 : index
    %c0_372 = arith.constant 0 : index
    %c0_373 = arith.constant 0 : index
    %c0_374 = arith.constant 0 : index
    %357 = vector.load %arg2[%c3_370, %c2_371, %c0_372, %c0_373, %c0_374] : memref<4x3x3x32x32xbf16, #tpu.memory_space<vmem>>, vector<1x1x1x32x32xbf16>
    %358 = vector.shape_cast %357 : vector<1x1x1x32x32xbf16> to vector<32x32xbf16>
    %cst_375 = arith.constant dense<0.000000e+00> : vector<256x32xf32>
    %359 = tpu.matmul %356, %358, %cst_375 {dimension_numbers = #tpu.dot_dimension_numbers<[1], [0], [0], [1], [0, 0, 1, 1], [], []>} : vector<256x32xbf16>, vector<32x32xbf16>, vector<256x32xf32> -> vector<256x32xf32>
    %360 = arith.addf %353, %359 : vector<256x32xf32>
    %c2_376 = arith.constant 2 : index
    %c1_377 = arith.constant 1 : index
    %c0_378 = arith.constant 0 : index
    %361 = vector.load %arg7[%c2_376, %c1_377, %c0_378] : memref<18x18x32xf32, #tpu.memory_space<vmem>>, vector<16x16x32xf32>
    %362 = vector.shape_cast %361 : vector<16x16x32xf32> to vector<256x32xf32>
    %363 = arith.truncf %362 : vector<256x32xf32> to vector<256x32xbf16>
    %c3_379 = arith.constant 3 : index
    %c2_380 = arith.constant 2 : index
    %c1_381 = arith.constant 1 : index
    %c0_382 = arith.constant 0 : index
    %c0_383 = arith.constant 0 : index
    %364 = vector.load %arg2[%c3_379, %c2_380, %c1_381, %c0_382, %c0_383] : memref<4x3x3x32x32xbf16, #tpu.memory_space<vmem>>, vector<1x1x1x32x32xbf16>
    %365 = vector.shape_cast %364 : vector<1x1x1x32x32xbf16> to vector<32x32xbf16>
    %cst_384 = arith.constant dense<0.000000e+00> : vector<256x32xf32>
    %366 = tpu.matmul %363, %365, %cst_384 {dimension_numbers = #tpu.dot_dimension_numbers<[1], [0], [0], [1], [0, 0, 1, 1], [], []>} : vector<256x32xbf16>, vector<32x32xbf16>, vector<256x32xf32> -> vector<256x32xf32>
    %367 = arith.addf %360, %366 : vector<256x32xf32>
    %c2_385 = arith.constant 2 : index
    %c2_386 = arith.constant 2 : index
    %c0_387 = arith.constant 0 : index
    %368 = vector.load %arg7[%c2_385, %c2_386, %c0_387] : memref<18x18x32xf32, #tpu.memory_space<vmem>>, vector<16x16x32xf32>
    %369 = vector.shape_cast %368 : vector<16x16x32xf32> to vector<256x32xf32>
    %370 = arith.truncf %369 : vector<256x32xf32> to vector<256x32xbf16>
    %c3_388 = arith.constant 3 : index
    %c2_389 = arith.constant 2 : index
    %c2_390 = arith.constant 2 : index
    %c0_391 = arith.constant 0 : index
    %c0_392 = arith.constant 0 : index
    %371 = vector.load %arg2[%c3_388, %c2_389, %c2_390, %c0_391, %c0_392] : memref<4x3x3x32x32xbf16, #tpu.memory_space<vmem>>, vector<1x1x1x32x32xbf16>
    %372 = vector.shape_cast %371 : vector<1x1x1x32x32xbf16> to vector<32x32xbf16>
    %cst_393 = arith.constant dense<0.000000e+00> : vector<256x32xf32>
    %373 = tpu.matmul %370, %372, %cst_393 {dimension_numbers = #tpu.dot_dimension_numbers<[1], [0], [0], [1], [0, 0, 1, 1], [], []>} : vector<256x32xbf16>, vector<32x32xbf16>, vector<256x32xf32> -> vector<256x32xf32>
    %374 = arith.addf %367, %373 : vector<256x32xf32>
    %c3_394 = arith.constant 3 : index
    %c0_395 = arith.constant 0 : index
    %c0_396 = arith.constant 0 : index
    %375 = vector.load %arg3[%c3_394, %c0_395, %c0_396] : memref<4x1x32xf32, #tpu.memory_space<vmem>>, vector<1x1x32xf32>
    %376 = vector.shape_cast %375 : vector<1x1x32xf32> to vector<1x32xf32>
    %377 = vector.broadcast %376 : vector<1x32xf32> to vector<256x32xf32>
    %378 = arith.addf %374, %377 : vector<256x32xf32>
    %cst_397 = arith.constant dense<0.000000e+00> : vector<32xf32>
    %379 = vector.multi_reduction <add>, %378, %cst_397 [0] : vector<256x32xf32> to vector<32xf32>
    %380 = vector.shape_cast %379 : vector<32xf32> to vector<1x32xf32>
    %cst_398 = arith.constant 3.906250e-03 : f32
    %381 = vector.broadcast %cst_398 : f32 to vector<1x32xf32>
    %382 = arith.mulf %380, %381 : vector<1x32xf32>
    %383 = vector.broadcast %382 : vector<1x32xf32> to vector<256x32xf32>
    %384 = arith.subf %378, %383 : vector<256x32xf32>
    %385 = arith.mulf %384, %384 : vector<256x32xf32>
    %cst_399 = arith.constant dense<0.000000e+00> : vector<32xf32>
    %386 = vector.multi_reduction <add>, %385, %cst_399 [0] : vector<256x32xf32> to vector<32xf32>
    %387 = vector.shape_cast %386 : vector<32xf32> to vector<1x32xf32>
    %cst_400 = arith.constant 3.906250e-03 : f32
    %388 = vector.broadcast %cst_400 : f32 to vector<1x32xf32>
    %389 = arith.mulf %387, %388 : vector<1x32xf32>
    %cst_401 = arith.constant 9.99999974E-6 : f32
    %390 = vector.broadcast %cst_401 : f32 to vector<1x32xf32>
    %391 = arith.addf %389, %390 : vector<1x32xf32>
    %392 = math.rsqrt %391 : vector<1x32xf32>
    %393 = vector.broadcast %392 : vector<1x32xf32> to vector<256x32xf32>
    %394 = arith.mulf %384, %393 : vector<256x32xf32>
    %c3_402 = arith.constant 3 : index
    %c0_403 = arith.constant 0 : index
    %c0_404 = arith.constant 0 : index
    %395 = vector.load %arg4[%c3_402, %c0_403, %c0_404] : memref<4x1x32xf32, #tpu.memory_space<vmem>>, vector<1x1x32xf32>
    %396 = vector.shape_cast %395 : vector<1x1x32xf32> to vector<1x32xf32>
    %397 = vector.broadcast %396 : vector<1x32xf32> to vector<256x32xf32>
    %398 = arith.mulf %394, %397 : vector<256x32xf32>
    %c3_405 = arith.constant 3 : index
    %c0_406 = arith.constant 0 : index
    %c0_407 = arith.constant 0 : index
    %399 = vector.load %arg5[%c3_405, %c0_406, %c0_407] : memref<4x1x32xf32, #tpu.memory_space<vmem>>, vector<1x1x32xf32>
    %400 = vector.shape_cast %399 : vector<1x1x32xf32> to vector<1x32xf32>
    %401 = vector.broadcast %400 : vector<1x32xf32> to vector<256x32xf32>
    %402 = arith.addf %398, %401 : vector<256x32xf32>
    %cst_408 = arith.constant 5.000000e-01 : f32
    %403 = vector.broadcast %cst_408 : f32 to vector<256x32xf32>
    %404 = arith.mulf %403, %402 : vector<256x32xf32>
    %cst_409 = arith.constant 1.41421354 : f32
    %405 = vector.broadcast %cst_409 : f32 to vector<256x32xf32>
    %406 = arith.divf %402, %405 : vector<256x32xf32>
    %407 = math.erf %406 : vector<256x32xf32>
    %cst_410 = arith.constant 1.000000e+00 : f32
    %408 = vector.broadcast %cst_410 : f32 to vector<256x32xf32>
    %409 = arith.addf %408, %407 : vector<256x32xf32>
    %410 = arith.mulf %404, %409 : vector<256x32xf32>
    %c0_411 = arith.constant 0 : index
    %c0_412 = arith.constant 0 : index
    %c0_413 = arith.constant 0 : index
    %411 = vector.load %arg6[%c0_411, %c0_412, %c0_413] : memref<1x256x32xf32, #tpu.memory_space<vmem>>, vector<1x256x32xf32>
    %412 = vector.shape_cast %411 : vector<1x256x32xf32> to vector<256x32xf32>
    %413 = vector.shape_cast %410 : vector<256x32xf32> to vector<1x256x32xf32>
    tpu.vector_store %arg6[%c0_411, %c0_412, %c0_413], %413 {strides = array<i32>} : memref<1x256x32xf32, #tpu.memory_space<vmem>>, vector<1x256x32xf32>,
    return
  }
  func.func @transform_0(%arg0: i32) -> (i32, i32, i32, i32) {
    %c0_i32 = arith.constant 0 : i32
    %c0_i32_0 = arith.constant 0 : i32
    %c0_i32_1 = arith.constant 0 : i32
    %c0_i32_2 = arith.constant 0 : i32
    return %arg0, %c0_i32, %c0_i32_0, %c0_i32_1 : i32, i32, i32, i32
  }
  func.func @transform_1(%arg0: i32) -> (i32, i32, i32, i32, i32) {
    %c0_i32 = arith.constant 0 : i32
    %c0_i32_0 = arith.constant 0 : i32
    %c0_i32_1 = arith.constant 0 : i32
    %c0_i32_2 = arith.constant 0 : i32
    %c0_i32_3 = arith.constant 0 : i32
    %c0_i32_4 = arith.constant 0 : i32
    return %c0_i32, %c0_i32_0, %c0_i32_1, %c0_i32_2, %c0_i32_3 : i32, i32, i32, i32, i32
  }
  func.func @transform_2(%arg0: i32) -> (i32, i32, i32) {
    %c0_i32 = arith.constant 0 : i32
    %c0_i32_0 = arith.constant 0 : i32
    %c0_i32_1 = arith.constant 0 : i32
    %c0_i32_2 = arith.constant 0 : i32
    return %c0_i32, %c0_i32_0, %c0_i32_1 : i32, i32, i32
  }
  func.func @transform_3(%arg0: i32) -> (i32, i32, i32) {
    %c0_i32 = arith.constant 0 : i32
    %c0_i32_0 = arith.constant 0 : i32
    %c0_i32_1 = arith.constant 0 : i32
    %c0_i32_2 = arith.constant 0 : i32
    return %c0_i32, %c0_i32_0, %c0_i32_1 : i32, i32, i32
  }
  func.func @transform_4(%arg0: i32) -> (i32, i32, i32) {
    %c0_i32 = arith.constant 0 : i32
    %c0_i32_0 = arith.constant 0 : i32
    %c0_i32_1 = arith.constant 0 : i32
    %c0_i32_2 = arith.constant 0 : i32
    return %c0_i32, %c0_i32_0, %c0_i32_1 : i32, i32, i32
  }
  func.func @transform_5(%arg0: i32) -> (i32, i32, i32) {
    %c0_i32 = arith.constant 0 : i32
    %c0_i32_0 = arith.constant 0 : i32
    %c0_i32_1 = arith.constant 0 : i32
    return %arg0, %c0_i32, %c0_i32_0 : i32, i32, i32
  }
}

</mosaic_0001>

<bundles_post_ra>
// kernel: tile.8
= control target key start
LH: loop header
LB: loop body
LE: loop exit
PB: predicated region body
PF: predicated region fallthrough
CT: control target
= control target key end

     0   :  { %s22_s0 = inlined_call_operand.vmem [shape: f32[32], index: 0, kind: input, shape index: {}]   ;;  %s23_s1 = inlined_call_operand.vmem [shape: f32[2,32], index: 1, kind: output, shape index: {}]  }
   0x1   :  { %v4_v0 = vld [vmem:[%s22_s0] ss:$0 sm:$0xff] }
   0x2   :  { %5 = vst [vmem:[%s23_s1] sm:$0x3] %v4_v0 }

// kernel: tile.9
= control target key start
LH: loop header
LB: loop body
LE: loop exit
PB: predicated region body
PF: predicated region fallthrough
CT: control target
= control target key end

     0   :  { %vm7_vm0 = vcmask 261120   ;;  %vm13_vm1 = vcmask 523520   ;;  %s39_s0 = inlined_call_operand.vmem [shape: f32[2,32], index: 0, kind: input, shape index: {}]   ;;  %s40_s1 = inlined_call_operand.vmem [shape: f32[1,64], index: 1, kind: output, shape index: {}]  }
   0x1   :  { %v4_v0 = vld [vmem:[%s39_s0] sm:$0x3]  ;;  %s22_s0 = smov 32  }
   0x2   :  { %5 = vst [vmem:[#allocation1] sm:$0x3] %v4_v0 }
   0x9   :  { %v10_v1 = vld [vmem:[#allocation1 + $0x1] sm:$0x1]   ;;  %v6_v2 = vld [vmem:[#allocation1] sm:$0x1]  }
   0xa   :  { %11 = vrot.lane.b32.xlu0 %v10_v1, %s22_s0  ;;  %8 = vst.msk [vmem:[#allocation0] sm:$0x1] %vm7_vm0, %v6_v2  }
  0x7c   :  { %v12_v3 = vpop.permute.xlu0 %11  }
  0x7d   :  { %14 = vst.msk [vmem:[#allocation0] sm:$0x1] %vm13_vm1, %v12_v3  }
  0x84   :  { %v18_v4 = vld [vmem:[#allocation0] sm:$0x1] }
  0x85   :  { %20 = vst [vmem:[%s40_s1] sm:$0x1] %v18_v4 }

// kernel: tile.9
= control target key start
LH: loop header
LB: loop body
LE: loop exit
PB: predicated region body
PF: predicated region fallthrough
CT: control target
= control target key end

     0   :  { %vm7_vm0 = vcmask 261120   ;;  %vm13_vm1 = vcmask 523520   ;;  %s39_s0 = inlined_call_operand.vmem [shape: f32[2,32], index: 0, kind: input, shape index: {}]   ;;  %s40_s1 = inlined_call_operand.vmem [shape: f32[1,64], index: 1, kind: output, shape index: {}]  }
   0x1   :  { %v4_v0 = vld [vmem:[%s39_s0] sm:$0x3]  ;;  %s22_s0 = smov 32  }
   0x2   :  { %5 = vst [vmem:[#allocation1] sm:$0x3] %v4_v0 }
   0x9   :  { %v10_v1 = vld [vmem:[#allocation1 + $0x1] sm:$0x1]   ;;  %v6_v2 = vld [vmem:[#allocation1] sm:$0x1]  }
   0xa   :  { %11 = vrot.lane.b32.xlu0 %v10_v1, %s22_s0  ;;  %8 = vst.msk [vmem:[#allocation0] sm:$0x1] %vm7_vm0, %v6_v2  }
  0x7c   :  { %v12_v3 = vpop.permute.xlu0 %11  }
  0x7d   :  { %14 = vst.msk [vmem:[#allocation0] sm:$0x1] %vm13_vm1, %v12_v3  }
  0x84   :  { %v18_v4 = vld [vmem:[#allocation0] sm:$0x1] }
  0x85   :  { %20 = vst [vmem:[%s40_s1] sm:$0x1] %v18_v4 }

// kernel: tile.8
= control target key start
LH: loop header
LB: loop body
LE: loop exit
PB: predicated region body
PF: predicated region fallthrough
CT: control target
= control target key end

     0   :  { %2 = vsyncpa [#allocation1], 0  ;;  %s44_s6 = smov [#allocation0]   ;;  %s70_s0 = inlined_call_operand.hbm [shape: f32[32], index: 0, kind: input, shape index: {}]   ;;  %s71_s1 = inlined_call_operand.vmem [shape: f32[2,32], index: 1, kind: output, shape index: {}]  }
   0x1   :  { %s9_s7 = sshll.u32 %s44_s6, 4  ;;  %s20_s10 = scalar_lea.hbm %s70_s0, 16  ;;  %s10_s7 = int_to_ptr.vmem [resolvable:$true] %s9_s7 }
   0x2   :  { %p21_p0 = scmp.ne.s32.totalorder %s70_s0, %s20_s10  ;;  %p24_p1 = scmp.lt.u32.totalorder %s20_s10, %s70_s0 }
   0x4   :  { %p26_p2 = pnand %p24_p1, %p21_p0 }
   0x6   :  { %29 = shalt.err (!%p26_p2)
}
   0x7   :  { %s30_s15 = scalar_lea.vmem %s10_s7, 16  ;;  %s34_s16 = scalar_lea.vmem %s10_s7, 32 }
   0x8   :  { %p31_p3 = scmp.ne.s32.totalorder %s10_s7, %s30_s15  ;;  %p35_p4 = scmp.lt.s32.totalorder %s10_s7, %s10_s7 }
   0x9   :  { %p36_p5 = scmp.lt.s32.totalorder %s34_s16, %s30_s15 }
   0xb   :  { %p37_p6 = por %p36_p5, %p35_p4 }
   0xd   :  { %p38_p7 = pnand %p37_p6, %p31_p3 }
   0xf   :  { %41 = shalt.err (!%p38_p7)
}
  0x10   :  { %12 = dma.hbm_to_vmem [thread:$0]  %s70_s0, 16, %s10_s7, [#allocation1]  }
  0x11   :  { %42 = dma.done.wait [#allocation1], 16  }
  0x12   :  { %43 = vsyncadd [#allocation1], 4294967280  ;;  %v16_v0 = vld [vmem:[#allocation0] ss:$0 sm:$0xff] }
  0x13   :  { %17 = vst [vmem:[%s71_s1] sm:$0x3] %v16_v0 }
  0x14   :  { %18 = vsyncpa [#allocation1], 1 }

// kernel: unet_up_forward.2
= control target key start
LH: loop header
LB: loop body
LE: loop exit
PB: predicated region body
PF: predicated region fallthrough
CT: control target
= control target key end

     0   :  { %s903_s15 = smov 0   ;;  %s1014_s0 = inlined_call_operand.vmem [shape: f32[2,8,8,32], index: 0, kind: input, shape index: {}]   ;;  %s1015_s1 = inlined_call_operand.vmem [shape: f32[2,8,8,32], index: 1, kind: input, shape index: {}]   ;;  %s1016_s2 = inlined_call_operand.vmem [shape: bf16[2,64,64], index: 2, kind: input, shape index: {}]   ;;  %s1017_s3 = inlined_call_operand.vmem [shape: f32[1,64], index: 3, kind: input, shape index: {}]   ;;  %s1018_s4 = inlined_call_operand.vmem [shape: f32[2,2,64,64], index: 4, kind: output, shape index: {}]  }
   0x1 LB: > { %s708_s16 = sadd.s32 4294967295, %s876_s15   ;;  %p712_p0 = scmp.ge.s32.totalorder %s876_s15, 1  ;;  %s876_s15 = sphi %s903_s15, %s14_s15  }
   0x2   : > { %p172_p1 = scmp.lt.s32.totalorder %s876_s15, 3 }
   0x4   : > { %p173_p2 = pnand %p712_p0, %p172_p1 }
   0x5   : > { %v862_v0 = vld [vmem:[%s1016_s2 + $0x10] sm:$0xff] (!%p173_p2)   ;;  %p203_p3 = scmp.lt.s32.totalorder (!%p173_p2), %s708_s16, 1  ;;  %v864_v2 = vld [vmem:[%s1016_s2 + $0x18] sm:$0xff] (!%p173_p2)   ;;  %v866_v4 = vld [vmem:[%s1016_s2] sm:$0xff] (!%p173_p2)   ;;  %vm263_vm0 = vcmask (!%p173_p2), 261120   ;;  %vm445_vm1 = vcmask (!%p173_p2), 523264  }
   0x6   : > { %176 = sbr.rel (%p173_p2) target bundleno = 262 (0x106), region = 36  ;;  %v863_v1 = vld [vmem:[%s1016_s2 + $0x30] sm:$0xff] (!%p173_p2)   ;;  %790 = vmatprep.subr.bf16.mxu0 (!%p173_p2), %v862_v0  ;;  %v865_v3 = vld [vmem:[%s1016_s2 + $0x38] sm:$0xff] (!%p173_p2)   ;;  %v867_v10 = vld [vmem:[%s1016_s2 + $0x20] sm:$0xff] (!%p173_p2)  }
   0x7   : > { %814 = vmatprep.subr.bf16.mxu1 (!%p173_p2), %v863_v1  ;;  %791 = vmatpush3.bf16.msra.mxu0 (!%p173_p2), %v862_v0  ;;  %v868_v15 = vld [vmem:[%s1016_s2 + $0x8] sm:$0xff] (!%p173_p2)   ;;  %v731_v32 = vld [vmem:[%s1017_s3] ss:$0 sm:$0xff] (!%p173_p2) }
   0x8   : > { %815 = vmatpush3.bf16.msra.mxu1 (!%p173_p2), %v863_v1  ;;  %792 = vmatprep.subr.bf16.mxu0 (!%p173_p2), %v864_v2  ;;  %v869_v16 = vld [vmem:[%s1016_s2 + $0x28] sm:$0xff] (!%p173_p2)  }
   0x9   : > { %816 = vmatprep.subr.bf16.mxu1 (!%p173_p2), %v865_v3 }
   0xb   : > { %793 = vmatpush3.bf16.msra.mxu0 (!%p173_p2), %v864_v2 }
   0xc   : > { %817 = vmatpush3.bf16.msra.mxu1 (!%p173_p2), %v865_v3  ;;  %802 = vmatprep.subr.bf16.mxu0 (!%p173_p2), %v866_v4 }
   0xd   : > { %s1020_s16 = smov (!%p203_p3, %s708_s16), 1  ;;  %826 = vmatprep.subr.bf16.mxu1 %v867_v10 }
   0xe   : > { %s763_s25 = sshll.u32 %s1020_s16, 6  ;;  %s765_s14 = sshll.u32 %s1020_s16, 7 }
   0xf   : > { %s212_s28 = scalar_lea.vmem %s1015_s1, %s763_s25  ;;  %s938_s9 = scalar_lea.vmem %s1014_s0, %s763_s25 }
  0x10   : > { %v231_v5 = vld [vmem:[%s212_s28] sm:$0xff]  ;;  %v232_v6 = vld [vmem:[%s212_s28 + $0x8] sm:$0xff]  ;;  %v233_v7 = vld [vmem:[%s212_s28 + $0x10] sm:$0xff]  ;;  %s977_s21 = scalar_lea.vmem %s1018_s4, %s765_s14 }
  0x11   : > { %v239_v8 = vpack.c.bf16 %v232_v6, %v231_v5  ;;  %v234_v9 = vld [vmem:[%s212_s28 + $0x18] sm:$0xff]  ;;  %v235_v11 = vld [vmem:[%s212_s28 + $0x20] sm:$0xff]  ;;  %v236_v13 = vld [vmem:[%s212_s28 + $0x28] sm:$0xff] }
  0x12   : > { %v240_v12 = vpack.c.bf16 %v234_v9, %v233_v7  ;;  %v241_v14 = vpack.c.bf16 %v236_v13, %v235_v11  ;;  %v237_v17 = vld [vmem:[%s212_s28 + $0x30] sm:$0xff]  ;;  %v238_v18 = vld [vmem:[%s212_s28 + $0x38] sm:$0xff]  ;;  %v219_v19 = vld [vmem:[%s938_s9] sm:$0xff] }
  0x13   : > { %794 = vmatprep.mubr.msk.bf16.mxu0 %vm263_vm0, %v239_v8  ;;  %818 = vmatprep.mubr.msk.bf16.mxu1 %vm263_vm0, %v239_v8  ;;  %v220_v20 = vld [vmem:[%s938_s9 + $0x8] sm:$0xff]  ;;  %v242_v21 = vpack.c.bf16 %v238_v18, %v237_v17  ;;  %v221_v23 = vld [vmem:[%s938_s9 + $0x10] sm:$0xff]  ;;  %v222_v24 = vld [vmem:[%s938_s9 + $0x18] sm:$0xff] }
  0x14   : > { %795 = vmatmul.mubr.msk.bf16.vlgmr.msra.gmra.mrb[0].mxu0 %vm263_vm0, %v240_v12  ;;  %819 = vmatmul.mubr.msk.bf16.vlgmr.msra.gmra.mrb[0].mxu1 %vm263_vm0, %v240_v12  ;;  %v227_v22 = vpack.c.bf16 %v220_v20, %v219_v19  ;;  %v223_v25 = vld [vmem:[%s938_s9 + $0x20] sm:$0xff]  ;;  %v224_v26 = vld [vmem:[%s938_s9 + $0x28] sm:$0xff]  ;;  %v228_v27 = vpack.c.bf16 %v222_v24, %v221_v23  ;;  %v225_v29 = vld [vmem:[%s938_s9 + $0x30] sm:$0xff] }
  0x15   : > { %803 = vmatpush3.bf16.msra.mxu0 %v866_v4  ;;  %827 = vmatpush3.bf16.msra.mxu1 %v867_v10  ;;  %v229_v28 = vpack.c.bf16 %v224_v26, %v223_v25  ;;  %v226_v30 = vld [vmem:[%s938_s9 + $0x38] sm:$0xff] }
  0x16   : > { %798 = vmatprep.mubr.msk.bf16.mxu0 %vm263_vm0, %v241_v14  ;;  %822 = vmatprep.mubr.msk.bf16.mxu1 %vm263_vm0, %v241_v14  ;;  %v230_v31 = vpack.c.bf16 %v226_v30, %v225_v29 }
  0x17   : > { %804 = vmatprep.subr.bf16.mxu0 %v868_v15  ;;  %828 = vmatprep.subr.bf16.mxu1 %v869_v16 }
  0x19   : > { %805 = vmatpush3.bf16.msra.mxu0 %v868_v15  ;;  %829 = vmatpush3.bf16.msra.mxu1 %v869_v16 }
  0x1c   : > { %799 = vmatmul.mubr.msk.bf16.gmra.mrb[4].mxu0 %vm263_vm0, %v242_v21  ;;  %823 = vmatmul.mubr.msk.bf16.gmra.mrb[4].mxu1 %vm263_vm0, %v242_v21 }
  0x1d   : > { %806 = vmatprep.mubr.msk.bf16.mxu0 %vm263_vm0, %v227_v22  ;;  %830 = vmatprep.mubr.msk.bf16.mxu1 %vm263_vm0, %v227_v22 }
  0x24   : > { %807 = vmatmul.mubr.msk.bf16.vlgmr.msra.gmra.mrb[0].mxu0 %vm263_vm0, %v228_v27  ;;  %831 = vmatmul.mubr.msk.bf16.vlgmr.msra.gmra.mrb[0].mxu1 %vm263_vm0, %v228_v27 }
  0x25   : > { %810 = vmatprep.mubr.msk.bf16.mxu0 %vm263_vm0, %v229_v28  ;;  %834 = vmatprep.mubr.msk.bf16.mxu1 %vm263_vm0, %v229_v28 }
  0x2c   : > { %811 = vmatmul.mubr.msk.bf16.gmra.mrb[4].mxu0 %vm263_vm0, %v230_v31  ;;  %835 = vmatmul.mubr.msk.bf16.gmra.mrb[4].mxu1 %vm263_vm0, %v230_v31 }
  0xf7   : > { %v808_v33 = vpop.f32.mrb[0].mxu0  ;;  %v832_v35 = vpop.f32.mrb[0].mxu1 }
  0xf8   : > { %v439_v34 = vadd.f32 %v808_v33, %v731_v32  ;;  %v399_v36 = vpop.f32.mrb[1].mxu0  ;;  %v626_v37 = vadd.f32 %v832_v35, %v731_v32  ;;  %v586_v39 = vpop.f32.mrb[1].mxu1 }
  0xf9   : > { %v437_v38 = vadd.f32 %v731_v32, %v399_v36  ;;  %v809_v40 = vpop.f32.mrb[2].mxu0  ;;  %v624_v41 = vadd.f32 %v731_v32, %v586_v39  ;;  %v833_v43 = vpop.f32.mrb[2].mxu1 }
  0xfa   : > { %448 = vst.msk [vmem:[%s977_s21 + $0x10] sm:$0xff] %vm445_vm1, %v439_v34  ;;  %v440_v42 = vadd.f32 %v809_v40, %v731_v32  ;;  %v402_v44 = vpop.f32.mrb[3].mxu0  ;;  %755 = vst.msk [vmem:[%s977_s21 + $0x50] sm:$0xff] %vm445_vm1, %v626_v37  ;;  %v627_v45 = vadd.f32 %v833_v43, %v731_v32  ;;  %v589_v47 = vpop.f32.mrb[3].mxu1 }
  0xfb   : > { %446 = vst.msk [vmem:[%s977_s21] sm:$0xff] %vm445_vm1, %v437_v38  ;;  %v438_v46 = vadd.f32 %v731_v32, %v402_v44  ;;  %753 = vst.msk [vmem:[%s977_s21 + $0x40] sm:$0xff] %vm445_vm1, %v624_v41  ;;  %v625_v48 = vadd.f32 %v731_v32, %v589_v47 }
  0xfc   : > { %449 = vst.msk [vmem:[%s977_s21 + $0x18] sm:$0xff] %vm445_vm1, %v440_v42  ;;  %756 = vst.msk [vmem:[%s977_s21 + $0x58] sm:$0xff] %vm445_vm1, %v627_v45 }
  0xfd   : > { %447 = vst.msk [vmem:[%s977_s21 + $0x8] sm:$0xff] %vm445_vm1, %v438_v46  ;;  %754 = vst.msk [vmem:[%s977_s21 + $0x48] sm:$0xff] %vm445_vm1, %v625_v48 }
  0xff   : > { %v812_v49 = vpop.f32.mrb[4].mxu0  ;;  %v836_v51 = vpop.f32.mrb[4].mxu1 }
 0x100   : > { %v443_v50 = vadd.f32 %v812_v49, %v731_v32  ;;  %v415_v52 = vpop.f32.mrb[5].mxu0  ;;  %v630_v53 = vadd.f32 %v836_v51, %v731_v32  ;;  %v602_v55 = vpop.f32.mrb[5].mxu1 }
 0x101   : > { %v441_v54 = vadd.f32 %v731_v32, %v415_v52  ;;  %v813_v56 = vpop.f32.mrb[6].mxu0  ;;  %v628_v57 = vadd.f32 %v731_v32, %v602_v55  ;;  %v837_v59 = vpop.f32.mrb[6].mxu1 }
 0x102   : > { %452 = vst.msk [vmem:[%s977_s21 + $0x30] sm:$0xff] %vm445_vm1, %v443_v50  ;;  %v444_v58 = vadd.f32 %v813_v56, %v731_v32  ;;  %v418_v60 = vpop.f32.mrb[7].mxu0  ;;  %759 = vst.msk [vmem:[%s977_s21 + $0x70] sm:$0xff] %vm445_vm1, %v630_v53  ;;  %v631_v61 = vadd.f32 %v837_v59, %v731_v32  ;;  %v605_v63 = vpop.f32.mrb[7].mxu1 }
 0x103   : > { %450 = vst.msk [vmem:[%s977_s21 + $0x20] sm:$0xff] %vm445_vm1, %v441_v54  ;;  %v442_v62 = vadd.f32 %v731_v32, %v418_v60  ;;  %757 = vst.msk [vmem:[%s977_s21 + $0x60] sm:$0xff] %vm445_vm1, %v628_v57  ;;  %v629_v0 = vadd.f32 %v731_v32, %v605_v63 }
 0x104   : > { %453 = vst.msk [vmem:[%s977_s21 + $0x38] sm:$0xff] %vm445_vm1, %v444_v58  ;;  %760 = vst.msk [vmem:[%s977_s21 + $0x78] sm:$0xff] %vm445_vm1, %v631_v61 }
 0x105   : > { %451 = vst.msk [vmem:[%s977_s21 + $0x28] sm:$0xff] %vm445_vm1, %v442_v62  ;;  %758 = vst.msk [vmem:[%s977_s21 + $0x68] sm:$0xff] %vm445_vm1, %v629_v0 }
 0x106 PF: > { %s14_s15 = sadd.s32 1, %s876_s15  }
 0x107   : > { %p11_p4 = scmp.ge.s32.totalorder %s14_s15, 4  }
 0x109   :  { %13 = sbr.rel (!%p11_p4) target bundleno = 1 (0x1), region = 71 }

// kernel: unet_up_forward.3
= control target key start
LH: loop header
LB: loop body
LE: loop exit
PB: predicated region body
PF: predicated region fallthrough
CT: control target
= control target key end

     0   :  { %10 = vsyncpa [#allocation4], 0  ;;  %s21843_s0 = inlined_call_operand.vmem [shape: f32[2,16,16,32], index: 0, kind: input, shape index: {}]   ;;  %s21844_s1 = inlined_call_operand.vmem [shape: bf16[4,3,3,32,32], index: 1, kind: input, shape index: {}]   ;;  %s21845_s2 = inlined_call_operand.vmem [shape: f32[4,1,32], index: 2, kind: input, shape index: {}]   ;;  %s21846_s3 = inlined_call_operand.vmem [shape: f32[4,1,32], index: 3, kind: input, shape index: {}]   ;;  %s21847_s4 = inlined_call_operand.vmem [shape: f32[4,1,32], index: 4, kind: input, shape index: {}]   ;;  %s21848_s5 = inlined_call_operand.hbm [shape: f32[2,256,32], index: 5, kind: output, shape index: {}]  }
   0x1   :  { %12 = vsyncpa [#allocation4 + $0x1], 0  ;;  %s17646_s18 = smov 0   ;;  %s17648_s19 = smov 0  }
   0x2   :  { %s17650_s20 = smov 0   ;;  %s17652_s21 = smov 0  }
   0x3 LB: > { %s17667_s22 = sadd.s32 4294967295, %s17610_s21   ;;  %s13379_s23 = sadd.s32 4294967294, %s17610_s21   ;;  %s17610_s21 = sphi %s17652_s21, %s21854_s21   ;;  %s17606_s20 = sphi %s17650_s20, %s21853_s20   ;;  %s17602_s19 = sphi %s17648_s19, %s21852_s19   ;;  %s17598_s18 = sphi %s17646_s18, %s21851_s18  }
   0x4   : > { %s17671_s24 = sadd.s32 1, %s17610_s21   ;;  %s135_s25 = sadd.s32 1, %s17606_s20 }
   0x5   : > { %s132_s26 = ssub.s32 %s17610_s21, %s17671_s24  ;;  %p145_p0 = scmp.ne.s32.totalorder %s17606_s20, %s17602_s19 }
   0x6   : > { %p133_p1 = scmp.eq.s32.totalorder %s132_s26, 0  ;;  %p146_p2 = scmp.eq.s32.totalorder %s17667_s22, 1 }
   0x7   : > { %p151_p3 = scmp.ne.s32.totalorder %s17602_s19, %s17598_s18  ;;  %p152_p4 = scmp.eq.s32.totalorder %s13379_s23, 1 }
   0x8   : > { %s17682_s27 = scalar_select %p133_p1, %s17606_s20, %s135_s25  }
   0x9   : > { %p17684_p5 = por %p146_p2, %p145_p0  ;;  %p17688_p6 = por %p152_p4, %p151_p3 }
   0xa   : > { %p13382_p7 = scmp.ge.s32.totalorder %s17610_s21, 1  ;;  %p190_p8 = scmp.lt.s32.totalorder %s17610_s21, 3 }
   0xc   : > { %p191_p9 = pnand %p13382_p7, %p190_p8 }
   0xd   : > { %v17212_v0 = vld [vmem:[%s21844_s1 + $0x10] sm:$0xff] (!%p191_p9)   ;;  %vm224_vm0 = vcmask (!%p191_p9), 261120   ;;  %v17213_v1 = vld [vmem:[%s21844_s1 + $0x18] sm:$0xff] (!%p191_p9)   ;;  %v17612_v2 = vmov (!%p191_p9), 0.0   ;;  %vm227_vm1 = vcmask (!%p191_p9), 254976   ;;  %p218_p10 = scmp.lt.s32.totalorder (!%p191_p9), %s17667_s22, 1 }
   0xe   : > { %194 = sbr.rel (%p191_p9) target bundleno = 3909 (0xf45), region = 40  ;;  %14850 = vmatprep.subr.bf16.mxu0 (!%p191_p9), %v17212_v0  ;;  %225 = vst.msk [vmem:[#allocation2] sm:$0xff] (!%p191_p9), %vm224_vm0, %v17612_v2  ;;  %226 = vst.msk [vmem:[#allocation2 + $0x8] sm:$0xff] (!%p191_p9), %vm224_vm0, %v17612_v2  ;;  %v17758_v3 = vld [vmem:[%s21844_s1] sm:$0xff] (!%p191_p9)   ;;  %v17215_v26 = vld [vmem:[%s21844_s1 + $0x8] sm:$0xff] (!%p191_p9)   ;;  %s215_s23 = sand.u32 (!%p191_p9), 1, %s17602_s19  }
   0xf   : > { %229 = vst.msk [vmem:[#allocation2 + $0x18] sm:$0xff] (!%p191_p9), %vm224_vm0, %v17612_v2  ;;  %230 = vst.msk [vmem:[#allocation2 + $0x20] sm:$0xff] (!%p191_p9), %vm224_vm0, %v17612_v2  ;;  %14851 = vmatpush3.bf16.msra.mxu0 (!%p191_p9), %v17212_v0  ;;  %v17831_v42 = vld [vmem:[%s21844_s1 + $0x20] sm:$0xff] (!%p191_p9)   ;;  %s13383_s25 = sshll.u32 (!%p191_p9), %s215_s23, 8  ;;  %s14201_s30 = sshll.u32 (!%p191_p9), %s17667_s22, 12 }
  0x10   : > { %232 = vst.msk [vmem:[#allocation2 + $0x30] sm:$0xff] (!%p191_p9), %vm224_vm0, %v17612_v2  ;;  %233 = vst.msk [vmem:[#allocation2 + $0x38] sm:$0xff] (!%p191_p9), %vm224_vm0, %v17612_v2  ;;  %14852 = vmatprep.subr.bf16.mxu0 (!%p191_p9), %v17213_v1  ;;  %s21583_s26 = scalar_lea.vmem (!%p191_p9), [#allocation3], %s13383_s25  ;;  %s21790_s8 = scalar_lea.hbm (!%p191_p9), %s21848_s5, %s14201_s30 }
  0x11   : > { %235 = vst.msk [vmem:[#allocation2 + $0x48] sm:$0xff] (!%p191_p9), %vm224_vm0, %v17612_v2  ;;  %236 = vst.msk [vmem:[#allocation2 + $0x50] sm:$0xff] (!%p191_p9), %vm224_vm0, %v17612_v2  ;;  %s13317_s6 = sshll.u32 (!%p191_p9), %s21583_s26, 4  ;;  %s21802_s9 = scalar_lea.sflag (!%p191_p9), [#allocation4], %s215_s23  ;;  %s21792_s6 = int_to_ptr.vmem [resolvable:$true] %s13317_s6 }
  0x12   : > { %238 = vst.msk [vmem:[#allocation2 + $0x60] sm:$0xff] (!%p191_p9), %vm224_vm0, %v17612_v2  ;;  %239 = vst.msk [vmem:[#allocation2 + $0x68] sm:$0xff] (!%p191_p9), %vm224_vm0, %v17612_v2  ;;  %s17548_s10 = scalar_lea.vmem (!%p191_p9), %s21792_s6, 4096 }
  0x13   : > { %241 = vst.msk [vmem:[#allocation2 + $0x78] sm:$0xff] (!%p191_p9), %vm224_vm0, %v17612_v2  ;;  %242 = vst.msk [vmem:[#allocation2 + $0x80] sm:$0xff] (!%p191_p9), %vm224_vm0, %v17612_v2  ;;  %14853 = vmatpush3.bf16.msra.mxu0 (!%p191_p9), %v17213_v1  ;;  %p17549_p11 = scmp.ne.s32.totalorder (!%p191_p9), %s21792_s6, %s17548_s10 }
  0x14   : > { %244 = vst.msk [vmem:[#allocation2 + $0x90] sm:$0xff] (!%p191_p9), %vm224_vm0, %v17612_v2  ;;  %245 = vst.msk [vmem:[#allocation2 + $0x98] sm:$0xff] (!%p191_p9), %vm224_vm0, %v17612_v2  ;;  %14886 = vmatprep.subr.bf16.mxu0 (!%p191_p9), %v17758_v3 }
  0x15   : > { %247 = vst.msk [vmem:[#allocation2 + $0xa8] sm:$0xff] %vm224_vm0, %v17612_v2  ;;  %248 = vst.msk [vmem:[#allocation2 + $0xb0] sm:$0xff] %vm224_vm0, %v17612_v2  ;;  %s219_s11 = scalar_select %p218_p10, %s17667_s22, 1  ;;  %v397_v4 = vld [vmem:[#allocation2 + $0x1] sm:$0xff] }
  0x16   : > { %250 = vst.msk [vmem:[#allocation2 + $0xc0] sm:$0xff] %vm224_vm0, %v17612_v2  ;;  %251 = vst.msk [vmem:[#allocation2 + $0xc8] sm:$0xff] %vm224_vm0, %v17612_v2  ;;  %p17550_p12 = pnand %p17549_p11, %p17684_p5 }
  0x17   : > { %253 = vst.msk [vmem:[#allocation2 + $0xd8] sm:$0xff] %vm224_vm0, %v17612_v2  ;;  %254 = vst.msk [vmem:[#allocation2 + $0xe0] sm:$0xff] %vm224_vm0, %v17612_v2  ;;  %s14200_s12 = sshll.u32 %s219_s11, 8  ;;  %s17613_s11 = smov [#allocation3]  }
  0x18   : > { %256 = vst.msk [vmem:[#allocation2 + $0xf0] sm:$0xff] %vm224_vm0, %v17612_v2  ;;  %257 = vst.msk [vmem:[#allocation2 + $0xf8] sm:$0xff] %vm224_vm0, %v17612_v2  ;;  %s17765_s15 = scalar_lea.vmem %s21843_s0, %s14200_s12  ;;  %p17551_p13 = pneg %p17550_p12 }
  0x19   : > { %259 = vst.msk [vmem:[#allocation2 + $0x108] sm:$0xff] %vm224_vm0, %v17612_v2  ;;  %260 = vst.msk [vmem:[#allocation2 + $0x110] sm:$0xff] %vm224_vm0, %v17612_v2  ;;  %v280_v5 = vld [vmem:[%s17765_s15] sm:$0xff]  ;;  %v281_v6 = vld [vmem:[%s17765_s15 + $0x8] sm:$0xff]  ;;  %s17552_s12 = sshll.u32 %s17613_s11, 4  ;;  %s17553_s12 = int_to_ptr.vmem [resolvable:$false] %s17552_s12 }
  0x1a   : > { %262 = vst.msk [vmem:[#allocation2 + $0x120] sm:$0xff] %vm224_vm0, %v17612_v2  ;;  %263 = vst.msk [vmem:[#allocation2 + $0x128] sm:$0xff] %vm224_vm0, %v17612_v2  ;;  %v282_v8 = vld [vmem:[%s17765_s15 + $0x10] sm:$0xff]  ;;  %v283_v9 = vld [vmem:[%s17765_s15 + $0x18] sm:$0xff]  ;;  %s17554_s13 = scalar_lea.vmem %s17553_s12, 8192  ;;  %p17555_p0 = scmp.lt.s32.totalorder %s21792_s6, %s17553_s12 }
  0x1b   : > { %265 = vst.msk [vmem:[#allocation2 + $0x138] sm:$0xff] %vm224_vm0, %v17612_v2  ;;  %266 = vst.msk [vmem:[#allocation2 + $0x140] sm:$0xff] %vm224_vm0, %v17612_v2  ;;  %v284_v11 = vld [vmem:[%s17765_s15 + $0x20] sm:$0xff]  ;;  %v285_v12 = vld [vmem:[%s17765_s15 + $0x28] sm:$0xff]  ;;  %p17556_p1 = scmp.lt.s32.totalorder %s17554_s13, %s17548_s10 }
  0x1c   : > { %268 = vst.msk [vmem:[#allocation2 + $0x150] sm:$0xff] %vm224_vm0, %v17612_v2  ;;  %269 = vst.msk [vmem:[#allocation2 + $0x158] sm:$0xff] %vm224_vm0, %v17612_v2  ;;  %v286_v13 = vld [vmem:[%s17765_s15 + $0x30] sm:$0xff]  ;;  %v287_v14 = vld [vmem:[%s17765_s15 + $0x38] sm:$0xff] }
  0x1d   : > { %271 = vst.msk [vmem:[#allocation2 + $0x168] sm:$0xff] %vm224_vm0, %v17612_v2  ;;  %272 = vst.msk [vmem:[#allocation2 + $0x170] sm:$0xff] %vm224_vm0, %v17612_v2  ;;  %v288_v15 = vld [vmem:[%s17765_s15 + $0x40] sm:$0xff]  ;;  %v289_v16 = vld [vmem:[%s17765_s15 + $0x48] sm:$0xff]  ;;  %p17557_p2 = por %p17556_p1, %p17555_p0 }
  0x1e   : > { %274 = vst.msk [vmem:[#allocation2 + $0x180] sm:$0xff] %vm224_vm0, %v17612_v2  ;;  %275 = vst.msk [vmem:[#allocation2 + $0x188] sm:$0xff] %vm224_vm0, %v17612_v2  ;;  %v290_v17 = vld [vmem:[%s17765_s15 + $0x50] sm:$0xff]  ;;  %v291_v18 = vld [vmem:[%s17765_s15 + $0x58] sm:$0xff] }
  0x1f   : > { %277 = vst.msk [vmem:[#allocation2 + $0x198] sm:$0xff] %vm224_vm0, %v17612_v2  ;;  %278 = vst.msk [vmem:[#allocation2 + $0x1a0] sm:$0xff] %vm224_vm0, %v17612_v2  ;;  %v292_v19 = vld [vmem:[%s17765_s15 + $0x60] sm:$0xff]  ;;  %v293_v20 = vld [vmem:[%s17765_s15 + $0x68] sm:$0xff]  ;;  %p17558_p3 = pnand %p17557_p2, %p17551_p13 }
  0x20   : > { %228 = vst.msk [vmem:[#allocation2 + $0x10] sm:$0x3] %vm227_vm1, %v17612_v2  ;;  %231 = vst.msk [vmem:[#allocation2 + $0x28] sm:$0x3] %vm227_vm1, %v17612_v2  ;;  %v294_v21 = vld [vmem:[%s17765_s15 + $0x70] sm:$0xff]  ;;  %v295_v22 = vld [vmem:[%s17765_s15 + $0x78] sm:$0xff] }
  0x21   : > { %234 = vst.msk [vmem:[#allocation2 + $0x40] sm:$0x3] %vm227_vm1, %v17612_v2  ;;  %237 = vst.msk [vmem:[#allocation2 + $0x58] sm:$0x3] %vm227_vm1, %v17612_v2  ;;  %v296_v23 = vld [vmem:[%s17765_s15 + $0x80] sm:$0xff]  ;;  %v297_v24 = vld [vmem:[%s17765_s15 + $0x88] sm:$0xff] }
  0x22   : > { %240 = vst.msk [vmem:[#allocation2 + $0x70] sm:$0x3] %vm227_vm1, %v17612_v2  ;;  %243 = vst.msk [vmem:[#allocation2 + $0x88] sm:$0x3] %vm227_vm1, %v17612_v2  ;;  %v298_v25 = vld [vmem:[%s17765_s15 + $0x90] sm:$0xff]  ;;  %v299_v27 = vld [vmem:[%s17765_s15 + $0x98] sm:$0xff] }
  0x23   : > { %246 = vst.msk [vmem:[#allocation2 + $0xa0] sm:$0x3] %vm227_vm1, %v17612_v2  ;;  %249 = vst.msk [vmem:[#allocation2 + $0xb8] sm:$0x3] %vm227_vm1, %v17612_v2  ;;  %v300_v28 = vld [vmem:[%s17765_s15 + $0xa0] sm:$0xff]  ;;  %v301_v29 = vld [vmem:[%s17765_s15 + $0xa8] sm:$0xff] }
  0x24   : > { %252 = vst.msk [vmem:[#allocation2 + $0xd0] sm:$0x3] %vm227_vm1, %v17612_v2  ;;  %255 = vst.msk [vmem:[#allocation2 + $0xe8] sm:$0x3] %vm227_vm1, %v17612_v2  ;;  %v302_v32 = vld [vmem:[%s17765_s15 + $0xb0] sm:$0xff]  ;;  %v303_v36 = vld [vmem:[%s17765_s15 + $0xb8] sm:$0xff] }
  0x25   : > { %258 = vst.msk [vmem:[#allocation2 + $0x100] sm:$0x3] %vm227_vm1, %v17612_v2  ;;  %261 = vst.msk [vmem:[#allocation2 + $0x118] sm:$0x3] %vm227_vm1, %v17612_v2  ;;  %v304_v45 = vld [vmem:[%s17765_s15 + $0xc0] sm:$0xff]  ;;  %v305_v46 = vld [vmem:[%s17765_s15 + $0xc8] sm:$0xff] }
  0x26   : > { %264 = vst.msk [vmem:[#allocation2 + $0x130] sm:$0x3] %vm227_vm1, %v17612_v2  ;;  %267 = vst.msk [vmem:[#allocation2 + $0x148] sm:$0x3] %vm227_vm1, %v17612_v2  ;;  %v306_v47 = vld [vmem:[%s17765_s15 + $0xd0] sm:$0xff]  ;;  %v307_v48 = vld [vmem:[%s17765_s15 + $0xd8] sm:$0xff] }
  0x27   : > { %270 = vst.msk [vmem:[#allocation2 + $0x160] sm:$0x3] %vm227_vm1, %v17612_v2  ;;  %273 = vst.msk [vmem:[#allocation2 + $0x178] sm:$0x3] %vm227_vm1, %v17612_v2  ;;  %v398_v7 = vld [vmem:[#allocation2 + $0x9] sm:$0xff]  ;;  %v308_v49 = vld [vmem:[%s17765_s15 + $0xe0] sm:$0xff] }
  0x28   : > { %276 = vst.msk [vmem:[#allocation2 + $0x190] sm:$0x3] %vm227_vm1, %v17612_v2  ;;  %279 = vst.msk [vmem:[#allocation2 + $0x1a8] sm:$0x3] %vm227_vm1, %v17612_v2  ;;  %v429_v10 = vpack.c.bf16 %v398_v7, %v397_v4  ;;  %v309_v50 = vld [vmem:[%s17765_s15 + $0xe8] sm:$0xff] }
  0x29   : > { %313 = vst.msk [vmem:[#allocation2 + $0x19] sm:$0xff] %vm224_vm0, %v280_v5  ;;  %314 = vst.msk [vmem:[#allocation2 + $0x21] sm:$0xff] %vm224_vm0, %v281_v6 }
  0x2a   : > { %315 = vst.msk [vmem:[#allocation2 + $0x31] sm:$0xff] %vm224_vm0, %v282_v8  ;;  %316 = vst.msk [vmem:[#allocation2 + $0x39] sm:$0xff] %vm224_vm0, %v283_v9  ;;  %14854 = vmatprep.mubr.msk.bf16.mxu0 %vm224_vm0, %v429_v10 }
  0x2b   : > { %317 = vst.msk [vmem:[#allocation2 + $0x49] sm:$0xff] %vm224_vm0, %v284_v11  ;;  %318 = vst.msk [vmem:[#allocation2 + $0x51] sm:$0xff] %vm224_vm0, %v285_v12 }
  0x2c   : > { %319 = vst.msk [vmem:[#allocation2 + $0x61] sm:$0xff] %vm224_vm0, %v286_v13  ;;  %320 = vst.msk [vmem:[#allocation2 + $0x69] sm:$0xff] %vm224_vm0, %v287_v14 }
  0x2d   : > { %321 = vst.msk [vmem:[#allocation2 + $0x79] sm:$0xff] %vm224_vm0, %v288_v15  ;;  %322 = vst.msk [vmem:[#allocation2 + $0x81] sm:$0xff] %vm224_vm0, %v289_v16 }
  0x2e   : > { %323 = vst.msk [vmem:[#allocation2 + $0x91] sm:$0xff] %vm224_vm0, %v290_v17  ;;  %324 = vst.msk [vmem:[#allocation2 + $0x99] sm:$0xff] %vm224_vm0, %v291_v18  ;;  %v345_v17 = vld [vmem:[#allocation2] sm:$0xff]  ;;  %v346_v18 = vld [vmem:[#allocation2 + $0x8] sm:$0xff] }
  0x2f   : > { %325 = vst.msk [vmem:[#allocation2 + $0xa9] sm:$0xff] %vm224_vm0, %v292_v19  ;;  %326 = vst.msk [vmem:[#allocation2 + $0xb1] sm:$0xff] %vm224_vm0, %v293_v20 }
  0x30   : > { %327 = vst.msk [vmem:[#allocation2 + $0xc1] sm:$0xff] %vm224_vm0, %v294_v21  ;;  %328 = vst.msk [vmem:[#allocation2 + $0xc9] sm:$0xff] %vm224_vm0, %v295_v22  ;;  %v399_v30 = vld [vmem:[#allocation2 + $0x19] sm:$0xff]  ;;  %v400_v31 = vld [vmem:[#allocation2 + $0x21] sm:$0xff]  ;;  %v377_v22 = vpack.c.bf16 %v346_v18, %v345_v17 }
  0x31   : > { %329 = vst.msk [vmem:[#allocation2 + $0xd9] sm:$0xff] %vm224_vm0, %v296_v23  ;;  %330 = vst.msk [vmem:[#allocation2 + $0xe1] sm:$0xff] %vm224_vm0, %v297_v24  ;;  %v17816_v33 = vpack.c.bf16 %v400_v31, %v399_v30  ;;  %v401_v34 = vld [vmem:[#allocation2 + $0x31] sm:$0xff]  ;;  %v402_v35 = vld [vmem:[#allocation2 + $0x39] sm:$0xff] }
  0x32   : > { %331 = vst.msk [vmem:[#allocation2 + $0xf1] sm:$0xff] %vm224_vm0, %v298_v25  ;;  %332 = vst.msk [vmem:[#allocation2 + $0xf9] sm:$0xff] %vm224_vm0, %v299_v27  ;;  %v17820_v37 = vpack.c.bf16 %v402_v35, %v401_v34  ;;  %v403_v38 = vld [vmem:[#allocation2 + $0x49] sm:$0xff]  ;;  %v404_v39 = vld [vmem:[#allocation2 + $0x51] sm:$0xff] }
  0x33   : > { %333 = vst.msk [vmem:[#allocation2 + $0x109] sm:$0xff] %vm224_vm0, %v300_v28  ;;  %334 = vst.msk [vmem:[#allocation2 + $0x111] sm:$0xff] %vm224_vm0, %v301_v29  ;;  %14855 = vmatmul.mubr.msk.bf16.vlgmr.msra.gmra.mrb[0].mxu0 %vm224_vm0, %v17816_v33  ;;  %v405_v40 = vld [vmem:[#allocation2 + $0x61] sm:$0xff]  ;;  %v406_v41 = vld [vmem:[#allocation2 + $0x69] sm:$0xff]  ;;  %v17833_v43 = vpack.c.bf16 %v404_v39, %v403_v38 }
  0x34   : > { %335 = vst.msk [vmem:[#allocation2 + $0x121] sm:$0xff] %vm224_vm0, %v302_v32  ;;  %336 = vst.msk [vmem:[#allocation2 + $0x129] sm:$0xff] %vm224_vm0, %v303_v36  ;;  %14887 = vmatpush3.bf16.msra.mxu0 %v17758_v3  ;;  %14858 = vmatprep.mubr.msk.bf16.mxu0 %vm224_vm0, %v17820_v37  ;;  %v17835_v44 = vpack.c.bf16 %v406_v41, %v405_v40  ;;  %v407_v51 = vld [vmem:[#allocation2 + $0x79] sm:$0xff]  ;;  %v408_v52 = vld [vmem:[#allocation2 + $0x81] sm:$0xff] }
  0x35   : > { %14888 = vmatprep.subr.bf16.mxu0 %v17215_v26  ;;  %337 = vst.msk [vmem:[#allocation2 + $0x139] sm:$0xff] %vm224_vm0, %v304_v45  ;;  %338 = vst.msk [vmem:[#allocation2 + $0x141] sm:$0xff] %vm224_vm0, %v305_v46  ;;  %v409_v53 = vld [vmem:[#allocation2 + $0x91] sm:$0xff]  ;;  %v410_v54 = vld [vmem:[#allocation2 + $0x99] sm:$0xff]  ;;  %v17854_v55 = vpack.c.bf16 %v408_v52, %v407_v51 }
  0x36   : > { %339 = vst.msk [vmem:[#allocation2 + $0x151] sm:$0xff] %vm224_vm0, %v306_v47  ;;  %340 = vst.msk [vmem:[#allocation2 + $0x159] sm:$0xff] %vm224_vm0, %v307_v48  ;;  %v17856_v56 = vpack.c.bf16 %v410_v54, %v409_v53  ;;  %v411_v57 = vld [vmem:[#allocation2 + $0xa9] sm:$0xff]  ;;  %v412_v58 = vld [vmem:[#allocation2 + $0xb1] sm:$0xff] }
  0x37   : > { %341 = vst.msk [vmem:[#allocation2 + $0x169] sm:$0xff] %vm224_vm0, %v308_v49  ;;  %342 = vst.msk [vmem:[#allocation2 + $0x171] sm:$0xff] %vm224_vm0, %v309_v50  ;;  %v413_v59 = vld [vmem:[#allocation2 + $0xc1] sm:$0xff]  ;;  %v414_v60 = vld [vmem:[#allocation2 + $0xc9] sm:$0xff]  ;;  %v17862_v61 = vpack.c.bf16 %v412_v58, %v411_v57 }
  0x38   : > { %14889 = vmatpush3.bf16.msra.mxu0 %v17215_v26  ;;  %v17864_v62 = vpack.c.bf16 %v414_v60, %v413_v59  ;;  %v415_v63 = vld [vmem:[#allocation2 + $0xd9] sm:$0xff]  ;;  %v416_v0 = vld [vmem:[#allocation2 + $0xe1] sm:$0xff]  ;;  %v349_v25 = vld [vmem:[#allocation2 + $0x30] sm:$0xff] }
  0x39   : > { %14922 = vmatprep.subr.bf16.mxu0 %v17831_v42  ;;  %v417_v1 = vld [vmem:[#allocation2 + $0xf1] sm:$0xff]  ;;  %v418_v2 = vld [vmem:[#allocation2 + $0xf9] sm:$0xff]  ;;  %v17870_v3 = vpack.c.bf16 %v416_v0, %v415_v63  ;;  %v17217_v28 = vld [vmem:[%s21844_s1 + $0x28] sm:$0xff]  }
  0x3a   : > { %v17872_v4 = vpack.c.bf16 %v418_v2, %v417_v1  ;;  %v419_v5 = vld [vmem:[#allocation2 + $0x109] sm:$0xff]  ;;  %v420_v6 = vld [vmem:[#allocation2 + $0x111] sm:$0xff]  ;;  %v348_v24 = vld [vmem:[#allocation2 + $0x20] sm:$0xff] }
  0x3b   : > { %14859 = vmatmul.mubr.msk.bf16.gmra.mrb[4].mxu0 %vm224_vm0, %v17833_v43  ;;  %v421_v7 = vld [vmem:[#allocation2 + $0x121] sm:$0xff]  ;;  %v422_v8 = vld [vmem:[#allocation2 + $0x129] sm:$0xff]  ;;  %v17878_v9 = vpack.c.bf16 %v420_v6, %v419_v5  ;;  %v347_v23 = vld [vmem:[#allocation2 + $0x18] sm:$0xff] }
  0x3c   : > { %14862 = vmatprep.mubr.msk.bf16.mxu0 %vm224_vm0, %v17835_v44  ;;  %v17880_v10 = vpack.c.bf16 %v422_v8, %v421_v7  ;;  %v423_v11 = vld [vmem:[#allocation2 + $0x139] sm:$0xff]  ;;  %v424_v12 = vld [vmem:[#allocation2 + $0x141] sm:$0xff]  ;;  %v17899_v27 = vpack.c.bf16 %v348_v24, %v347_v23  ;;  %v352_v31 = vld [vmem:[#allocation2 + $0x50] sm:$0xff] }
  0x3d   : > { %v425_v13 = vld [vmem:[#allocation2 + $0x151] sm:$0xff]  ;;  %v426_v14 = vld [vmem:[#allocation2 + $0x159] sm:$0xff]  ;;  %v17886_v15 = vpack.c.bf16 %v424_v12, %v423_v11  ;;  %v351_v30 = vld [vmem:[#allocation2 + $0x48] sm:$0xff] }
  0x3e   : > { %v17888_v16 = vpack.c.bf16 %v426_v14, %v425_v13  ;;  %v427_v19 = vld [vmem:[#allocation2 + $0x169] sm:$0xff]  ;;  %v428_v20 = vld [vmem:[#allocation2 + $0x171] sm:$0xff]  ;;  %v353_v32 = vld [vmem:[#allocation2 + $0x60] sm:$0xff]  ;;  %v17916_v36 = vpack.c.bf16 %v352_v31, %v351_v30 }
  0x3f   : > { %v17894_v21 = vpack.c.bf16 %v428_v20, %v427_v19  ;;  %v350_v26 = vld [vmem:[#allocation2 + $0x38] sm:$0xff]  ;;  %v354_v34 = vld [vmem:[#allocation2 + $0x68] sm:$0xff]  ;;  %v17911_v35 = vld [vmem:[%s21844_s1 + $0x30] sm:$0xff]  }
  0x40   : > { %v17904_v29 = vpack.c.bf16 %v350_v26, %v349_v25  ;;  %v17918_v38 = vpack.c.bf16 %v354_v34, %v353_v32  ;;  %v355_v39 = vld [vmem:[#allocation2 + $0x78] sm:$0xff]  ;;  %v356_v40 = vld [vmem:[#allocation2 + $0x80] sm:$0xff]  ;;  %v357_v41 = vld [vmem:[#allocation2 + $0x90] sm:$0xff] }
  0x41   : > { %v17925_v45 = vpack.c.bf16 %v356_v40, %v355_v39  ;;  %v359_v47 = vld [vmem:[#allocation2 + $0xa8] sm:$0xff]  ;;  %v360_v48 = vld [vmem:[#allocation2 + $0xb0] sm:$0xff]  ;;  %v361_v49 = vld [vmem:[#allocation2 + $0xc0] sm:$0xff] }
  0x42   : > { %v362_v50 = vld [vmem:[#allocation2 + $0xc8] sm:$0xff]  ;;  %v17933_v51 = vpack.c.bf16 %v360_v48, %v359_v47  ;;  %v363_v53 = vld [vmem:[#allocation2 + $0xd8] sm:$0xff]  ;;  %v364_v54 = vld [vmem:[#allocation2 + $0xe0] sm:$0xff] }
  0x43   : > { %14863 = vmatmul.mubr.msk.bf16.gmra.mrb[8].mxu0 %vm224_vm0, %v17854_v55  ;;  %v17935_v52 = vpack.c.bf16 %v362_v50, %v361_v49  ;;  %v365_v57 = vld [vmem:[#allocation2 + $0xf0] sm:$0xff]  ;;  %v366_v58 = vld [vmem:[#allocation2 + $0xf8] sm:$0xff]  ;;  %v17941_v59 = vpack.c.bf16 %v364_v54, %v363_v53  ;;  %v367_v63 = vld [vmem:[#allocation2 + $0x108] sm:$0xff] }
  0x44   : > { %14866 = vmatprep.mubr.msk.bf16.mxu0 %vm224_vm0, %v17856_v56  ;;  %v17943_v60 = vpack.c.bf16 %v366_v58, %v365_v57  ;;  %v368_v0 = vld [vmem:[#allocation2 + $0x110] sm:$0xff]  ;;  %v369_v1 = vld [vmem:[#allocation2 + $0x120] sm:$0xff]  ;;  %v370_v2 = vld [vmem:[#allocation2 + $0x128] sm:$0xff] }
  0x45   : > { %v17949_v5 = vpack.c.bf16 %v368_v0, %v367_v63  ;;  %v17951_v6 = vpack.c.bf16 %v370_v2, %v369_v1  ;;  %v371_v7 = vld [vmem:[#allocation2 + $0x138] sm:$0xff]  ;;  %v372_v8 = vld [vmem:[#allocation2 + $0x140] sm:$0xff]  ;;  %v373_v11 = vld [vmem:[#allocation2 + $0x150] sm:$0xff] }
  0x46   : > { %v374_v12 = vld [vmem:[#allocation2 + $0x158] sm:$0xff]  ;;  %v17957_v13 = vpack.c.bf16 %v372_v8, %v371_v7  ;;  %v310_v17 = vld [vmem:[%s17765_s15 + $0xf0] sm:$0xff]  ;;  %v375_v19 = vld [vmem:[#allocation2 + $0x168] sm:$0xff] }
  0x47   : > { %v17959_v14 = vpack.c.bf16 %v374_v12, %v373_v11  ;;  %v311_v18 = vld [vmem:[%s17765_s15 + $0xf8] sm:$0xff]  ;;  %343 = vst.msk [vmem:[#allocation2 + $0x181] sm:$0xff] %vm224_vm0, %v310_v17  ;;  %v376_v20 = vld [vmem:[#allocation2 + $0x170] sm:$0xff]  ;;  %v17220_v48 = vld [vmem:[%s21844_s1 + $0x40] sm:$0xff]  }
  0x48   : > { %344 = vst.msk [vmem:[#allocation2 + $0x189] sm:$0xff] %vm224_vm0, %v311_v18  ;;  %v893_v23 = vld [vmem:[#allocation2 + $0xa] sm:$0xff]  ;;  %v17969_v24 = vpack.c.bf16 %v376_v20, %v375_v19  ;;  %v894_v26 = vld [vmem:[#allocation2 + $0x1a] sm:$0xff]  ;;  %v896_v30 = vld [vmem:[#allocation2 + $0x32] sm:$0xff] }
  0x49   : > { %v897_v31 = vld [vmem:[#allocation2 + $0x3a] sm:$0xff]  ;;  %v898_v40 = vld [vmem:[#allocation2 + $0x4a] sm:$0xff]  ;;  %v903_v53 = vld [vmem:[#allocation2 + $0x82] sm:$0xff] }
  0x4a   : > { %v17976_v34 = vpack.c.bf16 %v897_v31, %v896_v30  ;;  %v17219_v39 = vld [vmem:[%s21844_s1 + $0x38] sm:$0xff]   ;;  %v901_v47 = vld [vmem:[#allocation2 + $0x6a] sm:$0xff]  ;;  %v908_v2 = vld [vmem:[#allocation2 + $0xc2] sm:$0xff] }
  0x4b   : > { %14867 = vmatmul.mubr.msk.bf16.gmra.mrb[12].mxu0 %vm224_vm0, %v17862_v61  ;;  %v904_v54 = vld [vmem:[#allocation2 + $0x92] sm:$0xff]  ;;  %v905_v57 = vld [vmem:[#allocation2 + $0x9a] sm:$0xff]  ;;  %v906_v0 = vld [vmem:[#allocation2 + $0xaa] sm:$0xff] }
  0x4c   : > { %14870 = vmatprep.mubr.msk.bf16.mxu0 %vm224_vm0, %v17864_v62  ;;  %v17999_v63 = vpack.c.bf16 %v905_v57, %v904_v54  ;;  %v907_v1 = vld [vmem:[#allocation2 + $0xb2] sm:$0xff]  ;;  %v909_v7 = vld [vmem:[#allocation2 + $0xca] sm:$0xff]  ;;  %v910_v12 = vld [vmem:[#allocation2 + $0xda] sm:$0xff] }
  0x4d   : > { %v18005_v8 = vpack.c.bf16 %v907_v1, %v906_v0  ;;  %v18007_v11 = vpack.c.bf16 %v909_v7, %v908_v2  ;;  %v911_v17 = vld [vmem:[#allocation2 + $0xe2] sm:$0xff]  ;;  %v912_v18 = vld [vmem:[#allocation2 + $0xf2] sm:$0xff]  ;;  %v913_v19 = vld [vmem:[#allocation2 + $0xfa] sm:$0xff] }
  0x4e   : > { %v18013_v20 = vpack.c.bf16 %v911_v17, %v910_v12  ;;  %v923_v54 = vld [vmem:[#allocation2 + $0x172] sm:$0xff]  ;;  %v17221_v0 = vld [vmem:[%s21844_s1 + $0x48] sm:$0xff]   ;;  %v17224_v12 = vld [vmem:[%s21844_s1 + $0x60] sm:$0xff]  }
  0x4f   : > { %v17222_v1 = vld [vmem:[%s21844_s1 + $0x50] sm:$0xff]   ;;  %v17223_v7 = vld [vmem:[%s21844_s1 + $0x58] sm:$0xff]  }
  0x50   : > { %v2434_v17 = vld [vmem:[#allocation2 + $0xb1] sm:$0xff] }
  0x53   : > { %14871 = vmatmul.mubr.msk.bf16.gmra.mrb[16].mxu0 %vm224_vm0, %v17870_v3 }
  0x54   : > { %14874 = vmatprep.mubr.msk.bf16.mxu0 %vm224_vm0, %v17872_v4 }
  0x5b   : > { %14875 = vmatmul.mubr.msk.bf16.gmra.mrb[20].mxu0 %vm224_vm0, %v17878_v9 }
  0x5c   : > { %14878 = vmatprep.mubr.msk.bf16.mxu0 %vm224_vm0, %v17880_v10 }
  0x63   : > { %14879 = vmatmul.mubr.msk.bf16.gmra.mrb[24].mxu0 %vm224_vm0, %v17886_v15 }
  0x64   : > { %14882 = vmatprep.mubr.msk.bf16.mxu0 %vm224_vm0, %v17888_v16 }
  0x6b   : > { %14883 = vmatmul.mubr.msk.bf16.gmra.mrb[28].mxu0 %vm224_vm0, %v17894_v21 }
  0x6c   : > { %14890 = vmatprep.mubr.msk.bf16.mxu0 %vm224_vm0, %v377_v22  ;;  %v892_v22 = vld [vmem:[#allocation2 + $0x2] sm:$0xff] }
  0x6d   : > { %v924_v25 = vpack.c.bf16 %v893_v23, %v892_v22  ;;  %v18015_v22 = vpack.c.bf16 %v913_v19, %v912_v18  ;;  %v914_v23 = vld [vmem:[#allocation2 + $0x10a] sm:$0xff]  ;;  %v2435_v18 = vld [vmem:[#allocation2 + $0xc1] sm:$0xff] }
  0x6e   : > { %v2436_v19 = vld [vmem:[#allocation2 + $0xc9] sm:$0xff] }
  0x73   : > { %14891 = vmatmul.mubr.msk.bf16.vlgmr.msra.gmra.mrb[0].mxu0 %vm224_vm0, %v17899_v27 }
  0x74   : > { %14923 = vmatpush3.bf16.msra.mxu0 %v17831_v42  ;;  %14894 = vmatprep.mubr.msk.bf16.mxu0 %vm224_vm0, %v17904_v29  ;;  %v358_v42 = vld [vmem:[#allocation2 + $0x98] sm:$0xff] }
  0x75   : > { %14924 = vmatprep.subr.bf16.mxu0 %v17217_v28  ;;  %v17927_v46 = vpack.c.bf16 %v358_v42, %v357_v41  ;;  %v899_v41 = vld [vmem:[#allocation2 + $0x52] sm:$0xff]  ;;  %v900_v42 = vld [vmem:[#allocation2 + $0x62] sm:$0xff] }
  0x76   : > { %v17989_v49 = vpack.c.bf16 %v899_v41, %v898_v40  ;;  %v17991_v50 = vpack.c.bf16 %v901_v47, %v900_v42  ;;  %v919_v40 = vld [vmem:[#allocation2 + $0x142] sm:$0xff]  ;;  %v920_v41 = vld [vmem:[#allocation2 + $0x152] sm:$0xff]  ;;  %v921_v42 = vld [vmem:[#allocation2 + $0x15a] sm:$0xff] }
  0x78   : > { %14925 = vmatpush3.bf16.msra.mxu0 %v17217_v28  ;;  %v895_v28 = vld [vmem:[#allocation2 + $0x22] sm:$0xff] }
  0x79   : > { %14958 = vmatprep.subr.bf16.mxu0 %v17911_v35  ;;  %v17974_v32 = vpack.c.bf16 %v895_v28, %v894_v26  ;;  %v916_v26 = vld [vmem:[#allocation2 + $0x122] sm:$0xff]  ;;  %v917_v28 = vld [vmem:[#allocation2 + $0x12a] sm:$0xff] }
  0x7a   : > { %v18023_v31 = vpack.c.bf16 %v917_v28, %v916_v26  ;;  %v2437_v26 = vld [vmem:[#allocation2 + $0xd9] sm:$0xff]  ;;  %v2438_v28 = vld [vmem:[#allocation2 + $0xe1] sm:$0xff] }
  0x7b   : > { %14895 = vmatmul.mubr.msk.bf16.gmra.mrb[4].mxu0 %vm224_vm0, %v17916_v36 }
  0x7c   : > { %14898 = vmatprep.mubr.msk.bf16.mxu0 %vm224_vm0, %v17918_v38 }
  0x83   : > { %14899 = vmatmul.mubr.msk.bf16.gmra.mrb[8].mxu0 %vm224_vm0, %v17925_v45 }
  0x84   : > { %14902 = vmatprep.mubr.msk.bf16.mxu0 %vm224_vm0, %v17927_v46 }
  0x8b   : > { %14903 = vmatmul.mubr.msk.bf16.gmra.mrb[12].mxu0 %vm224_vm0, %v17933_v51 }
  0x8c   : > { %14906 = vmatprep.mubr.msk.bf16.mxu0 %vm224_vm0, %v17935_v52 }
  0x93   : > { %14907 = vmatmul.mubr.msk.bf16.gmra.mrb[16].mxu0 %vm224_vm0, %v17941_v59 }
  0x94   : > { %14910 = vmatprep.mubr.msk.bf16.mxu0 %vm224_vm0, %v17943_v60 }
  0x9b   : > { %14911 = vmatmul.mubr.msk.bf16.gmra.mrb[20].mxu0 %vm224_vm0, %v17949_v5 }
  0x9c   : > { %14914 = vmatprep.mubr.msk.bf16.mxu0 %vm224_vm0, %v17951_v6 }
  0xa3   : > { %14915 = vmatmul.mubr.msk.bf16.gmra.mrb[24].mxu0 %vm224_vm0, %v17957_v13 }
  0xa4   : > { %14918 = vmatprep.mubr.msk.bf16.mxu0 %vm224_vm0, %v17959_v14 }
  0xab   : > { %14919 = vmatmul.mubr.msk.bf16.gmra.mrb[28].mxu0 %vm224_vm0, %v17969_v24 }
  0xac   : > { %14926 = vmatprep.mubr.msk.bf16.mxu0 %vm224_vm0, %v924_v25  ;;  %v915_v25 = vld [vmem:[#allocation2 + $0x112] sm:$0xff] }
  0xad   : > { %v18021_v30 = vpack.c.bf16 %v915_v25, %v914_v23  ;;  %v2461_v25 = vpack.c.bf16 %v2436_v19, %v2435_v18 }
  0xb3   : > { %14927 = vmatmul.mubr.msk.bf16.vlgmr.msra.gmra.mrb[0].mxu0 %vm224_vm0, %v17974_v32 }
  0xb4   : > { %14959 = vmatpush3.bf16.msra.mxu0 %v17911_v35  ;;  %14930 = vmatprep.mubr.msk.bf16.mxu0 %vm224_vm0, %v17976_v34  ;;  %v902_v35 = vld [vmem:[#allocation2 + $0x7a] sm:$0xff] }
  0xb5   : > { %14960 = vmatprep.subr.bf16.mxu0 %v17219_v39  ;;  %v17997_v58 = vpack.c.bf16 %v903_v53, %v902_v35  ;;  %v18031_v35 = vpack.c.bf16 %v921_v42, %v920_v41  ;;  %v922_v53 = vld [vmem:[#allocation2 + $0x16a] sm:$0xff]  ;;  %v2462_v41 = vpack.c.bf16 %v2438_v28, %v2437_v26 }
  0xb6   : > { %v18037_v57 = vpack.c.bf16 %v923_v54, %v922_v53  ;;  %v2441_v53 = vld [vmem:[#allocation2 + $0x109] sm:$0xff]  ;;  %v2442_v54 = vld [vmem:[#allocation2 + $0x111] sm:$0xff] }
  0xb8   : > { %14961 = vmatpush3.bf16.msra.mxu0 %v17219_v39  ;;  %v918_v39 = vld [vmem:[#allocation2 + $0x13a] sm:$0xff] }
  0xb9   : > { %14994 = vmatprep.subr.bf16.mxu0 %v17220_v48  ;;  %v18029_v47 = vpack.c.bf16 %v919_v40, %v918_v39  ;;  %v2439_v39 = vld [vmem:[#allocation2 + $0xf1] sm:$0xff]  ;;  %v2440_v40 = vld [vmem:[#allocation2 + $0xf9] sm:$0xff] }
  0xba   : > { %v2463_v42 = vpack.c.bf16 %v2440_v40, %v2439_v39 }
  0xbb   : > { %14931 = vmatmul.mubr.msk.bf16.gmra.mrb[4].mxu0 %vm224_vm0, %v17989_v49 }
  0xbc   : > { %14934 = vmatprep.mubr.msk.bf16.mxu0 %vm224_vm0, %v17991_v50 }
  0xc3   : > { %14935 = vmatmul.mubr.msk.bf16.gmra.mrb[8].mxu0 %vm224_vm0, %v17997_v58 }
  0xc4   : > { %14938 = vmatprep.mubr.msk.bf16.mxu0 %vm224_vm0, %v17999_v63 }
  0xcb   : > { %14939 = vmatmul.mubr.msk.bf16.gmra.mrb[12].mxu0 %vm224_vm0, %v18005_v8 }
  0xcc   : > { %14942 = vmatprep.mubr.msk.bf16.mxu0 %vm224_vm0, %v18007_v11 }
  0xd3   : > { %14943 = vmatmul.mubr.msk.bf16.gmra.mrb[16].mxu0 %vm224_vm0, %v18013_v20 }
  0xd4   : > { %14946 = vmatprep.mubr.msk.bf16.mxu0 %vm224_vm0, %v18015_v22 }
  0xdb   : > { %14947 = vmatmul.mubr.msk.bf16.gmra.mrb[20].mxu0 %vm224_vm0, %v18021_v30 }
  0xdc   : > { %14950 = vmatprep.mubr.msk.bf16.mxu0 %vm224_vm0, %v18023_v31 }
  0xe3   : > { %14951 = vmatmul.mubr.msk.bf16.gmra.mrb[24].mxu0 %vm224_vm0, %v18029_v47 }
  0xe4   : > { %14954 = vmatprep.mubr.msk.bf16.mxu0 %vm224_vm0, %v18031_v35 }
  0xeb   : > { %14955 = vmatmul.mubr.msk.bf16.gmra.mrb[28].mxu0 %vm224_vm0, %v18037_v57 }
  0xec   : > { %14962 = vmatprep.mubr.msk.bf16.mxu0 %vm224_vm0, %v17899_v27  ;;  %v1228_v27 = vld [vmem:[#allocation2 + $0x180] sm:$0xff] }
  0xf3   : > { %14963 = vmatmul.mubr.msk.bf16.vlgmr.msra.gmra.mrb[0].mxu0 %vm224_vm0, %v17904_v29 }
  0xf4   : > { %14995 = vmatpush3.bf16.msra.mxu0 %v17220_v48  ;;  %14966 = vmatprep.mubr.msk.bf16.mxu0 %vm224_vm0, %v17916_v36  ;;  %v1229_v48 = vld [vmem:[#allocation2 + $0x188] sm:$0xff] }
  0xf5   : > { %14996 = vmatprep.subr.bf16.mxu0 %v17221_v0  ;;  %v18077_v2 = vpack.c.bf16 %v1229_v48, %v1228_v27  ;;  %v2464_v27 = vpack.c.bf16 %v2442_v54, %v2441_v53 }
  0xf8   : > { %14997 = vmatpush3.bf16.msra.mxu0 %v17221_v0  ;;  %v2443_v0 = vld [vmem:[#allocation2 + $0x121] sm:$0xff] }
  0xf9   : > { %15030 = vmatprep.subr.bf16.mxu0 %v17222_v1 }
  0xfb   : > { %14967 = vmatmul.mubr.msk.bf16.gmra.mrb[4].mxu0 %vm224_vm0, %v17918_v38 }
  0xfc   : > { %14970 = vmatprep.mubr.msk.bf16.mxu0 %vm224_vm0, %v17925_v45 }
 0x103   : > { %14971 = vmatmul.mubr.msk.bf16.gmra.mrb[8].mxu0 %vm224_vm0, %v17927_v46 }
 0x104   : > { %14974 = vmatprep.mubr.msk.bf16.mxu0 %vm224_vm0, %v17933_v51 }
 0x10b   : > { %14975 = vmatmul.mubr.msk.bf16.gmra.mrb[12].mxu0 %vm224_vm0, %v17935_v52 }
 0x10c   : > { %14978 = vmatprep.mubr.msk.bf16.mxu0 %vm224_vm0, %v17941_v59 }
 0x113   : > { %14979 = vmatmul.mubr.msk.bf16.gmra.mrb[16].mxu0 %vm224_vm0, %v17943_v60 }
 0x114   : > { %14982 = vmatprep.mubr.msk.bf16.mxu0 %vm224_vm0, %v17949_v5 }
 0x11b   : > { %14983 = vmatmul.mubr.msk.bf16.gmra.mrb[20].mxu0 %vm224_vm0, %v17951_v6 }
 0x11c   : > { %14986 = vmatprep.mubr.msk.bf16.mxu0 %vm224_vm0, %v17957_v13 }
 0x123   : > { %14987 = vmatmul.mubr.msk.bf16.gmra.mrb[24].mxu0 %vm224_vm0, %v17959_v14 }
 0x124   : > { %14990 = vmatprep.mubr.msk.bf16.mxu0 %vm224_vm0, %v17969_v24 }
 0x12b   : > { %14991 = vmatmul.mubr.msk.bf16.gmra.mrb[28].mxu0 %vm224_vm0, %v18077_v2 }
 0x12c   : > { %14998 = vmatprep.mubr.msk.bf16.mxu0 %vm224_vm0, %v17816_v33  ;;  %v1534_v33 = vld [vmem:[#allocation2 + $0x181] sm:$0xff] }
 0x133   : > { %14999 = vmatmul.mubr.msk.bf16.vlgmr.msra.gmra.mrb[0].mxu0 %vm224_vm0, %v17820_v37  ;;  %v1535_v37 = vld [vmem:[#allocation2 + $0x189] sm:$0xff] }
 0x134   : > { %15031 = vmatpush3.bf16.msra.mxu0 %v17222_v1  ;;  %15002 = vmatprep.mubr.msk.bf16.mxu0 %vm224_vm0, %v17833_v43  ;;  %v18117_v43 = vpack.c.bf16 %v1535_v37, %v1534_v33  ;;  %v2444_v1 = vld [vmem:[#allocation2 + $0x129] sm:$0xff]  ;;  %v2448_v33 = vld [vmem:[#allocation2 + $0x159] sm:$0xff] }
 0x135   : > { %15032 = vmatprep.subr.bf16.mxu0 %v17223_v7  ;;  %v2465_v48 = vpack.c.bf16 %v2444_v1, %v2443_v0 }
 0x138   : > { %15033 = vmatpush3.bf16.msra.mxu0 %v17223_v7  ;;  %v2446_v7 = vld [vmem:[#allocation2 + $0x141] sm:$0xff] }
 0x139   : > { %15066 = vmatprep.subr.bf16.mxu0 %v17224_v12 }
 0x13b   : > { %15003 = vmatmul.mubr.msk.bf16.gmra.mrb[4].mxu0 %vm224_vm0, %v17835_v44  ;;  %v17225_v44 = vld [vmem:[%s21844_s1 + $0x68] sm:$0xff]  }
 0x13c   : > { %15006 = vmatprep.mubr.msk.bf16.mxu0 %vm224_vm0, %v17854_v55  ;;  %v17226_v55 = vld [vmem:[%s21844_s1 + $0x70] sm:$0xff]  }
 0x143   : > { %15007 = vmatmul.mubr.msk.bf16.gmra.mrb[8].mxu0 %vm224_vm0, %v17856_v56  ;;  %v1840_v56 = vld [vmem:[#allocation2 + $0x182] sm:$0xff] }
 0x144   : > { %15010 = vmatprep.mubr.msk.bf16.mxu0 %vm224_vm0, %v17862_v61  ;;  %v1841_v61 = vld [vmem:[#allocation2 + $0x18a] sm:$0xff] }
 0x14b   : > { %15011 = vmatmul.mubr.msk.bf16.gmra.mrb[12].mxu0 %vm224_vm0, %v17864_v62  ;;  %v18157_v62 = vpack.c.bf16 %v1841_v61, %v1840_v56  ;;  %v2450_v56 = vld [vmem:[#allocation2 + $0x171] sm:$0xff] }
 0x14c   : > { %15014 = vmatprep.mubr.msk.bf16.mxu0 %vm224_vm0, %v17870_v3  ;;  %v17227_v3 = vld [vmem:[%s21844_s1 + $0x78] sm:$0xff]  }
 0x153   : > { %15015 = vmatmul.mubr.msk.bf16.gmra.mrb[16].mxu0 %vm224_vm0, %v17872_v4  ;;  %v17228_v4 = vld [vmem:[%s21844_s1 + $0x80] sm:$0xff]  }
 0x154   : > { %15018 = vmatprep.mubr.msk.bf16.mxu0 %vm224_vm0, %v17878_v9  ;;  %v2147_v9 = vld [vmem:[#allocation2 + $0x198] sm:$0xff] }
 0x15b   : > { %15019 = vmatmul.mubr.msk.bf16.gmra.mrb[20].mxu0 %vm224_vm0, %v17880_v10  ;;  %v2148_v10 = vld [vmem:[#allocation2 + $0x1a0] sm:$0xff] }
 0x15c   : > { %15022 = vmatprep.mubr.msk.bf16.mxu0 %vm224_vm0, %v17886_v15  ;;  %v2423_v15 = vld [vmem:[#allocation2 + $0x31] sm:$0xff] }
 0x163   : > { %15023 = vmatmul.mubr.msk.bf16.gmra.mrb[24].mxu0 %vm224_vm0, %v17888_v16  ;;  %v2424_v16 = vld [vmem:[#allocation2 + $0x39] sm:$0xff] }
 0x164   : > { %15026 = vmatprep.mubr.msk.bf16.mxu0 %vm224_vm0, %v17894_v21  ;;  %v2164_v21 = vpack.c.bf16 %v2148_v10, %v2147_v9 }
 0x16b   : > { %15027 = vmatmul.mubr.msk.bf16.gmra.mrb[28].mxu0 %vm224_vm0, %v18117_v43 }
 0x16c   : > { %15034 = vmatprep.mubr.msk.bf16.mxu0 %vm224_vm0, %v17974_v32  ;;  %v2433_v32 = vld [vmem:[#allocation2 + $0xa9] sm:$0xff] }
 0x16d   : > { %v2460_v23 = vpack.c.bf16 %v2434_v17, %v2433_v32 }
 0x173   : > { %15035 = vmatmul.mubr.msk.bf16.vlgmr.msra.gmra.mrb[0].mxu0 %vm224_vm0, %v17976_v34 }
 0x174   : > { %15067 = vmatpush3.bf16.msra.mxu0 %v17224_v12  ;;  %15038 = vmatprep.mubr.msk.bf16.mxu0 %vm224_vm0, %v17989_v49  ;;  %v2447_v12 = vld [vmem:[#allocation2 + $0x151] sm:$0xff] }
 0x175   : > { %15068 = vmatprep.subr.bf16.mxu0 %v17225_v44 }
 0x178   : > { %15069 = vmatpush3.bf16.msra.mxu0 %v17225_v44  ;;  %v2467_v44 = vpack.c.bf16 %v2448_v33, %v2447_v12 }
 0x179   : > { %15102 = vmatprep.subr.bf16.mxu0 %v17226_v55 }
 0x17b   : > { %15039 = vmatmul.mubr.msk.bf16.gmra.mrb[4].mxu0 %vm224_vm0, %v17991_v50 }
 0x17c   : > { %15042 = vmatprep.mubr.msk.bf16.mxu0 %vm224_vm0, %v17997_v58 }
 0x183   : > { %15043 = vmatmul.mubr.msk.bf16.gmra.mrb[8].mxu0 %vm224_vm0, %v17999_v63 }
 0x184   : > { %15046 = vmatprep.mubr.msk.bf16.mxu0 %vm224_vm0, %v18005_v8 }
 0x18b   : > { %15047 = vmatmul.mubr.msk.bf16.gmra.mrb[12].mxu0 %vm224_vm0, %v18007_v11 }
 0x18c   : > { %15050 = vmatprep.mubr.msk.bf16.mxu0 %vm224_vm0, %v18013_v20 }
 0x193   : > { %15051 = vmatmul.mubr.msk.bf16.gmra.mrb[16].mxu0 %vm224_vm0, %v18015_v22 }
 0x194   : > { %15054 = vmatprep.mubr.msk.bf16.mxu0 %vm224_vm0, %v18021_v30 }
 0x19b   : > { %15055 = vmatmul.mubr.msk.bf16.gmra.mrb[20].mxu0 %vm224_vm0, %v18023_v31 }
 0x19c   : > { %15058 = vmatprep.mubr.msk.bf16.mxu0 %vm224_vm0, %v18029_v47 }
 0x1a3   : > { %15059 = vmatmul.mubr.msk.bf16.gmra.mrb[24].mxu0 %vm224_vm0, %v18031_v35 }
 0x1a4   : > { %15062 = vmatprep.mubr.msk.bf16.mxu0 %vm224_vm0, %v18037_v57 }
 0x1ab   : > { %15063 = vmatmul.mubr.msk.bf16.gmra.mrb[28].mxu0 %vm224_vm0, %v18157_v62 }
 0x1ac   : > { %15070 = vmatprep.mubr.msk.bf16.mxu0 %vm224_vm0, %v17904_v29  ;;  %v2455_v29 = vpack.c.bf16 %v2424_v16, %v2423_v15 }
 0x1b3   : > { %15071 = vmatmul.mubr.msk.bf16.vlgmr.msra.gmra.mrb[0].mxu0 %vm224_vm0, %v17916_v36  ;;  %v2425_v36 = vld [vmem:[#allocation2 + $0x49] sm:$0xff] }
 0x1b4   : > { %15103 = vmatpush3.bf16.msra.mxu0 %v17226_v55  ;;  %15074 = vmatprep.mubr.msk.bf16.mxu0 %vm224_vm0, %v17918_v38  ;;  %v2426_v38 = vld [vmem:[#allocation2 + $0x51] sm:$0xff]  ;;  %v2449_v55 = vld [vmem:[#allocation2 + $0x169] sm:$0xff] }
 0x1b5   : > { %15104 = vmatprep.subr.bf16.mxu0 %v17227_v3  ;;  %v2468_v61 = vpack.c.bf16 %v2450_v56, %v2449_v55 }
 0x1b8   : > { %15105 = vmatpush3.bf16.msra.mxu0 %v17227_v3  ;;  %v2453_v3 = vld [vmem:[#allocation2 + $0x199] sm:$0xff] }
 0x1b9   : > { %15138 = vmatprep.subr.bf16.mxu0 %v17228_v4 }
 0x1bb   : > { %15075 = vmatmul.mubr.msk.bf16.gmra.mrb[4].mxu0 %vm224_vm0, %v17925_v45  ;;  %v2427_v45 = vld [vmem:[#allocation2 + $0x61] sm:$0xff] }
 0x1bc   : > { %15078 = vmatprep.mubr.msk.bf16.mxu0 %vm224_vm0, %v17927_v46  ;;  %v2428_v46 = vld [vmem:[#allocation2 + $0x69] sm:$0xff] }
 0x1c3   : > { %15079 = vmatmul.mubr.msk.bf16.gmra.mrb[8].mxu0 %vm224_vm0, %v17933_v51  ;;  %v2456_v51 = vpack.c.bf16 %v2426_v38, %v2425_v36 }
 0x1c4   : > { %15082 = vmatprep.mubr.msk.bf16.mxu0 %vm224_vm0, %v17935_v52  ;;  %v2457_v52 = vpack.c.bf16 %v2428_v46, %v2427_v45 }
 0x1cb   : > { %15083 = vmatmul.mubr.msk.bf16.gmra.mrb[12].mxu0 %vm224_vm0, %v17941_v59  ;;  %v17229_v59 = vld [vmem:[%s21844_s1 + $0x88] sm:$0xff]  }
 0x1cc   : > { %15086 = vmatprep.mubr.msk.bf16.mxu0 %vm224_vm0, %v17943_v60  ;;  %v2429_v60 = vld [vmem:[#allocation2 + $0x79] sm:$0xff] }
 0x1d3   : > { %15087 = vmatmul.mubr.msk.bf16.gmra.mrb[16].mxu0 %vm224_vm0, %v17949_v5  ;;  %v2430_v5 = vld [vmem:[#allocation2 + $0x81] sm:$0xff] }
 0x1d4   : > { %15090 = vmatprep.mubr.msk.bf16.mxu0 %vm224_vm0, %v17951_v6  ;;  %v2431_v6 = vld [vmem:[#allocation2 + $0x91] sm:$0xff] }
 0x1db   : > { %15091 = vmatmul.mubr.msk.bf16.gmra.mrb[20].mxu0 %vm224_vm0, %v17957_v13  ;;  %v2432_v13 = vld [vmem:[#allocation2 + $0x99] sm:$0xff] }
 0x1dc   : > { %15094 = vmatprep.mubr.msk.bf16.mxu0 %vm224_vm0, %v17959_v14  ;;  %v2458_v14 = vpack.c.bf16 %v2430_v5, %v2429_v60 }
 0x1e3   : > { %15095 = vmatmul.mubr.msk.bf16.gmra.mrb[24].mxu0 %vm224_vm0, %v17969_v24  ;;  %v2459_v24 = vpack.c.bf16 %v2432_v13, %v2431_v6 }
 0x1e4   : > { %15098 = vmatprep.mubr.msk.bf16.mxu0 %vm224_vm0, %v18077_v2  ;;  %v2445_v2 = vld [vmem:[#allocation2 + $0x139] sm:$0xff] }
 0x1e5   : > { %v2466_v37 = vpack.c.bf16 %v2446_v7, %v2445_v2 }
 0x1eb   : > { %15099 = vmatmul.mubr.msk.bf16.gmra.mrb[28].mxu0 %vm224_vm0, %v2164_v21 }
 0x1ec   : > { %15106 = vmatprep.mubr.msk.bf16.mxu0 %vm224_vm0, %v2455_v29 }
 0x1f3   : > { %15107 = vmatmul.mubr.msk.bf16.vlgmr.msra.gmra.mrb[0].mxu0 %vm224_vm0, %v2456_v51 }
 0x1f4   : > { %15139 = vmatpush3.bf16.msra.mxu0 %v17228_v4  ;;  %15110 = vmatprep.mubr.msk.bf16.mxu0 %vm224_vm0, %v2457_v52  ;;  %v2454_v4 = vld [vmem:[#allocation2 + $0x1a1] sm:$0xff] }
 0x1f5   : > { %15140 = vmatprep.subr.bf16.mxu0 %v17229_v59  ;;  %v2470_v9 = vpack.c.bf16 %v2454_v4, %v2453_v3 }
 0x1f8   : > { %15141 = vmatpush3.bf16.msra.mxu0 %v17229_v59 }
 0x1fb   : > { %15111 = vmatmul.mubr.msk.bf16.gmra.mrb[4].mxu0 %vm224_vm0, %v2458_v14 }
 0x1fc   : > { %15114 = vmatprep.mubr.msk.bf16.mxu0 %vm224_vm0, %v2459_v24 }
 0x203   : > { %15115 = vmatmul.mubr.msk.bf16.gmra.mrb[8].mxu0 %vm224_vm0, %v2460_v23 }
 0x204   : > { %15118 = vmatprep.mubr.msk.bf16.mxu0 %vm224_vm0, %v2461_v25 }
 0x20b   : > { %15119 = vmatmul.mubr.msk.bf16.gmra.mrb[12].mxu0 %vm224_vm0, %v2462_v41 }
 0x20c   : > { %15122 = vmatprep.mubr.msk.bf16.mxu0 %vm224_vm0, %v2463_v42 }
 0x213   : > { %15123 = vmatmul.mubr.msk.bf16.gmra.mrb[16].mxu0 %vm224_vm0, %v2464_v27 }
 0x214   : > { %15126 = vmatprep.mubr.msk.bf16.mxu0 %vm224_vm0, %v2465_v48 }
 0x21b   : > { %15127 = vmatmul.mubr.msk.bf16.gmra.mrb[20].mxu0 %vm224_vm0, %v2466_v37 }
 0x21c   : > { %15130 = vmatprep.mubr.msk.bf16.mxu0 %vm224_vm0, %v2467_v44 }
 0x223   : > { %15131 = vmatmul.mubr.msk.bf16.gmra.mrb[24].mxu0 %vm224_vm0, %v2468_v61 }
 0x224   : > { %15134 = vmatprep.mubr.msk.bf16.mxu0 %vm224_vm0, %v18117_v43 }
 0x22b   : > { %15135 = vmatmul.mubr.msk.bf16.gmra.mrb[28].mxu0 %vm224_vm0, %v2470_v9 }
 0x22c   : > { %15142 = vmatprep.mubr.msk.bf16.mxu0 %vm224_vm0, %v17976_v34  ;;  %v2759_v34 = vld [vmem:[#allocation2 + $0x19a] sm:$0xff] }
 0x233   : > { %15143 = vmatmul.mubr.msk.bf16.vlgmr.msra.gmra.mrb[0].mxu0 %vm224_vm0, %v17989_v49  ;;  %v2760_v49 = vld [vmem:[#allocation2 + $0x1a2] sm:$0xff] }
 0x234   : > { %15146 = vmatprep.mubr.msk.bf16.mxu0 %vm224_vm0, %v17991_v50  ;;  %v2776_v50 = vpack.c.bf16 %v2760_v49, %v2759_v34 }
 0x23b   : > { %15147 = vmatmul.mubr.msk.bf16.gmra.mrb[4].mxu0 %vm224_vm0, %v17997_v58  ;;  %v18252_v58 = vld [vmem:[%s21845_s2] ss:$0 sm:$0xff] }
 0x23c   : > { %15150 = vmatprep.mubr.msk.bf16.mxu0 %vm224_vm0, %v17999_v63 }
 0x243   : > { %15151 = vmatmul.mubr.msk.bf16.gmra.mrb[8].mxu0 %vm224_vm0, %v18005_v8 }
 0x244   : > { %15154 = vmatprep.mubr.msk.bf16.mxu0 %vm224_vm0, %v18007_v11 }
 0x24b   : > { %15155 = vmatmul.mubr.msk.bf16.gmra.mrb[12].mxu0 %vm224_vm0, %v18013_v20 }
 0x24c   : > { %15158 = vmatprep.mubr.msk.bf16.mxu0 %vm224_vm0, %v18015_v22 }
 0x253   : > { %15159 = vmatmul.mubr.msk.bf16.gmra.mrb[16].mxu0 %vm224_vm0, %v18021_v30 }
 0x254   : > { %15162 = vmatprep.mubr.msk.bf16.mxu0 %vm224_vm0, %v18023_v31 }
 0x25b   : > { %15163 = vmatmul.mubr.msk.bf16.gmra.mrb[20].mxu0 %vm224_vm0, %v18029_v47 }
 0x25c   : > { %15166 = vmatprep.mubr.msk.bf16.mxu0 %vm224_vm0, %v18031_v35 }
 0x263   : > { %15167 = vmatmul.mubr.msk.bf16.gmra.mrb[24].mxu0 %vm224_vm0, %v18037_v57 }
 0x264   : > { %15170 = vmatprep.mubr.msk.bf16.mxu0 %vm224_vm0, %v18157_v62 }
 0x26b   : > { %15171 = vmatmul.mubr.msk.bf16.gmra.mrb[28].mxu0 %vm224_vm0, %v2776_v50 }
 0x306   : > { %v15144_v63 = vpop.f32.mrb[0].mxu0 }
 0x307   : > { %v2876_v8 = vpop.f32.mrb[1].mxu0  ;;  %v18258_v30 = vadd.f32 %v15144_v63, %v18252_v58 }
 0x308   : > { %v18255_v11 = vadd.f32 %v18252_v58, %v2876_v8  ;;  %v15145_v20 = vpop.f32.mrb[2].mxu0 }
 0x309   : > { %v2879_v22 = vpop.f32.mrb[3].mxu0  ;;  %v18266_v35 = vadd.f32 %v15145_v20, %v18252_v58  ;;  %v3077_v62 = vsel %vm224_vm0, %v18258_v30, 0.0 }
 0x30a   : > { %v18261_v31 = vadd.f32 %v18252_v58, %v2879_v22  ;;  %v3074_v47 = vsel %vm224_vm0, %v18255_v11, 0.0 }
 0x30b   : > { %v3079_v21 = vsel %vm224_vm0, %v18266_v35, 0.0 }
 0x30c   : > { %v3075_v57 = vsel %vm224_vm0, %v18261_v31, 0.0 }
 0x30d   : > { %v3076_v43 = vadd.f32 %v3075_v57, %v3074_v47 }
 0x30e   : > { %v15148_v10 = vpop.f32.mrb[4].mxu0 }
 0x30f   : > { %v3078_v15 = vadd.f32 %v3077_v62, %v3076_v43  ;;  %v2892_v16 = vpop.f32.mrb[5].mxu0  ;;  %v18278_v46 = vadd.f32 %v15148_v10, %v18252_v58 }
 0x310   : > { %v18275_v29 = vadd.f32 %v18252_v58, %v2892_v16  ;;  %v15149_v36 = vpop.f32.mrb[6].mxu0 }
 0x311   : > { %v3080_v38 = vadd.f32 %v3079_v21, %v3078_v15  ;;  %v2895_v45 = vpop.f32.mrb[7].mxu0  ;;  %v18286_v60 = vadd.f32 %v15149_v36, %v18252_v58  ;;  %v3085_v13 = vsel %vm224_vm0, %v18278_v46, 0.0 }
 0x312   : > { %v3081_v51 = vsel %vm224_vm0, %v18275_v29, 0.0  ;;  %v18283_v52 = vadd.f32 %v18252_v58, %v2895_v45 }
 0x313   : > { %v3082_v59 = vadd.f32 %v3081_v51, %v3080_v38  ;;  %v3087_v17 = vsel %vm224_vm0, %v18286_v60, 0.0 }
 0x314   : > { %v3083_v5 = vsel %vm224_vm0, %v18283_v52, 0.0 }
 0x315   : > { %v3084_v6 = vadd.f32 %v3083_v5, %v3082_v59 }
 0x316   : > { %v15152_v14 = vpop.f32.mrb[8].mxu0 }
 0x317   : > { %v3086_v24 = vadd.f32 %v3085_v13, %v3084_v6  ;;  %v2908_v32 = vpop.f32.mrb[9].mxu0  ;;  %v18298_v26 = vadd.f32 %v15152_v14, %v18252_v58 }
 0x318   : > { %v18295_v18 = vadd.f32 %v18252_v58, %v2908_v32  ;;  %v15153_v19 = vpop.f32.mrb[10].mxu0 }
 0x319   : > { %v3088_v23 = vadd.f32 %v3087_v17, %v3086_v24  ;;  %v2911_v25 = vpop.f32.mrb[11].mxu0  ;;  %v18306_v41 = vadd.f32 %v15153_v19, %v18252_v58  ;;  %v3093_v54 = vsel %vm224_vm0, %v18298_v26, 0.0 }
 0x31a   : > { %v3089_v28 = vsel %vm224_vm0, %v18295_v18, 0.0  ;;  %v18303_v39 = vadd.f32 %v18252_v58, %v2911_v25 }
 0x31b   : > { %v3090_v40 = vadd.f32 %v3089_v28, %v3088_v23  ;;  %v3095_v48 = vsel %vm224_vm0, %v18306_v41, 0.0 }
 0x31c   : > { %v3091_v42 = vsel %vm224_vm0, %v18303_v39, 0.0 }
 0x31d   : > { %v3092_v53 = vadd.f32 %v3091_v42, %v3090_v40 }
 0x31e   : > { %v15156_v0 = vpop.f32.mrb[12].mxu0 }
 0x31f   : > { %v3094_v1 = vadd.f32 %v3093_v54, %v3092_v53  ;;  %v2924_v27 = vpop.f32.mrb[13].mxu0  ;;  %v18318_v37 = vadd.f32 %v15156_v0, %v18252_v58 }
 0x320   : > { %v18315_v2 = vadd.f32 %v18252_v58, %v2924_v27  ;;  %v15157_v7 = vpop.f32.mrb[14].mxu0 }
 0x321   : > { %v3096_v12 = vadd.f32 %v3095_v48, %v3094_v1  ;;  %v2927_v33 = vpop.f32.mrb[15].mxu0  ;;  %v18326_v61 = vadd.f32 %v15157_v7, %v18252_v58  ;;  %v3101_v9 = vsel %vm224_vm0, %v18318_v37, 0.0 }
 0x322   : > { %v3097_v44 = vsel %vm224_vm0, %v18315_v2, 0.0  ;;  %v18323_v55 = vadd.f32 %v18252_v58, %v2927_v33 }
 0x323   : > { %v3098_v56 = vadd.f32 %v3097_v44, %v3096_v12  ;;  %v3103_v63 = vsel %vm224_vm0, %v18326_v61, 0.0 }
 0x324   : > { %v3099_v3 = vsel %vm224_vm0, %v18323_v55, 0.0 }
 0x325   : > { %v3100_v4 = vadd.f32 %v3099_v3, %v3098_v56 }
 0x326   : > { %v15160_v34 = vpop.f32.mrb[16].mxu0 }
 0x327   : > { %v3102_v49 = vadd.f32 %v3101_v9, %v3100_v4  ;;  %v2940_v50 = vpop.f32.mrb[17].mxu0  ;;  %v18338_v57 = vadd.f32 %v15160_v34, %v18252_v58 }
 0x328   : > { %v18335_v8 = vadd.f32 %v18252_v58, %v2940_v50  ;;  %v15161_v20 = vpop.f32.mrb[18].mxu0 }
 0x329   : > { %v3104_v22 = vadd.f32 %v3103_v63, %v3102_v49  ;;  %v2943_v47 = vpop.f32.mrb[19].mxu0  ;;  %v18346_v15 = vadd.f32 %v15161_v20, %v18252_v58  ;;  %v3109_v36 = vsel %vm224_vm0, %v18338_v57, 0.0 }
 0x32a   : > { %v3105_v43 = vsel %vm224_vm0, %v18335_v8, 0.0  ;;  %v18343_v62 = vadd.f32 %v18252_v58, %v2943_v47 }
 0x32b   : > { %v3106_v10 = vadd.f32 %v3105_v43, %v3104_v22  ;;  %v3111_v59 = vsel %vm224_vm0, %v18346_v15, 0.0 }
 0x32c   : > { %v3107_v16 = vsel %vm224_vm0, %v18343_v62, 0.0 }
 0x32d   : > { %v3108_v21 = vadd.f32 %v3107_v16, %v3106_v10 }
 0x32e   : > { %v15164_v38 = vpop.f32.mrb[20].mxu0 }
 0x32f   : > { %v3110_v45 = vadd.f32 %v3109_v36, %v3108_v21  ;;  %v2956_v51 = vpop.f32.mrb[21].mxu0  ;;  %v3064_v24 = vadd.f32 %v15164_v38, %v18252_v58 }
 0x330   : > { %v18355_v5 = vadd.f32 %v18252_v58, %v2956_v51  ;;  %v15165_v6 = vpop.f32.mrb[22].mxu0 }
 0x331   : > { %v3112_v13 = vadd.f32 %v3111_v59, %v3110_v45  ;;  %v2959_v14 = vpop.f32.mrb[23].mxu0  ;;  %v3065_v23 = vadd.f32 %v15165_v6, %v18252_v58  ;;  %v3117_v40 = vsel %vm224_vm0, %v3064_v24, 0.0 }
 0x332   : > { %v3113_v32 = vsel %vm224_vm0, %v18355_v5, 0.0  ;;  %v3063_v17 = vadd.f32 %v18252_v58, %v2959_v14 }
 0x333   : > { %v3114_v19 = vadd.f32 %v3113_v32, %v3112_v13  ;;  %v3119_v0 = vsel %vm224_vm0, %v3065_v23, 0.0 }
 0x334   : > { %v3115_v25 = vsel %vm224_vm0, %v3063_v17, 0.0 }
 0x335   : > { %v3116_v28 = vadd.f32 %v3115_v25, %v3114_v19 }
 0x336   : > { %v15168_v42 = vpop.f32.mrb[24].mxu0 }
 0x337   : > { %v3118_v53 = vadd.f32 %v3117_v40, %v3116_v28  ;;  %v2972_v54 = vpop.f32.mrb[25].mxu0  ;;  %v3068_v12 = vadd.f32 %v15168_v42, %v18252_v58 }
 0x338   : > { %v3066_v1 = vadd.f32 %v18252_v58, %v2972_v54  ;;  %v15169_v27 = vpop.f32.mrb[26].mxu0 }
 0x339   : > { %v3120_v48 = vadd.f32 %v3119_v0, %v3118_v53  ;;  %v2975_v7 = vpop.f32.mrb[27].mxu0  ;;  %v3069_v3 = vadd.f32 %v15169_v27, %v18252_v58  ;;  %v3125_v34 = vsel %vm224_vm0, %v3068_v12, 0.0 }
 0x33a   : > { %v3121_v33 = vsel %vm224_vm0, %v3066_v1, 0.0  ;;  %v3067_v44 = vadd.f32 %v18252_v58, %v2975_v7 }
 0x33b   : > { %v3122_v56 = vadd.f32 %v3121_v33, %v3120_v48  ;;  %v3127_v20 = vsel %vm224_vm0, %v3069_v3, 0.0 }
 0x33c   : > { %v3123_v4 = vsel %vm224_vm0, %v3067_v44, 0.0 }
 0x33d   : > { %v3124_v9 = vadd.f32 %v3123_v4, %v3122_v56 }
 0x33e   : > { %v15172_v49 = vpop.f32.mrb[28].mxu0 }
 0x33f   : > { %v3126_v50 = vadd.f32 %v3125_v34, %v3124_v9  ;;  %v2988_v63 = vpop.f32.mrb[29].mxu0  ;;  %v3072_v16 = vadd.f32 %v15172_v49, %v18252_v58 }
 0x340   : > { %v3070_v22 = vadd.f32 %v18252_v58, %v2988_v63  ;;  %v15173_v47 = vpop.f32.mrb[30].mxu0 }
 0x341   : > { %v3128_v43 = vadd.f32 %v3127_v20, %v3126_v50  ;;  %v2991_v10 = vpop.f32.mrb[31].mxu0  ;;  %v3073_v45 = vadd.f32 %v15173_v47, %v18252_v58  ;;  %v3133_v6 = vsel %vm224_vm0, %v3072_v16, 0.0 }
 0x342   : > { %v3129_v21 = vsel %vm224_vm0, %v3070_v22, 0.0  ;;  %v3071_v36 = vadd.f32 %v18252_v58, %v2991_v10 }
 0x343   : > { %v3130_v38 = vadd.f32 %v3129_v21, %v3128_v43  ;;  %v3135_v14 = vsel %vm224_vm0, %v3073_v45, 0.0 }
 0x344   : > { %v3131_v51 = vsel %vm224_vm0, %v3071_v36, 0.0 }
 0x345   : > { %v3132_v59 = vadd.f32 %v3131_v51, %v3130_v38 }
 0x347   : > { %v3134_v13 = vadd.f32 %v3133_v6, %v3132_v59 }
 0x349   : > { %v3136_v32 = vadd.f32 %v3135_v14, %v3134_v13 }
 0x34b   : > { %v3137_v19 = vrot.slane %v3136_v32, 4 }
 0x34d   : > { %v3138_v25 = vadd.f32 %v3137_v19, %v3136_v32 }
 0x34f   : > { %v3139_v28 = vrot.slane %v3138_v25, 2 }
 0x351   : > { %v3140_v40 = vadd.f32 %v3139_v28, %v3138_v25 }
 0x353   : > { %v3141_v42 = vrot.slane %v3140_v40, 1 }
 0x355   : > { %v3142_v53 = vadd.f32 %v3141_v42, %v3140_v40 }
 0x357   : > { %v3143_v54 = vmul.f32 0.00390625, %v3142_v53 }
 0x359   : > { %v18382_v0 = vsub.f32 %v18303_v39, %v3143_v54  ;;  %v18385_v58 = vsub.f32 %v18306_v41, %v3143_v54  ;;  %v18388_v27 = vsub.f32 %v18315_v2, %v3143_v54  ;;  %v18391_v48 = vsub.f32 %v18323_v55, %v3143_v54 }
 0x35a   : > { %v18394_v7 = vsub.f32 %v18318_v37, %v3143_v54  ;;  %v18397_v33 = vsub.f32 %v18326_v61, %v3143_v54  ;;  %v18400_v56 = vsub.f32 %v18335_v8, %v3143_v54  ;;  %v18403_v39 = vsub.f32 %v18343_v62, %v3143_v54 }
 0x35b   : > { %v18406_v41 = vsub.f32 %v18338_v57, %v3143_v54  ;;  %v18409_v2 = vsub.f32 %v18346_v15, %v3143_v54  ;;  %v18412_v55 = vsub.f32 %v18355_v5, %v3143_v54  ;;  %v18414_v37 = vsub.f32 %v3063_v17, %v3143_v54 }
 0x35c   : > { %v18416_v4 = vsub.f32 %v3064_v24, %v3143_v54  ;;  %v18418_v61 = vsub.f32 %v3065_v23, %v3143_v54  ;;  %v18420_v8 = vsub.f32 %v3066_v1, %v3143_v54  ;;  %v18422_v9 = vsub.f32 %v3067_v44, %v3143_v54 }
 0x35d   : > { %v18424_v62 = vsub.f32 %v3068_v12, %v3143_v54  ;;  %v18426_v57 = vsub.f32 %v3069_v3, %v3143_v54  ;;  %v18428_v34 = vsub.f32 %v3070_v22, %v3143_v54  ;;  %v18430_v15 = vsub.f32 %v3071_v36, %v3143_v54 }
 0x35e   : > { %v18432_v5 = vsub.f32 %v3072_v16, %v3143_v54  ;;  %v18434_v17 = vsub.f32 %v3073_v45, %v3143_v54  ;;  %v18437_v24 = vsub.f32 %v18255_v11, %v3143_v54  ;;  %v18440_v23 = vsub.f32 %v18261_v31, %v3143_v54 }
 0x35f   : > { %v18443_v1 = vsub.f32 %v18258_v30, %v3143_v54  ;;  %v18446_v12 = vsub.f32 %v18266_v35, %v3143_v54  ;;  %v18453_v49 = vsub.f32 %v18275_v29, %v3143_v54  ;;  %v18458_v31 = vsub.f32 %v18283_v52, %v3143_v54 }
 0x360   : > { %v3176_v44 = vmul.f32 %v18437_v24, %v18437_v24  ;;  %v3177_v3 = vmul.f32 %v18440_v23, %v18440_v23  ;;  %v18465_v20 = vsub.f32 %v18278_v46, %v3143_v54  ;;  %v18471_v52 = vsub.f32 %v18286_v60, %v3143_v54 }
 0x361   : > { %v3178_v11 = vmul.f32 %v18443_v1, %v18443_v1  ;;  %v3179_v30 = vmul.f32 %v18446_v12, %v18446_v12  ;;  %v3180_v29 = vmul.f32 %v18453_v49, %v18453_v49  ;;  %v3181_v43 = vmul.f32 %v18458_v31, %v18458_v31 }
 0x362   : > { %v3208_v35 = vsel %vm224_vm0, %v3176_v44, 0.0  ;;  %v3209_v50 = vsel %vm224_vm0, %v3177_v3, 0.0  ;;  %v18477_v21 = vsub.f32 %v18295_v18, %v3143_v54  ;;  %v3182_v46 = vmul.f32 %v18465_v20, %v18465_v20 }
 0x363   : > { %v3210_v63 = vadd.f32 %v3209_v50, %v3208_v35  ;;  %v3211_v22 = vsel %vm224_vm0, %v3178_v11, 0.0  ;;  %v3213_v10 = vsel %vm224_vm0, %v3179_v30, 0.0  ;;  %v3215_v36 = vsel %vm224_vm0, %v3180_v29, 0.0 }
 0x364   : > { %v3183_v45 = vmul.f32 %v18471_v52, %v18471_v52  ;;  %v3217_v60 = vsel %vm224_vm0, %v3181_v43, 0.0  ;;  %v18486_v59 = vsub.f32 %v18298_v26, %v3143_v54  ;;  %v3184_v6 = vmul.f32 %v18477_v21, %v18477_v21 }
 0x365   : > { %v3212_v47 = vadd.f32 %v3211_v22, %v3210_v63  ;;  %v3219_v18 = vsel %vm224_vm0, %v3182_v46, 0.0  ;;  %v3185_v14 = vmul.f32 %v18382_v0, %v18382_v0  ;;  %v3187_v26 = vmul.f32 %v18385_v58, %v18385_v58 }
 0x366   : > { %v3221_v32 = vsel %vm224_vm0, %v3183_v45, 0.0  ;;  %v3186_v25 = vmul.f32 %v18486_v59, %v18486_v59  ;;  %v3223_v28 = vsel %vm224_vm0, %v3184_v6, 0.0  ;;  %v3188_v54 = vmul.f32 %v18388_v27, %v18388_v27 }
 0x367   : > { %v3214_v16 = vadd.f32 %v3213_v10, %v3212_v47  ;;  %v3225_v42 = vsel %vm224_vm0, %v3185_v14, 0.0  ;;  %v3189_v11 = vmul.f32 %v18391_v48, %v18391_v48  ;;  %v3229_v30 = vsel %vm224_vm0, %v3187_v26, 0.0 }
 0x368   : > { %v3227_v44 = vsel %vm224_vm0, %v3186_v25, 0.0  ;;  %v3190_v50 = vmul.f32 %v18394_v7, %v18394_v7  ;;  %v3231_v63 = vsel %vm224_vm0, %v3188_v54, 0.0  ;;  %v3191_v22 = vmul.f32 %v18397_v33, %v18397_v33 }
 0x369   : > { %v3216_v38 = vadd.f32 %v3215_v36, %v3214_v16  ;;  %v3233_v47 = vsel %vm224_vm0, %v3189_v11, 0.0  ;;  %v3192_v10 = vmul.f32 %v18400_v56, %v18400_v56  ;;  %v3193_v36 = vmul.f32 %v18403_v39, %v18403_v39  ;;  %v17230_v11 = vld [vmem:[%s21844_s1 + $0xa0] sm:$0xff]  }
 0x36a   : > { %v3235_v16 = vsel %vm224_vm0, %v3190_v50, 0.0  ;;  %15174 = vmatprep.subr.bf16.mxu1 %v17230_v11 }
 0x36b   : > { %v3218_v51 = vadd.f32 %v3217_v60, %v3216_v38  ;;  %v3237_v38 = vsel %vm224_vm0, %v3191_v22, 0.0  ;;  %v3194_v60 = vmul.f32 %v18406_v41, %v18406_v41  ;;  %v3637_v22 = vld [vmem:[#allocation2 + $0x9] sm:$0xff]  ;;  %15175 = vmatpush3.bf16.msra.mxu1 %v17230_v11 }
 0x36d   : > { %v3220_v13 = vadd.f32 %v3219_v18, %v3218_v51  ;;  %v3239_v51 = vsel %vm224_vm0, %v3192_v10, 0.0  ;;  %v3195_v18 = vmul.f32 %v18409_v2, %v18409_v2  ;;  %v3201_v10 = vmul.f32 %v18422_v9, %v18422_v9 }
 0x36f   : > { %v3222_v19 = vadd.f32 %v3221_v32, %v3220_v13  ;;  %v3241_v13 = vsel %vm224_vm0, %v3193_v36, 0.0  ;;  %v3196_v32 = vmul.f32 %v18412_v55, %v18412_v55 }
 0x371   : > { %v3224_v40 = vadd.f32 %v3223_v28, %v3222_v19  ;;  %v3243_v19 = vsel %vm224_vm0, %v3194_v60, 0.0  ;;  %v3197_v28 = vmul.f32 %v18414_v37, %v18414_v37 }
 0x373   : > { %v3226_v53 = vadd.f32 %v3225_v42, %v3224_v40  ;;  %v3245_v40 = vsel %vm224_vm0, %v3195_v18, 0.0  ;;  %v3198_v42 = vmul.f32 %v18416_v4, %v18416_v4 }
 0x375   : > { %v3228_v3 = vadd.f32 %v3227_v44, %v3226_v53  ;;  %v3247_v53 = vsel %vm224_vm0, %v3196_v32, 0.0  ;;  %v3199_v44 = vmul.f32 %v18418_v61, %v18418_v61  ;;  %v3251_v50 = vsel %vm224_vm0, %v3198_v42, 0.0 }
 0x377   : > { %v3230_v35 = vadd.f32 %v3229_v30, %v3228_v3  ;;  %v3249_v3 = vsel %vm224_vm0, %v3197_v28, 0.0 }
 0x379   : > { %v3232_v29 = vadd.f32 %v3231_v63, %v3230_v35  ;;  %v3200_v35 = vmul.f32 %v18420_v8, %v18420_v8  ;;  %v17231_v63 = vld [vmem:[%s21844_s1 + $0xa8] sm:$0xff]  }
 0x37a   : > { %15176 = vmatprep.subr.bf16.mxu1 %v17231_v63 }
 0x37b   : > { %v3234_v43 = vadd.f32 %v3233_v47, %v3232_v29  ;;  %v3636_v29 = vld [vmem:[#allocation2 + $0x1] sm:$0xff]  ;;  %15177 = vmatpush3.bf16.msra.mxu1 %v17231_v63 }
 0x37d   : > { %v3236_v46 = vadd.f32 %v3235_v16, %v3234_v43  ;;  %v3668_v43 = vpack.c.bf16 %v3637_v22, %v3636_v29  ;;  %v3253_v16 = vsel %vm224_vm0, %v3199_v44, 0.0 }
 0x37f   : > { %v3238_v45 = vadd.f32 %v3237_v38, %v3236_v46  ;;  %v18551_v46 = vld [vmem:[%s21844_s1 + $0x90] sm:$0xff]   ;;  %15178 = vmatprep.mubr.msk.bf16.mxu1 %vm224_vm0, %v3668_v43  ;;  %v3202_v38 = vmul.f32 %v18424_v62, %v18424_v62 }
 0x380   : > { %15210 = vmatprep.subr.bf16.mxu1 %v18551_v46 }
 0x381   : > { %v3240_v6 = vadd.f32 %v3239_v51, %v3238_v45  ;;  %v3255_v45 = vsel %vm224_vm0, %v3200_v35, 0.0  ;;  %v3203_v51 = vmul.f32 %v18426_v57, %v18426_v57 }
 0x383   : > { %v3242_v14 = vadd.f32 %v3241_v13, %v3240_v6  ;;  %v3257_v6 = vsel %vm224_vm0, %v3201_v10, 0.0  ;;  %v3204_v13 = vmul.f32 %v18428_v34, %v18428_v34 }
 0x385   : > { %v3244_v25 = vadd.f32 %v3243_v19, %v3242_v14  ;;  %v3259_v14 = vsel %vm224_vm0, %v3202_v38, 0.0  ;;  %v3205_v19 = vmul.f32 %v18430_v15, %v18430_v15  ;;  %v18578_v38 = vld [vmem:[%s21846_s3] ss:$0 sm:$0xff] }
 0x387   : > { %v3246_v26 = vadd.f32 %v3245_v40, %v3244_v25  ;;  %v3261_v25 = vsel %vm224_vm0, %v3203_v51, 0.0  ;;  %v3206_v40 = vmul.f32 %v18432_v5, %v18432_v5 }
 0x389   : > { %v3248_v54 = vadd.f32 %v3247_v53, %v3246_v26  ;;  %v3263_v26 = vsel %vm224_vm0, %v3204_v13, 0.0  ;;  %v3207_v53 = vmul.f32 %v18434_v17, %v18434_v17 }
 0x38b   : > { %v3250_v30 = vadd.f32 %v3249_v3, %v3248_v54  ;;  %v3265_v54 = vsel %vm224_vm0, %v3205_v19, 0.0  ;;  %v3267_v3 = vsel %vm224_vm0, %v3206_v40, 0.0 }
 0x38d   : > { %v3252_v47 = vadd.f32 %v3251_v50, %v3250_v30  ;;  %v3269_v30 = vsel %vm224_vm0, %v3207_v53, 0.0 }
 0x38f   : > { %v3254_v36 = vadd.f32 %v3253_v16, %v3252_v47 }
 0x391   : > { %v3256_v60 = vadd.f32 %v3255_v45, %v3254_v36 }
 0x393   : > { %v3258_v18 = vadd.f32 %v3257_v6, %v3256_v60  ;;  %v18584_v60 = vld [vmem:[%s21847_s4] ss:$0 sm:$0xff] }
 0x395   : > { %v3260_v32 = vadd.f32 %v3259_v14, %v3258_v18 }
 0x397   : > { %v3262_v28 = vadd.f32 %v3261_v25, %v3260_v32 }
 0x399   : > { %v3264_v42 = vadd.f32 %v3263_v26, %v3262_v28 }
 0x39b   : > { %v3266_v44 = vadd.f32 %v3265_v54, %v3264_v42 }
 0x39d   : > { %v3268_v11 = vadd.f32 %v3267_v3, %v3266_v44 }
 0x39f   : > { %v3270_v35 = vadd.f32 %v3269_v30, %v3268_v11 }
 0x3a1   : > { %v3271_v50 = vrot.slane %v3270_v35, 4 }
 0x3a3   : > { %v3272_v63 = vadd.f32 %v3271_v50, %v3270_v35 }
 0x3a5   : > { %v3273_v29 = vrot.slane %v3272_v63, 2 }
 0x3a7   : > { %v3274_v22 = vadd.f32 %v3273_v29, %v3272_v63 }
 0x3a9   : > { %v3275_v47 = vrot.slane %v3274_v22, 1 }
 0x3ab   : > { %v3276_v43 = vadd.f32 %v3275_v47, %v3274_v22 }
 0x3ad   : > { %v3277_v10 = vmul.f32 0.00390625, %v3276_v43 }
 0x3af   : > { %v3278_v16 = vadd.f32 1e-05, %v3277_v10 }
 0x3b1   : > { %17284 = vrsqrt.f32 %v3278_v16 }
 0x3bb   : > { %v17285_v36 = vpop.eup %17284 }
 0x3bc   : > { %v3309_v45 = vmul.f32 %v17285_v36, %v18430_v15  ;;  %v3280_v13 = vmul.f32 %v17285_v36, %v18437_v24  ;;  %v3281_v14 = vmul.f32 %v17285_v36, %v18440_v23  ;;  %v3282_v32 = vmul.f32 %v17285_v36, %v18443_v1 }
 0x3bd   : > { %v3283_v19 = vmul.f32 %v17285_v36, %v18446_v12  ;;  %v3284_v15 = vmul.f32 %v17285_v36, %v18453_v49  ;;  %v3285_v25 = vmul.f32 %v17285_v36, %v18458_v31  ;;  %v3286_v28 = vmul.f32 %v17285_v36, %v18465_v20 }
 0x3be   : > { %v3348_v51 = vmul.f32 %v18578_v38, %v3309_v45  ;;  %v3287_v40 = vmul.f32 %v17285_v36, %v18471_v52  ;;  %v3288_v26 = vmul.f32 %v17285_v36, %v18477_v21  ;;  %v3289_v42 = vmul.f32 %v17285_v36, %v18382_v0 }
 0x3bf   : > { %v3290_v24 = vmul.f32 %v17285_v36, %v18486_v59  ;;  %v3291_v23 = vmul.f32 %v17285_v36, %v18385_v58  ;;  %v3292_v1 = vmul.f32 %v17285_v36, %v18388_v27  ;;  %v3293_v12 = vmul.f32 %v17285_v36, %v18391_v48 }
 0x3c0   : > { %v3387_v6 = vadd.f32 %v18584_v60, %v3348_v51  ;;  %v3294_v49 = vmul.f32 %v17285_v36, %v18394_v7  ;;  %v3295_v31 = vmul.f32 %v17285_v36, %v18397_v33  ;;  %v3296_v20 = vmul.f32 %v17285_v36, %v18400_v56 }
 0x3c1   : > { %v3297_v52 = vmul.f32 %v17285_v36, %v18403_v39  ;;  %v3298_v21 = vmul.f32 %v17285_v36, %v18406_v41  ;;  %v3299_v0 = vmul.f32 %v17285_v36, %v18409_v2  ;;  %v3300_v59 = vmul.f32 %v17285_v36, %v18412_v55 }
 0x3c2   : > { %v3452_v18 = vmul.f32 0.70710677, %v3387_v6  ;;  %v3419_v53 = vmul.f32 0.5, %v3387_v6  ;;  %v3301_v58 = vmul.f32 %v17285_v36, %v18414_v37  ;;  %v3302_v27 = vmul.f32 %v17285_v36, %v18416_v4 }
 0x3c3   : > { %v3303_v48 = vmul.f32 %v17285_v36, %v18418_v61  ;;  %v3304_v7 = vmul.f32 %v17285_v36, %v18420_v8  ;;  %v3305_v56 = vmul.f32 %v17285_v36, %v18422_v9  ;;  %v3306_v39 = vmul.f32 %v17285_v36, %v18424_v62 }
 0x3c4   : > { %17286 = verf.f32 %v3452_v18  ;;  %v3307_v54 = vmul.f32 %v17285_v36, %v18426_v57  ;;  %v3308_v41 = vmul.f32 %v17285_v36, %v18428_v34  ;;  %v3310_v55 = vmul.f32 %v17285_v36, %v18432_v5 }
 0x3c5   : > { %v3311_v37 = vmul.f32 %v17285_v36, %v18434_v17  ;;  %v3319_v4 = vmul.f32 %v18578_v38, %v3280_v13  ;;  %v3320_v61 = vmul.f32 %v18578_v38, %v3281_v14  ;;  %v3321_v8 = vmul.f32 %v18578_v38, %v3282_v32 }
 0x3c6   : > { %v3322_v44 = vmul.f32 %v18578_v38, %v3283_v19  ;;  %v3323_v9 = vmul.f32 %v18578_v38, %v3284_v15  ;;  %v3324_v57 = vmul.f32 %v18578_v38, %v3285_v25  ;;  %v3325_v34 = vmul.f32 %v18578_v38, %v3286_v28 }
 0x3c7   : > { %v3326_v3 = vmul.f32 %v18578_v38, %v3287_v40  ;;  %v3327_v5 = vmul.f32 %v18578_v38, %v3288_v26  ;;  %v3328_v17 = vmul.f32 %v18578_v38, %v3289_v42  ;;  %v3329_v11 = vmul.f32 %v18578_v38, %v3290_v24 }
 0x3c8   : > { %v3330_v30 = vmul.f32 %v18578_v38, %v3291_v23  ;;  %v3331_v35 = vmul.f32 %v18578_v38, %v3292_v1  ;;  %v3332_v50 = vmul.f32 %v18578_v38, %v3293_v12  ;;  %v3333_v63 = vmul.f32 %v18578_v38, %v3294_v49 }
 0x3c9   : > { %v3334_v29 = vmul.f32 %v18578_v38, %v3295_v31  ;;  %v3335_v22 = vmul.f32 %v18578_v38, %v3296_v20  ;;  %v3336_v47 = vmul.f32 %v18578_v38, %v3297_v52  ;;  %v3337_v43 = vmul.f32 %v18578_v38, %v3298_v21 }
 0x3ca   : > { %v3338_v10 = vmul.f32 %v18578_v38, %v3299_v0  ;;  %v3339_v16 = vmul.f32 %v18578_v38, %v3300_v59  ;;  %v3340_v36 = vmul.f32 %v18578_v38, %v3301_v58  ;;  %v3341_v45 = vmul.f32 %v18578_v38, %v3302_v27 }
 0x3cb   : > { %v3342_v51 = vmul.f32 %v18578_v38, %v3303_v48  ;;  %v3343_v6 = vmul.f32 %v18578_v38, %v3304_v7  ;;  %v3344_v18 = vmul.f32 %v18578_v38, %v3305_v56  ;;  %v3345_v13 = vmul.f32 %v18578_v38, %v3306_v39 }
 0x3cc   : > { %v3346_v14 = vmul.f32 %v18578_v38, %v3307_v54  ;;  %v3347_v32 = vmul.f32 %v18578_v38, %v3308_v41  ;;  %v3349_v19 = vmul.f32 %v18578_v38, %v3310_v55  ;;  %v3350_v15 = vmul.f32 %v18578_v38, %v3311_v37 }
 0x3cd   : > { %v3358_v25 = vadd.f32 %v18584_v60, %v3319_v4  ;;  %v3359_v28 = vadd.f32 %v18584_v60, %v3320_v61  ;;  %v3360_v40 = vadd.f32 %v18584_v60, %v3321_v8  ;;  %v3361_v26 = vadd.f32 %v18584_v60, %v3322_v44 }
 0x3ce   : > { %v17287_v33 = vpop.eup %17286  ;;  %v3362_v42 = vadd.f32 %v18584_v60, %v3323_v9  ;;  %v3363_v24 = vadd.f32 %v18584_v60, %v3324_v57  ;;  %v3364_v23 = vadd.f32 %v18584_v60, %v3325_v34  ;;  %v3365_v1 = vadd.f32 %v18584_v60, %v3326_v3 }
 0x3cf   : > { %v3516_v2 = vadd.f32 1.0, %v17287_v33  ;;  %v3366_v12 = vadd.f32 %v18584_v60, %v3327_v5  ;;  %v3367_v38 = vadd.f32 %v18584_v60, %v3328_v17  ;;  %v3368_v49 = vadd.f32 %v18584_v60, %v3329_v11 }
 0x3d0   : > { %v3369_v31 = vadd.f32 %v18584_v60, %v3330_v30  ;;  %v3370_v20 = vadd.f32 %v18584_v60, %v3331_v35  ;;  %v3371_v52 = vadd.f32 %v18584_v60, %v3332_v50  ;;  %v3373_v21 = vadd.f32 %v18584_v60, %v3334_v29 }
 0x3d1   : > { %v3548_v62 = vmul.f32 %v3516_v2, %v3419_v53  ;;  %v3372_v53 = vadd.f32 %v18584_v60, %v3333_v63  ;;  %v18668_v0 = vadd.f32 %v18584_v60, %v3335_v22  ;;  %v18671_v59 = vadd.f32 %v18584_v60, %v3336_v47 }
 0x3d2   : > { %v18674_v58 = vadd.f32 %v18584_v60, %v3337_v43  ;;  %v18677_v27 = vadd.f32 %v18584_v60, %v3338_v10  ;;  %v18680_v48 = vadd.f32 %v18584_v60, %v3339_v16  ;;  %v18683_v7 = vadd.f32 %v18584_v60, %v3340_v36 }
 0x3d3   : > { %3580 = vst.msk [vmem:[#allocation2 + $0x171] sm:$0xff] %vm224_vm0, %v3548_v62  ;;  %v3423_v33 = vmul.f32 0.70710677, %v3358_v25  ;;  %v3424_v56 = vmul.f32 0.70710677, %v3359_v28  ;;  %v18686_v54 = vadd.f32 %v18584_v60, %v3341_v45  ;;  %v18689_v41 = vadd.f32 %v18584_v60, %v3342_v51 }
 0x3d4   : > { %v3425_v39 = vmul.f32 0.70710677, %v3360_v40  ;;  %v18692_v2 = vadd.f32 %v18584_v60, %v3343_v6  ;;  %v3426_v55 = vmul.f32 0.70710677, %v3361_v26  ;;  %v18695_v37 = vadd.f32 %v18584_v60, %v3344_v18 }
 0x3d5   : > { %v18698_v4 = vadd.f32 %v18584_v60, %v3345_v13  ;;  %v3427_v61 = vmul.f32 0.70710677, %v3362_v42  ;;  %17288 = verf.f32 %v3423_v33  ;;  %v18701_v8 = vadd.f32 %v18584_v60, %v3346_v14 }
 0x3d6   : > { %v18704_v44 = vadd.f32 %v18584_v60, %v3347_v32  ;;  %v3428_v9 = vmul.f32 0.70710677, %v3363_v24  ;;  %17290 = verf.f32 %v3424_v56  ;;  %v18707_v62 = vadd.f32 %v18584_v60, %v3349_v19 }
 0x3d7   : > { %v18710_v57 = vadd.f32 %v18584_v60, %v3350_v15  ;;  %v3429_v34 = vmul.f32 0.70710677, %v3364_v23  ;;  %17292 = verf.f32 %v3425_v39  ;;  %v3390_v3 = vmul.f32 0.5, %v3358_v25 }
 0x3d8   : > { %v3391_v5 = vmul.f32 0.5, %v3359_v28  ;;  %v3430_v17 = vmul.f32 0.70710677, %v3365_v1  ;;  %17294 = verf.f32 %v3426_v55  ;;  %v3392_v11 = vmul.f32 0.5, %v3360_v40 }
 0x3d9   : > { %v3393_v30 = vmul.f32 0.5, %v3361_v26  ;;  %v3431_v35 = vmul.f32 0.70710677, %v3366_v12  ;;  %17296 = verf.f32 %v3427_v61  ;;  %v3394_v50 = vmul.f32 0.5, %v3362_v42 }
 0x3da   : > { %v18712_v63 = vmul.f32 0.5, %v3363_v24  ;;  %v3432_v29 = vmul.f32 0.70710677, %v3367_v38  ;;  %17298 = verf.f32 %v3428_v9  ;;  %v18714_v22 = vmul.f32 0.5, %v3364_v23 }
 0x3db   : > { %v18716_v47 = vmul.f32 0.5, %v3365_v1  ;;  %v3433_v60 = vmul.f32 0.70710677, %v3368_v49  ;;  %17300 = verf.f32 %v3429_v34  ;;  %v18718_v43 = vmul.f32 0.5, %v3366_v12 }
 0x3dc   : > { %v18720_v10 = vmul.f32 0.5, %v3367_v38  ;;  %v3434_v16 = vmul.f32 0.70710677, %v3369_v31  ;;  %17302 = verf.f32 %v3430_v17  ;;  %v18722_v36 = vmul.f32 0.5, %v3368_v49 }
 0x3dd   : > { %v18724_v45 = vmul.f32 0.5, %v3369_v31  ;;  %v3435_v51 = vmul.f32 0.70710677, %v3370_v20  ;;  %17304 = verf.f32 %v3431_v35  ;;  %v18726_v6 = vmul.f32 0.5, %v3370_v20 }
 0x3de   : > { %v18728_v18 = vmul.f32 0.5, %v3371_v52  ;;  %v3436_v13 = vmul.f32 0.70710677, %v3371_v52  ;;  %17306 = verf.f32 %v3432_v29  ;;  %v18730_v32 = vmul.f32 0.5, %v3372_v53 }
 0x3df   : > { %v17289_v14 = vpop.eup %17288  ;;  %v18732_v19 = vmul.f32 0.5, %v3373_v21  ;;  %v3437_v15 = vmul.f32 0.70710677, %v3372_v53  ;;  %17308 = verf.f32 %v3433_v60  ;;  %v3438_v28 = vmul.f32 0.70710677, %v3373_v21 }
 0x3e0   : > { %v17291_v25 = vpop.eup %17290  ;;  %v3439_v40 = vmul.f32 0.70710677, %v18668_v0  ;;  %17310 = verf.f32 %v3434_v16  ;;  %v3487_v26 = vadd.f32 1.0, %v17289_v14  ;;  %v3440_v24 = vmul.f32 0.70710677, %v18671_v59 }
 0x3e1   : > { %v17293_v42 = vpop.eup %17292  ;;  %v3441_v23 = vmul.f32 0.70710677, %v18674_v58  ;;  %17312 = verf.f32 %v3435_v51  ;;  %v3488_v1 = vadd.f32 1.0, %v17291_v25  ;;  %v3442_v38 = vmul.f32 0.70710677, %v18677_v27 }
 0x3e2   : > { %v17295_v12 = vpop.eup %17294  ;;  %17314 = verf.f32 %v3436_v13  ;;  %v3489_v49 = vadd.f32 1.0, %v17293_v42  ;;  %v3519_v31 = vmul.f32 %v3487_v26, %v3390_v3  ;;  %v3443_v52 = vmul.f32 0.70710677, %v18680_v48 }
 0x3e3   : > { %v17297_v20 = vpop.eup %17296  ;;  %17316 = verf.f32 %v3437_v15  ;;  %v3490_v53 = vadd.f32 1.0, %v17295_v12  ;;  %v3520_v21 = vmul.f32 %v3488_v1, %v3391_v5  ;;  %v3444_v56 = vmul.f32 0.70710677, %v18683_v7 }
 0x3e4   : > { %v17299_v33 = vpop.eup %17298  ;;  %17318 = verf.f32 %v3438_v28  ;;  %v3491_v39 = vadd.f32 1.0, %v17297_v20  ;;  %v3521_v55 = vmul.f32 %v3489_v49, %v3392_v11  ;;  %3551 = vst.msk [vmem:[#allocation2 + $0x19] sm:$0xff] %vm224_vm0, %v3519_v31  ;;  %v3445_v9 = vmul.f32 0.70710677, %v18686_v54 }
 0x3e5   : > { %v17301_v61 = vpop.eup %17300  ;;  %17320 = verf.f32 %v3439_v40  ;;  %v3492_v34 = vadd.f32 1.0, %v17299_v33  ;;  %v3522_v3 = vmul.f32 %v3490_v53, %v3393_v30  ;;  %3552 = vst.msk [vmem:[#allocation2 + $0x21] sm:$0xff] %vm224_vm0, %v3520_v21  ;;  %v3446_v35 = vmul.f32 0.70710677, %v18689_v41 }
 0x3e6   : > { %v17303_v17 = vpop.eup %17302  ;;  %17322 = verf.f32 %v3440_v24  ;;  %v3493_v5 = vadd.f32 1.0, %v17301_v61  ;;  %v3523_v29 = vmul.f32 %v3491_v39, %v3394_v50  ;;  %3553 = vst.msk [vmem:[#allocation2 + $0x31] sm:$0xff] %vm224_vm0, %v3521_v55  ;;  %v3447_v11 = vmul.f32 0.70710677, %v18692_v2 }
 0x3e7   : > { %v17305_v60 = vpop.eup %17304  ;;  %17324 = verf.f32 %v3441_v23  ;;  %v3494_v16 = vadd.f32 1.0, %v17303_v17  ;;  %v3524_v51 = vmul.f32 %v3492_v34, %v18712_v63  ;;  %3554 = vst.msk [vmem:[#allocation2 + $0x39] sm:$0xff] %vm224_vm0, %v3522_v3  ;;  %v3448_v13 = vmul.f32 0.70710677, %v18695_v37 }
 0x3e8   : > { %v17307_v30 = vpop.eup %17306  ;;  %17326 = verf.f32 %v3442_v38  ;;  %v3495_v14 = vadd.f32 1.0, %v17305_v60  ;;  %v3525_v15 = vmul.f32 %v3493_v5, %v18714_v22  ;;  %3555 = vst.msk [vmem:[#allocation2 + $0x49] sm:$0xff] %vm224_vm0, %v3523_v29  ;;  %v3449_v25 = vmul.f32 0.70710677, %v18698_v4 }
 0x3e9   : > { %v17309_v50 = vpop.eup %17308  ;;  %17328 = verf.f32 %v3443_v52  ;;  %v3496_v28 = vadd.f32 1.0, %v17307_v30  ;;  %v3526_v40 = vmul.f32 %v3494_v16, %v18716_v47  ;;  %3556 = vst.msk [vmem:[#allocation2 + $0x51] sm:$0xff] %vm224_vm0, %v3524_v51  ;;  %v3450_v26 = vmul.f32 0.70710677, %v18701_v8 }
 0x3ea   : > { %v17311_v63 = vpop.eup %17310  ;;  %17330 = verf.f32 %v3444_v56  ;;  %v3497_v42 = vadd.f32 1.0, %v17309_v50  ;;  %v3527_v24 = vmul.f32 %v3495_v14, %v18718_v43  ;;  %3557 = vst.msk [vmem:[#allocation2 + $0x61] sm:$0xff] %vm224_vm0, %v3525_v15  ;;  %v3451_v23 = vmul.f32 0.70710677, %v18704_v44  ;;  %v17233_v56 = vld [vmem:[%s21844_s1 + $0x98] sm:$0xff]  }
 0x3eb   : > { %v17313_v22 = vpop.eup %17312  ;;  %17332 = verf.f32 %v3445_v9  ;;  %v3498_v1 = vadd.f32 1.0, %v17311_v63  ;;  %v3528_v12 = vmul.f32 %v3496_v28, %v18720_v10  ;;  %3558 = vst.msk [vmem:[#allocation2 + $0x69] sm:$0xff] %vm224_vm0, %v3526_v40  ;;  %v3638_v47 = vld [vmem:[#allocation2 + $0x19] sm:$0xff]  ;;  %v3453_v49 = vmul.f32 0.70710677, %v18707_v62 }
 0x3ec   : > { %v17315_v38 = vpop.eup %17314  ;;  %17334 = verf.f32 %v3446_v35  ;;  %v3499_v31 = vadd.f32 1.0, %v17313_v22  ;;  %v3529_v20 = vmul.f32 %v3497_v42, %v18722_v36  ;;  %3559 = vst.msk [vmem:[#allocation2 + $0x79] sm:$0xff] %vm224_vm0, %v3527_v24  ;;  %v3639_v43 = vld [vmem:[#allocation2 + $0x21] sm:$0xff]  ;;  %v3454_v36 = vmul.f32 0.70710677, %v18710_v57 }
 0x3ed   : > { %v17317_v52 = vpop.eup %17316  ;;  %17336 = verf.f32 %v3447_v11  ;;  %v3500_v53 = vadd.f32 1.0, %v17315_v38  ;;  %v3530_v21 = vmul.f32 %v3498_v1, %v18724_v45  ;;  %3560 = vst.msk [vmem:[#allocation2 + $0x81] sm:$0xff] %vm224_vm0, %v3528_v12  ;;  %v18765_v10 = vpack.c.bf16 %v3639_v43, %v3638_v47  ;;  %v3640_v33 = vld [vmem:[#allocation2 + $0x31] sm:$0xff] }
 0x3ee   : > { %v17319_v39 = vpop.eup %17318  ;;  %17338 = verf.f32 %v3448_v13  ;;  %v3501_v55 = vadd.f32 1.0, %v17317_v52  ;;  %v3531_v61 = vmul.f32 %v3499_v31, %v18726_v6  ;;  %3561 = vst.msk [vmem:[#allocation2 + $0x91] sm:$0xff] %vm224_vm0, %v3529_v20  ;;  %v3641_v9 = vld [vmem:[#allocation2 + $0x39] sm:$0xff]  ;;  %v3406_v5 = vmul.f32 0.5, %v18668_v0  ;;  %v18791_v0 = vld [vmem:[%s21844_s1 + $0xb0] sm:$0xff]  }
 0x3ef   : > { %v17321_v45 = vpop.eup %17320  ;;  %17340 = verf.f32 %v3449_v25  ;;  %v3502_v34 = vadd.f32 1.0, %v17319_v39  ;;  %v3532_v3 = vmul.f32 %v3500_v53, %v18728_v18  ;;  %3562 = vst.msk [vmem:[#allocation2 + $0x99] sm:$0xff] %vm224_vm0, %v3530_v21  ;;  %15179 = vmatmul.mubr.msk.bf16.vlgmr.msra.gmra.mrb[0].mxu1 %vm224_vm0, %v18765_v10  ;;  %v18777_v17 = vpack.c.bf16 %v3641_v9, %v3640_v33 }
 0x3f0   : > { %v17323_v35 = vpop.eup %17322  ;;  %17342 = verf.f32 %v3450_v26  ;;  %v3503_v6 = vadd.f32 1.0, %v17321_v45  ;;  %v3533_v29 = vmul.f32 %v3501_v55, %v18730_v32  ;;  %3563 = vst.msk [vmem:[#allocation2 + $0xa9] sm:$0xff] %vm224_vm0, %v3531_v61  ;;  %15211 = vmatpush3.bf16.msra.mxu1 %v18551_v46  ;;  %v3407_v18 = vmul.f32 0.5, %v18671_v59  ;;  %v3643_v30 = vld [vmem:[#allocation2 + $0x51] sm:$0xff] }
 0x3f1   : > { %v17325_v60 = vpop.eup %17324  ;;  %17344 = verf.f32 %v3451_v23  ;;  %v3504_v11 = vadd.f32 1.0, %v17323_v35  ;;  %v3534_v16 = vmul.f32 %v3502_v34, %v18732_v19  ;;  %3564 = vst.msk [vmem:[#allocation2 + $0xb1] sm:$0xff] %vm224_vm0, %v3532_v3  ;;  %15182 = vmatprep.mubr.msk.bf16.mxu1 %vm224_vm0, %v18777_v17  ;;  %15212 = vmatprep.subr.bf16.mxu1 %v17233_v56  ;;  %v3408_v46 = vmul.f32 0.5, %v18674_v58  ;;  %v3642_v19 = vld [vmem:[#allocation2 + $0x49] sm:$0xff]  ;;  %v3644_v25 = vld [vmem:[#allocation2 + $0x61] sm:$0xff] }
 0x3f2   : > { %v17327_v32 = vpop.eup %17326  ;;  %17346 = verf.f32 %v3453_v49  ;;  %v3505_v59 = vadd.f32 1.0, %v17325_v60  ;;  %v3535_v51 = vmul.f32 %v3503_v6, %v3406_v5  ;;  %3565 = vst.msk [vmem:[#allocation2 + $0xc1] sm:$0xff] %vm224_vm0, %v3533_v29  ;;  %v3409_v14 = vmul.f32 0.5, %v18677_v27  ;;  %v3645_v28 = vld [vmem:[#allocation2 + $0x69] sm:$0xff] }
 0x3f3   : > { %v17329_v13 = vpop.eup %17328  ;;  %17348 = verf.f32 %v3454_v36  ;;  %v3506_v15 = vadd.f32 1.0, %v17327_v32  ;;  %v3536_v50 = vmul.f32 %v3504_v11, %v3407_v18  ;;  %3566 = vst.msk [vmem:[#allocation2 + $0xc9] sm:$0xff] %vm224_vm0, %v3534_v16  ;;  %v3410_v58 = vmul.f32 0.5, %v18680_v48 }
 0x3f4   : > { %v17331_v40 = vpop.eup %17330  ;;  %v3507_v63 = vadd.f32 1.0, %v17329_v13  ;;  %v3537_v26 = vmul.f32 %v3505_v59, %v3408_v46  ;;  %3567 = vst.msk [vmem:[#allocation2 + $0xd9] sm:$0xff] %vm224_vm0, %v3535_v51  ;;  %15213 = vmatpush3.bf16.msra.mxu1 %v17233_v56  ;;  %v3411_v24 = vmul.f32 0.5, %v18683_v7  ;;  %v18801_v23 = vpack.c.bf16 %v3643_v30, %v3642_v19  ;;  %v3647_v9 = vld [vmem:[#allocation2 + $0x81] sm:$0xff] }
 0x3f5   : > { %v17333_v42 = vpop.eup %17332  ;;  %v3508_v22 = vadd.f32 1.0, %v17331_v40  ;;  %v3538_v27 = vmul.f32 %v3506_v15, %v3409_v14  ;;  %3568 = vst.msk [vmem:[#allocation2 + $0xe1] sm:$0xff] %vm224_vm0, %v3536_v50  ;;  %15246 = vmatprep.subr.bf16.mxu1 %v18791_v0  ;;  %v3412_v12 = vmul.f32 0.5, %v18686_v54  ;;  %v18806_v38 = vpack.c.bf16 %v3645_v28, %v3644_v25 }
 0x3f6   : > { %v17335_v1 = vpop.eup %17334  ;;  %v3509_v48 = vadd.f32 1.0, %v17333_v42  ;;  %v3539_v47 = vmul.f32 %v3507_v63, %v3410_v58  ;;  %3569 = vst.msk [vmem:[#allocation2 + $0xf1] sm:$0xff] %vm224_vm0, %v3537_v26  ;;  %v3413_v7 = vmul.f32 0.5, %v18689_v41  ;;  %v3414_v52 = vmul.f32 0.5, %v18692_v2  ;;  %v3646_v2 = vld [vmem:[#allocation2 + $0x79] sm:$0xff] }
 0x3f7   : > { %v17337_v49 = vpop.eup %17336  ;;  %v3510_v31 = vadd.f32 1.0, %v17335_v1  ;;  %v3540_v20 = vmul.f32 %v3508_v22, %v3411_v24  ;;  %3570 = vst.msk [vmem:[#allocation2 + $0xf9] sm:$0xff] %vm224_vm0, %v3538_v27  ;;  %15183 = vmatmul.mubr.msk.bf16.gmra.mrb[4].mxu1 %vm224_vm0, %v18801_v23  ;;  %v3415_v41 = vmul.f32 0.5, %v18695_v37  ;;  %v3416_v36 = vmul.f32 0.5, %v18698_v4  ;;  %v3648_v37 = vld [vmem:[#allocation2 + $0x91] sm:$0xff]  ;;  %v3649_v5 = vld [vmem:[#allocation2 + $0x99] sm:$0xff] }
 0x3f8   : > { %v17339_v43 = vpop.eup %17338  ;;  %v3511_v54 = vadd.f32 1.0, %v17337_v49  ;;  %v3541_v53 = vmul.f32 %v3509_v48, %v3412_v12  ;;  %3571 = vst.msk [vmem:[#allocation2 + $0x109] sm:$0xff] %vm224_vm0, %v3539_v47  ;;  %15186 = vmatprep.mubr.msk.bf16.mxu1 %vm224_vm0, %v18806_v38  ;;  %v3417_v34 = vmul.f32 0.5, %v18701_v8  ;;  %v3418_v29 = vmul.f32 0.5, %v18704_v44  ;;  %v3651_v30 = vld [vmem:[#allocation2 + $0xb1] sm:$0xff] }
 0x3f9   : > { %v17341_v21 = vpop.eup %17340  ;;  %v3512_v33 = vadd.f32 1.0, %v17339_v43  ;;  %v3542_v56 = vmul.f32 %v3510_v31, %v3413_v7  ;;  %3572 = vst.msk [vmem:[#allocation2 + $0x111] sm:$0xff] %vm224_vm0, %v3540_v20  ;;  %v3420_v11 = vmul.f32 0.5, %v18707_v62  ;;  %v18826_v8 = vpack.c.bf16 %v3647_v9, %v3646_v2  ;;  %v3652_v13 = vld [vmem:[#allocation2 + $0xc1] sm:$0xff] }
 0x3fa   : > { %v17343_v39 = vpop.eup %17342  ;;  %v3513_v55 = vadd.f32 1.0, %v17341_v21  ;;  %v3543_v61 = vmul.f32 %v3511_v54, %v3414_v52  ;;  %3573 = vst.msk [vmem:[#allocation2 + $0x121] sm:$0xff] %vm224_vm0, %v3541_v53  ;;  %v3421_v46 = vmul.f32 0.5, %v18710_v57  ;;  %v18830_v44 = vpack.c.bf16 %v3649_v5, %v3648_v37  ;;  %v3650_v57 = vld [vmem:[#allocation2 + $0xa9] sm:$0xff]  ;;  %v3583_v43 = vld [vmem:[#allocation2] sm:$0xff]  ;;  %v3667_v53 = vld [vmem:[#allocation2 + $0x171] sm:$0xff] }
 0x3fb   : > { %v17345_v45 = vpop.eup %17344  ;;  %v3514_v3 = vadd.f32 1.0, %v17343_v39  ;;  %v3544_v35 = vmul.f32 %v3512_v33, %v3415_v41  ;;  %3574 = vst.msk [vmem:[#allocation2 + $0x129] sm:$0xff] %vm224_vm0, %v3542_v56  ;;  %v3653_v14 = vld [vmem:[#allocation2 + $0xc9] sm:$0xff]  ;;  %v18840_v15 = vpack.c.bf16 %v3651_v30, %v3650_v57  ;;  %v3654_v25 = vld [vmem:[#allocation2 + $0xd9] sm:$0xff] }
 0x3fc   : > { %v17347_v6 = vpop.eup %17346  ;;  %v3515_v60 = vadd.f32 1.0, %v17345_v45  ;;  %v3545_v4 = vmul.f32 %v3513_v55, %v3416_v36  ;;  %3575 = vst.msk [vmem:[#allocation2 + $0x139] sm:$0xff] %vm224_vm0, %v3543_v61  ;;  %v18842_v50 = vpack.c.bf16 %v3653_v14, %v3652_v13  ;;  %v3655_v28 = vld [vmem:[#allocation2 + $0xe1] sm:$0xff]  ;;  %v3585_v33 = vld [vmem:[#allocation2 + $0x18] sm:$0xff]  ;;  %v3587_v39 = vld [vmem:[#allocation2 + $0x30] sm:$0xff] }
 0x3fd   : > { %v17349_v18 = vpop.eup %17348  ;;  %v3517_v16 = vadd.f32 1.0, %v17347_v6  ;;  %v3546_v32 = vmul.f32 %v3514_v3, %v3417_v34  ;;  %3576 = vst.msk [vmem:[#allocation2 + $0x141] sm:$0xff] %vm224_vm0, %v3544_v35  ;;  %v3656_v40 = vld [vmem:[#allocation2 + $0xf1] sm:$0xff]  ;;  %v18848_v63 = vpack.c.bf16 %v3655_v28, %v3654_v25  ;;  %v3584_v52 = vld [vmem:[#allocation2 + $0x8] sm:$0xff]  ;;  %v3586_v56 = vld [vmem:[#allocation2 + $0x20] sm:$0xff] }
 0x3fe   : > { %v3518_v59 = vadd.f32 1.0, %v17349_v18  ;;  %v3547_v51 = vmul.f32 %v3515_v60, %v3418_v29  ;;  %3577 = vst.msk [vmem:[#allocation2 + $0x151] sm:$0xff] %vm224_vm0, %v3545_v4  ;;  %v3657_v58 = vld [vmem:[#allocation2 + $0xf9] sm:$0xff]  ;;  %v3615_v21 = vpack.c.bf16 %v3584_v52, %v3583_v43  ;;  %v18877_v55 = vpack.c.bf16 %v3586_v56, %v3585_v33  ;;  %v3589_v45 = vld [vmem:[#allocation2 + $0x48] sm:$0xff]  ;;  %v3590_v34 = vld [vmem:[#allocation2 + $0x50] sm:$0xff] }
 0x3ff   : > { %v3549_v19 = vmul.f32 %v3517_v16, %v3420_v11  ;;  %3578 = vst.msk [vmem:[#allocation2 + $0x159] sm:$0xff] %vm224_vm0, %v3546_v32  ;;  %15187 = vmatmul.mubr.msk.bf16.gmra.mrb[8].mxu1 %vm224_vm0, %v18826_v8  ;;  %v18850_v26 = vpack.c.bf16 %v3657_v58, %v3656_v40  ;;  %v3658_v42 = vld [vmem:[#allocation2 + $0x109] sm:$0xff]  ;;  %v3588_v36 = vld [vmem:[#allocation2 + $0x38] sm:$0xff]  ;;  %v18892_v9 = vld [vmem:[%s21844_s1 + $0xc0] sm:$0xff]   ;;  %v18894_v37 = vpack.c.bf16 %v3590_v34, %v3589_v45 }
 0x400   : > { %v3550_v62 = vmul.f32 %v3518_v59, %v3421_v46  ;;  %3579 = vst.msk [vmem:[#allocation2 + $0x169] sm:$0xff] %vm224_vm0, %v3547_v51  ;;  %15190 = vmatprep.mubr.msk.bf16.mxu1 %vm224_vm0, %v18830_v44  ;;  %v3659_v24 = vld [vmem:[#allocation2 + $0x111] sm:$0xff]  ;;  %v18882_v2 = vpack.c.bf16 %v3588_v36, %v3587_v39  ;;  %v3591_v3 = vld [vmem:[#allocation2 + $0x60] sm:$0xff]  ;;  %v3592_v35 = vld [vmem:[#allocation2 + $0x68] sm:$0xff] }
 0x401   : > { %3581 = vst.msk [vmem:[#allocation2 + $0x181] sm:$0xff] %vm224_vm0, %v3549_v19  ;;  %v3660_v22 = vld [vmem:[#allocation2 + $0x121] sm:$0xff]  ;;  %v18856_v1 = vpack.c.bf16 %v3659_v24, %v3658_v42  ;;  %v17235_v61 = vld [vmem:[%s21844_s1 + $0xb8] sm:$0xff]   ;;  %v18897_v5 = vpack.c.bf16 %v3592_v35, %v3591_v3  ;;  %v3595_v29 = vld [vmem:[#allocation2 + $0x90] sm:$0xff] }
 0x402   : > { %3582 = vst.msk [vmem:[#allocation2 + $0x189] sm:$0xff] %vm224_vm0, %v3550_v62  ;;  %v3661_v27 = vld [vmem:[#allocation2 + $0x129] sm:$0xff]  ;;  %v3594_v6 = vld [vmem:[#allocation2 + $0x80] sm:$0xff]  ;;  %v3596_v60 = vld [vmem:[#allocation2 + $0x98] sm:$0xff] }
 0x403   : > { %v18858_v12 = vpack.c.bf16 %v3661_v27, %v3660_v22  ;;  %v3662_v48 = vld [vmem:[#allocation2 + $0x139] sm:$0xff]  ;;  %v18905_v18 = vpack.c.bf16 %v3596_v60, %v3595_v29  ;;  %v3597_v11 = vld [vmem:[#allocation2 + $0xa8] sm:$0xff]  ;;  %v3598_v16 = vld [vmem:[#allocation2 + $0xb0] sm:$0xff] }
 0x404   : > { %v3663_v47 = vld [vmem:[#allocation2 + $0x141] sm:$0xff]  ;;  %v18911_v59 = vpack.c.bf16 %v3598_v16, %v3597_v11  ;;  %v3601_v19 = vld [vmem:[#allocation2 + $0xd8] sm:$0xff]  ;;  %v3603_v57 = vld [vmem:[#allocation2 + $0xf0] sm:$0xff] }
 0x405   : > { %v3664_v49 = vld [vmem:[#allocation2 + $0x151] sm:$0xff]  ;;  %v18864_v31 = vpack.c.bf16 %v3663_v47, %v3662_v48  ;;  %v3599_v32 = vld [vmem:[#allocation2 + $0xc0] sm:$0xff]  ;;  %v3600_v46 = vld [vmem:[#allocation2 + $0xc8] sm:$0xff] }
 0x406   : > { %v3665_v7 = vld [vmem:[#allocation2 + $0x159] sm:$0xff]  ;;  %v18913_v51 = vpack.c.bf16 %v3600_v46, %v3599_v32  ;;  %v3605_v25 = vld [vmem:[#allocation2 + $0x108] sm:$0xff]  ;;  %v3606_v28 = vld [vmem:[#allocation2 + $0x110] sm:$0xff] }
 0x407   : > { %15191 = vmatmul.mubr.msk.bf16.gmra.mrb[12].mxu1 %vm224_vm0, %v18840_v15  ;;  %v18866_v20 = vpack.c.bf16 %v3665_v7, %v3664_v49  ;;  %v3666_v54 = vld [vmem:[#allocation2 + $0x169] sm:$0xff]  ;;  %v3602_v62 = vld [vmem:[#allocation2 + $0xe0] sm:$0xff]  ;;  %v3604_v30 = vld [vmem:[#allocation2 + $0xf8] sm:$0xff]  ;;  %v18927_v42 = vpack.c.bf16 %v3606_v28, %v3605_v25 }
 0x408   : > { %15194 = vmatprep.mubr.msk.bf16.mxu1 %vm224_vm0, %v18842_v50  ;;  %v18872_v41 = vpack.c.bf16 %v3667_v53, %v3666_v54  ;;  %v18919_v13 = vpack.c.bf16 %v3602_v62, %v3601_v19  ;;  %v18921_v14 = vpack.c.bf16 %v3604_v30, %v3603_v57  ;;  %v3607_v40 = vld [vmem:[#allocation2 + $0x120] sm:$0xff]  ;;  %v3608_v58 = vld [vmem:[#allocation2 + $0x128] sm:$0xff]  ;;  %v3609_v22 = vld [vmem:[#allocation2 + $0x138] sm:$0xff] }
 0x409   : > { %v18929_v24 = vpack.c.bf16 %v3608_v58, %v3607_v40  ;;  %v3610_v27 = vld [vmem:[#allocation2 + $0x140] sm:$0xff]  ;;  %v3611_v48 = vld [vmem:[#allocation2 + $0x150] sm:$0xff]  ;;  %v3612_v47 = vld [vmem:[#allocation2 + $0x158] sm:$0xff] }
 0x40a   : > { %v18935_v49 = vpack.c.bf16 %v3610_v27, %v3609_v22  ;;  %v18937_v7 = vpack.c.bf16 %v3612_v47, %v3611_v48  ;;  %v4131_v43 = vld [vmem:[#allocation2 + $0x2] sm:$0xff]  ;;  %v4132_v52 = vld [vmem:[#allocation2 + $0xa] sm:$0xff]  ;;  %v4133_v56 = vld [vmem:[#allocation2 + $0x1a] sm:$0xff] }
 0x40b   : > { %v3613_v54 = vld [vmem:[#allocation2 + $0x168] sm:$0xff]  ;;  %v3614_v53 = vld [vmem:[#allocation2 + $0x170] sm:$0xff]  ;;  %v4144_v19 = vld [vmem:[#allocation2 + $0x9a] sm:$0xff] }
 0x40c   : > { %v18943_v33 = vpack.c.bf16 %v3614_v53, %v3613_v54  ;;  %v4134_v39 = vld [vmem:[#allocation2 + $0x22] sm:$0xff]  ;;  %v4135_v36 = vld [vmem:[#allocation2 + $0x32] sm:$0xff]  ;;  %v4140_v60 = vld [vmem:[#allocation2 + $0x6a] sm:$0xff] }
 0x40d   : > { %v18948_v45 = vpack.c.bf16 %v4134_v39, %v4133_v56  ;;  %v17237_v34 = vld [vmem:[%s21844_s1 + $0xc8] sm:$0xff]   ;;  %v17238_v35 = vld [vmem:[%s21844_s1 + $0xd0] sm:$0xff]   ;;  %v4149_v27 = vld [vmem:[#allocation2 + $0xda] sm:$0xff] }
 0x40e   : > { %v4139_v29 = vld [vmem:[#allocation2 + $0x62] sm:$0xff]  ;;  %v4143_v46 = vld [vmem:[#allocation2 + $0x92] sm:$0xff]  ;;  %v4145_v30 = vld [vmem:[#allocation2 + $0xaa] sm:$0xff] }
 0x40f   : > { %15195 = vmatmul.mubr.msk.bf16.gmra.mrb[16].mxu1 %vm224_vm0, %v18848_v63  ;;  %v18965_v16 = vpack.c.bf16 %v4140_v60, %v4139_v29  ;;  %v4142_v32 = vld [vmem:[#allocation2 + $0x82] sm:$0xff]  ;;  %v18973_v57 = vpack.c.bf16 %v4144_v19, %v4143_v46  ;;  %v4146_v25 = vld [vmem:[#allocation2 + $0xb2] sm:$0xff]  ;;  %v4148_v40 = vld [vmem:[#allocation2 + $0xca] sm:$0xff] }
 0x410   : > { %15198 = vmatprep.mubr.msk.bf16.mxu1 %vm224_vm0, %v18850_v26  ;;  %v4147_v28 = vld [vmem:[#allocation2 + $0xc2] sm:$0xff]  ;;  %v18979_v58 = vpack.c.bf16 %v4146_v25, %v4145_v30  ;;  %v4151_v47 = vld [vmem:[#allocation2 + $0xf2] sm:$0xff]  ;;  %v4153_v53 = vld [vmem:[#allocation2 + $0x10a] sm:$0xff] }
 0x411   : > { %v18981_v22 = vpack.c.bf16 %v4148_v40, %v4147_v28  ;;  %v4150_v48 = vld [vmem:[#allocation2 + $0xe2] sm:$0xff]  ;;  %v4156_v39 = vld [vmem:[#allocation2 + $0x12a] sm:$0xff]  ;;  %v4160_v29 = vld [vmem:[#allocation2 + $0x15a] sm:$0xff] }
 0x412   : > { %v4155_v56 = vld [vmem:[#allocation2 + $0x122] sm:$0xff]  ;;  %v4162_v46 = vld [vmem:[#allocation2 + $0x172] sm:$0xff] }
 0x413   : > { %v17239_v30 = vld [vmem:[%s21844_s1 + $0xd8] sm:$0xff]   ;;  %v17240_v25 = vld [vmem:[%s21844_s1 + $0xe0] sm:$0xff]   ;;  %v17241_v40 = vld [vmem:[%s21844_s1 + $0xe8] sm:$0xff]  }
 0x417   : > { %15199 = vmatmul.mubr.msk.bf16.gmra.mrb[20].mxu1 %vm224_vm0, %v18856_v1 }
 0x418   : > { %15202 = vmatprep.mubr.msk.bf16.mxu1 %vm224_vm0, %v18858_v12 }
 0x41f   : > { %15203 = vmatmul.mubr.msk.bf16.gmra.mrb[24].mxu1 %vm224_vm0, %v18864_v31 }
 0x420   : > { %15206 = vmatprep.mubr.msk.bf16.mxu1 %vm224_vm0, %v18866_v20 }
 0x427   : > { %15207 = vmatmul.mubr.msk.bf16.gmra.mrb[28].mxu1 %vm224_vm0, %v18872_v41 }
 0x428   : > { %15214 = vmatprep.mubr.msk.bf16.mxu1 %vm224_vm0, %v3615_v21  ;;  %v4163_v21 = vpack.c.bf16 %v4132_v52, %v4131_v43  ;;  %v4152_v43 = vld [vmem:[#allocation2 + $0xfa] sm:$0xff]  ;;  %v18987_v52 = vpack.c.bf16 %v4150_v48, %v4149_v27  ;;  %v17242_v27 = vld [vmem:[%s21844_s1 + $0xf0] sm:$0xff]  }
 0x429   : > { %v18989_v54 = vpack.c.bf16 %v4152_v43, %v4151_v47  ;;  %v4774_v48 = vld [vmem:[#allocation2 + $0x189] sm:$0xff]  ;;  %v17243_v43 = vld [vmem:[%s21844_s1 + $0xf8] sm:$0xff]  }
 0x42f   : > { %15215 = vmatmul.mubr.msk.bf16.vlgmr.msra.gmra.mrb[0].mxu1 %vm224_vm0, %v18877_v55 }
 0x430   : > { %15247 = vmatpush3.bf16.msra.mxu1 %v18791_v0  ;;  %15218 = vmatprep.mubr.msk.bf16.mxu1 %vm224_vm0, %v18882_v2  ;;  %v3593_v0 = vld [vmem:[#allocation2 + $0x78] sm:$0xff] }
 0x431   : > { %15248 = vmatprep.subr.bf16.mxu1 %v17235_v61  ;;  %v18903_v4 = vpack.c.bf16 %v3594_v6, %v3593_v0  ;;  %v4137_v0 = vld [vmem:[#allocation2 + $0x4a] sm:$0xff]  ;;  %v4138_v6 = vld [vmem:[#allocation2 + $0x52] sm:$0xff] }
 0x432   : > { %v18963_v11 = vpack.c.bf16 %v4138_v6, %v4137_v0  ;;  %v4158_v0 = vld [vmem:[#allocation2 + $0x142] sm:$0xff]  ;;  %v4159_v6 = vld [vmem:[#allocation2 + $0x152] sm:$0xff] }
 0x434   : > { %15249 = vmatpush3.bf16.msra.mxu1 %v17235_v61  ;;  %v4136_v61 = vld [vmem:[#allocation2 + $0x3a] sm:$0xff] }
 0x435   : > { %15282 = vmatprep.subr.bf16.mxu1 %v18892_v9  ;;  %v18953_v3 = vpack.c.bf16 %v4136_v61, %v4135_v36  ;;  %v18997_v61 = vpack.c.bf16 %v4156_v39, %v4155_v56  ;;  %v17245_v39 = vld [vmem:[%s21844_s1 + $0x108] sm:$0xff]  }
 0x437   : > { %15219 = vmatmul.mubr.msk.bf16.gmra.mrb[4].mxu1 %vm224_vm0, %v18894_v37 }
 0x438   : > { %15222 = vmatprep.mubr.msk.bf16.mxu1 %vm224_vm0, %v18897_v5 }
 0x43f   : > { %15223 = vmatmul.mubr.msk.bf16.gmra.mrb[8].mxu1 %vm224_vm0, %v18903_v4 }
 0x440   : > { %15226 = vmatprep.mubr.msk.bf16.mxu1 %vm224_vm0, %v18905_v18 }
 0x447   : > { %15227 = vmatmul.mubr.msk.bf16.gmra.mrb[12].mxu1 %vm224_vm0, %v18911_v59 }
 0x448   : > { %15230 = vmatprep.mubr.msk.bf16.mxu1 %vm224_vm0, %v18913_v51 }
 0x44f   : > { %15231 = vmatmul.mubr.msk.bf16.gmra.mrb[16].mxu1 %vm224_vm0, %v18919_v13 }
 0x450   : > { %15234 = vmatprep.mubr.msk.bf16.mxu1 %vm224_vm0, %v18921_v14 }
 0x457   : > { %15235 = vmatmul.mubr.msk.bf16.gmra.mrb[20].mxu1 %vm224_vm0, %v18927_v42 }
 0x458   : > { %15238 = vmatprep.mubr.msk.bf16.mxu1 %vm224_vm0, %v18929_v24 }
 0x45f   : > { %15239 = vmatmul.mubr.msk.bf16.gmra.mrb[24].mxu1 %vm224_vm0, %v18935_v49 }
 0x460   : > { %15242 = vmatprep.mubr.msk.bf16.mxu1 %vm224_vm0, %v18937_v7 }
 0x467   : > { %15243 = vmatmul.mubr.msk.bf16.gmra.mrb[28].mxu1 %vm224_vm0, %v18943_v33 }
 0x468   : > { %15250 = vmatprep.mubr.msk.bf16.mxu1 %vm224_vm0, %v4163_v21  ;;  %v4154_v21 = vld [vmem:[#allocation2 + $0x112] sm:$0xff] }
 0x469   : > { %v18995_v36 = vpack.c.bf16 %v4154_v21, %v4153_v53  ;;  %v17244_v53 = vld [vmem:[%s21844_s1 + $0x100] sm:$0xff]   ;;  %v5080_v21 = vld [vmem:[#allocation2 + $0x18a] sm:$0xff] }
 0x46f   : > { %15251 = vmatmul.mubr.msk.bf16.vlgmr.msra.gmra.mrb[0].mxu1 %vm224_vm0, %v18948_v45 }
 0x470   : > { %15283 = vmatpush3.bf16.msra.mxu1 %v18892_v9  ;;  %15254 = vmatprep.mubr.msk.bf16.mxu1 %vm224_vm0, %v18953_v3  ;;  %v4141_v9 = vld [vmem:[#allocation2 + $0x7a] sm:$0xff] }
 0x471   : > { %15284 = vmatprep.subr.bf16.mxu1 %v17237_v34  ;;  %v18971_v62 = vpack.c.bf16 %v4142_v32, %v4141_v9  ;;  %v19005_v9 = vpack.c.bf16 %v4160_v29, %v4159_v6  ;;  %v4161_v32 = vld [vmem:[#allocation2 + $0x16a] sm:$0xff] }
 0x472   : > { %v19011_v19 = vpack.c.bf16 %v4162_v46, %v4161_v32 }
 0x474   : > { %15285 = vmatpush3.bf16.msra.mxu1 %v17237_v34  ;;  %v4157_v34 = vld [vmem:[#allocation2 + $0x13a] sm:$0xff] }
 0x475   : > { %15318 = vmatprep.subr.bf16.mxu1 %v17238_v35  ;;  %v19003_v60 = vpack.c.bf16 %v4158_v0, %v4157_v34  ;;  %v17246_v34 = vld [vmem:[%s21844_s1 + $0x110] sm:$0xff]  }
 0x477   : > { %15255 = vmatmul.mubr.msk.bf16.gmra.mrb[4].mxu1 %vm224_vm0, %v18963_v11 }
 0x478   : > { %15258 = vmatprep.mubr.msk.bf16.mxu1 %vm224_vm0, %v18965_v16 }
 0x47f   : > { %15259 = vmatmul.mubr.msk.bf16.gmra.mrb[8].mxu1 %vm224_vm0, %v18971_v62 }
 0x480   : > { %15262 = vmatprep.mubr.msk.bf16.mxu1 %vm224_vm0, %v18973_v57 }
 0x487   : > { %15263 = vmatmul.mubr.msk.bf16.gmra.mrb[12].mxu1 %vm224_vm0, %v18979_v58 }
 0x488   : > { %15266 = vmatprep.mubr.msk.bf16.mxu1 %vm224_vm0, %v18981_v22 }
 0x48f   : > { %15267 = vmatmul.mubr.msk.bf16.gmra.mrb[16].mxu1 %vm224_vm0, %v18987_v52 }
 0x490   : > { %15270 = vmatprep.mubr.msk.bf16.mxu1 %vm224_vm0, %v18989_v54 }
 0x497   : > { %15271 = vmatmul.mubr.msk.bf16.gmra.mrb[20].mxu1 %vm224_vm0, %v18995_v36 }
 0x498   : > { %15274 = vmatprep.mubr.msk.bf16.mxu1 %vm224_vm0, %v18997_v61 }
 0x49f   : > { %15275 = vmatmul.mubr.msk.bf16.gmra.mrb[24].mxu1 %vm224_vm0, %v19003_v60 }
 0x4a0   : > { %15278 = vmatprep.mubr.msk.bf16.mxu1 %vm224_vm0, %v19005_v9 }
 0x4a7   : > { %15279 = vmatmul.mubr.msk.bf16.gmra.mrb[28].mxu1 %vm224_vm0, %v19011_v19 }
 0x4a8   : > { %15286 = vmatprep.mubr.msk.bf16.mxu1 %vm224_vm0, %v18877_v55  ;;  %v4467_v55 = vld [vmem:[#allocation2 + $0x180] sm:$0xff] }
 0x4af   : > { %15287 = vmatmul.mubr.msk.bf16.vlgmr.msra.gmra.mrb[0].mxu1 %vm224_vm0, %v18882_v2 }
 0x4b0   : > { %15319 = vmatpush3.bf16.msra.mxu1 %v17238_v35  ;;  %15290 = vmatprep.mubr.msk.bf16.mxu1 %vm224_vm0, %v18894_v37  ;;  %v4468_v35 = vld [vmem:[#allocation2 + $0x188] sm:$0xff] }
 0x4b1   : > { %15320 = vmatprep.subr.bf16.mxu1 %v17239_v30  ;;  %v19051_v28 = vpack.c.bf16 %v4468_v35, %v4467_v55 }
 0x4b4   : > { %15321 = vmatpush3.bf16.msra.mxu1 %v17239_v30 }
 0x4b5   : > { %15354 = vmatprep.subr.bf16.mxu1 %v17240_v25 }
 0x4b7   : > { %15291 = vmatmul.mubr.msk.bf16.gmra.mrb[4].mxu1 %vm224_vm0, %v18897_v5 }
 0x4b8   : > { %15294 = vmatprep.mubr.msk.bf16.mxu1 %vm224_vm0, %v18903_v4 }
 0x4bf   : > { %15295 = vmatmul.mubr.msk.bf16.gmra.mrb[8].mxu1 %vm224_vm0, %v18905_v18 }
 0x4c0   : > { %15298 = vmatprep.mubr.msk.bf16.mxu1 %vm224_vm0, %v18911_v59 }
 0x4c7   : > { %15299 = vmatmul.mubr.msk.bf16.gmra.mrb[12].mxu1 %vm224_vm0, %v18913_v51 }
 0x4c8   : > { %15302 = vmatprep.mubr.msk.bf16.mxu1 %vm224_vm0, %v18919_v13 }
 0x4cf   : > { %15303 = vmatmul.mubr.msk.bf16.gmra.mrb[16].mxu1 %vm224_vm0, %v18921_v14 }
 0x4d0   : > { %15306 = vmatprep.mubr.msk.bf16.mxu1 %vm224_vm0, %v18927_v42 }
 0x4d7   : > { %15307 = vmatmul.mubr.msk.bf16.gmra.mrb[20].mxu1 %vm224_vm0, %v18929_v24 }
 0x4d8   : > { %15310 = vmatprep.mubr.msk.bf16.mxu1 %vm224_vm0, %v18935_v49 }
 0x4df   : > { %15311 = vmatmul.mubr.msk.bf16.gmra.mrb[24].mxu1 %vm224_vm0, %v18937_v7 }
 0x4e0   : > { %15314 = vmatprep.mubr.msk.bf16.mxu1 %vm224_vm0, %v18943_v33 }
 0x4e7   : > { %15315 = vmatmul.mubr.msk.bf16.gmra.mrb[28].mxu1 %vm224_vm0, %v19051_v28 }
 0x4e8   : > { %15322 = vmatprep.mubr.msk.bf16.mxu1 %vm224_vm0, %v18765_v10  ;;  %v4773_v10 = vld [vmem:[#allocation2 + $0x181] sm:$0xff] }
 0x4e9   : > { %v19091_v47 = vpack.c.bf16 %v4774_v48, %v4773_v10 }
 0x4ef   : > { %15323 = vmatmul.mubr.msk.bf16.vlgmr.msra.gmra.mrb[0].mxu1 %vm224_vm0, %v18777_v17 }
 0x4f0   : > { %15355 = vmatpush3.bf16.msra.mxu1 %v17240_v25  ;;  %15326 = vmatprep.mubr.msk.bf16.mxu1 %vm224_vm0, %v18801_v23 }
 0x4f1   : > { %15356 = vmatprep.subr.bf16.mxu1 %v17241_v40 }
 0x4f4   : > { %15357 = vmatpush3.bf16.msra.mxu1 %v17241_v40 }
 0x4f5   : > { %15390 = vmatprep.subr.bf16.mxu1 %v17242_v27 }
 0x4f7   : > { %15327 = vmatmul.mubr.msk.bf16.gmra.mrb[4].mxu1 %vm224_vm0, %v18806_v38 }
 0x4f8   : > { %15330 = vmatprep.mubr.msk.bf16.mxu1 %vm224_vm0, %v18826_v8 }
 0x4ff   : > { %15331 = vmatmul.mubr.msk.bf16.gmra.mrb[8].mxu1 %vm224_vm0, %v18830_v44 }
 0x500   : > { %15334 = vmatprep.mubr.msk.bf16.mxu1 %vm224_vm0, %v18840_v15 }
 0x507   : > { %15335 = vmatmul.mubr.msk.bf16.gmra.mrb[12].mxu1 %vm224_vm0, %v18842_v50 }
 0x508   : > { %15338 = vmatprep.mubr.msk.bf16.mxu1 %vm224_vm0, %v18848_v63 }
 0x50f   : > { %15339 = vmatmul.mubr.msk.bf16.gmra.mrb[16].mxu1 %vm224_vm0, %v18850_v26 }
 0x510   : > { %15342 = vmatprep.mubr.msk.bf16.mxu1 %vm224_vm0, %v18856_v1 }
 0x517   : > { %15343 = vmatmul.mubr.msk.bf16.gmra.mrb[20].mxu1 %vm224_vm0, %v18858_v12 }
 0x518   : > { %15346 = vmatprep.mubr.msk.bf16.mxu1 %vm224_vm0, %v18864_v31 }
 0x51f   : > { %15347 = vmatmul.mubr.msk.bf16.gmra.mrb[24].mxu1 %vm224_vm0, %v18866_v20 }
 0x520   : > { %15350 = vmatprep.mubr.msk.bf16.mxu1 %vm224_vm0, %v18872_v41 }
 0x527   : > { %15351 = vmatmul.mubr.msk.bf16.gmra.mrb[28].mxu1 %vm224_vm0, %v19091_v47 }
 0x528   : > { %15358 = vmatprep.mubr.msk.bf16.mxu1 %vm224_vm0, %v18948_v45  ;;  %v5079_v45 = vld [vmem:[#allocation2 + $0x182] sm:$0xff] }
 0x529   : > { %v19131_v56 = vpack.c.bf16 %v5080_v21, %v5079_v45 }
 0x52f   : > { %15359 = vmatmul.mubr.msk.bf16.vlgmr.msra.gmra.mrb[0].mxu1 %vm224_vm0, %v18953_v3 }
 0x530   : > { %15391 = vmatpush3.bf16.msra.mxu1 %v17242_v27  ;;  %15362 = vmatprep.mubr.msk.bf16.mxu1 %vm224_vm0, %v18963_v11 }
 0x531   : > { %15392 = vmatprep.subr.bf16.mxu1 %v17243_v43 }
 0x534   : > { %15393 = vmatpush3.bf16.msra.mxu1 %v17243_v43 }
 0x535   : > { %15426 = vmatprep.subr.bf16.mxu1 %v17244_v53 }
 0x537   : > { %15363 = vmatmul.mubr.msk.bf16.gmra.mrb[4].mxu1 %vm224_vm0, %v18965_v16 }
 0x538   : > { %15366 = vmatprep.mubr.msk.bf16.mxu1 %vm224_vm0, %v18971_v62 }
 0x53f   : > { %15367 = vmatmul.mubr.msk.bf16.gmra.mrb[8].mxu1 %vm224_vm0, %v18973_v57 }
 0x540   : > { %15370 = vmatprep.mubr.msk.bf16.mxu1 %vm224_vm0, %v18979_v58 }
 0x547   : > { %15371 = vmatmul.mubr.msk.bf16.gmra.mrb[12].mxu1 %vm224_vm0, %v18981_v22 }
 0x548   : > { %15374 = vmatprep.mubr.msk.bf16.mxu1 %vm224_vm0, %v18987_v52 }
 0x54f   : > { %15375 = vmatmul.mubr.msk.bf16.gmra.mrb[16].mxu1 %vm224_vm0, %v18989_v54 }
 0x550   : > { %15378 = vmatprep.mubr.msk.bf16.mxu1 %vm224_vm0, %v18995_v36 }
 0x557   : > { %15379 = vmatmul.mubr.msk.bf16.gmra.mrb[20].mxu1 %vm224_vm0, %v18997_v61 }
 0x558   : > { %15382 = vmatprep.mubr.msk.bf16.mxu1 %vm224_vm0, %v19003_v60 }
 0x55f   : > { %15383 = vmatmul.mubr.msk.bf16.gmra.mrb[24].mxu1 %vm224_vm0, %v19005_v9 }
 0x560   : > { %15386 = vmatprep.mubr.msk.bf16.mxu1 %vm224_vm0, %v19011_v19 }
 0x567   : > { %15387 = vmatmul.mubr.msk.bf16.gmra.mrb[28].mxu1 %vm224_vm0, %v19131_v56 }
 0x568   : > { %15394 = vmatprep.mubr.msk.bf16.mxu1 %vm224_vm0, %v18882_v2  ;;  %v5385_v2 = vld [vmem:[#allocation2 + $0x198] sm:$0xff] }
 0x56f   : > { %15395 = vmatmul.mubr.msk.bf16.vlgmr.msra.gmra.mrb[0].mxu1 %vm224_vm0, %v18894_v37  ;;  %v5386_v37 = vld [vmem:[#allocation2 + $0x1a0] sm:$0xff] }
 0x570   : > { %15427 = vmatpush3.bf16.msra.mxu1 %v17244_v53  ;;  %15398 = vmatprep.mubr.msk.bf16.mxu1 %vm224_vm0, %v18897_v5  ;;  %v5402_v5 = vpack.c.bf16 %v5386_v37, %v5385_v2 }
 0x571   : > { %15428 = vmatprep.subr.bf16.mxu1 %v17245_v39 }
 0x574   : > { %15429 = vmatpush3.bf16.msra.mxu1 %v17245_v39 }
 0x575   : > { %15462 = vmatprep.subr.bf16.mxu1 %v17246_v34 }
 0x577   : > { %15399 = vmatmul.mubr.msk.bf16.gmra.mrb[4].mxu1 %vm224_vm0, %v18903_v4  ;;  %v17247_v4 = vld [vmem:[%s21844_s1 + $0x118] sm:$0xff]  }
 0x578   : > { %15402 = vmatprep.mubr.msk.bf16.mxu1 %vm224_vm0, %v18905_v18 }
 0x57f   : > { %15403 = vmatmul.mubr.msk.bf16.gmra.mrb[8].mxu1 %vm224_vm0, %v18911_v59 }
 0x580   : > { %15406 = vmatprep.mubr.msk.bf16.mxu1 %vm224_vm0, %v18913_v51 }
 0x587   : > { %15407 = vmatmul.mubr.msk.bf16.gmra.mrb[12].mxu1 %vm224_vm0, %v18919_v13 }
 0x588   : > { %15410 = vmatprep.mubr.msk.bf16.mxu1 %vm224_vm0, %v18921_v14 }
 0x58f   : > { %15411 = vmatmul.mubr.msk.bf16.gmra.mrb[16].mxu1 %vm224_vm0, %v18927_v42 }
 0x590   : > { %15414 = vmatprep.mubr.msk.bf16.mxu1 %vm224_vm0, %v18929_v24 }
 0x597   : > { %15415 = vmatmul.mubr.msk.bf16.gmra.mrb[20].mxu1 %vm224_vm0, %v18935_v49 }
 0x598   : > { %15418 = vmatprep.mubr.msk.bf16.mxu1 %vm224_vm0, %v18937_v7 }
 0x59f   : > { %15419 = vmatmul.mubr.msk.bf16.gmra.mrb[24].mxu1 %vm224_vm0, %v18943_v33 }
 0x5a0   : > { %15422 = vmatprep.mubr.msk.bf16.mxu1 %vm224_vm0, %v19051_v28 }
 0x5a7   : > { %15423 = vmatmul.mubr.msk.bf16.gmra.mrb[28].mxu1 %vm224_vm0, %v5402_v5 }
 0x5a8   : > { %15430 = vmatprep.mubr.msk.bf16.mxu1 %vm224_vm0, %v18777_v17  ;;  %v5691_v17 = vld [vmem:[#allocation2 + $0x199] sm:$0xff] }
 0x5af   : > { %15431 = vmatmul.mubr.msk.bf16.vlgmr.msra.gmra.mrb[0].mxu1 %vm224_vm0, %v18801_v23  ;;  %v5692_v23 = vld [vmem:[#allocation2 + $0x1a1] sm:$0xff] }
 0x5b0   : > { %15463 = vmatpush3.bf16.msra.mxu1 %v17246_v34  ;;  %15434 = vmatprep.mubr.msk.bf16.mxu1 %vm224_vm0, %v18806_v38  ;;  %v5708_v38 = vpack.c.bf16 %v5692_v23, %v5691_v17 }
 0x5b1   : > { %15464 = vmatprep.subr.bf16.mxu1 %v17247_v4 }
 0x5b4   : > { %15465 = vmatpush3.bf16.msra.mxu1 %v17247_v4 }
 0x5b7   : > { %15435 = vmatmul.mubr.msk.bf16.gmra.mrb[4].mxu1 %vm224_vm0, %v18826_v8  ;;  %v5997_v8 = vld [vmem:[#allocation2 + $0x19a] sm:$0xff] }
 0x5b8   : > { %15438 = vmatprep.mubr.msk.bf16.mxu1 %vm224_vm0, %v18830_v44  ;;  %v5998_v44 = vld [vmem:[#allocation2 + $0x1a2] sm:$0xff] }
 0x5bf   : > { %15439 = vmatmul.mubr.msk.bf16.gmra.mrb[8].mxu1 %vm224_vm0, %v18840_v15  ;;  %v6014_v15 = vpack.c.bf16 %v5998_v44, %v5997_v8 }
 0x5c0   : > { %15442 = vmatprep.mubr.msk.bf16.mxu1 %vm224_vm0, %v18842_v50  ;;  %v19240_v50 = vld [vmem:[%s21845_s2 + $0x1] ss:$0 sm:$0xff] }
 0x5c7   : > { %15443 = vmatmul.mubr.msk.bf16.gmra.mrb[12].mxu1 %vm224_vm0, %v18848_v63 }
 0x5c8   : > { %15446 = vmatprep.mubr.msk.bf16.mxu1 %vm224_vm0, %v18850_v26 }
 0x5cf   : > { %15447 = vmatmul.mubr.msk.bf16.gmra.mrb[16].mxu1 %vm224_vm0, %v18856_v1 }
 0x5d0   : > { %15450 = vmatprep.mubr.msk.bf16.mxu1 %vm224_vm0, %v18858_v12 }
 0x5d7   : > { %15451 = vmatmul.mubr.msk.bf16.gmra.mrb[20].mxu1 %vm224_vm0, %v18864_v31 }
 0x5d8   : > { %15454 = vmatprep.mubr.msk.bf16.mxu1 %vm224_vm0, %v18866_v20 }
 0x5df   : > { %15455 = vmatmul.mubr.msk.bf16.gmra.mrb[24].mxu1 %vm224_vm0, %v18872_v41 }
 0x5e0   : > { %15458 = vmatprep.mubr.msk.bf16.mxu1 %vm224_vm0, %v19091_v47 }
 0x5e7   : > { %15459 = vmatmul.mubr.msk.bf16.gmra.mrb[28].mxu1 %vm224_vm0, %v5708_v38 }
 0x5e8   : > { %15466 = vmatprep.mubr.msk.bf16.mxu1 %vm224_vm0, %v18953_v3 }
 0x5ef   : > { %15467 = vmatmul.mubr.msk.bf16.vlgmr.msra.gmra.mrb[0].mxu1 %vm224_vm0, %v18963_v11 }
 0x5f0   : > { %15470 = vmatprep.mubr.msk.bf16.mxu1 %vm224_vm0, %v18965_v16 }
 0x5f7   : > { %15471 = vmatmul.mubr.msk.bf16.gmra.mrb[4].mxu1 %vm224_vm0, %v18971_v62 }
 0x5f8   : > { %15474 = vmatprep.mubr.msk.bf16.mxu1 %vm224_vm0, %v18973_v57 }
 0x5ff   : > { %15475 = vmatmul.mubr.msk.bf16.gmra.mrb[8].mxu1 %vm224_vm0, %v18979_v58 }
 0x600   : > { %15478 = vmatprep.mubr.msk.bf16.mxu1 %vm224_vm0, %v18981_v22 }
 0x607   : > { %15479 = vmatmul.mubr.msk.bf16.gmra.mrb[12].mxu1 %vm224_vm0, %v18987_v52 }
 0x608   : > { %15482 = vmatprep.mubr.msk.bf16.mxu1 %vm224_vm0, %v18989_v54 }
 0x60f   : > { %15483 = vmatmul.mubr.msk.bf16.gmra.mrb[16].mxu1 %vm224_vm0, %v18995_v36 }
 0x610   : > { %15486 = vmatprep.mubr.msk.bf16.mxu1 %vm224_vm0, %v18997_v61 }
 0x617   : > { %15487 = vmatmul.mubr.msk.bf16.gmra.mrb[20].mxu1 %vm224_vm0, %v19003_v60 }
 0x618   : > { %15490 = vmatprep.mubr.msk.bf16.mxu1 %vm224_vm0, %v19005_v9 }
 0x61f   : > { %15491 = vmatmul.mubr.msk.bf16.gmra.mrb[24].mxu1 %vm224_vm0, %v19011_v19 }
 0x620   : > { %15494 = vmatprep.mubr.msk.bf16.mxu1 %vm224_vm0, %v19131_v56 }
 0x627   : > { %15495 = vmatmul.mubr.msk.bf16.gmra.mrb[28].mxu1 %vm224_vm0, %v6014_v15 }
 0x6c2   : > { %v15468_v63 = vpop.f32.mrb[0].mxu1 }
 0x6c3   : > { %v6114_v26 = vpop.f32.mrb[1].mxu1  ;;  %v19246_v20 = vadd.f32 %v15468_v63, %v19240_v50 }
 0x6c4   : > { %v19243_v1 = vadd.f32 %v19240_v50, %v6114_v26  ;;  %v15469_v12 = vpop.f32.mrb[2].mxu1 }
 0x6c5   : > { %v6117_v31 = vpop.f32.mrb[3].mxu1  ;;  %v19254_v59 = vadd.f32 %v15469_v12, %v19240_v50  ;;  %v6316_v14 = vsel %vm224_vm0, %v19246_v20, 0.0 }
 0x6c6   : > { %v19249_v41 = vadd.f32 %v19240_v50, %v6117_v31  ;;  %v6313_v18 = vsel %vm224_vm0, %v19243_v1, 0.0 }
 0x6c7   : > { %v6318_v7 = vsel %vm224_vm0, %v19254_v59, 0.0 }
 0x6c8   : > { %v6314_v51 = vsel %vm224_vm0, %v19249_v41, 0.0 }
 0x6c9   : > { %v6315_v13 = vadd.f32 %v6314_v51, %v6313_v18 }
 0x6ca   : > { %v15472_v42 = vpop.f32.mrb[4].mxu1 }
 0x6cb   : > { %v6317_v24 = vadd.f32 %v6316_v14, %v6315_v13  ;;  %v6130_v49 = vpop.f32.mrb[5].mxu1  ;;  %v19266_v62 = vadd.f32 %v15472_v42, %v19240_v50 }
 0x6cc   : > { %v19263_v33 = vadd.f32 %v19240_v50, %v6130_v49  ;;  %v15473_v3 = vpop.f32.mrb[6].mxu1 }
 0x6cd   : > { %v6319_v11 = vadd.f32 %v6318_v7, %v6317_v24  ;;  %v6133_v16 = vpop.f32.mrb[7].mxu1  ;;  %v19274_v52 = vadd.f32 %v15473_v3, %v19240_v50  ;;  %v6324_v61 = vsel %vm224_vm0, %v19266_v62, 0.0 }
 0x6ce   : > { %v6320_v57 = vsel %vm224_vm0, %v19263_v33, 0.0  ;;  %v19271_v58 = vadd.f32 %v19240_v50, %v6133_v16 }
 0x6cf   : > { %v6321_v22 = vadd.f32 %v6320_v57, %v6319_v11  ;;  %v6326_v60 = vsel %vm224_vm0, %v19274_v52, 0.0 }
 0x6d0   : > { %v6322_v54 = vsel %vm224_vm0, %v19271_v58, 0.0 }
 0x6d1   : > { %v6323_v36 = vadd.f32 %v6322_v54, %v6321_v22 }
 0x6d2   : > { %v15476_v0 = vpop.f32.mrb[8].mxu1 }
 0x6d3   : > { %v6325_v6 = vadd.f32 %v6324_v61, %v6323_v36  ;;  %v6146_v29 = vpop.f32.mrb[9].mxu1  ;;  %v19286_v30 = vadd.f32 %v15476_v0, %v19240_v50 }
 0x6d4   : > { %v19283_v9 = vadd.f32 %v19240_v50, %v6146_v29  ;;  %v15477_v32 = vpop.f32.mrb[10].mxu1 }
 0x6d5   : > { %v6327_v46 = vadd.f32 %v6326_v60, %v6325_v6  ;;  %v6149_v19 = vpop.f32.mrb[11].mxu1  ;;  %v19294_v28 = vadd.f32 %v15477_v32, %v19240_v50  ;;  %v6332_v10 = vsel %vm224_vm0, %v19286_v30, 0.0 }
 0x6d6   : > { %v6328_v25 = vsel %vm224_vm0, %v19283_v9, 0.0  ;;  %v19291_v55 = vadd.f32 %v19240_v50, %v6149_v19 }
 0x6d7   : > { %v6329_v35 = vadd.f32 %v6328_v25, %v6327_v46  ;;  %v6334_v53 = vsel %vm224_vm0, %v19294_v28, 0.0 }
 0x6d8   : > { %v6330_v40 = vsel %vm224_vm0, %v19291_v55, 0.0 }
 0x6d9   : > { %v6331_v27 = vadd.f32 %v6330_v40, %v6329_v35 }
 0x6da   : > { %v15480_v48 = vpop.f32.mrb[12].mxu1 }
 0x6db   : > { %v6333_v47 = vadd.f32 %v6332_v10, %v6331_v27  ;;  %v6162_v43 = vpop.f32.mrb[13].mxu1  ;;  %v19306_v34 = vadd.f32 %v15480_v48, %v19240_v50 }
 0x6dc   : > { %v19303_v45 = vadd.f32 %v19240_v50, %v6162_v43  ;;  %v15481_v21 = vpop.f32.mrb[14].mxu1 }
 0x6dd   : > { %v6335_v56 = vadd.f32 %v6334_v53, %v6333_v47  ;;  %v6165_v39 = vpop.f32.mrb[15].mxu1  ;;  %v19314_v4 = vadd.f32 %v15481_v21, %v19240_v50  ;;  %v6340_v38 = vsel %vm224_vm0, %v19306_v34, 0.0 }
 0x6de   : > { %v6336_v2 = vsel %vm224_vm0, %v19303_v45, 0.0  ;;  %v19311_v37 = vadd.f32 %v19240_v50, %v6165_v39 }
 0x6df   : > { %v6337_v5 = vadd.f32 %v6336_v2, %v6335_v56  ;;  %v6342_v63 = vsel %vm224_vm0, %v19314_v4, 0.0 }
 0x6e0   : > { %v6338_v17 = vsel %vm224_vm0, %v19311_v37, 0.0 }
 0x6e1   : > { %v6339_v23 = vadd.f32 %v6338_v17, %v6337_v5 }
 0x6e2   : > { %v15484_v8 = vpop.f32.mrb[16].mxu1 }
 0x6e3   : > { %v6341_v44 = vadd.f32 %v6340_v38, %v6339_v23  ;;  %v6178_v15 = vpop.f32.mrb[17].mxu1  ;;  %v19326_v51 = vadd.f32 %v15484_v8, %v19240_v50 }
 0x6e4   : > { %v19323_v26 = vadd.f32 %v19240_v50, %v6178_v15  ;;  %v15485_v12 = vpop.f32.mrb[18].mxu1 }
 0x6e5   : > { %v6343_v31 = vadd.f32 %v6342_v63, %v6341_v44  ;;  %v6181_v18 = vpop.f32.mrb[19].mxu1  ;;  %v19334_v24 = vadd.f32 %v15485_v12, %v19240_v50  ;;  %v6348_v3 = vsel %vm224_vm0, %v19326_v51, 0.0 }
 0x6e6   : > { %v6344_v13 = vsel %vm224_vm0, %v19323_v26, 0.0  ;;  %v19331_v14 = vadd.f32 %v19240_v50, %v6181_v18 }
 0x6e7   : > { %v6345_v42 = vadd.f32 %v6344_v13, %v6343_v31  ;;  %v6350_v22 = vsel %vm224_vm0, %v19334_v24, 0.0 }
 0x6e8   : > { %v6346_v49 = vsel %vm224_vm0, %v19331_v14, 0.0 }
 0x6e9   : > { %v6347_v7 = vadd.f32 %v6346_v49, %v6345_v42 }
 0x6ea   : > { %v15488_v11 = vpop.f32.mrb[20].mxu1 }
 0x6eb   : > { %v6349_v16 = vadd.f32 %v6348_v3, %v6347_v7  ;;  %v6194_v57 = vpop.f32.mrb[21].mxu1  ;;  %v6303_v6 = vadd.f32 %v15488_v11, %v19240_v50 }
 0x6ec   : > { %v19343_v54 = vadd.f32 %v19240_v50, %v6194_v57  ;;  %v15489_v36 = vpop.f32.mrb[22].mxu1 }
 0x6ed   : > { %v6351_v61 = vadd.f32 %v6350_v22, %v6349_v16  ;;  %v6197_v0 = vpop.f32.mrb[23].mxu1  ;;  %v6304_v46 = vadd.f32 %v15489_v36, %v19240_v50  ;;  %v6356_v35 = vsel %vm224_vm0, %v6303_v6, 0.0 }
 0x6ee   : > { %v6352_v29 = vsel %vm224_vm0, %v19343_v54, 0.0  ;;  %v6302_v60 = vadd.f32 %v19240_v50, %v6197_v0 }
 0x6ef   : > { %v6353_v32 = vadd.f32 %v6352_v29, %v6351_v61  ;;  %v6358_v48 = vsel %vm224_vm0, %v6304_v46, 0.0 }
 0x6f0   : > { %v6354_v19 = vsel %vm224_vm0, %v6302_v60, 0.0 }
 0x6f1   : > { %v6355_v25 = vadd.f32 %v6354_v19, %v6353_v32 }
 0x6f2   : > { %v15492_v40 = vpop.f32.mrb[24].mxu1 }
 0x6f3   : > { %v6357_v27 = vadd.f32 %v6356_v35, %v6355_v25  ;;  %v6210_v10 = vpop.f32.mrb[25].mxu1  ;;  %v6307_v56 = vadd.f32 %v15492_v40, %v19240_v50 }
 0x6f4   : > { %v6305_v47 = vadd.f32 %v19240_v50, %v6210_v10  ;;  %v15493_v43 = vpop.f32.mrb[26].mxu1 }
 0x6f5   : > { %v6359_v53 = vadd.f32 %v6358_v48, %v6357_v27  ;;  %v6213_v21 = vpop.f32.mrb[27].mxu1  ;;  %v6308_v17 = vadd.f32 %v15493_v43, %v19240_v50  ;;  %v6364_v8 = vsel %vm224_vm0, %v6307_v56, 0.0 }
 0x6f6   : > { %v6360_v39 = vsel %vm224_vm0, %v6305_v47, 0.0  ;;  %v6306_v2 = vadd.f32 %v19240_v50, %v6213_v21 }
 0x6f7   : > { %v6361_v5 = vadd.f32 %v6360_v39, %v6359_v53  ;;  %v6366_v12 = vsel %vm224_vm0, %v6308_v17, 0.0 }
 0x6f8   : > { %v6362_v23 = vsel %vm224_vm0, %v6306_v2, 0.0 }
 0x6f9   : > { %v6363_v38 = vadd.f32 %v6362_v23, %v6361_v5 }
 0x6fa   : > { %v15496_v44 = vpop.f32.mrb[28].mxu1 }
 0x6fb   : > { %v6365_v15 = vadd.f32 %v6364_v8, %v6363_v38  ;;  %v6226_v63 = vpop.f32.mrb[29].mxu1  ;;  %v6311_v49 = vadd.f32 %v15496_v44, %v19240_v50 }
 0x6fc   : > { %v6309_v31 = vadd.f32 %v19240_v50, %v6226_v63  ;;  %v15497_v18 = vpop.f32.mrb[30].mxu1 }
 0x6fd   : > { %v6367_v13 = vadd.f32 %v6366_v12, %v6365_v15  ;;  %v6229_v42 = vpop.f32.mrb[31].mxu1  ;;  %v6312_v16 = vadd.f32 %v15497_v18, %v19240_v50  ;;  %v6372_v36 = vsel %vm224_vm0, %v6311_v49, 0.0 }
 0x6fe   : > { %v6368_v7 = vsel %vm224_vm0, %v6309_v31, 0.0  ;;  %v6310_v3 = vadd.f32 %v19240_v50, %v6229_v42 }
 0x6ff   : > { %v6369_v11 = vadd.f32 %v6368_v7, %v6367_v13  ;;  %v6374_v0 = vsel %vm224_vm0, %v6312_v16, 0.0 }
 0x700   : > { %v6370_v57 = vsel %vm224_vm0, %v6310_v3, 0.0 }
 0x701   : > { %v6371_v22 = vadd.f32 %v6370_v57, %v6369_v11 }
 0x703   : > { %v6373_v61 = vadd.f32 %v6372_v36, %v6371_v22 }
 0x705   : > { %v6375_v29 = vadd.f32 %v6374_v0, %v6373_v61 }
 0x707   : > { %v6376_v32 = vrot.slane %v6375_v29, 4 }
 0x709   : > { %v6377_v19 = vadd.f32 %v6376_v32, %v6375_v29 }
 0x70b   : > { %v6378_v25 = vrot.slane %v6377_v19, 2 }
 0x70d   : > { %v6379_v35 = vadd.f32 %v6378_v25, %v6377_v19 }
 0x70f   : > { %v6380_v40 = vrot.slane %v6379_v35, 1 }
 0x711   : > { %v6381_v27 = vadd.f32 %v6380_v40, %v6379_v35 }
 0x713   : > { %v6382_v10 = vmul.f32 0.00390625, %v6381_v27 }
 0x715   : > { %v19370_v48 = vsub.f32 %v19291_v55, %v6382_v10  ;;  %v19373_v50 = vsub.f32 %v19294_v28, %v6382_v10  ;;  %v19376_v43 = vsub.f32 %v19303_v45, %v6382_v10  ;;  %v19379_v53 = vsub.f32 %v19311_v37, %v6382_v10 }
 0x716   : > { %v19382_v21 = vsub.f32 %v19306_v34, %v6382_v10  ;;  %v19385_v39 = vsub.f32 %v19314_v4, %v6382_v10  ;;  %v19388_v5 = vsub.f32 %v19323_v26, %v6382_v10  ;;  %v19391_v55 = vsub.f32 %v19331_v14, %v6382_v10 }
 0x717   : > { %v19394_v28 = vsub.f32 %v19326_v51, %v6382_v10  ;;  %v19397_v45 = vsub.f32 %v19334_v24, %v6382_v10  ;;  %v19400_v37 = vsub.f32 %v19343_v54, %v6382_v10  ;;  %v19402_v34 = vsub.f32 %v6302_v60, %v6382_v10 }
 0x718   : > { %v19404_v23 = vsub.f32 %v6303_v6, %v6382_v10  ;;  %v19406_v4 = vsub.f32 %v6304_v46, %v6382_v10  ;;  %v19408_v26 = vsub.f32 %v6305_v47, %v6382_v10  ;;  %v19410_v38 = vsub.f32 %v6306_v2, %v6382_v10 }
 0x719   : > { %v19412_v14 = vsub.f32 %v6307_v56, %v6382_v10  ;;  %v19414_v51 = vsub.f32 %v6308_v17, %v6382_v10  ;;  %v19416_v8 = vsub.f32 %v6309_v31, %v6382_v10  ;;  %v19418_v24 = vsub.f32 %v6310_v3, %v6382_v10 }
 0x71a   : > { %v19420_v54 = vsub.f32 %v6311_v49, %v6382_v10  ;;  %v19422_v60 = vsub.f32 %v6312_v16, %v6382_v10  ;;  %v19425_v6 = vsub.f32 %v19243_v1, %v6382_v10  ;;  %v19428_v46 = vsub.f32 %v19249_v41, %v6382_v10 }
 0x71b   : > { %v19431_v47 = vsub.f32 %v19246_v20, %v6382_v10  ;;  %v19434_v56 = vsub.f32 %v19254_v59, %v6382_v10  ;;  %v19441_v44 = vsub.f32 %v19263_v33, %v6382_v10  ;;  %v19446_v41 = vsub.f32 %v19271_v58, %v6382_v10 }
 0x71c   : > { %v6415_v2 = vmul.f32 %v19425_v6, %v19425_v6  ;;  %v6416_v17 = vmul.f32 %v19428_v46, %v19428_v46  ;;  %v19453_v12 = vsub.f32 %v19266_v62, %v6382_v10  ;;  %v19459_v58 = vsub.f32 %v19274_v52, %v6382_v10 }
 0x71d   : > { %v6417_v1 = vmul.f32 %v19431_v47, %v19431_v47  ;;  %v6418_v20 = vmul.f32 %v19434_v56, %v19434_v56  ;;  %v6419_v33 = vmul.f32 %v19441_v44, %v19441_v44  ;;  %v6420_v13 = vmul.f32 %v19446_v41, %v19446_v41 }
 0x71e   : > { %v6447_v59 = vsel %vm224_vm0, %v6415_v2, 0.0  ;;  %v6448_v15 = vsel %vm224_vm0, %v6416_v17, 0.0  ;;  %v19465_v7 = vsub.f32 %v19283_v9, %v6382_v10  ;;  %v6421_v62 = vmul.f32 %v19453_v12, %v19453_v12 }
 0x71f   : > { %v6449_v63 = vadd.f32 %v6448_v15, %v6447_v59  ;;  %v6450_v31 = vsel %vm224_vm0, %v6417_v1, 0.0  ;;  %v6452_v42 = vsel %vm224_vm0, %v6418_v20, 0.0  ;;  %v6454_v3 = vsel %vm224_vm0, %v6419_v33, 0.0 }
 0x720   : > { %v6422_v16 = vmul.f32 %v19459_v58, %v19459_v58  ;;  %v6456_v52 = vsel %vm224_vm0, %v6420_v13, 0.0  ;;  %v19474_v22 = vsub.f32 %v19286_v30, %v6382_v10  ;;  %v6423_v36 = vmul.f32 %v19465_v7, %v19465_v7 }
 0x721   : > { %v6451_v18 = vadd.f32 %v6450_v31, %v6449_v63  ;;  %v6458_v9 = vsel %vm224_vm0, %v6421_v62, 0.0  ;;  %v6424_v0 = vmul.f32 %v19370_v48, %v19370_v48  ;;  %v6426_v30 = vmul.f32 %v19373_v50, %v19373_v50 }
 0x722   : > { %v6460_v29 = vsel %vm224_vm0, %v6422_v16, 0.0  ;;  %v6425_v19 = vmul.f32 %v19474_v22, %v19474_v22  ;;  %v6462_v25 = vsel %vm224_vm0, %v6423_v36, 0.0  ;;  %v6427_v10 = vmul.f32 %v19376_v43, %v19376_v43 }
 0x723   : > { %v6453_v49 = vadd.f32 %v6452_v42, %v6451_v18  ;;  %v6464_v40 = vsel %vm224_vm0, %v6424_v0, 0.0  ;;  %v6428_v1 = vmul.f32 %v19379_v53, %v19379_v53  ;;  %v6468_v20 = vsel %vm224_vm0, %v6426_v30, 0.0 }
 0x724   : > { %v6466_v2 = vsel %vm224_vm0, %v6425_v19, 0.0  ;;  %v6429_v15 = vmul.f32 %v19382_v21, %v19382_v21  ;;  %v6470_v63 = vsel %vm224_vm0, %v6427_v10, 0.0  ;;  %v6430_v31 = vmul.f32 %v19385_v39, %v19385_v39 }
 0x725   : > { %v6455_v11 = vadd.f32 %v6454_v3, %v6453_v49  ;;  %v6472_v18 = vsel %vm224_vm0, %v6428_v1, 0.0  ;;  %v6431_v42 = vmul.f32 %v19388_v5, %v19388_v5  ;;  %v6432_v3 = vmul.f32 %v19391_v55, %v19391_v55  ;;  %v17248_v1 = vld [vmem:[%s21844_s1 + $0x130] sm:$0xff]  }
 0x726   : > { %v6474_v49 = vsel %vm224_vm0, %v6429_v15, 0.0  ;;  %15498 = vmatprep.subr.bf16.mxu0 %v17248_v1 }
 0x727   : > { %v6457_v57 = vadd.f32 %v6456_v52, %v6455_v11  ;;  %v6476_v11 = vsel %vm224_vm0, %v6430_v31, 0.0  ;;  %v6433_v52 = vmul.f32 %v19394_v28, %v19394_v28  ;;  %v6877_v31 = vld [vmem:[#allocation2 + $0x9] sm:$0xff]  ;;  %15499 = vmatpush3.bf16.msra.mxu0 %v17248_v1 }
 0x729   : > { %v6459_v61 = vadd.f32 %v6458_v9, %v6457_v57  ;;  %v6478_v57 = vsel %vm224_vm0, %v6431_v42, 0.0  ;;  %v6434_v9 = vmul.f32 %v19397_v45, %v19397_v45  ;;  %v6440_v42 = vmul.f32 %v19410_v38, %v19410_v38 }
 0x72b   : > { %v6461_v32 = vadd.f32 %v6460_v29, %v6459_v61  ;;  %v6480_v61 = vsel %vm224_vm0, %v6432_v3, 0.0  ;;  %v6435_v29 = vmul.f32 %v19400_v37, %v19400_v37 }
 0x72d   : > { %v6463_v35 = vadd.f32 %v6462_v25, %v6461_v32  ;;  %v6482_v32 = vsel %vm224_vm0, %v6433_v52, 0.0  ;;  %v6436_v25 = vmul.f32 %v19402_v34, %v19402_v34 }
 0x72f   : > { %v6465_v27 = vadd.f32 %v6464_v40, %v6463_v35  ;;  %v6484_v35 = vsel %vm224_vm0, %v6434_v9, 0.0  ;;  %v6437_v40 = vmul.f32 %v19404_v23, %v19404_v23 }
 0x731   : > { %v6467_v17 = vadd.f32 %v6466_v2, %v6465_v27  ;;  %v6486_v27 = vsel %vm224_vm0, %v6435_v29, 0.0  ;;  %v6438_v2 = vmul.f32 %v19406_v4, %v19406_v4  ;;  %v6490_v15 = vsel %vm224_vm0, %v6437_v40, 0.0 }
 0x733   : > { %v6469_v59 = vadd.f32 %v6468_v20, %v6467_v17  ;;  %v6488_v17 = vsel %vm224_vm0, %v6436_v25, 0.0 }
 0x735   : > { %v6471_v33 = vadd.f32 %v6470_v63, %v6469_v59  ;;  %v6439_v59 = vmul.f32 %v19408_v26, %v19408_v26  ;;  %v17249_v63 = vld [vmem:[%s21844_s1 + $0x138] sm:$0xff]  }
 0x736   : > { %15500 = vmatprep.subr.bf16.mxu0 %v17249_v63 }
 0x737   : > { %v6473_v13 = vadd.f32 %v6472_v18, %v6471_v33  ;;  %v6876_v33 = vld [vmem:[#allocation2 + $0x1] sm:$0xff]  ;;  %15501 = vmatpush3.bf16.msra.mxu0 %v17249_v63 }
 0x739   : > { %v6475_v62 = vadd.f32 %v6474_v49, %v6473_v13  ;;  %v6908_v13 = vpack.c.bf16 %v6877_v31, %v6876_v33  ;;  %v6492_v49 = vsel %vm224_vm0, %v6438_v2, 0.0 }
 0x73b   : > { %v6477_v16 = vadd.f32 %v6476_v11, %v6475_v62  ;;  %v19539_v62 = vld [vmem:[%s21844_s1 + $0x120] sm:$0xff]   ;;  %15502 = vmatprep.mubr.msk.bf16.mxu0 %vm224_vm0, %v6908_v13  ;;  %v6441_v11 = vmul.f32 %v19412_v14, %v19412_v14 }
 0x73c   : > { %15534 = vmatprep.subr.bf16.mxu0 %v19539_v62 }
 0x73d   : > { %v6479_v36 = vadd.f32 %v6478_v57, %v6477_v16  ;;  %v6494_v16 = vsel %vm224_vm0, %v6439_v59, 0.0  ;;  %v6442_v57 = vmul.f32 %v19414_v51, %v19414_v51 }
 0x73f   : > { %v6481_v0 = vadd.f32 %v6480_v61, %v6479_v36  ;;  %v6496_v36 = vsel %vm224_vm0, %v6440_v42, 0.0  ;;  %v6443_v61 = vmul.f32 %v19416_v8, %v19416_v8 }
 0x741   : > { %v6483_v19 = vadd.f32 %v6482_v32, %v6481_v0  ;;  %v6498_v0 = vsel %vm224_vm0, %v6441_v11, 0.0  ;;  %v6444_v32 = vmul.f32 %v19418_v24, %v19418_v24  ;;  %v19566_v11 = vld [vmem:[%s21846_s3 + $0x1] ss:$0 sm:$0xff] }
 0x743   : > { %v6485_v30 = vadd.f32 %v6484_v35, %v6483_v19  ;;  %v6500_v19 = vsel %vm224_vm0, %v6442_v57, 0.0  ;;  %v6445_v35 = vmul.f32 %v19420_v54, %v19420_v54 }
 0x745   : > { %v6487_v10 = vadd.f32 %v6486_v27, %v6485_v30  ;;  %v6502_v30 = vsel %vm224_vm0, %v6443_v61, 0.0  ;;  %v6446_v27 = vmul.f32 %v19422_v60, %v19422_v60 }
 0x747   : > { %v6489_v20 = vadd.f32 %v6488_v17, %v6487_v10  ;;  %v6504_v10 = vsel %vm224_vm0, %v6444_v32, 0.0  ;;  %v6506_v17 = vsel %vm224_vm0, %v6445_v35, 0.0 }
 0x749   : > { %v6491_v18 = vadd.f32 %v6490_v15, %v6489_v20  ;;  %v6508_v20 = vsel %vm224_vm0, %v6446_v27, 0.0 }
 0x74b   : > { %v6493_v3 = vadd.f32 %v6492_v49, %v6491_v18 }
 0x74d   : > { %v6495_v52 = vadd.f32 %v6494_v16, %v6493_v3 }
 0x74f   : > { %v6497_v9 = vadd.f32 %v6496_v36, %v6495_v52  ;;  %v19572_v52 = vld [vmem:[%s21847_s4 + $0x1] ss:$0 sm:$0xff] }
 0x751   : > { %v6499_v29 = vadd.f32 %v6498_v0, %v6497_v9 }
 0x753   : > { %v6501_v25 = vadd.f32 %v6500_v19, %v6499_v29 }
 0x755   : > { %v6503_v40 = vadd.f32 %v6502_v30, %v6501_v25 }
 0x757   : > { %v6505_v2 = vadd.f32 %v6504_v10, %v6503_v40 }
 0x759   : > { %v6507_v1 = vadd.f32 %v6506_v17, %v6505_v2 }
 0x75b   : > { %v6509_v59 = vadd.f32 %v6508_v20, %v6507_v1 }
 0x75d   : > { %v6510_v15 = vrot.slane %v6509_v59, 4 }
 0x75f   : > { %v6511_v63 = vadd.f32 %v6510_v15, %v6509_v59 }
 0x761   : > { %v6512_v33 = vrot.slane %v6511_v63, 2 }
 0x763   : > { %v6513_v31 = vadd.f32 %v6512_v33, %v6511_v63 }
 0x765   : > { %v6514_v18 = vrot.slane %v6513_v31, 1 }
 0x767   : > { %v6515_v13 = vadd.f32 %v6514_v18, %v6513_v31 }
 0x769   : > { %v6516_v42 = vmul.f32 0.00390625, %v6515_v13 }
 0x76b   : > { %v6517_v49 = vadd.f32 1e-05, %v6516_v42 }
 0x76d   : > { %17350 = vrsqrt.f32 %v6517_v49 }
 0x777   : > { %v17351_v3 = vpop.eup %17350 }
 0x778   : > { %v6548_v16 = vmul.f32 %v17351_v3, %v19418_v24  ;;  %v6519_v61 = vmul.f32 %v17351_v3, %v19425_v6  ;;  %v6520_v0 = vmul.f32 %v17351_v3, %v19428_v46  ;;  %v6521_v29 = vmul.f32 %v17351_v3, %v19431_v47 }
 0x779   : > { %v6522_v32 = vmul.f32 %v17351_v3, %v19434_v56  ;;  %v6523_v24 = vmul.f32 %v17351_v3, %v19441_v44  ;;  %v6524_v19 = vmul.f32 %v17351_v3, %v19446_v41  ;;  %v6525_v25 = vmul.f32 %v17351_v3, %v19453_v12 }
 0x77a   : > { %v6588_v57 = vmul.f32 %v19566_v11, %v6548_v16  ;;  %v6526_v35 = vmul.f32 %v17351_v3, %v19459_v58  ;;  %v6527_v30 = vmul.f32 %v17351_v3, %v19465_v7  ;;  %v6528_v40 = vmul.f32 %v17351_v3, %v19370_v48 }
 0x77b   : > { %v6529_v6 = vmul.f32 %v17351_v3, %v19474_v22  ;;  %v6530_v46 = vmul.f32 %v17351_v3, %v19373_v50  ;;  %v6531_v47 = vmul.f32 %v17351_v3, %v19376_v43  ;;  %v6532_v56 = vmul.f32 %v17351_v3, %v19379_v53 }
 0x77c   : > { %v6628_v36 = vadd.f32 %v19572_v52, %v6588_v57  ;;  %v6533_v44 = vmul.f32 %v17351_v3, %v19382_v21  ;;  %v6534_v41 = vmul.f32 %v17351_v3, %v19385_v39  ;;  %v6535_v12 = vmul.f32 %v17351_v3, %v19388_v5 }
 0x77d   : > { %v6536_v58 = vmul.f32 %v17351_v3, %v19391_v55  ;;  %v6537_v7 = vmul.f32 %v17351_v3, %v19394_v28  ;;  %v6538_v48 = vmul.f32 %v17351_v3, %v19397_v45  ;;  %v6539_v22 = vmul.f32 %v17351_v3, %v19400_v37 }
 0x77e   : > { %v6692_v9 = vmul.f32 0.70710677, %v6628_v36  ;;  %v6660_v27 = vmul.f32 0.5, %v6628_v36  ;;  %v6540_v50 = vmul.f32 %v17351_v3, %v19402_v34  ;;  %v6541_v43 = vmul.f32 %v17351_v3, %v19404_v23 }
 0x77f   : > { %v6542_v53 = vmul.f32 %v17351_v3, %v19406_v4  ;;  %v6543_v21 = vmul.f32 %v17351_v3, %v19408_v26  ;;  %v6544_v5 = vmul.f32 %v17351_v3, %v19410_v38  ;;  %v6545_v55 = vmul.f32 %v17351_v3, %v19412_v14 }
 0x780   : > { %17352 = verf.f32 %v6692_v9  ;;  %v6546_v10 = vmul.f32 %v17351_v3, %v19414_v51  ;;  %v6547_v28 = vmul.f32 %v17351_v3, %v19416_v8  ;;  %v6549_v37 = vmul.f32 %v17351_v3, %v19420_v54 }
 0x781   : > { %v6550_v34 = vmul.f32 %v17351_v3, %v19422_v60  ;;  %v6559_v23 = vmul.f32 %v19566_v11, %v6519_v61  ;;  %v6560_v4 = vmul.f32 %v19566_v11, %v6520_v0  ;;  %v6561_v26 = vmul.f32 %v19566_v11, %v6521_v29 }
 0x782   : > { %v6562_v2 = vmul.f32 %v19566_v11, %v6522_v32  ;;  %v6563_v38 = vmul.f32 %v19566_v11, %v6523_v24  ;;  %v6564_v51 = vmul.f32 %v19566_v11, %v6524_v19  ;;  %v6565_v8 = vmul.f32 %v19566_v11, %v6525_v25 }
 0x783   : > { %v6566_v17 = vmul.f32 %v19566_v11, %v6526_v35  ;;  %v6567_v54 = vmul.f32 %v19566_v11, %v6527_v30  ;;  %v6568_v60 = vmul.f32 %v19566_v11, %v6528_v40  ;;  %v6569_v1 = vmul.f32 %v19566_v11, %v6529_v6 }
 0x784   : > { %v6570_v20 = vmul.f32 %v19566_v11, %v6530_v46  ;;  %v6571_v59 = vmul.f32 %v19566_v11, %v6531_v47  ;;  %v6572_v15 = vmul.f32 %v19566_v11, %v6532_v56  ;;  %v6573_v63 = vmul.f32 %v19566_v11, %v6533_v44 }
 0x785   : > { %v6574_v33 = vmul.f32 %v19566_v11, %v6534_v41  ;;  %v6575_v31 = vmul.f32 %v19566_v11, %v6535_v12  ;;  %v6576_v18 = vmul.f32 %v19566_v11, %v6536_v58  ;;  %v6577_v13 = vmul.f32 %v19566_v11, %v6537_v7 }
 0x786   : > { %v6578_v42 = vmul.f32 %v19566_v11, %v6538_v48  ;;  %v6579_v49 = vmul.f32 %v19566_v11, %v6539_v22  ;;  %v6580_v3 = vmul.f32 %v19566_v11, %v6540_v50  ;;  %v6581_v16 = vmul.f32 %v19566_v11, %v6541_v43 }
 0x787   : > { %v6582_v57 = vmul.f32 %v19566_v11, %v6542_v53  ;;  %v6583_v36 = vmul.f32 %v19566_v11, %v6543_v21  ;;  %v6584_v9 = vmul.f32 %v19566_v11, %v6544_v5  ;;  %v6585_v61 = vmul.f32 %v19566_v11, %v6545_v55 }
 0x788   : > { %v6586_v0 = vmul.f32 %v19566_v11, %v6546_v10  ;;  %v6587_v29 = vmul.f32 %v19566_v11, %v6547_v28  ;;  %v6589_v32 = vmul.f32 %v19566_v11, %v6549_v37  ;;  %v6590_v24 = vmul.f32 %v19566_v11, %v6550_v34 }
 0x789   : > { %v6599_v19 = vadd.f32 %v19572_v52, %v6559_v23  ;;  %v6600_v25 = vadd.f32 %v19572_v52, %v6560_v4  ;;  %v6601_v35 = vadd.f32 %v19572_v52, %v6561_v26  ;;  %v6602_v30 = vadd.f32 %v19572_v52, %v6562_v2 }
 0x78a   : > { %v17353_v39 = vpop.eup %17352  ;;  %v6603_v40 = vadd.f32 %v19572_v52, %v6563_v38  ;;  %v6604_v6 = vadd.f32 %v19572_v52, %v6564_v51  ;;  %v6605_v46 = vadd.f32 %v19572_v52, %v6565_v8  ;;  %v6606_v47 = vadd.f32 %v19572_v52, %v6566_v17 }
 0x78b   : > { %v6756_v45 = vadd.f32 1.0, %v17353_v39  ;;  %v6607_v56 = vadd.f32 %v19572_v52, %v6567_v54  ;;  %v6608_v11 = vadd.f32 %v19572_v52, %v6568_v60  ;;  %v6609_v44 = vadd.f32 %v19572_v52, %v6569_v1 }
 0x78c   : > { %v6610_v41 = vadd.f32 %v19572_v52, %v6570_v20  ;;  %v6611_v12 = vadd.f32 %v19572_v52, %v6571_v59  ;;  %v6612_v58 = vadd.f32 %v19572_v52, %v6572_v15  ;;  %v6614_v7 = vadd.f32 %v19572_v52, %v6574_v33 }
 0x78d   : > { %v6788_v14 = vmul.f32 %v6756_v45, %v6660_v27  ;;  %v6613_v27 = vadd.f32 %v19572_v52, %v6573_v63  ;;  %v19656_v48 = vadd.f32 %v19572_v52, %v6575_v31  ;;  %v19659_v22 = vadd.f32 %v19572_v52, %v6576_v18 }
 0x78e   : > { %v19662_v50 = vadd.f32 %v19572_v52, %v6577_v13  ;;  %v19665_v43 = vadd.f32 %v19572_v52, %v6578_v42  ;;  %v19668_v53 = vadd.f32 %v19572_v52, %v6579_v49  ;;  %v19671_v21 = vadd.f32 %v19572_v52, %v6580_v3 }
 0x78f   : > { %6820 = vst.msk [vmem:[#allocation2 + $0x171] sm:$0xff] %vm224_vm0, %v6788_v14  ;;  %v6663_v39 = vmul.f32 0.70710677, %v6599_v19  ;;  %v6664_v5 = vmul.f32 0.70710677, %v6600_v25  ;;  %v19674_v10 = vadd.f32 %v19572_v52, %v6581_v16  ;;  %v19677_v28 = vadd.f32 %v19572_v52, %v6582_v57 }
 0x790   : > { %v6665_v55 = vmul.f32 0.70710677, %v6601_v35  ;;  %v19680_v45 = vadd.f32 %v19572_v52, %v6583_v36  ;;  %v6666_v37 = vmul.f32 0.70710677, %v6602_v30  ;;  %v19683_v34 = vadd.f32 %v19572_v52, %v6584_v9 }
 0x791   : > { %v19686_v23 = vadd.f32 %v19572_v52, %v6585_v61  ;;  %v6667_v4 = vmul.f32 0.70710677, %v6603_v40  ;;  %17354 = verf.f32 %v6663_v39  ;;  %v19689_v26 = vadd.f32 %v19572_v52, %v6586_v0 }
 0x792   : > { %v19692_v2 = vadd.f32 %v19572_v52, %v6587_v29  ;;  %v6668_v38 = vmul.f32 0.70710677, %v6604_v6  ;;  %17356 = verf.f32 %v6664_v5  ;;  %v19695_v14 = vadd.f32 %v19572_v52, %v6589_v32 }
 0x793   : > { %v19698_v51 = vadd.f32 %v19572_v52, %v6590_v24  ;;  %v6669_v8 = vmul.f32 0.70710677, %v6605_v46  ;;  %17358 = verf.f32 %v6665_v55  ;;  %v6631_v17 = vmul.f32 0.5, %v6599_v19 }
 0x794   : > { %v6632_v54 = vmul.f32 0.5, %v6600_v25  ;;  %v6670_v60 = vmul.f32 0.70710677, %v6606_v47  ;;  %17360 = verf.f32 %v6666_v37  ;;  %v6633_v1 = vmul.f32 0.5, %v6601_v35 }
 0x795   : > { %v6634_v20 = vmul.f32 0.5, %v6602_v30  ;;  %v6671_v59 = vmul.f32 0.70710677, %v6607_v56  ;;  %17362 = verf.f32 %v6667_v4  ;;  %v6635_v15 = vmul.f32 0.5, %v6603_v40 }
 0x796   : > { %v19700_v63 = vmul.f32 0.5, %v6604_v6  ;;  %v6672_v33 = vmul.f32 0.70710677, %v6608_v11  ;;  %17364 = verf.f32 %v6668_v38  ;;  %v19702_v31 = vmul.f32 0.5, %v6605_v46 }
 0x797   : > { %v19704_v18 = vmul.f32 0.5, %v6606_v47  ;;  %v6673_v52 = vmul.f32 0.70710677, %v6609_v44  ;;  %17366 = verf.f32 %v6669_v8  ;;  %v19706_v13 = vmul.f32 0.5, %v6607_v56 }
 0x798   : > { %v19708_v42 = vmul.f32 0.5, %v6608_v11  ;;  %v6674_v49 = vmul.f32 0.70710677, %v6610_v41  ;;  %17368 = verf.f32 %v6670_v60  ;;  %v19710_v3 = vmul.f32 0.5, %v6609_v44 }
 0x799   : > { %v19712_v16 = vmul.f32 0.5, %v6610_v41  ;;  %v6675_v57 = vmul.f32 0.70710677, %v6611_v12  ;;  %17370 = verf.f32 %v6671_v59  ;;  %v19714_v36 = vmul.f32 0.5, %v6611_v12 }
 0x79a   : > { %v19716_v9 = vmul.f32 0.5, %v6612_v58  ;;  %v6676_v61 = vmul.f32 0.70710677, %v6612_v58  ;;  %17372 = verf.f32 %v6672_v33  ;;  %v19718_v29 = vmul.f32 0.5, %v6613_v27 }
 0x79b   : > { %v17355_v0 = vpop.eup %17354  ;;  %v19720_v32 = vmul.f32 0.5, %v6614_v7  ;;  %v6677_v24 = vmul.f32 0.70710677, %v6613_v27  ;;  %17374 = verf.f32 %v6673_v52  ;;  %v6678_v25 = vmul.f32 0.70710677, %v6614_v7 }
 0x79c   : > { %v17357_v19 = vpop.eup %17356  ;;  %v6679_v35 = vmul.f32 0.70710677, %v19656_v48  ;;  %17376 = verf.f32 %v6674_v49  ;;  %v6727_v30 = vadd.f32 1.0, %v17355_v0  ;;  %v6680_v6 = vmul.f32 0.70710677, %v19659_v22 }
 0x79d   : > { %v17359_v40 = vpop.eup %17358  ;;  %v6681_v46 = vmul.f32 0.70710677, %v19662_v50  ;;  %17378 = verf.f32 %v6675_v57  ;;  %v6728_v47 = vadd.f32 1.0, %v17357_v19  ;;  %v6682_v11 = vmul.f32 0.70710677, %v19665_v43 }
 0x79e   : > { %v17361_v56 = vpop.eup %17360  ;;  %17380 = verf.f32 %v6676_v61  ;;  %v6729_v44 = vadd.f32 1.0, %v17359_v40  ;;  %v6759_v41 = vmul.f32 %v6727_v30, %v6631_v17  ;;  %v6683_v58 = vmul.f32 0.70710677, %v19668_v53 }
 0x79f   : > { %v17363_v12 = vpop.eup %17362  ;;  %17382 = verf.f32 %v6677_v24  ;;  %v6730_v27 = vadd.f32 1.0, %v17361_v56  ;;  %v6760_v7 = vmul.f32 %v6728_v47, %v6632_v54  ;;  %v6684_v5 = vmul.f32 0.70710677, %v19671_v21 }
 0x7a0   : > { %v17365_v39 = vpop.eup %17364  ;;  %17384 = verf.f32 %v6678_v25  ;;  %v6731_v55 = vadd.f32 1.0, %v17363_v12  ;;  %v6761_v37 = vmul.f32 %v6729_v44, %v6633_v1  ;;  %6791 = vst.msk [vmem:[#allocation2 + $0x19] sm:$0xff] %vm224_vm0, %v6759_v41  ;;  %v6685_v38 = vmul.f32 0.70710677, %v19674_v10 }
 0x7a1   : > { %v17367_v4 = vpop.eup %17366  ;;  %17386 = verf.f32 %v6679_v35  ;;  %v6732_v8 = vadd.f32 1.0, %v17365_v39  ;;  %v6762_v17 = vmul.f32 %v6730_v27, %v6634_v20  ;;  %6792 = vst.msk [vmem:[#allocation2 + $0x21] sm:$0xff] %vm224_vm0, %v6760_v7  ;;  %v6686_v59 = vmul.f32 0.70710677, %v19677_v28 }
 0x7a2   : > { %v17369_v60 = vpop.eup %17368  ;;  %17388 = verf.f32 %v6680_v6  ;;  %v6733_v54 = vadd.f32 1.0, %v17367_v4  ;;  %v6763_v33 = vmul.f32 %v6731_v55, %v6635_v15  ;;  %6793 = vst.msk [vmem:[#allocation2 + $0x31] sm:$0xff] %vm224_vm0, %v6761_v37  ;;  %v6687_v1 = vmul.f32 0.70710677, %v19680_v45 }
 0x7a3   : > { %v17371_v52 = vpop.eup %17370  ;;  %17390 = verf.f32 %v6681_v46  ;;  %v6734_v49 = vadd.f32 1.0, %v17369_v60  ;;  %v6764_v57 = vmul.f32 %v6732_v8, %v19700_v63  ;;  %6794 = vst.msk [vmem:[#allocation2 + $0x39] sm:$0xff] %vm224_vm0, %v6762_v17  ;;  %v6688_v61 = vmul.f32 0.70710677, %v19683_v34 }
 0x7a4   : > { %v17373_v20 = vpop.eup %17372  ;;  %17392 = verf.f32 %v6682_v11  ;;  %v6735_v0 = vadd.f32 1.0, %v17371_v52  ;;  %v6765_v24 = vmul.f32 %v6733_v54, %v19702_v31  ;;  %6795 = vst.msk [vmem:[#allocation2 + $0x49] sm:$0xff] %vm224_vm0, %v6763_v33  ;;  %v6689_v19 = vmul.f32 0.70710677, %v19686_v23 }
 0x7a5   : > { %v17375_v15 = vpop.eup %17374  ;;  %17394 = verf.f32 %v6683_v58  ;;  %v6736_v25 = vadd.f32 1.0, %v17373_v20  ;;  %v6766_v35 = vmul.f32 %v6734_v49, %v19704_v18  ;;  %6796 = vst.msk [vmem:[#allocation2 + $0x51] sm:$0xff] %vm224_vm0, %v6764_v57  ;;  %v6690_v30 = vmul.f32 0.70710677, %v19689_v26 }
 0x7a6   : > { %v17377_v63 = vpop.eup %17376  ;;  %17396 = verf.f32 %v6684_v5  ;;  %v6737_v40 = vadd.f32 1.0, %v17375_v15  ;;  %v6767_v6 = vmul.f32 %v6735_v0, %v19706_v13  ;;  %6797 = vst.msk [vmem:[#allocation2 + $0x61] sm:$0xff] %vm224_vm0, %v6765_v24  ;;  %v6691_v46 = vmul.f32 0.70710677, %v19692_v2  ;;  %v17251_v5 = vld [vmem:[%s21844_s1 + $0x128] sm:$0xff]  }
 0x7a7   : > { %v17379_v31 = vpop.eup %17378  ;;  %17398 = verf.f32 %v6685_v38  ;;  %v6738_v47 = vadd.f32 1.0, %v17377_v63  ;;  %v6768_v56 = vmul.f32 %v6736_v25, %v19708_v42  ;;  %6798 = vst.msk [vmem:[#allocation2 + $0x69] sm:$0xff] %vm224_vm0, %v6766_v35  ;;  %v6878_v18 = vld [vmem:[#allocation2 + $0x19] sm:$0xff]  ;;  %v6693_v44 = vmul.f32 0.70710677, %v19695_v14 }
 0x7a8   : > { %v17381_v11 = vpop.eup %17380  ;;  %17400 = verf.f32 %v6686_v59  ;;  %v6739_v41 = vadd.f32 1.0, %v17379_v31  ;;  %v6769_v12 = vmul.f32 %v6737_v40, %v19710_v3  ;;  %6799 = vst.msk [vmem:[#allocation2 + $0x79] sm:$0xff] %vm224_vm0, %v6767_v6  ;;  %v6879_v13 = vld [vmem:[#allocation2 + $0x21] sm:$0xff]  ;;  %v6694_v3 = vmul.f32 0.70710677, %v19698_v51 }
 0x7a9   : > { %v17383_v58 = vpop.eup %17382  ;;  %17402 = verf.f32 %v6687_v1  ;;  %v6740_v27 = vadd.f32 1.0, %v17381_v11  ;;  %v6770_v7 = vmul.f32 %v6738_v47, %v19712_v16  ;;  %6800 = vst.msk [vmem:[#allocation2 + $0x81] sm:$0xff] %vm224_vm0, %v6768_v56  ;;  %v19753_v42 = vpack.c.bf16 %v6879_v13, %v6878_v18  ;;  %v6880_v39 = vld [vmem:[#allocation2 + $0x31] sm:$0xff] }
 0x7aa   : > { %v17385_v55 = vpop.eup %17384  ;;  %17404 = verf.f32 %v6688_v61  ;;  %v6741_v37 = vadd.f32 1.0, %v17383_v58  ;;  %v6771_v4 = vmul.f32 %v6739_v41, %v19714_v36  ;;  %6801 = vst.msk [vmem:[#allocation2 + $0x91] sm:$0xff] %vm224_vm0, %v6769_v12  ;;  %v6881_v38 = vld [vmem:[#allocation2 + $0x39] sm:$0xff]  ;;  %v6647_v54 = vmul.f32 0.5, %v19656_v48 }
 0x7ab   : > { %v17387_v16 = vpop.eup %17386  ;;  %17406 = verf.f32 %v6689_v19  ;;  %v6742_v8 = vadd.f32 1.0, %v17385_v55  ;;  %v6772_v17 = vmul.f32 %v6740_v27, %v19716_v9  ;;  %6802 = vst.msk [vmem:[#allocation2 + $0x99] sm:$0xff] %vm224_vm0, %v6770_v7  ;;  %15503 = vmatmul.mubr.msk.bf16.vlgmr.msra.gmra.mrb[32].mxu0 %vm224_vm0, %v19753_v42  ;;  %v19765_v60 = vpack.c.bf16 %v6881_v38, %v6880_v39  ;;  %v19779_v48 = vld [vmem:[%s21844_s1 + $0x140] sm:$0xff]  }
 0x7ac   : > { %v17389_v59 = vpop.eup %17388  ;;  %17408 = verf.f32 %v6690_v30  ;;  %v6743_v36 = vadd.f32 1.0, %v17387_v16  ;;  %v6773_v33 = vmul.f32 %v6741_v37, %v19718_v29  ;;  %6803 = vst.msk [vmem:[#allocation2 + $0xa9] sm:$0xff] %vm224_vm0, %v6771_v4  ;;  %15535 = vmatpush3.bf16.msra.mxu0 %v19539_v62  ;;  %v6648_v9 = vmul.f32 0.5, %v19659_v22  ;;  %v6883_v20 = vld [vmem:[#allocation2 + $0x51] sm:$0xff] }
 0x7ad   : > { %v17391_v52 = vpop.eup %17390  ;;  %17410 = verf.f32 %v6691_v46  ;;  %v6744_v1 = vadd.f32 1.0, %v17389_v59  ;;  %v6774_v49 = vmul.f32 %v6742_v8, %v19720_v32  ;;  %6804 = vst.msk [vmem:[#allocation2 + $0xb1] sm:$0xff] %vm224_vm0, %v6772_v17  ;;  %15506 = vmatprep.mubr.msk.bf16.mxu0 %vm224_vm0, %v19765_v60  ;;  %15536 = vmatprep.subr.bf16.mxu0 %v17251_v5  ;;  %v6649_v62 = vmul.f32 0.5, %v19662_v50  ;;  %v6882_v32 = vld [vmem:[#allocation2 + $0x49] sm:$0xff]  ;;  %v6884_v19 = vld [vmem:[#allocation2 + $0x61] sm:$0xff] }
 0x7ae   : > { %v17393_v29 = vpop.eup %17392  ;;  %17412 = verf.f32 %v6693_v44  ;;  %v6745_v22 = vadd.f32 1.0, %v17391_v52  ;;  %v6775_v57 = vmul.f32 %v6743_v36, %v6647_v54  ;;  %6805 = vst.msk [vmem:[#allocation2 + $0xc1] sm:$0xff] %vm224_vm0, %v6773_v33  ;;  %v6650_v0 = vmul.f32 0.5, %v19665_v43  ;;  %v6885_v25 = vld [vmem:[#allocation2 + $0x69] sm:$0xff] }
 0x7af   : > { %v17395_v61 = vpop.eup %17394  ;;  %17414 = verf.f32 %v6694_v3  ;;  %v6746_v24 = vadd.f32 1.0, %v17393_v29  ;;  %v6776_v15 = vmul.f32 %v6744_v1, %v6648_v9  ;;  %6806 = vst.msk [vmem:[#allocation2 + $0xc9] sm:$0xff] %vm224_vm0, %v6774_v49  ;;  %v6651_v50 = vmul.f32 0.5, %v19668_v53 }
 0x7b0   : > { %v17397_v35 = vpop.eup %17396  ;;  %v6747_v63 = vadd.f32 1.0, %v17395_v61  ;;  %v6777_v30 = vmul.f32 %v6745_v22, %v6649_v62  ;;  %6807 = vst.msk [vmem:[#allocation2 + $0xd9] sm:$0xff] %vm224_vm0, %v6775_v57  ;;  %15537 = vmatpush3.bf16.msra.mxu0 %v17251_v5  ;;  %v6652_v6 = vmul.f32 0.5, %v19671_v21  ;;  %v19789_v46 = vpack.c.bf16 %v6883_v20, %v6882_v32  ;;  %v6887_v38 = vld [vmem:[#allocation2 + $0x81] sm:$0xff] }
 0x7b1   : > { %v17399_v40 = vpop.eup %17398  ;;  %v6748_v31 = vadd.f32 1.0, %v17397_v35  ;;  %v6778_v43 = vmul.f32 %v6746_v24, %v6650_v0  ;;  %6808 = vst.msk [vmem:[#allocation2 + $0xe1] sm:$0xff] %vm224_vm0, %v6776_v15  ;;  %15570 = vmatprep.subr.bf16.mxu0 %v19779_v48  ;;  %v6653_v56 = vmul.f32 0.5, %v19674_v10  ;;  %v19794_v11 = vpack.c.bf16 %v6885_v25, %v6884_v19 }
 0x7b2   : > { %v17401_v47 = vpop.eup %17400  ;;  %v6749_v53 = vadd.f32 1.0, %v17399_v40  ;;  %v6779_v18 = vmul.f32 %v6747_v63, %v6651_v50  ;;  %6809 = vst.msk [vmem:[#allocation2 + $0xf1] sm:$0xff] %vm224_vm0, %v6777_v30  ;;  %v6654_v21 = vmul.f32 0.5, %v19677_v28  ;;  %v6655_v58 = vmul.f32 0.5, %v19680_v45  ;;  %v6886_v45 = vld [vmem:[#allocation2 + $0x79] sm:$0xff] }
 0x7b3   : > { %v17403_v44 = vpop.eup %17402  ;;  %v6750_v41 = vadd.f32 1.0, %v17401_v47  ;;  %v6780_v12 = vmul.f32 %v6748_v31, %v6652_v6  ;;  %6810 = vst.msk [vmem:[#allocation2 + $0xf9] sm:$0xff] %vm224_vm0, %v6778_v43  ;;  %15507 = vmatmul.mubr.msk.bf16.gmra.mrb[36].mxu0 %vm224_vm0, %v19789_v46  ;;  %v6656_v28 = vmul.f32 0.5, %v19683_v34  ;;  %v6657_v3 = vmul.f32 0.5, %v19686_v23  ;;  %v6888_v34 = vld [vmem:[#allocation2 + $0x91] sm:$0xff]  ;;  %v6889_v54 = vld [vmem:[#allocation2 + $0x99] sm:$0xff] }
 0x7b4   : > { %v17405_v13 = vpop.eup %17404  ;;  %v6751_v10 = vadd.f32 1.0, %v17403_v44  ;;  %v6781_v27 = vmul.f32 %v6749_v53, %v6653_v56  ;;  %6811 = vst.msk [vmem:[#allocation2 + $0x109] sm:$0xff] %vm224_vm0, %v6779_v18  ;;  %15510 = vmatprep.mubr.msk.bf16.mxu0 %vm224_vm0, %v19794_v11  ;;  %v6658_v8 = vmul.f32 0.5, %v19689_v26  ;;  %v6659_v33 = vmul.f32 0.5, %v19692_v2  ;;  %v6891_v20 = vld [vmem:[#allocation2 + $0xb1] sm:$0xff] }
 0x7b5   : > { %v17407_v7 = vpop.eup %17406  ;;  %v6752_v39 = vadd.f32 1.0, %v17405_v13  ;;  %v6782_v5 = vmul.f32 %v6750_v41, %v6654_v21  ;;  %6812 = vst.msk [vmem:[#allocation2 + $0x111] sm:$0xff] %vm224_vm0, %v6780_v12  ;;  %v6661_v1 = vmul.f32 0.5, %v19695_v14  ;;  %v19814_v26 = vpack.c.bf16 %v6887_v38, %v6886_v45  ;;  %v6892_v61 = vld [vmem:[#allocation2 + $0xc1] sm:$0xff]  ;;  %v19880_v38 = vld [vmem:[%s21844_s1 + $0x150] sm:$0xff]  }
 0x7b6   : > { %v17409_v55 = vpop.eup %17408  ;;  %v6753_v37 = vadd.f32 1.0, %v17407_v7  ;;  %v6783_v4 = vmul.f32 %v6751_v10, %v6655_v58  ;;  %6813 = vst.msk [vmem:[#allocation2 + $0x121] sm:$0xff] %vm224_vm0, %v6781_v27  ;;  %v6662_v62 = vmul.f32 0.5, %v19698_v51  ;;  %v19818_v2 = vpack.c.bf16 %v6889_v54, %v6888_v34  ;;  %v6890_v51 = vld [vmem:[#allocation2 + $0xa9] sm:$0xff]  ;;  %v6823_v13 = vld [vmem:[#allocation2] sm:$0xff]  ;;  %v6907_v27 = vld [vmem:[#allocation2 + $0x171] sm:$0xff] }
 0x7b7   : > { %v17411_v16 = vpop.eup %17410  ;;  %v6754_v17 = vadd.f32 1.0, %v17409_v55  ;;  %v6784_v59 = vmul.f32 %v6752_v39, %v6656_v28  ;;  %6814 = vst.msk [vmem:[#allocation2 + $0x129] sm:$0xff] %vm224_vm0, %v6782_v5  ;;  %v6893_v0 = vld [vmem:[#allocation2 + $0xc9] sm:$0xff]  ;;  %v19828_v24 = vpack.c.bf16 %v6891_v20, %v6890_v51  ;;  %v6894_v19 = vld [vmem:[#allocation2 + $0xd9] sm:$0xff] }
 0x7b8   : > { %v17413_v36 = vpop.eup %17412  ;;  %v6755_v52 = vadd.f32 1.0, %v17411_v16  ;;  %v6785_v23 = vmul.f32 %v6753_v37, %v6657_v3  ;;  %6815 = vst.msk [vmem:[#allocation2 + $0x139] sm:$0xff] %vm224_vm0, %v6783_v4  ;;  %v19830_v15 = vpack.c.bf16 %v6893_v0, %v6892_v61  ;;  %v6895_v25 = vld [vmem:[#allocation2 + $0xe1] sm:$0xff]  ;;  %v6825_v39 = vld [vmem:[#allocation2 + $0x18] sm:$0xff]  ;;  %v6827_v55 = vld [vmem:[#allocation2 + $0x30] sm:$0xff] }
 0x7b9   : > { %v17415_v9 = vpop.eup %17414  ;;  %v6757_v49 = vadd.f32 1.0, %v17413_v36  ;;  %v6786_v29 = vmul.f32 %v6754_v17, %v6658_v8  ;;  %6816 = vst.msk [vmem:[#allocation2 + $0x141] sm:$0xff] %vm224_vm0, %v6784_v59  ;;  %v6896_v35 = vld [vmem:[#allocation2 + $0xf1] sm:$0xff]  ;;  %v19836_v63 = vpack.c.bf16 %v6895_v25, %v6894_v19  ;;  %v6824_v58 = vld [vmem:[#allocation2 + $0x8] sm:$0xff]  ;;  %v6826_v5 = vld [vmem:[#allocation2 + $0x20] sm:$0xff] }
 0x7ba   : > { %v6758_v22 = vadd.f32 1.0, %v17415_v9  ;;  %v6787_v57 = vmul.f32 %v6755_v52, %v6659_v33  ;;  %6817 = vst.msk [vmem:[#allocation2 + $0x151] sm:$0xff] %vm224_vm0, %v6785_v23  ;;  %v6897_v50 = vld [vmem:[#allocation2 + $0xf9] sm:$0xff]  ;;  %v6855_v7 = vpack.c.bf16 %v6824_v58, %v6823_v13  ;;  %v19865_v37 = vpack.c.bf16 %v6826_v5, %v6825_v39  ;;  %v17253_v4 = vld [vmem:[%s21844_s1 + $0x148] sm:$0xff]   ;;  %v6830_v8 = vld [vmem:[#allocation2 + $0x50] sm:$0xff] }
 0x7bb   : > { %v6789_v32 = vmul.f32 %v6757_v49, %v6661_v1  ;;  %6818 = vst.msk [vmem:[#allocation2 + $0x159] sm:$0xff] %vm224_vm0, %v6786_v29  ;;  %15511 = vmatmul.mubr.msk.bf16.gmra.mrb[40].mxu0 %vm224_vm0, %v19814_v26  ;;  %v19838_v30 = vpack.c.bf16 %v6897_v50, %v6896_v35  ;;  %v6898_v40 = vld [vmem:[#allocation2 + $0x109] sm:$0xff]  ;;  %v6828_v3 = vld [vmem:[#allocation2 + $0x38] sm:$0xff]  ;;  %v6831_v17 = vld [vmem:[#allocation2 + $0x60] sm:$0xff] }
 0x7bc   : > { %v6790_v14 = vmul.f32 %v6758_v22, %v6662_v62  ;;  %6819 = vst.msk [vmem:[#allocation2 + $0x169] sm:$0xff] %vm224_vm0, %v6787_v57  ;;  %15514 = vmatprep.mubr.msk.bf16.mxu0 %vm224_vm0, %v19818_v2  ;;  %v6899_v6 = vld [vmem:[#allocation2 + $0x111] sm:$0xff]  ;;  %v19870_v45 = vpack.c.bf16 %v6828_v3, %v6827_v55  ;;  %v6829_v16 = vld [vmem:[#allocation2 + $0x48] sm:$0xff]  ;;  %v6834_v36 = vld [vmem:[#allocation2 + $0x80] sm:$0xff] }
 0x7bd   : > { %6821 = vst.msk [vmem:[#allocation2 + $0x181] sm:$0xff] %vm224_vm0, %v6789_v32  ;;  %v6900_v31 = vld [vmem:[#allocation2 + $0x121] sm:$0xff]  ;;  %v19844_v47 = vpack.c.bf16 %v6899_v6, %v6898_v40  ;;  %v19882_v34 = vpack.c.bf16 %v6830_v8, %v6829_v16  ;;  %v6835_v33 = vld [vmem:[#allocation2 + $0x90] sm:$0xff]  ;;  %v6836_v52 = vld [vmem:[#allocation2 + $0x98] sm:$0xff] }
 0x7be   : > { %6822 = vst.msk [vmem:[#allocation2 + $0x189] sm:$0xff] %vm224_vm0, %v6790_v14  ;;  %v6901_v43 = vld [vmem:[#allocation2 + $0x129] sm:$0xff]  ;;  %v19893_v9 = vpack.c.bf16 %v6836_v52, %v6835_v33  ;;  %v6839_v29 = vld [vmem:[#allocation2 + $0xc0] sm:$0xff]  ;;  %v6841_v32 = vld [vmem:[#allocation2 + $0xd8] sm:$0xff] }
 0x7bf   : > { %v19846_v56 = vpack.c.bf16 %v6901_v43, %v6900_v31  ;;  %v6902_v53 = vld [vmem:[#allocation2 + $0x139] sm:$0xff]  ;;  %v6832_v59 = vld [vmem:[#allocation2 + $0x68] sm:$0xff]  ;;  %v6838_v49 = vld [vmem:[#allocation2 + $0xb0] sm:$0xff] }
 0x7c0   : > { %v6903_v18 = vld [vmem:[#allocation2 + $0x141] sm:$0xff]  ;;  %v19885_v54 = vpack.c.bf16 %v6832_v59, %v6831_v17  ;;  %v6843_v51 = vld [vmem:[#allocation2 + $0xf0] sm:$0xff]  ;;  %v6844_v20 = vld [vmem:[#allocation2 + $0xf8] sm:$0xff] }
 0x7c1   : > { %v6904_v44 = vld [vmem:[#allocation2 + $0x151] sm:$0xff]  ;;  %v19852_v41 = vpack.c.bf16 %v6903_v18, %v6902_v53  ;;  %v6837_v1 = vld [vmem:[#allocation2 + $0xa8] sm:$0xff]  ;;  %v6842_v14 = vld [vmem:[#allocation2 + $0xe0] sm:$0xff]  ;;  %v19909_v0 = vpack.c.bf16 %v6844_v20, %v6843_v51 }
 0x7c2   : > { %v6905_v21 = vld [vmem:[#allocation2 + $0x159] sm:$0xff]  ;;  %v6840_v62 = vld [vmem:[#allocation2 + $0xc8] sm:$0xff]  ;;  %v19899_v22 = vpack.c.bf16 %v6838_v49, %v6837_v1  ;;  %v19907_v61 = vpack.c.bf16 %v6842_v14, %v6841_v32  ;;  %v6846_v25 = vld [vmem:[#allocation2 + $0x110] sm:$0xff] }
 0x7c3   : > { %15515 = vmatmul.mubr.msk.bf16.gmra.mrb[44].mxu0 %vm224_vm0, %v19828_v24  ;;  %v19854_v12 = vpack.c.bf16 %v6905_v21, %v6904_v44  ;;  %v6906_v10 = vld [vmem:[#allocation2 + $0x169] sm:$0xff]  ;;  %v19901_v57 = vpack.c.bf16 %v6840_v62, %v6839_v29  ;;  %v6847_v35 = vld [vmem:[#allocation2 + $0x120] sm:$0xff]  ;;  %v6849_v31 = vld [vmem:[#allocation2 + $0x138] sm:$0xff] }
 0x7c4   : > { %15518 = vmatprep.mubr.msk.bf16.mxu0 %vm224_vm0, %v19830_v15  ;;  %v19860_v28 = vpack.c.bf16 %v6907_v27, %v6906_v10  ;;  %v6845_v19 = vld [vmem:[#allocation2 + $0x108] sm:$0xff]  ;;  %v6850_v43 = vld [vmem:[#allocation2 + $0x140] sm:$0xff]  ;;  %v6851_v53 = vld [vmem:[#allocation2 + $0x150] sm:$0xff] }
 0x7c5   : > { %v6848_v50 = vld [vmem:[#allocation2 + $0x128] sm:$0xff]  ;;  %v19915_v40 = vpack.c.bf16 %v6846_v25, %v6845_v19  ;;  %v6852_v18 = vld [vmem:[#allocation2 + $0x158] sm:$0xff]  ;;  %v19923_v44 = vpack.c.bf16 %v6850_v43, %v6849_v31  ;;  %v6854_v27 = vld [vmem:[#allocation2 + $0x170] sm:$0xff] }
 0x7c6   : > { %v19917_v6 = vpack.c.bf16 %v6848_v50, %v6847_v35  ;;  %v19925_v21 = vpack.c.bf16 %v6852_v18, %v6851_v53  ;;  %v7371_v13 = vld [vmem:[#allocation2 + $0x2] sm:$0xff]  ;;  %v7372_v58 = vld [vmem:[#allocation2 + $0xa] sm:$0xff]  ;;  %v7373_v5 = vld [vmem:[#allocation2 + $0x1a] sm:$0xff] }
 0x7c7   : > { %v6853_v10 = vld [vmem:[#allocation2 + $0x168] sm:$0xff]  ;;  %v7375_v3 = vld [vmem:[#allocation2 + $0x32] sm:$0xff]  ;;  %v17256_v59 = vld [vmem:[%s21844_s1 + $0x160] sm:$0xff]  }
 0x7c8   : > { %v19931_v39 = vpack.c.bf16 %v6854_v27, %v6853_v10  ;;  %v7374_v55 = vld [vmem:[#allocation2 + $0x22] sm:$0xff]  ;;  %v17255_v8 = vld [vmem:[%s21844_s1 + $0x158] sm:$0xff]   ;;  %v7380_v52 = vld [vmem:[#allocation2 + $0x6a] sm:$0xff] }
 0x7c9   : > { %v19936_v16 = vpack.c.bf16 %v7374_v55, %v7373_v5  ;;  %v7379_v33 = vld [vmem:[#allocation2 + $0x62] sm:$0xff]  ;;  %v7383_v62 = vld [vmem:[#allocation2 + $0x92] sm:$0xff]  ;;  %v7384_v32 = vld [vmem:[#allocation2 + $0x9a] sm:$0xff] }
 0x7ca   : > { %v19953_v49 = vpack.c.bf16 %v7380_v52, %v7379_v33  ;;  %v7382_v29 = vld [vmem:[#allocation2 + $0x82] sm:$0xff]  ;;  %v19961_v51 = vpack.c.bf16 %v7384_v32, %v7383_v62  ;;  %v7385_v20 = vld [vmem:[#allocation2 + $0xaa] sm:$0xff]  ;;  %v7386_v19 = vld [vmem:[#allocation2 + $0xb2] sm:$0xff] }
 0x7cb   : > { %15519 = vmatmul.mubr.msk.bf16.gmra.mrb[48].mxu0 %vm224_vm0, %v19836_v63  ;;  %v7387_v25 = vld [vmem:[#allocation2 + $0xc2] sm:$0xff]  ;;  %v7388_v35 = vld [vmem:[#allocation2 + $0xca] sm:$0xff]  ;;  %v19967_v50 = vpack.c.bf16 %v7386_v19, %v7385_v20  ;;  %v7389_v43 = vld [vmem:[#allocation2 + $0xda] sm:$0xff] }
 0x7cc   : > { %15522 = vmatprep.mubr.msk.bf16.mxu0 %vm224_vm0, %v19838_v30  ;;  %v19969_v31 = vpack.c.bf16 %v7388_v35, %v7387_v25  ;;  %v7390_v53 = vld [vmem:[#allocation2 + $0xe2] sm:$0xff]  ;;  %v7391_v18 = vld [vmem:[#allocation2 + $0xf2] sm:$0xff]  ;;  %v7393_v27 = vld [vmem:[#allocation2 + $0x10a] sm:$0xff] }
 0x7cd   : > { %v7395_v5 = vld [vmem:[#allocation2 + $0x122] sm:$0xff]  ;;  %v7396_v55 = vld [vmem:[#allocation2 + $0x12a] sm:$0xff]  ;;  %v7400_v33 = vld [vmem:[#allocation2 + $0x15a] sm:$0xff] }
 0x7ce   : > { %v7402_v62 = vld [vmem:[#allocation2 + $0x172] sm:$0xff]  ;;  %v17257_v20 = vld [vmem:[%s21844_s1 + $0x168] sm:$0xff]  }
 0x7cf   : > { %v17258_v19 = vld [vmem:[%s21844_s1 + $0x170] sm:$0xff]   ;;  %v17259_v35 = vld [vmem:[%s21844_s1 + $0x178] sm:$0xff]  }
 0x7d3   : > { %15523 = vmatmul.mubr.msk.bf16.gmra.mrb[52].mxu0 %vm224_vm0, %v19844_v47 }
 0x7d4   : > { %15526 = vmatprep.mubr.msk.bf16.mxu0 %vm224_vm0, %v19846_v56 }
 0x7db   : > { %15527 = vmatmul.mubr.msk.bf16.gmra.mrb[56].mxu0 %vm224_vm0, %v19852_v41 }
 0x7dc   : > { %15530 = vmatprep.mubr.msk.bf16.mxu0 %vm224_vm0, %v19854_v12 }
 0x7e3   : > { %15531 = vmatmul.mubr.msk.bf16.gmra.mrb[60].mxu0 %vm224_vm0, %v19860_v28 }
 0x7e4   : > { %15538 = vmatprep.mubr.msk.bf16.mxu0 %vm224_vm0, %v6855_v7  ;;  %v7403_v7 = vpack.c.bf16 %v7372_v58, %v7371_v13  ;;  %v7392_v13 = vld [vmem:[#allocation2 + $0xfa] sm:$0xff]  ;;  %v19975_v58 = vpack.c.bf16 %v7390_v53, %v7389_v43  ;;  %v8014_v53 = vld [vmem:[#allocation2 + $0x189] sm:$0xff] }
 0x7e5   : > { %v19977_v10 = vpack.c.bf16 %v7392_v13, %v7391_v18  ;;  %v17260_v43 = vld [vmem:[%s21844_s1 + $0x180] sm:$0xff]   ;;  %v17261_v13 = vld [vmem:[%s21844_s1 + $0x188] sm:$0xff]  }
 0x7eb   : > { %15539 = vmatmul.mubr.msk.bf16.vlgmr.msra.gmra.mrb[32].mxu0 %vm224_vm0, %v19865_v37 }
 0x7ec   : > { %15571 = vmatpush3.bf16.msra.mxu0 %v19779_v48  ;;  %15542 = vmatprep.mubr.msk.bf16.mxu0 %vm224_vm0, %v19870_v45  ;;  %v6833_v48 = vld [vmem:[#allocation2 + $0x78] sm:$0xff] }
 0x7ed   : > { %15572 = vmatprep.subr.bf16.mxu0 %v17253_v4  ;;  %v19891_v23 = vpack.c.bf16 %v6834_v36, %v6833_v48  ;;  %v7377_v48 = vld [vmem:[#allocation2 + $0x4a] sm:$0xff]  ;;  %v7378_v36 = vld [vmem:[#allocation2 + $0x52] sm:$0xff] }
 0x7ee   : > { %v19951_v1 = vpack.c.bf16 %v7378_v36, %v7377_v48  ;;  %v7398_v48 = vld [vmem:[#allocation2 + $0x142] sm:$0xff]  ;;  %v7399_v36 = vld [vmem:[#allocation2 + $0x152] sm:$0xff] }
 0x7f0   : > { %15573 = vmatpush3.bf16.msra.mxu0 %v17253_v4  ;;  %v7376_v4 = vld [vmem:[#allocation2 + $0x3a] sm:$0xff] }
 0x7f1   : > { %15606 = vmatprep.subr.bf16.mxu0 %v19880_v38  ;;  %v19941_v17 = vpack.c.bf16 %v7376_v4, %v7375_v3  ;;  %v19985_v4 = vpack.c.bf16 %v7396_v55, %v7395_v5  ;;  %v17263_v55 = vld [vmem:[%s21844_s1 + $0x198] sm:$0xff]  }
 0x7f3   : > { %15543 = vmatmul.mubr.msk.bf16.gmra.mrb[36].mxu0 %vm224_vm0, %v19882_v34 }
 0x7f4   : > { %15546 = vmatprep.mubr.msk.bf16.mxu0 %vm224_vm0, %v19885_v54 }
 0x7fb   : > { %15547 = vmatmul.mubr.msk.bf16.gmra.mrb[40].mxu0 %vm224_vm0, %v19891_v23 }
 0x7fc   : > { %15550 = vmatprep.mubr.msk.bf16.mxu0 %vm224_vm0, %v19893_v9 }
 0x803   : > { %15551 = vmatmul.mubr.msk.bf16.gmra.mrb[44].mxu0 %vm224_vm0, %v19899_v22 }
 0x804   : > { %15554 = vmatprep.mubr.msk.bf16.mxu0 %vm224_vm0, %v19901_v57 }
 0x80b   : > { %15555 = vmatmul.mubr.msk.bf16.gmra.mrb[48].mxu0 %vm224_vm0, %v19907_v61 }
 0x80c   : > { %15558 = vmatprep.mubr.msk.bf16.mxu0 %vm224_vm0, %v19909_v0 }
 0x813   : > { %15559 = vmatmul.mubr.msk.bf16.gmra.mrb[52].mxu0 %vm224_vm0, %v19915_v40 }
 0x814   : > { %15562 = vmatprep.mubr.msk.bf16.mxu0 %vm224_vm0, %v19917_v6 }
 0x81b   : > { %15563 = vmatmul.mubr.msk.bf16.gmra.mrb[56].mxu0 %vm224_vm0, %v19923_v44 }
 0x81c   : > { %15566 = vmatprep.mubr.msk.bf16.mxu0 %vm224_vm0, %v19925_v21 }
 0x823   : > { %15567 = vmatmul.mubr.msk.bf16.gmra.mrb[60].mxu0 %vm224_vm0, %v19931_v39 }
 0x824   : > { %15574 = vmatprep.mubr.msk.bf16.mxu0 %vm224_vm0, %v7403_v7  ;;  %v7394_v7 = vld [vmem:[#allocation2 + $0x112] sm:$0xff] }
 0x825   : > { %v19983_v3 = vpack.c.bf16 %v7394_v7, %v7393_v27  ;;  %v17262_v27 = vld [vmem:[%s21844_s1 + $0x190] sm:$0xff]  }
 0x826   : > { %v8320_v7 = vld [vmem:[#allocation2 + $0x18a] sm:$0xff] }
 0x82b   : > { %15575 = vmatmul.mubr.msk.bf16.vlgmr.msra.gmra.mrb[32].mxu0 %vm224_vm0, %v19936_v16 }
 0x82c   : > { %15607 = vmatpush3.bf16.msra.mxu0 %v19880_v38  ;;  %15578 = vmatprep.mubr.msk.bf16.mxu0 %vm224_vm0, %v19941_v17  ;;  %v7381_v38 = vld [vmem:[#allocation2 + $0x7a] sm:$0xff] }
 0x82d   : > { %15608 = vmatprep.subr.bf16.mxu0 %v17255_v8  ;;  %v19959_v14 = vpack.c.bf16 %v7382_v29, %v7381_v38  ;;  %v19993_v38 = vpack.c.bf16 %v7400_v33, %v7399_v36  ;;  %v7401_v29 = vld [vmem:[#allocation2 + $0x16a] sm:$0xff] }
 0x82e   : > { %v19999_v32 = vpack.c.bf16 %v7402_v62, %v7401_v29 }
 0x830   : > { %15609 = vmatpush3.bf16.msra.mxu0 %v17255_v8  ;;  %v7397_v8 = vld [vmem:[#allocation2 + $0x13a] sm:$0xff] }
 0x831   : > { %15642 = vmatprep.subr.bf16.mxu0 %v17256_v59  ;;  %v19991_v52 = vpack.c.bf16 %v7398_v48, %v7397_v8  ;;  %v17264_v8 = vld [vmem:[%s21844_s1 + $0x1a0] sm:$0xff]  }
 0x833   : > { %15579 = vmatmul.mubr.msk.bf16.gmra.mrb[36].mxu0 %vm224_vm0, %v19951_v1 }
 0x834   : > { %15582 = vmatprep.mubr.msk.bf16.mxu0 %vm224_vm0, %v19953_v49 }
 0x83b   : > { %15583 = vmatmul.mubr.msk.bf16.gmra.mrb[40].mxu0 %vm224_vm0, %v19959_v14 }
 0x83c   : > { %15586 = vmatprep.mubr.msk.bf16.mxu0 %vm224_vm0, %v19961_v51 }
 0x843   : > { %15587 = vmatmul.mubr.msk.bf16.gmra.mrb[44].mxu0 %vm224_vm0, %v19967_v50 }
 0x844   : > { %15590 = vmatprep.mubr.msk.bf16.mxu0 %vm224_vm0, %v19969_v31 }
 0x84b   : > { %15591 = vmatmul.mubr.msk.bf16.gmra.mrb[48].mxu0 %vm224_vm0, %v19975_v58 }
 0x84c   : > { %15594 = vmatprep.mubr.msk.bf16.mxu0 %vm224_vm0, %v19977_v10 }
 0x853   : > { %15595 = vmatmul.mubr.msk.bf16.gmra.mrb[52].mxu0 %vm224_vm0, %v19983_v3 }
 0x854   : > { %15598 = vmatprep.mubr.msk.bf16.mxu0 %vm224_vm0, %v19985_v4 }
 0x85b   : > { %15599 = vmatmul.mubr.msk.bf16.gmra.mrb[56].mxu0 %vm224_vm0, %v19991_v52 }
 0x85c   : > { %15602 = vmatprep.mubr.msk.bf16.mxu0 %vm224_vm0, %v19993_v38 }
 0x863   : > { %15603 = vmatmul.mubr.msk.bf16.gmra.mrb[60].mxu0 %vm224_vm0, %v19999_v32 }
 0x864   : > { %15610 = vmatprep.mubr.msk.bf16.mxu0 %vm224_vm0, %v19865_v37  ;;  %v7707_v37 = vld [vmem:[#allocation2 + $0x180] sm:$0xff] }
 0x86b   : > { %15611 = vmatmul.mubr.msk.bf16.vlgmr.msra.gmra.mrb[32].mxu0 %vm224_vm0, %v19870_v45 }
 0x86c   : > { %15643 = vmatpush3.bf16.msra.mxu0 %v17256_v59  ;;  %15614 = vmatprep.mubr.msk.bf16.mxu0 %vm224_vm0, %v19882_v34  ;;  %v7708_v59 = vld [vmem:[#allocation2 + $0x188] sm:$0xff] }
 0x86d   : > { %15644 = vmatprep.subr.bf16.mxu0 %v17257_v20  ;;  %v20039_v25 = vpack.c.bf16 %v7708_v59, %v7707_v37 }
 0x870   : > { %15645 = vmatpush3.bf16.msra.mxu0 %v17257_v20 }
 0x871   : > { %15678 = vmatprep.subr.bf16.mxu0 %v17258_v19 }
 0x873   : > { %15615 = vmatmul.mubr.msk.bf16.gmra.mrb[36].mxu0 %vm224_vm0, %v19885_v54 }
 0x874   : > { %15618 = vmatprep.mubr.msk.bf16.mxu0 %vm224_vm0, %v19891_v23 }
 0x87b   : > { %15619 = vmatmul.mubr.msk.bf16.gmra.mrb[40].mxu0 %vm224_vm0, %v19893_v9 }
 0x87c   : > { %15622 = vmatprep.mubr.msk.bf16.mxu0 %vm224_vm0, %v19899_v22 }
 0x883   : > { %15623 = vmatmul.mubr.msk.bf16.gmra.mrb[44].mxu0 %vm224_vm0, %v19901_v57 }
 0x884   : > { %15626 = vmatprep.mubr.msk.bf16.mxu0 %vm224_vm0, %v19907_v61 }
 0x88b   : > { %15627 = vmatmul.mubr.msk.bf16.gmra.mrb[48].mxu0 %vm224_vm0, %v19909_v0 }
 0x88c   : > { %15630 = vmatprep.mubr.msk.bf16.mxu0 %vm224_vm0, %v19915_v40 }
 0x893   : > { %15631 = vmatmul.mubr.msk.bf16.gmra.mrb[52].mxu0 %vm224_vm0, %v19917_v6 }
 0x894   : > { %15634 = vmatprep.mubr.msk.bf16.mxu0 %vm224_vm0, %v19923_v44 }
 0x89b   : > { %15635 = vmatmul.mubr.msk.bf16.gmra.mrb[56].mxu0 %vm224_vm0, %v19925_v21 }
 0x89c   : > { %15638 = vmatprep.mubr.msk.bf16.mxu0 %vm224_vm0, %v19931_v39 }
 0x8a3   : > { %15639 = vmatmul.mubr.msk.bf16.gmra.mrb[60].mxu0 %vm224_vm0, %v20039_v25 }
 0x8a4   : > { %15646 = vmatprep.mubr.msk.bf16.mxu0 %vm224_vm0, %v19753_v42  ;;  %v8013_v42 = vld [vmem:[#allocation2 + $0x181] sm:$0xff] }
 0x8a5   : > { %v20079_v18 = vpack.c.bf16 %v8014_v53, %v8013_v42 }
 0x8ab   : > { %15647 = vmatmul.mubr.msk.bf16.vlgmr.msra.gmra.mrb[32].mxu0 %vm224_vm0, %v19765_v60 }
 0x8ac   : > { %15679 = vmatpush3.bf16.msra.mxu0 %v17258_v19  ;;  %15650 = vmatprep.mubr.msk.bf16.mxu0 %vm224_vm0, %v19789_v46 }
 0x8ad   : > { %15680 = vmatprep.subr.bf16.mxu0 %v17259_v35 }
 0x8b0   : > { %15681 = vmatpush3.bf16.msra.mxu0 %v17259_v35 }
 0x8b1   : > { %15714 = vmatprep.subr.bf16.mxu0 %v17260_v43 }
 0x8b3   : > { %15651 = vmatmul.mubr.msk.bf16.gmra.mrb[36].mxu0 %vm224_vm0, %v19794_v11 }
 0x8b4   : > { %15654 = vmatprep.mubr.msk.bf16.mxu0 %vm224_vm0, %v19814_v26 }
 0x8bb   : > { %15655 = vmatmul.mubr.msk.bf16.gmra.mrb[40].mxu0 %vm224_vm0, %v19818_v2 }
 0x8bc   : > { %15658 = vmatprep.mubr.msk.bf16.mxu0 %vm224_vm0, %v19828_v24 }
 0x8c3   : > { %15659 = vmatmul.mubr.msk.bf16.gmra.mrb[44].mxu0 %vm224_vm0, %v19830_v15 }
 0x8c4   : > { %15662 = vmatprep.mubr.msk.bf16.mxu0 %vm224_vm0, %v19836_v63 }
 0x8cb   : > { %15663 = vmatmul.mubr.msk.bf16.gmra.mrb[48].mxu0 %vm224_vm0, %v19838_v30 }
 0x8cc   : > { %15666 = vmatprep.mubr.msk.bf16.mxu0 %vm224_vm0, %v19844_v47 }
 0x8d3   : > { %15667 = vmatmul.mubr.msk.bf16.gmra.mrb[52].mxu0 %vm224_vm0, %v19846_v56 }
 0x8d4   : > { %15670 = vmatprep.mubr.msk.bf16.mxu0 %vm224_vm0, %v19852_v41 }
 0x8db   : > { %15671 = vmatmul.mubr.msk.bf16.gmra.mrb[56].mxu0 %vm224_vm0, %v19854_v12 }
 0x8dc   : > { %15674 = vmatprep.mubr.msk.bf16.mxu0 %vm224_vm0, %v19860_v28 }
 0x8e3   : > { %15675 = vmatmul.mubr.msk.bf16.gmra.mrb[60].mxu0 %vm224_vm0, %v20079_v18 }
 0x8e4   : > { %15682 = vmatprep.mubr.msk.bf16.mxu0 %vm224_vm0, %v19936_v16  ;;  %v8319_v16 = vld [vmem:[#allocation2 + $0x182] sm:$0xff] }
 0x8e5   : > { %v20119_v5 = vpack.c.bf16 %v8320_v7, %v8319_v16 }
 0x8eb   : > { %15683 = vmatmul.mubr.msk.bf16.vlgmr.msra.gmra.mrb[32].mxu0 %vm224_vm0, %v19941_v17 }
 0x8ec   : > { %15715 = vmatpush3.bf16.msra.mxu0 %v17260_v43  ;;  %15686 = vmatprep.mubr.msk.bf16.mxu0 %vm224_vm0, %v19951_v1 }
 0x8ed   : > { %15716 = vmatprep.subr.bf16.mxu0 %v17261_v13 }
 0x8f0   : > { %15717 = vmatpush3.bf16.msra.mxu0 %v17261_v13 }
 0x8f1   : > { %15750 = vmatprep.subr.bf16.mxu0 %v17262_v27 }
 0x8f3   : > { %15687 = vmatmul.mubr.msk.bf16.gmra.mrb[36].mxu0 %vm224_vm0, %v19953_v49 }
 0x8f4   : > { %15690 = vmatprep.mubr.msk.bf16.mxu0 %vm224_vm0, %v19959_v14 }
 0x8fb   : > { %15691 = vmatmul.mubr.msk.bf16.gmra.mrb[40].mxu0 %vm224_vm0, %v19961_v51 }
 0x8fc   : > { %15694 = vmatprep.mubr.msk.bf16.mxu0 %vm224_vm0, %v19967_v50 }
 0x903   : > { %15695 = vmatmul.mubr.msk.bf16.gmra.mrb[44].mxu0 %vm224_vm0, %v19969_v31 }
 0x904   : > { %15698 = vmatprep.mubr.msk.bf16.mxu0 %vm224_vm0, %v19975_v58 }
 0x90b   : > { %15699 = vmatmul.mubr.msk.bf16.gmra.mrb[48].mxu0 %vm224_vm0, %v19977_v10 }
 0x90c   : > { %15702 = vmatprep.mubr.msk.bf16.mxu0 %vm224_vm0, %v19983_v3 }
 0x913   : > { %15703 = vmatmul.mubr.msk.bf16.gmra.mrb[52].mxu0 %vm224_vm0, %v19985_v4 }
 0x914   : > { %15706 = vmatprep.mubr.msk.bf16.mxu0 %vm224_vm0, %v19991_v52 }
 0x91b   : > { %15707 = vmatmul.mubr.msk.bf16.gmra.mrb[56].mxu0 %vm224_vm0, %v19993_v38 }
 0x91c   : > { %15710 = vmatprep.mubr.msk.bf16.mxu0 %vm224_vm0, %v19999_v32 }
 0x923   : > { %15711 = vmatmul.mubr.msk.bf16.gmra.mrb[60].mxu0 %vm224_vm0, %v20119_v5 }
 0x924   : > { %15718 = vmatprep.mubr.msk.bf16.mxu0 %vm224_vm0, %v19870_v45  ;;  %v8625_v45 = vld [vmem:[#allocation2 + $0x198] sm:$0xff] }
 0x92b   : > { %15719 = vmatmul.mubr.msk.bf16.vlgmr.msra.gmra.mrb[32].mxu0 %vm224_vm0, %v19882_v34  ;;  %v8626_v34 = vld [vmem:[#allocation2 + $0x1a0] sm:$0xff] }
 0x92c   : > { %15751 = vmatpush3.bf16.msra.mxu0 %v17262_v27  ;;  %15722 = vmatprep.mubr.msk.bf16.mxu0 %vm224_vm0, %v19885_v54  ;;  %v8642_v54 = vpack.c.bf16 %v8626_v34, %v8625_v45 }
 0x92d   : > { %15752 = vmatprep.subr.bf16.mxu0 %v17263_v55 }
 0x930   : > { %15753 = vmatpush3.bf16.msra.mxu0 %v17263_v55 }
 0x931   : > { %15786 = vmatprep.subr.bf16.mxu0 %v17264_v8 }
 0x933   : > { %15723 = vmatmul.mubr.msk.bf16.gmra.mrb[36].mxu0 %vm224_vm0, %v19891_v23  ;;  %v17265_v23 = vld [vmem:[%s21844_s1 + $0x1a8] sm:$0xff]  }
 0x934   : > { %15726 = vmatprep.mubr.msk.bf16.mxu0 %vm224_vm0, %v19893_v9 }
 0x93b   : > { %15727 = vmatmul.mubr.msk.bf16.gmra.mrb[40].mxu0 %vm224_vm0, %v19899_v22 }
 0x93c   : > { %15730 = vmatprep.mubr.msk.bf16.mxu0 %vm224_vm0, %v19901_v57 }
 0x943   : > { %15731 = vmatmul.mubr.msk.bf16.gmra.mrb[44].mxu0 %vm224_vm0, %v19907_v61 }
 0x944   : > { %15734 = vmatprep.mubr.msk.bf16.mxu0 %vm224_vm0, %v19909_v0 }
 0x94b   : > { %15735 = vmatmul.mubr.msk.bf16.gmra.mrb[48].mxu0 %vm224_vm0, %v19915_v40 }
 0x94c   : > { %15738 = vmatprep.mubr.msk.bf16.mxu0 %vm224_vm0, %v19917_v6 }
 0x953   : > { %15739 = vmatmul.mubr.msk.bf16.gmra.mrb[52].mxu0 %vm224_vm0, %v19923_v44 }
 0x954   : > { %15742 = vmatprep.mubr.msk.bf16.mxu0 %vm224_vm0, %v19925_v21 }
 0x95b   : > { %15743 = vmatmul.mubr.msk.bf16.gmra.mrb[56].mxu0 %vm224_vm0, %v19931_v39 }
 0x95c   : > { %15746 = vmatprep.mubr.msk.bf16.mxu0 %vm224_vm0, %v20039_v25 }
 0x963   : > { %15747 = vmatmul.mubr.msk.bf16.gmra.mrb[60].mxu0 %vm224_vm0, %v8642_v54 }
 0x964   : > { %15754 = vmatprep.mubr.msk.bf16.mxu0 %vm224_vm0, %v19765_v60  ;;  %v8931_v60 = vld [vmem:[#allocation2 + $0x199] sm:$0xff] }
 0x96b   : > { %15755 = vmatmul.mubr.msk.bf16.vlgmr.msra.gmra.mrb[32].mxu0 %vm224_vm0, %v19789_v46  ;;  %v8932_v46 = vld [vmem:[#allocation2 + $0x1a1] sm:$0xff] }
 0x96c   : > { %15787 = vmatpush3.bf16.msra.mxu0 %v17264_v8  ;;  %15758 = vmatprep.mubr.msk.bf16.mxu0 %vm224_vm0, %v19794_v11  ;;  %v8948_v11 = vpack.c.bf16 %v8932_v46, %v8931_v60 }
 0x96d   : > { %15788 = vmatprep.subr.bf16.mxu0 %v17265_v23 }
 0x970   : > { %15789 = vmatpush3.bf16.msra.mxu0 %v17265_v23 }
 0x973   : > { %15759 = vmatmul.mubr.msk.bf16.gmra.mrb[36].mxu0 %vm224_vm0, %v19814_v26  ;;  %v9237_v26 = vld [vmem:[#allocation2 + $0x19a] sm:$0xff] }
 0x974   : > { %15762 = vmatprep.mubr.msk.bf16.mxu0 %vm224_vm0, %v19818_v2  ;;  %v9238_v2 = vld [vmem:[#allocation2 + $0x1a2] sm:$0xff] }
 0x97b   : > { %15763 = vmatmul.mubr.msk.bf16.gmra.mrb[40].mxu0 %vm224_vm0, %v19828_v24  ;;  %v9254_v24 = vpack.c.bf16 %v9238_v2, %v9237_v26 }
 0x97c   : > { %15766 = vmatprep.mubr.msk.bf16.mxu0 %vm224_vm0, %v19830_v15  ;;  %v20228_v15 = vld [vmem:[%s21845_s2 + $0x2] ss:$0 sm:$0xff] }
 0x983   : > { %15767 = vmatmul.mubr.msk.bf16.gmra.mrb[44].mxu0 %vm224_vm0, %v19836_v63 }
 0x984   : > { %15770 = vmatprep.mubr.msk.bf16.mxu0 %vm224_vm0, %v19838_v30 }
 0x98b   : > { %15771 = vmatmul.mubr.msk.bf16.gmra.mrb[48].mxu0 %vm224_vm0, %v19844_v47 }
 0x98c   : > { %15774 = vmatprep.mubr.msk.bf16.mxu0 %vm224_vm0, %v19846_v56 }
 0x993   : > { %15775 = vmatmul.mubr.msk.bf16.gmra.mrb[52].mxu0 %vm224_vm0, %v19852_v41 }
 0x994   : > { %15778 = vmatprep.mubr.msk.bf16.mxu0 %vm224_vm0, %v19854_v12 }
 0x99b   : > { %15779 = vmatmul.mubr.msk.bf16.gmra.mrb[56].mxu0 %vm224_vm0, %v19860_v28 }
 0x99c   : > { %15782 = vmatprep.mubr.msk.bf16.mxu0 %vm224_vm0, %v20079_v18 }
 0x9a3   : > { %15783 = vmatmul.mubr.msk.bf16.gmra.mrb[60].mxu0 %vm224_vm0, %v8948_v11 }
 0x9a4   : > { %15790 = vmatprep.mubr.msk.bf16.mxu0 %vm224_vm0, %v19941_v17 }
 0x9ab   : > { %15791 = vmatmul.mubr.msk.bf16.vlgmr.msra.gmra.mrb[32].mxu0 %vm224_vm0, %v19951_v1 }
 0x9ac   : > { %15794 = vmatprep.mubr.msk.bf16.mxu0 %vm224_vm0, %v19953_v49 }
 0x9b3   : > { %15795 = vmatmul.mubr.msk.bf16.gmra.mrb[36].mxu0 %vm224_vm0, %v19959_v14 }
 0x9b4   : > { %15798 = vmatprep.mubr.msk.bf16.mxu0 %vm224_vm0, %v19961_v51 }
 0x9bb   : > { %15799 = vmatmul.mubr.msk.bf16.gmra.mrb[40].mxu0 %vm224_vm0, %v19967_v50 }
 0x9bc   : > { %15802 = vmatprep.mubr.msk.bf16.mxu0 %vm224_vm0, %v19969_v31 }
 0x9c3   : > { %15803 = vmatmul.mubr.msk.bf16.gmra.mrb[44].mxu0 %vm224_vm0, %v19975_v58 }
 0x9c4   : > { %15806 = vmatprep.mubr.msk.bf16.mxu0 %vm224_vm0, %v19977_v10 }
 0x9cb   : > { %15807 = vmatmul.mubr.msk.bf16.gmra.mrb[48].mxu0 %vm224_vm0, %v19983_v3 }
 0x9cc   : > { %15810 = vmatprep.mubr.msk.bf16.mxu0 %vm224_vm0, %v19985_v4 }
 0x9d3   : > { %15811 = vmatmul.mubr.msk.bf16.gmra.mrb[52].mxu0 %vm224_vm0, %v19991_v52 }
 0x9d4   : > { %15814 = vmatprep.mubr.msk.bf16.mxu0 %vm224_vm0, %v19993_v38 }
 0x9db   : > { %15815 = vmatmul.mubr.msk.bf16.gmra.mrb[56].mxu0 %vm224_vm0, %v19999_v32 }
 0x9dc   : > { %15818 = vmatprep.mubr.msk.bf16.mxu0 %vm224_vm0, %v20119_v5 }
 0x9e3   : > { %15819 = vmatmul.mubr.msk.bf16.gmra.mrb[60].mxu0 %vm224_vm0, %v9254_v24 }
 0xa7e   : > { %v15792_v63 = vpop.f32.mrb[32].mxu0 }
 0xa7f   : > { %v9354_v30 = vpop.f32.mrb[33].mxu0  ;;  %v20234_v12 = vadd.f32 %v15792_v63, %v20228_v15 }
 0xa80   : > { %v20231_v47 = vadd.f32 %v20228_v15, %v9354_v30  ;;  %v15793_v56 = vpop.f32.mrb[34].mxu0 }
 0xa81   : > { %v9357_v41 = vpop.f32.mrb[35].mxu0  ;;  %v20242_v22 = vadd.f32 %v15793_v56, %v20228_v15  ;;  %v9556_v0 = vsel %vm224_vm0, %v20234_v12, 0.0 }
 0xa82   : > { %v20237_v28 = vadd.f32 %v20228_v15, %v9357_v41  ;;  %v9553_v9 = vsel %vm224_vm0, %v20231_v47, 0.0 }
 0xa83   : > { %v9558_v21 = vsel %vm224_vm0, %v20242_v22, 0.0 }
 0xa84   : > { %v9554_v57 = vsel %vm224_vm0, %v20237_v28, 0.0 }
 0xa85   : > { %v9555_v61 = vadd.f32 %v9554_v57, %v9553_v9 }
 0xa86   : > { %v15796_v40 = vpop.f32.mrb[36].mxu0 }
 0xa87   : > { %v9557_v6 = vadd.f32 %v9556_v0, %v9555_v61  ;;  %v9370_v44 = vpop.f32.mrb[37].mxu0  ;;  %v20254_v14 = vadd.f32 %v15796_v40, %v20228_v15 }
 0xa88   : > { %v20251_v39 = vadd.f32 %v20228_v15, %v9370_v44  ;;  %v15797_v17 = vpop.f32.mrb[38].mxu0 }
 0xa89   : > { %v9559_v1 = vadd.f32 %v9558_v21, %v9557_v6  ;;  %v9373_v49 = vpop.f32.mrb[39].mxu0  ;;  %v20262_v58 = vadd.f32 %v15797_v17, %v20228_v15  ;;  %v9564_v4 = vsel %vm224_vm0, %v20254_v14, 0.0 }
 0xa8a   : > { %v9560_v51 = vsel %vm224_vm0, %v20251_v39, 0.0  ;;  %v20259_v50 = vadd.f32 %v20228_v15, %v9373_v49 }
 0xa8b   : > { %v9561_v31 = vadd.f32 %v9560_v51, %v9559_v1  ;;  %v9566_v52 = vsel %vm224_vm0, %v20262_v58, 0.0 }
 0xa8c   : > { %v9562_v10 = vsel %vm224_vm0, %v20259_v50, 0.0 }
 0xa8d   : > { %v9563_v3 = vadd.f32 %v9562_v10, %v9561_v31 }
 0xa8e   : > { %v15800_v48 = vpop.f32.mrb[40].mxu0 }
 0xa8f   : > { %v9565_v36 = vadd.f32 %v9564_v4, %v9563_v3  ;;  %v9386_v33 = vpop.f32.mrb[41].mxu0  ;;  %v20274_v20 = vadd.f32 %v15800_v48, %v20228_v15 }
 0xa90   : > { %v20271_v38 = vadd.f32 %v20228_v15, %v9386_v33  ;;  %v15801_v29 = vpop.f32.mrb[42].mxu0 }
 0xa91   : > { %v9567_v62 = vadd.f32 %v9566_v52, %v9565_v36  ;;  %v9389_v32 = vpop.f32.mrb[43].mxu0  ;;  %v20282_v25 = vadd.f32 %v15801_v29, %v20228_v15  ;;  %v9572_v42 = vsel %vm224_vm0, %v20274_v20, 0.0 }
 0xa92   : > { %v9568_v19 = vsel %vm224_vm0, %v20271_v38, 0.0  ;;  %v20279_v37 = vadd.f32 %v20228_v15, %v9389_v32 }
 0xa93   : > { %v9569_v59 = vadd.f32 %v9568_v19, %v9567_v62  ;;  %v9574_v27 = vsel %vm224_vm0, %v20282_v25, 0.0 }
 0xa94   : > { %v9570_v35 = vsel %vm224_vm0, %v20279_v37, 0.0 }
 0xa95   : > { %v9571_v43 = vadd.f32 %v9570_v35, %v9569_v59 }
 0xa96   : > { %v15804_v53 = vpop.f32.mrb[44].mxu0 }
 0xa97   : > { %v9573_v18 = vadd.f32 %v9572_v42, %v9571_v43  ;;  %v9402_v13 = vpop.f32.mrb[45].mxu0  ;;  %v20294_v8 = vadd.f32 %v15804_v53, %v20228_v15 }
 0xa98   : > { %v20291_v16 = vadd.f32 %v20228_v15, %v9402_v13  ;;  %v15805_v7 = vpop.f32.mrb[46].mxu0 }
 0xa99   : > { %v9575_v5 = vadd.f32 %v9574_v27, %v9573_v18  ;;  %v9405_v55 = vpop.f32.mrb[47].mxu0  ;;  %v20302_v23 = vadd.f32 %v15805_v7, %v20228_v15  ;;  %v9580_v11 = vsel %vm224_vm0, %v20294_v8, 0.0 }
 0xa9a   : > { %v9576_v45 = vsel %vm224_vm0, %v20291_v16, 0.0  ;;  %v20299_v34 = vadd.f32 %v20228_v15, %v9405_v55 }
 0xa9b   : > { %v9577_v54 = vadd.f32 %v9576_v45, %v9575_v5  ;;  %v9582_v63 = vsel %vm224_vm0, %v20302_v23, 0.0 }
 0xa9c   : > { %v9578_v60 = vsel %vm224_vm0, %v20299_v34, 0.0 }
 0xa9d   : > { %v9579_v46 = vadd.f32 %v9578_v60, %v9577_v54 }
 0xa9e   : > { %v15808_v26 = vpop.f32.mrb[48].mxu0 }
 0xa9f   : > { %v9581_v2 = vadd.f32 %v9580_v11, %v9579_v46  ;;  %v9418_v24 = vpop.f32.mrb[49].mxu0  ;;  %v20314_v57 = vadd.f32 %v15808_v26, %v20228_v15 }
 0xaa0   : > { %v20311_v30 = vadd.f32 %v20228_v15, %v9418_v24  ;;  %v15809_v56 = vpop.f32.mrb[50].mxu0 }
 0xaa1   : > { %v9583_v41 = vadd.f32 %v9582_v63, %v9581_v2  ;;  %v9421_v9 = vpop.f32.mrb[51].mxu0  ;;  %v20322_v6 = vadd.f32 %v15809_v56, %v20228_v15  ;;  %v9588_v17 = vsel %vm224_vm0, %v20314_v57, 0.0 }
 0xaa2   : > { %v9584_v61 = vsel %vm224_vm0, %v20311_v30, 0.0  ;;  %v20319_v0 = vadd.f32 %v20228_v15, %v9421_v9 }
 0xaa3   : > { %v9585_v40 = vadd.f32 %v9584_v61, %v9583_v41  ;;  %v9590_v31 = vsel %vm224_vm0, %v20322_v6, 0.0 }
 0xaa4   : > { %v9586_v44 = vsel %vm224_vm0, %v20319_v0, 0.0 }
 0xaa5   : > { %v9587_v21 = vadd.f32 %v9586_v44, %v9585_v40 }
 0xaa6   : > { %v15812_v1 = vpop.f32.mrb[52].mxu0 }
 0xaa7   : > { %v9589_v49 = vadd.f32 %v9588_v17, %v9587_v21  ;;  %v9434_v51 = vpop.f32.mrb[53].mxu0  ;;  %v9543_v36 = vadd.f32 %v15812_v1, %v20228_v15 }
 0xaa8   : > { %v20331_v10 = vadd.f32 %v20228_v15, %v9434_v51  ;;  %v15813_v3 = vpop.f32.mrb[54].mxu0 }
 0xaa9   : > { %v9591_v4 = vadd.f32 %v9590_v31, %v9589_v49  ;;  %v9437_v48 = vpop.f32.mrb[55].mxu0  ;;  %v9544_v62 = vadd.f32 %v15813_v3, %v20228_v15  ;;  %v9596_v59 = vsel %vm224_vm0, %v9543_v36, 0.0 }
 0xaaa   : > { %v9592_v33 = vsel %vm224_vm0, %v20331_v10, 0.0  ;;  %v9542_v52 = vadd.f32 %v20228_v15, %v9437_v48 }
 0xaab   : > { %v9593_v29 = vadd.f32 %v9592_v33, %v9591_v4  ;;  %v9598_v53 = vsel %vm224_vm0, %v9544_v62, 0.0 }
 0xaac   : > { %v9594_v32 = vsel %vm224_vm0, %v9542_v52, 0.0 }
 0xaad   : > { %v9595_v19 = vadd.f32 %v9594_v32, %v9593_v29 }
 0xaae   : > { %v15816_v35 = vpop.f32.mrb[56].mxu0 }
 0xaaf   : > { %v9597_v43 = vadd.f32 %v9596_v59, %v9595_v19  ;;  %v9450_v42 = vpop.f32.mrb[57].mxu0  ;;  %v9547_v5 = vadd.f32 %v15816_v35, %v20228_v15 }
 0xab0   : > { %v9545_v18 = vadd.f32 %v20228_v15, %v9450_v42  ;;  %v15817_v13 = vpop.f32.mrb[58].mxu0 }
 0xab1   : > { %v9599_v27 = vadd.f32 %v9598_v53, %v9597_v43  ;;  %v9453_v7 = vpop.f32.mrb[59].mxu0  ;;  %v9548_v60 = vadd.f32 %v15817_v13, %v20228_v15  ;;  %v9604_v26 = vsel %vm224_vm0, %v9547_v5, 0.0 }
 0xab2   : > { %v9600_v55 = vsel %vm224_vm0, %v9545_v18, 0.0  ;;  %v9546_v45 = vadd.f32 %v20228_v15, %v9453_v7 }
 0xab3   : > { %v9601_v54 = vadd.f32 %v9600_v55, %v9599_v27  ;;  %v9606_v56 = vsel %vm224_vm0, %v9548_v60, 0.0 }
 0xab4   : > { %v9602_v46 = vsel %vm224_vm0, %v9546_v45, 0.0 }
 0xab5   : > { %v9603_v11 = vadd.f32 %v9602_v46, %v9601_v54 }
 0xab6   : > { %v15820_v2 = vpop.f32.mrb[60].mxu0 }
 0xab7   : > { %v9605_v24 = vadd.f32 %v9604_v26, %v9603_v11  ;;  %v9466_v63 = vpop.f32.mrb[61].mxu0  ;;  %v9551_v44 = vadd.f32 %v15820_v2, %v20228_v15 }
 0xab8   : > { %v9549_v41 = vadd.f32 %v20228_v15, %v9466_v63  ;;  %v15821_v9 = vpop.f32.mrb[62].mxu0 }
 0xab9   : > { %v9607_v61 = vadd.f32 %v9606_v56, %v9605_v24  ;;  %v9469_v40 = vpop.f32.mrb[63].mxu0  ;;  %v9552_v49 = vadd.f32 %v15821_v9, %v20228_v15  ;;  %v9612_v3 = vsel %vm224_vm0, %v9551_v44, 0.0 }
 0xaba   : > { %v9608_v21 = vsel %vm224_vm0, %v9549_v41, 0.0  ;;  %v9550_v17 = vadd.f32 %v20228_v15, %v9469_v40 }
 0xabb   : > { %v9609_v1 = vadd.f32 %v9608_v21, %v9607_v61  ;;  %v9614_v48 = vsel %vm224_vm0, %v9552_v49, 0.0 }
 0xabc   : > { %v9610_v51 = vsel %vm224_vm0, %v9550_v17, 0.0 }
 0xabd   : > { %v9611_v31 = vadd.f32 %v9610_v51, %v9609_v1 }
 0xabf   : > { %v9613_v4 = vadd.f32 %v9612_v3, %v9611_v31 }
 0xac1   : > { %v9615_v33 = vadd.f32 %v9614_v48, %v9613_v4 }
 0xac3   : > { %v9616_v29 = vrot.slane %v9615_v33, 4 }
 0xac5   : > { %v9617_v32 = vadd.f32 %v9616_v29, %v9615_v33 }
 0xac7   : > { %v9618_v19 = vrot.slane %v9617_v32, 2 }
 0xac9   : > { %v9619_v59 = vadd.f32 %v9618_v19, %v9617_v32 }
 0xacb   : > { %v9620_v35 = vrot.slane %v9619_v59, 1 }
 0xacd   : > { %v9621_v43 = vadd.f32 %v9620_v35, %v9619_v59 }
 0xacf   : > { %v9622_v42 = vmul.f32 0.00390625, %v9621_v43 }
 0xad1   : > { %v20358_v53 = vsub.f32 %v20279_v37, %v9622_v42  ;;  %v20361_v15 = vsub.f32 %v20282_v25, %v9622_v42  ;;  %v20364_v13 = vsub.f32 %v20291_v16, %v9622_v42  ;;  %v20367_v27 = vsub.f32 %v20299_v34, %v9622_v42 }
 0xad2   : > { %v20370_v7 = vsub.f32 %v20294_v8, %v9622_v42  ;;  %v20373_v55 = vsub.f32 %v20302_v23, %v9622_v42  ;;  %v20376_v54 = vsub.f32 %v20311_v30, %v9622_v42  ;;  %v20379_v37 = vsub.f32 %v20319_v0, %v9622_v42 }
 0xad3   : > { %v20382_v25 = vsub.f32 %v20314_v57, %v9622_v42  ;;  %v20385_v16 = vsub.f32 %v20322_v6, %v9622_v42  ;;  %v20388_v34 = vsub.f32 %v20331_v10, %v9622_v42  ;;  %v20390_v8 = vsub.f32 %v9542_v52, %v9622_v42 }
 0xad4   : > { %v20392_v46 = vsub.f32 %v9543_v36, %v9622_v42  ;;  %v20394_v23 = vsub.f32 %v9544_v62, %v9622_v42  ;;  %v20396_v30 = vsub.f32 %v9545_v18, %v9622_v42  ;;  %v20398_v11 = vsub.f32 %v9546_v45, %v9622_v42 }
 0xad5   : > { %v20400_v0 = vsub.f32 %v9547_v5, %v9622_v42  ;;  %v20402_v57 = vsub.f32 %v9548_v60, %v9622_v42  ;;  %v20404_v26 = vsub.f32 %v9549_v41, %v9622_v42  ;;  %v20406_v6 = vsub.f32 %v9550_v17, %v9622_v42 }
 0xad6   : > { %v20408_v10 = vsub.f32 %v9551_v44, %v9622_v42  ;;  %v20410_v52 = vsub.f32 %v9552_v49, %v9622_v42  ;;  %v20413_v36 = vsub.f32 %v20231_v47, %v9622_v42  ;;  %v20416_v62 = vsub.f32 %v20237_v28, %v9622_v42 }
 0xad7   : > { %v20419_v18 = vsub.f32 %v20234_v12, %v9622_v42  ;;  %v20422_v5 = vsub.f32 %v20242_v22, %v9622_v42  ;;  %v20429_v2 = vsub.f32 %v20251_v39, %v9622_v42  ;;  %v20434_v28 = vsub.f32 %v20259_v50, %v9622_v42 }
 0xad8   : > { %v9655_v45 = vmul.f32 %v20413_v36, %v20413_v36  ;;  %v9656_v60 = vmul.f32 %v20416_v62, %v20416_v62  ;;  %v20441_v56 = vsub.f32 %v20254_v14, %v9622_v42  ;;  %v20447_v50 = vsub.f32 %v20262_v58, %v9622_v42 }
 0xad9   : > { %v9657_v47 = vmul.f32 %v20419_v18, %v20419_v18  ;;  %v9658_v12 = vmul.f32 %v20422_v5, %v20422_v5  ;;  %v9659_v39 = vmul.f32 %v20429_v2, %v20429_v2  ;;  %v9660_v61 = vmul.f32 %v20434_v28, %v20434_v28 }
 0xada   : > { %v9687_v22 = vsel %vm224_vm0, %v9655_v45, 0.0  ;;  %v9688_v24 = vsel %vm224_vm0, %v9656_v60, 0.0  ;;  %v20453_v21 = vsub.f32 %v20271_v38, %v9622_v42  ;;  %v9661_v14 = vmul.f32 %v20441_v56, %v20441_v56 }
 0xadb   : > { %v9689_v63 = vadd.f32 %v9688_v24, %v9687_v22  ;;  %v9690_v41 = vsel %vm224_vm0, %v9657_v47, 0.0  ;;  %v9692_v40 = vsel %vm224_vm0, %v9658_v12, 0.0  ;;  %v9694_v17 = vsel %vm224_vm0, %v9659_v39, 0.0 }
 0xadc   : > { %v9662_v49 = vmul.f32 %v20447_v50, %v20447_v50  ;;  %v9696_v58 = vsel %vm224_vm0, %v9660_v61, 0.0  ;;  %v20462_v31 = vsub.f32 %v20274_v20, %v9622_v42  ;;  %v9663_v3 = vmul.f32 %v20453_v21, %v20453_v21 }
 0xadd   : > { %v9691_v9 = vadd.f32 %v9690_v41, %v9689_v63  ;;  %v9698_v38 = vsel %vm224_vm0, %v9661_v14, 0.0  ;;  %v9664_v48 = vmul.f32 %v20358_v53, %v20358_v53  ;;  %v9666_v20 = vmul.f32 %v20361_v15, %v20361_v15 }
 0xade   : > { %v9700_v33 = vsel %vm224_vm0, %v9662_v49, 0.0  ;;  %v9665_v32 = vmul.f32 %v20462_v31, %v20462_v31  ;;  %v9702_v19 = vsel %vm224_vm0, %v9663_v3, 0.0  ;;  %v9667_v42 = vmul.f32 %v20364_v13, %v20364_v13 }
 0xadf   : > { %v9693_v44 = vadd.f32 %v9692_v40, %v9691_v9  ;;  %v9704_v35 = vsel %vm224_vm0, %v9664_v48, 0.0  ;;  %v9668_v47 = vmul.f32 %v20367_v27, %v20367_v27  ;;  %v9708_v12 = vsel %vm224_vm0, %v9666_v20, 0.0 }
 0xae0   : > { %v9706_v45 = vsel %vm224_vm0, %v9665_v32, 0.0  ;;  %v9669_v24 = vmul.f32 %v20370_v7, %v20370_v7  ;;  %v9710_v63 = vsel %vm224_vm0, %v9667_v42, 0.0  ;;  %v9670_v41 = vmul.f32 %v20373_v55, %v20373_v55 }
 0xae1   : > { %v9695_v1 = vadd.f32 %v9694_v17, %v9693_v44  ;;  %v9712_v9 = vsel %vm224_vm0, %v9668_v47, 0.0  ;;  %v9671_v40 = vmul.f32 %v20376_v54, %v20376_v54  ;;  %v9672_v17 = vmul.f32 %v20379_v37, %v20379_v37  ;;  %v17266_v47 = vld [vmem:[%s21844_s1 + $0x1c0] sm:$0xff]  }
 0xae2   : > { %v9714_v44 = vsel %vm224_vm0, %v9669_v24, 0.0  ;;  %15822 = vmatprep.subr.bf16.mxu1 %v17266_v47 }
 0xae3   : > { %v9697_v51 = vadd.f32 %v9696_v58, %v9695_v1  ;;  %v9716_v1 = vsel %vm224_vm0, %v9670_v41, 0.0  ;;  %v9673_v58 = vmul.f32 %v20382_v25, %v20382_v25  ;;  %v10117_v41 = vld [vmem:[#allocation2 + $0x9] sm:$0xff]  ;;  %15823 = vmatpush3.bf16.msra.mxu1 %v17266_v47 }
 0xae5   : > { %v9699_v4 = vadd.f32 %v9698_v38, %v9697_v51  ;;  %v9718_v51 = vsel %vm224_vm0, %v9671_v40, 0.0  ;;  %v9674_v38 = vmul.f32 %v20385_v16, %v20385_v16  ;;  %v9680_v40 = vmul.f32 %v20398_v11, %v20398_v11 }
 0xae7   : > { %v9701_v29 = vadd.f32 %v9700_v33, %v9699_v4  ;;  %v9720_v4 = vsel %vm224_vm0, %v9672_v17, 0.0  ;;  %v9675_v33 = vmul.f32 %v20388_v34, %v20388_v34 }
 0xae9   : > { %v9703_v59 = vadd.f32 %v9702_v19, %v9701_v29  ;;  %v9722_v29 = vsel %vm224_vm0, %v9673_v58, 0.0  ;;  %v9676_v19 = vmul.f32 %v20390_v8, %v20390_v8 }
 0xaeb   : > { %v9705_v43 = vadd.f32 %v9704_v35, %v9703_v59  ;;  %v9724_v59 = vsel %vm224_vm0, %v9674_v38, 0.0  ;;  %v9677_v35 = vmul.f32 %v20392_v46, %v20392_v46 }
 0xaed   : > { %v9707_v60 = vadd.f32 %v9706_v45, %v9705_v43  ;;  %v9726_v43 = vsel %vm224_vm0, %v9675_v33, 0.0  ;;  %v9678_v45 = vmul.f32 %v20394_v23, %v20394_v23  ;;  %v9730_v24 = vsel %vm224_vm0, %v9677_v35, 0.0 }
 0xaef   : > { %v9709_v22 = vadd.f32 %v9708_v12, %v9707_v60  ;;  %v9728_v60 = vsel %vm224_vm0, %v9676_v19, 0.0 }
 0xaf1   : > { %v9711_v39 = vadd.f32 %v9710_v63, %v9709_v22  ;;  %v9679_v22 = vmul.f32 %v20396_v30, %v20396_v30  ;;  %v17267_v63 = vld [vmem:[%s21844_s1 + $0x1c8] sm:$0xff]  }
 0xaf2   : > { %15824 = vmatprep.subr.bf16.mxu1 %v17267_v63 }
 0xaf3   : > { %v9713_v61 = vadd.f32 %v9712_v9, %v9711_v39  ;;  %v10116_v39 = vld [vmem:[#allocation2 + $0x1] sm:$0xff]  ;;  %15825 = vmatpush3.bf16.msra.mxu1 %v17267_v63 }
 0xaf5   : > { %v9715_v14 = vadd.f32 %v9714_v44, %v9713_v61  ;;  %v10148_v61 = vpack.c.bf16 %v10117_v41, %v10116_v39  ;;  %v9732_v44 = vsel %vm224_vm0, %v9678_v45, 0.0 }
 0xaf7   : > { %v9717_v49 = vadd.f32 %v9716_v1, %v9715_v14  ;;  %v20527_v14 = vld [vmem:[%s21844_s1 + $0x1b0] sm:$0xff]   ;;  %15826 = vmatprep.mubr.msk.bf16.mxu1 %vm224_vm0, %v10148_v61  ;;  %v9681_v1 = vmul.f32 %v20400_v0, %v20400_v0 }
 0xaf8   : > { %15858 = vmatprep.subr.bf16.mxu1 %v20527_v14 }
 0xaf9   : > { %v9719_v3 = vadd.f32 %v9718_v51, %v9717_v49  ;;  %v9734_v49 = vsel %vm224_vm0, %v9679_v22, 0.0  ;;  %v9682_v51 = vmul.f32 %v20402_v57, %v20402_v57 }
 0xafb   : > { %v9721_v48 = vadd.f32 %v9720_v4, %v9719_v3  ;;  %v9736_v3 = vsel %vm224_vm0, %v9680_v40, 0.0  ;;  %v9683_v4 = vmul.f32 %v20404_v26, %v20404_v26 }
 0xafd   : > { %v9723_v32 = vadd.f32 %v9722_v29, %v9721_v48  ;;  %v9738_v48 = vsel %vm224_vm0, %v9681_v1, 0.0  ;;  %v9684_v29 = vmul.f32 %v20406_v6, %v20406_v6  ;;  %v20554_v1 = vld [vmem:[%s21846_s3 + $0x2] ss:$0 sm:$0xff] }
 0xaff   : > { %v9725_v20 = vadd.f32 %v9724_v59, %v9723_v32  ;;  %v9740_v32 = vsel %vm224_vm0, %v9682_v51, 0.0  ;;  %v9685_v59 = vmul.f32 %v20408_v10, %v20408_v10 }
 0xb01   : > { %v9727_v42 = vadd.f32 %v9726_v43, %v9725_v20  ;;  %v9742_v20 = vsel %vm224_vm0, %v9683_v4, 0.0  ;;  %v9686_v43 = vmul.f32 %v20410_v52, %v20410_v52 }
 0xb03   : > { %v9729_v12 = vadd.f32 %v9728_v60, %v9727_v42  ;;  %v9744_v42 = vsel %vm224_vm0, %v9684_v29, 0.0  ;;  %v9746_v60 = vsel %vm224_vm0, %v9685_v59, 0.0 }
 0xb05   : > { %v9731_v9 = vadd.f32 %v9730_v24, %v9729_v12  ;;  %v9748_v12 = vsel %vm224_vm0, %v9686_v43, 0.0 }
 0xb07   : > { %v9733_v17 = vadd.f32 %v9732_v44, %v9731_v9 }
 0xb09   : > { %v9735_v58 = vadd.f32 %v9734_v49, %v9733_v17 }
 0xb0b   : > { %v9737_v38 = vadd.f32 %v9736_v3, %v9735_v58  ;;  %v20560_v58 = vld [vmem:[%s21847_s4 + $0x2] ss:$0 sm:$0xff] }
 0xb0d   : > { %v9739_v33 = vadd.f32 %v9738_v48, %v9737_v38 }
 0xb0f   : > { %v9741_v19 = vadd.f32 %v9740_v32, %v9739_v33 }
 0xb11   : > { %v9743_v35 = vadd.f32 %v9742_v20, %v9741_v19 }
 0xb13   : > { %v9745_v45 = vadd.f32 %v9744_v42, %v9743_v35 }
 0xb15   : > { %v9747_v47 = vadd.f32 %v9746_v60, %v9745_v45 }
 0xb17   : > { %v9749_v22 = vadd.f32 %v9748_v12, %v9747_v47 }
 0xb19   : > { %v9750_v24 = vrot.slane %v9749_v22, 4 }
 0xb1b   : > { %v9751_v63 = vadd.f32 %v9750_v24, %v9749_v22 }
 0xb1d   : > { %v9752_v39 = vrot.slane %v9751_v63, 2 }
 0xb1f   : > { %v9753_v41 = vadd.f32 %v9752_v39, %v9751_v63 }
 0xb21   : > { %v9754_v9 = vrot.slane %v9753_v41, 1 }
 0xb23   : > { %v9755_v61 = vadd.f32 %v9754_v9, %v9753_v41 }
 0xb25   : > { %v9756_v40 = vmul.f32 0.00390625, %v9755_v61 }
 0xb27   : > { %v9757_v44 = vadd.f32 1e-05, %v9756_v40 }
 0xb29   : > { %17416 = vrsqrt.f32 %v9757_v44 }
 0xb33   : > { %v17417_v17 = vpop.eup %17416 }
 0xb34   : > { %v9788_v49 = vmul.f32 %v17417_v17, %v20406_v6  ;;  %v9759_v4 = vmul.f32 %v17417_v17, %v20413_v36  ;;  %v9760_v48 = vmul.f32 %v17417_v17, %v20416_v62  ;;  %v9761_v33 = vmul.f32 %v17417_v17, %v20419_v18 }
 0xb35   : > { %v9762_v29 = vmul.f32 %v17417_v17, %v20422_v5  ;;  %v9763_v6 = vmul.f32 %v17417_v17, %v20429_v2  ;;  %v9764_v32 = vmul.f32 %v17417_v17, %v20434_v28  ;;  %v9765_v19 = vmul.f32 %v17417_v17, %v20441_v56 }
 0xb36   : > { %v9828_v51 = vmul.f32 %v20554_v1, %v9788_v49  ;;  %v9766_v59 = vmul.f32 %v17417_v17, %v20447_v50  ;;  %v9767_v20 = vmul.f32 %v17417_v17, %v20453_v21  ;;  %v9768_v35 = vmul.f32 %v17417_v17, %v20358_v53 }
 0xb37   : > { %v9769_v36 = vmul.f32 %v17417_v17, %v20462_v31  ;;  %v9770_v62 = vmul.f32 %v17417_v17, %v20361_v15  ;;  %v9771_v18 = vmul.f32 %v17417_v17, %v20364_v13  ;;  %v9772_v5 = vmul.f32 %v17417_v17, %v20367_v27 }
 0xb38   : > { %v9868_v3 = vadd.f32 %v20560_v58, %v9828_v51  ;;  %v9773_v2 = vmul.f32 %v17417_v17, %v20370_v7  ;;  %v9774_v28 = vmul.f32 %v17417_v17, %v20373_v55  ;;  %v9775_v56 = vmul.f32 %v17417_v17, %v20376_v54 }
 0xb39   : > { %v9776_v50 = vmul.f32 %v17417_v17, %v20379_v37  ;;  %v9777_v21 = vmul.f32 %v17417_v17, %v20382_v25  ;;  %v9778_v53 = vmul.f32 %v17417_v17, %v20385_v16  ;;  %v9779_v31 = vmul.f32 %v17417_v17, %v20388_v34 }
 0xb3a   : > { %v9932_v38 = vmul.f32 0.70710677, %v9868_v3  ;;  %v9900_v43 = vmul.f32 0.5, %v9868_v3  ;;  %v9780_v15 = vmul.f32 %v17417_v17, %v20390_v8  ;;  %v9781_v13 = vmul.f32 %v17417_v17, %v20392_v46 }
 0xb3b   : > { %v9782_v27 = vmul.f32 %v17417_v17, %v20394_v23  ;;  %v9783_v7 = vmul.f32 %v17417_v17, %v20396_v30  ;;  %v9784_v54 = vmul.f32 %v17417_v17, %v20398_v11  ;;  %v9785_v37 = vmul.f32 %v17417_v17, %v20400_v0 }
 0xb3c   : > { %17418 = verf.f32 %v9932_v38  ;;  %v9786_v42 = vmul.f32 %v17417_v17, %v20402_v57  ;;  %v9787_v25 = vmul.f32 %v17417_v17, %v20404_v26  ;;  %v9789_v34 = vmul.f32 %v17417_v17, %v20408_v10 }
 0xb3d   : > { %v9790_v8 = vmul.f32 %v17417_v17, %v20410_v52  ;;  %v9799_v46 = vmul.f32 %v20554_v1, %v9759_v4  ;;  %v9800_v23 = vmul.f32 %v20554_v1, %v9760_v48  ;;  %v9801_v30 = vmul.f32 %v20554_v1, %v9761_v33 }
 0xb3e   : > { %v9802_v45 = vmul.f32 %v20554_v1, %v9762_v29  ;;  %v9803_v11 = vmul.f32 %v20554_v1, %v9763_v6  ;;  %v9804_v57 = vmul.f32 %v20554_v1, %v9764_v32  ;;  %v9805_v26 = vmul.f32 %v20554_v1, %v9765_v19 }
 0xb3f   : > { %v9806_v60 = vmul.f32 %v20554_v1, %v9766_v59  ;;  %v9807_v10 = vmul.f32 %v20554_v1, %v9767_v20  ;;  %v9808_v52 = vmul.f32 %v20554_v1, %v9768_v35  ;;  %v9809_v47 = vmul.f32 %v20554_v1, %v9769_v36 }
 0xb40   : > { %v9810_v12 = vmul.f32 %v20554_v1, %v9770_v62  ;;  %v9811_v22 = vmul.f32 %v20554_v1, %v9771_v18  ;;  %v9812_v24 = vmul.f32 %v20554_v1, %v9772_v5  ;;  %v9813_v63 = vmul.f32 %v20554_v1, %v9773_v2 }
 0xb41   : > { %v9814_v39 = vmul.f32 %v20554_v1, %v9774_v28  ;;  %v9815_v41 = vmul.f32 %v20554_v1, %v9775_v56  ;;  %v9816_v9 = vmul.f32 %v20554_v1, %v9776_v50  ;;  %v9817_v61 = vmul.f32 %v20554_v1, %v9777_v21 }
 0xb42   : > { %v9818_v40 = vmul.f32 %v20554_v1, %v9778_v53  ;;  %v9819_v44 = vmul.f32 %v20554_v1, %v9779_v31  ;;  %v9820_v17 = vmul.f32 %v20554_v1, %v9780_v15  ;;  %v9821_v49 = vmul.f32 %v20554_v1, %v9781_v13 }
 0xb43   : > { %v9822_v51 = vmul.f32 %v20554_v1, %v9782_v27  ;;  %v9823_v3 = vmul.f32 %v20554_v1, %v9783_v7  ;;  %v9824_v38 = vmul.f32 %v20554_v1, %v9784_v54  ;;  %v9825_v4 = vmul.f32 %v20554_v1, %v9785_v37 }
 0xb44   : > { %v9826_v48 = vmul.f32 %v20554_v1, %v9786_v42  ;;  %v9827_v33 = vmul.f32 %v20554_v1, %v9787_v25  ;;  %v9829_v29 = vmul.f32 %v20554_v1, %v9789_v34  ;;  %v9830_v6 = vmul.f32 %v20554_v1, %v9790_v8 }
 0xb45   : > { %v9839_v32 = vadd.f32 %v20560_v58, %v9799_v46  ;;  %v9840_v19 = vadd.f32 %v20560_v58, %v9800_v23  ;;  %v9841_v59 = vadd.f32 %v20560_v58, %v9801_v30  ;;  %v9842_v20 = vadd.f32 %v20560_v58, %v9802_v45 }
 0xb46   : > { %v17419_v55 = vpop.eup %17418  ;;  %v9843_v35 = vadd.f32 %v20560_v58, %v9803_v11  ;;  %v9844_v36 = vadd.f32 %v20560_v58, %v9804_v57  ;;  %v9845_v62 = vadd.f32 %v20560_v58, %v9805_v26  ;;  %v9846_v18 = vadd.f32 %v20560_v58, %v9806_v60 }
 0xb47   : > { %v9996_v16 = vadd.f32 1.0, %v17419_v55  ;;  %v9847_v5 = vadd.f32 %v20560_v58, %v9807_v10  ;;  %v9848_v1 = vadd.f32 %v20560_v58, %v9808_v52  ;;  %v9849_v2 = vadd.f32 %v20560_v58, %v9809_v47 }
 0xb48   : > { %v9850_v28 = vadd.f32 %v20560_v58, %v9810_v12  ;;  %v9851_v56 = vadd.f32 %v20560_v58, %v9811_v22  ;;  %v9852_v50 = vadd.f32 %v20560_v58, %v9812_v24  ;;  %v9854_v21 = vadd.f32 %v20560_v58, %v9814_v39 }
 0xb49   : > { %v10028_v0 = vmul.f32 %v9996_v16, %v9900_v43  ;;  %v9853_v43 = vadd.f32 %v20560_v58, %v9813_v63  ;;  %v20644_v53 = vadd.f32 %v20560_v58, %v9815_v41  ;;  %v20647_v31 = vadd.f32 %v20560_v58, %v9816_v9 }
 0xb4a   : > { %v20650_v15 = vadd.f32 %v20560_v58, %v9817_v61  ;;  %v20653_v13 = vadd.f32 %v20560_v58, %v9818_v40  ;;  %v20656_v27 = vadd.f32 %v20560_v58, %v9819_v44  ;;  %v20659_v7 = vadd.f32 %v20560_v58, %v9820_v17 }
 0xb4b   : > { %10060 = vst.msk [vmem:[#allocation2 + $0x171] sm:$0xff] %vm224_vm0, %v10028_v0  ;;  %v9903_v55 = vmul.f32 0.70710677, %v9839_v32  ;;  %v9904_v54 = vmul.f32 0.70710677, %v9840_v19  ;;  %v20662_v42 = vadd.f32 %v20560_v58, %v9821_v49  ;;  %v20665_v25 = vadd.f32 %v20560_v58, %v9822_v51 }
 0xb4c   : > { %v9905_v37 = vmul.f32 0.70710677, %v9841_v59  ;;  %v20668_v16 = vadd.f32 %v20560_v58, %v9823_v3  ;;  %v9906_v34 = vmul.f32 0.70710677, %v9842_v20  ;;  %v20671_v8 = vadd.f32 %v20560_v58, %v9824_v38 }
 0xb4d   : > { %v20674_v46 = vadd.f32 %v20560_v58, %v9825_v4  ;;  %v9907_v23 = vmul.f32 0.70710677, %v9843_v35  ;;  %17420 = verf.f32 %v9903_v55  ;;  %v20677_v30 = vadd.f32 %v20560_v58, %v9826_v48 }
 0xb4e   : > { %v20680_v45 = vadd.f32 %v20560_v58, %v9827_v33  ;;  %v9908_v11 = vmul.f32 0.70710677, %v9844_v36  ;;  %17422 = verf.f32 %v9904_v54  ;;  %v20683_v0 = vadd.f32 %v20560_v58, %v9829_v29 }
 0xb4f   : > { %v20686_v57 = vadd.f32 %v20560_v58, %v9830_v6  ;;  %v9909_v26 = vmul.f32 0.70710677, %v9845_v62  ;;  %17424 = verf.f32 %v9905_v37  ;;  %v9871_v60 = vmul.f32 0.5, %v9839_v32 }
 0xb50   : > { %v9872_v10 = vmul.f32 0.5, %v9840_v19  ;;  %v9910_v52 = vmul.f32 0.70710677, %v9846_v18  ;;  %17426 = verf.f32 %v9906_v34  ;;  %v9873_v47 = vmul.f32 0.5, %v9841_v59 }
 0xb51   : > { %v9874_v12 = vmul.f32 0.5, %v9842_v20  ;;  %v9911_v22 = vmul.f32 0.70710677, %v9847_v5  ;;  %17428 = verf.f32 %v9907_v23  ;;  %v9875_v24 = vmul.f32 0.5, %v9843_v35 }
 0xb52   : > { %v20688_v63 = vmul.f32 0.5, %v9844_v36  ;;  %v9912_v39 = vmul.f32 0.70710677, %v9848_v1  ;;  %17430 = verf.f32 %v9908_v11  ;;  %v20690_v41 = vmul.f32 0.5, %v9845_v62 }
 0xb53   : > { %v20692_v9 = vmul.f32 0.5, %v9846_v18  ;;  %v9913_v58 = vmul.f32 0.70710677, %v9849_v2  ;;  %17432 = verf.f32 %v9909_v26  ;;  %v20694_v61 = vmul.f32 0.5, %v9847_v5 }
 0xb54   : > { %v20696_v40 = vmul.f32 0.5, %v9848_v1  ;;  %v9914_v44 = vmul.f32 0.70710677, %v9850_v28  ;;  %17434 = verf.f32 %v9910_v52  ;;  %v20698_v17 = vmul.f32 0.5, %v9849_v2 }
 0xb55   : > { %v20700_v49 = vmul.f32 0.5, %v9850_v28  ;;  %v9915_v51 = vmul.f32 0.70710677, %v9851_v56  ;;  %17436 = verf.f32 %v9911_v22  ;;  %v20702_v3 = vmul.f32 0.5, %v9851_v56 }
 0xb56   : > { %v20704_v38 = vmul.f32 0.5, %v9852_v50  ;;  %v9916_v4 = vmul.f32 0.70710677, %v9852_v50  ;;  %17438 = verf.f32 %v9912_v39  ;;  %v20706_v33 = vmul.f32 0.5, %v9853_v43 }
 0xb57   : > { %v17421_v48 = vpop.eup %17420  ;;  %v20708_v29 = vmul.f32 0.5, %v9854_v21  ;;  %v9917_v6 = vmul.f32 0.70710677, %v9853_v43  ;;  %17440 = verf.f32 %v9913_v58  ;;  %v9918_v19 = vmul.f32 0.70710677, %v9854_v21 }
 0xb58   : > { %v17423_v32 = vpop.eup %17422  ;;  %v9919_v59 = vmul.f32 0.70710677, %v20644_v53  ;;  %17442 = verf.f32 %v9914_v44  ;;  %v9967_v20 = vadd.f32 1.0, %v17421_v48  ;;  %v9920_v36 = vmul.f32 0.70710677, %v20647_v31 }
 0xb59   : > { %v17425_v35 = vpop.eup %17424  ;;  %v9921_v62 = vmul.f32 0.70710677, %v20650_v15  ;;  %17444 = verf.f32 %v9915_v51  ;;  %v9968_v18 = vadd.f32 1.0, %v17423_v32  ;;  %v9922_v1 = vmul.f32 0.70710677, %v20653_v13 }
 0xb5a   : > { %v17427_v5 = vpop.eup %17426  ;;  %17446 = verf.f32 %v9916_v4  ;;  %v9969_v2 = vadd.f32 1.0, %v17425_v35  ;;  %v9999_v28 = vmul.f32 %v9967_v20, %v9871_v60  ;;  %v9923_v50 = vmul.f32 0.70710677, %v20656_v27 }
 0xb5b   : > { %v17429_v56 = vpop.eup %17428  ;;  %17448 = verf.f32 %v9917_v6  ;;  %v9970_v43 = vadd.f32 1.0, %v17427_v5  ;;  %v10000_v21 = vmul.f32 %v9968_v18, %v9872_v10  ;;  %v9924_v54 = vmul.f32 0.70710677, %v20659_v7 }
 0xb5c   : > { %v17431_v55 = vpop.eup %17430  ;;  %17450 = verf.f32 %v9918_v19  ;;  %v9971_v37 = vadd.f32 1.0, %v17429_v56  ;;  %v10001_v34 = vmul.f32 %v9969_v2, %v9873_v47  ;;  %10031 = vst.msk [vmem:[#allocation2 + $0x19] sm:$0xff] %vm224_vm0, %v9999_v28  ;;  %v9925_v11 = vmul.f32 0.70710677, %v20662_v42 }
 0xb5d   : > { %v17433_v23 = vpop.eup %17432  ;;  %17452 = verf.f32 %v9919_v59  ;;  %v9972_v26 = vadd.f32 1.0, %v17431_v55  ;;  %v10002_v60 = vmul.f32 %v9970_v43, %v9874_v12  ;;  %10032 = vst.msk [vmem:[#allocation2 + $0x21] sm:$0xff] %vm224_vm0, %v10000_v21  ;;  %v9926_v22 = vmul.f32 0.70710677, %v20665_v25 }
 0xb5e   : > { %v17435_v52 = vpop.eup %17434  ;;  %17454 = verf.f32 %v9920_v36  ;;  %v9973_v10 = vadd.f32 1.0, %v17433_v23  ;;  %v10003_v39 = vmul.f32 %v9971_v37, %v9875_v24  ;;  %10033 = vst.msk [vmem:[#allocation2 + $0x31] sm:$0xff] %vm224_vm0, %v10001_v34  ;;  %v9927_v47 = vmul.f32 0.70710677, %v20668_v16 }
 0xb5f   : > { %v17437_v58 = vpop.eup %17436  ;;  %17456 = verf.f32 %v9921_v62  ;;  %v9974_v44 = vadd.f32 1.0, %v17435_v52  ;;  %v10004_v51 = vmul.f32 %v9972_v26, %v20688_v63  ;;  %10034 = vst.msk [vmem:[#allocation2 + $0x39] sm:$0xff] %vm224_vm0, %v10002_v60  ;;  %v9928_v4 = vmul.f32 0.70710677, %v20671_v8 }
 0xb60   : > { %v17439_v12 = vpop.eup %17438  ;;  %17458 = verf.f32 %v9922_v1  ;;  %v9975_v48 = vadd.f32 1.0, %v17437_v58  ;;  %v10005_v6 = vmul.f32 %v9973_v10, %v20690_v41  ;;  %10035 = vst.msk [vmem:[#allocation2 + $0x49] sm:$0xff] %vm224_vm0, %v10003_v39  ;;  %v9929_v32 = vmul.f32 0.70710677, %v20674_v46 }
 0xb61   : > { %v17441_v24 = vpop.eup %17440  ;;  %17460 = verf.f32 %v9923_v50  ;;  %v9976_v19 = vadd.f32 1.0, %v17439_v12  ;;  %v10006_v59 = vmul.f32 %v9974_v44, %v20692_v9  ;;  %10036 = vst.msk [vmem:[#allocation2 + $0x51] sm:$0xff] %vm224_vm0, %v10004_v51  ;;  %v9930_v20 = vmul.f32 0.70710677, %v20677_v30 }
 0xb62   : > { %v17443_v63 = vpop.eup %17442  ;;  %17462 = verf.f32 %v9924_v54  ;;  %v9977_v35 = vadd.f32 1.0, %v17441_v24  ;;  %v10007_v36 = vmul.f32 %v9975_v48, %v20694_v61  ;;  %10037 = vst.msk [vmem:[#allocation2 + $0x61] sm:$0xff] %vm224_vm0, %v10005_v6  ;;  %v9931_v62 = vmul.f32 0.70710677, %v20680_v45  ;;  %v17269_v54 = vld [vmem:[%s21844_s1 + $0x1b8] sm:$0xff]  }
 0xb63   : > { %v17445_v41 = vpop.eup %17444  ;;  %17464 = verf.f32 %v9925_v11  ;;  %v9978_v18 = vadd.f32 1.0, %v17443_v63  ;;  %v10008_v5 = vmul.f32 %v9976_v19, %v20696_v40  ;;  %10038 = vst.msk [vmem:[#allocation2 + $0x69] sm:$0xff] %vm224_vm0, %v10006_v59  ;;  %v10118_v9 = vld [vmem:[#allocation2 + $0x19] sm:$0xff]  ;;  %v9933_v2 = vmul.f32 0.70710677, %v20683_v0 }
 0xb64   : > { %v17447_v1 = vpop.eup %17446  ;;  %17466 = verf.f32 %v9926_v22  ;;  %v9979_v28 = vadd.f32 1.0, %v17445_v41  ;;  %v10009_v56 = vmul.f32 %v9977_v35, %v20698_v17  ;;  %10039 = vst.msk [vmem:[#allocation2 + $0x79] sm:$0xff] %vm224_vm0, %v10007_v36  ;;  %v10119_v61 = vld [vmem:[#allocation2 + $0x21] sm:$0xff]  ;;  %v9934_v17 = vmul.f32 0.70710677, %v20686_v57 }
 0xb65   : > { %v17449_v50 = vpop.eup %17448  ;;  %17468 = verf.f32 %v9927_v47  ;;  %v9980_v43 = vadd.f32 1.0, %v17447_v1  ;;  %v10010_v21 = vmul.f32 %v9978_v18, %v20700_v49  ;;  %10040 = vst.msk [vmem:[#allocation2 + $0x81] sm:$0xff] %vm224_vm0, %v10008_v5  ;;  %v20741_v40 = vpack.c.bf16 %v10119_v61, %v10118_v9  ;;  %v10120_v55 = vld [vmem:[#allocation2 + $0x31] sm:$0xff] }
 0xb66   : > { %v17451_v37 = vpop.eup %17450  ;;  %17470 = verf.f32 %v9928_v4  ;;  %v9981_v34 = vadd.f32 1.0, %v17449_v50  ;;  %v10011_v23 = vmul.f32 %v9979_v28, %v20702_v3  ;;  %10041 = vst.msk [vmem:[#allocation2 + $0x91] sm:$0xff] %vm224_vm0, %v10009_v56  ;;  %v10121_v11 = vld [vmem:[#allocation2 + $0x39] sm:$0xff]  ;;  %v9887_v10 = vmul.f32 0.5, %v20644_v53  ;;  %v20767_v53 = vld [vmem:[%s21844_s1 + $0x1d0] sm:$0xff]  }
 0xb67   : > { %v17453_v49 = vpop.eup %17452  ;;  %17472 = verf.f32 %v9929_v32  ;;  %v9982_v26 = vadd.f32 1.0, %v17451_v37  ;;  %v10012_v60 = vmul.f32 %v9980_v43, %v20704_v38  ;;  %10042 = vst.msk [vmem:[#allocation2 + $0x99] sm:$0xff] %vm224_vm0, %v10010_v21  ;;  %15827 = vmatmul.mubr.msk.bf16.vlgmr.msra.gmra.mrb[32].mxu1 %vm224_vm0, %v20741_v40  ;;  %v20753_v52 = vpack.c.bf16 %v10121_v11, %v10120_v55 }
 0xb68   : > { %v17455_v22 = vpop.eup %17454  ;;  %17474 = verf.f32 %v9930_v20  ;;  %v9983_v3 = vadd.f32 1.0, %v17453_v49  ;;  %v10013_v39 = vmul.f32 %v9981_v34, %v20706_v33  ;;  %10043 = vst.msk [vmem:[#allocation2 + $0xa9] sm:$0xff] %vm224_vm0, %v10011_v23  ;;  %15859 = vmatpush3.bf16.msra.mxu1 %v20527_v14  ;;  %v9888_v38 = vmul.f32 0.5, %v20647_v31  ;;  %v10123_v12 = vld [vmem:[#allocation2 + $0x51] sm:$0xff] }
 0xb69   : > { %v17457_v58 = vpop.eup %17456  ;;  %17476 = verf.f32 %v9931_v62  ;;  %v9984_v47 = vadd.f32 1.0, %v17455_v22  ;;  %v10014_v44 = vmul.f32 %v9982_v26, %v20708_v29  ;;  %10044 = vst.msk [vmem:[#allocation2 + $0xb1] sm:$0xff] %vm224_vm0, %v10012_v60  ;;  %15830 = vmatprep.mubr.msk.bf16.mxu1 %vm224_vm0, %v20753_v52  ;;  %15860 = vmatprep.subr.bf16.mxu1 %v17269_v54  ;;  %v9889_v14 = vmul.f32 0.5, %v20650_v15  ;;  %v10122_v29 = vld [vmem:[#allocation2 + $0x49] sm:$0xff]  ;;  %v10124_v32 = vld [vmem:[#allocation2 + $0x61] sm:$0xff] }
 0xb6a   : > { %v17459_v33 = vpop.eup %17458  ;;  %17478 = verf.f32 %v9933_v2  ;;  %v9985_v31 = vadd.f32 1.0, %v17457_v58  ;;  %v10015_v51 = vmul.f32 %v9983_v3, %v9887_v10  ;;  %10045 = vst.msk [vmem:[#allocation2 + $0xc1] sm:$0xff] %vm224_vm0, %v10013_v39  ;;  %v9890_v48 = vmul.f32 0.5, %v20653_v13  ;;  %v10125_v19 = vld [vmem:[#allocation2 + $0x69] sm:$0xff] }
 0xb6b   : > { %v17461_v4 = vpop.eup %17460  ;;  %17480 = verf.f32 %v9934_v17  ;;  %v9986_v6 = vadd.f32 1.0, %v17459_v33  ;;  %v10016_v24 = vmul.f32 %v9984_v47, %v9888_v38  ;;  %10046 = vst.msk [vmem:[#allocation2 + $0xc9] sm:$0xff] %vm224_vm0, %v10014_v44  ;;  %v9891_v15 = vmul.f32 0.5, %v20656_v27 }
 0xb6c   : > { %v17463_v59 = vpop.eup %17462  ;;  %v9987_v63 = vadd.f32 1.0, %v17461_v4  ;;  %v10017_v20 = vmul.f32 %v9985_v31, %v9889_v14  ;;  %10047 = vst.msk [vmem:[#allocation2 + $0xd9] sm:$0xff] %vm224_vm0, %v10015_v51  ;;  %15861 = vmatpush3.bf16.msra.mxu1 %v17269_v54  ;;  %v9892_v36 = vmul.f32 0.5, %v20659_v7  ;;  %v20777_v62 = vpack.c.bf16 %v10123_v12, %v10122_v29  ;;  %v10127_v11 = vld [vmem:[#allocation2 + $0x81] sm:$0xff] }
 0xb6d   : > { %v17465_v35 = vpop.eup %17464  ;;  %v9988_v41 = vadd.f32 1.0, %v17463_v59  ;;  %v10018_v13 = vmul.f32 %v9986_v6, %v9890_v48  ;;  %10048 = vst.msk [vmem:[#allocation2 + $0xe1] sm:$0xff] %vm224_vm0, %v10016_v24  ;;  %15894 = vmatprep.subr.bf16.mxu1 %v20767_v53  ;;  %v9893_v5 = vmul.f32 0.5, %v20662_v42  ;;  %v20782_v1 = vpack.c.bf16 %v10125_v19, %v10124_v32 }
 0xb6e   : > { %v17467_v18 = vpop.eup %17466  ;;  %v9989_v27 = vadd.f32 1.0, %v17465_v35  ;;  %v10019_v9 = vmul.f32 %v9987_v63, %v9891_v15  ;;  %10049 = vst.msk [vmem:[#allocation2 + $0xf1] sm:$0xff] %vm224_vm0, %v10017_v20  ;;  %v9894_v7 = vmul.f32 0.5, %v20665_v25  ;;  %v9895_v50 = vmul.f32 0.5, %v20668_v16  ;;  %v10126_v16 = vld [vmem:[#allocation2 + $0x79] sm:$0xff] }
 0xb6f   : > { %v17469_v2 = vpop.eup %17468  ;;  %v9990_v28 = vadd.f32 1.0, %v17467_v18  ;;  %v10020_v56 = vmul.f32 %v9988_v41, %v9892_v36  ;;  %10050 = vst.msk [vmem:[#allocation2 + $0xf9] sm:$0xff] %vm224_vm0, %v10018_v13  ;;  %15831 = vmatmul.mubr.msk.bf16.gmra.mrb[36].mxu1 %vm224_vm0, %v20777_v62  ;;  %v9896_v25 = vmul.f32 0.5, %v20671_v8  ;;  %v9897_v17 = vmul.f32 0.5, %v20674_v46  ;;  %v10128_v8 = vld [vmem:[#allocation2 + $0x91] sm:$0xff]  ;;  %v10129_v10 = vld [vmem:[#allocation2 + $0x99] sm:$0xff] }
 0xb70   : > { %v17471_v61 = vpop.eup %17470  ;;  %v9991_v42 = vadd.f32 1.0, %v17469_v2  ;;  %v10021_v43 = vmul.f32 %v9989_v27, %v9893_v5  ;;  %10051 = vst.msk [vmem:[#allocation2 + $0x109] sm:$0xff] %vm224_vm0, %v10019_v9  ;;  %15834 = vmatprep.mubr.msk.bf16.mxu1 %vm224_vm0, %v20782_v1  ;;  %v9898_v26 = vmul.f32 0.5, %v20677_v30  ;;  %v9899_v39 = vmul.f32 0.5, %v20680_v45  ;;  %v10131_v12 = vld [vmem:[#allocation2 + $0xb1] sm:$0xff] }
 0xb71   : > { %v17473_v21 = vpop.eup %17472  ;;  %v9992_v55 = vadd.f32 1.0, %v17471_v61  ;;  %v10022_v54 = vmul.f32 %v9990_v28, %v9894_v7  ;;  %10052 = vst.msk [vmem:[#allocation2 + $0x111] sm:$0xff] %vm224_vm0, %v10020_v56  ;;  %v9901_v47 = vmul.f32 0.5, %v20683_v0  ;;  %v20802_v30 = vpack.c.bf16 %v10127_v11, %v10126_v16  ;;  %v10132_v4 = vld [vmem:[#allocation2 + $0xc1] sm:$0xff] }
 0xb72   : > { %v17475_v37 = vpop.eup %17474  ;;  %v9993_v34 = vadd.f32 1.0, %v17473_v21  ;;  %v10023_v23 = vmul.f32 %v9991_v42, %v9895_v50  ;;  %10053 = vst.msk [vmem:[#allocation2 + $0x121] sm:$0xff] %vm224_vm0, %v10021_v43  ;;  %v9902_v14 = vmul.f32 0.5, %v20686_v57  ;;  %v20806_v45 = vpack.c.bf16 %v10129_v10, %v10128_v8  ;;  %v10130_v57 = vld [vmem:[#allocation2 + $0xa9] sm:$0xff]  ;;  %v10063_v61 = vld [vmem:[#allocation2] sm:$0xff]  ;;  %v10147_v43 = vld [vmem:[#allocation2 + $0x171] sm:$0xff] }
 0xb73   : > { %v17477_v49 = vpop.eup %17476  ;;  %v9994_v60 = vadd.f32 1.0, %v17475_v37  ;;  %v10024_v22 = vmul.f32 %v9992_v55, %v9896_v25  ;;  %10054 = vst.msk [vmem:[#allocation2 + $0x129] sm:$0xff] %vm224_vm0, %v10022_v54  ;;  %v10133_v48 = vld [vmem:[#allocation2 + $0xc9] sm:$0xff]  ;;  %v20816_v6 = vpack.c.bf16 %v10131_v12, %v10130_v57  ;;  %v10134_v32 = vld [vmem:[#allocation2 + $0xd9] sm:$0xff] }
 0xb74   : > { %v17479_v3 = vpop.eup %17478  ;;  %v9995_v58 = vadd.f32 1.0, %v17477_v49  ;;  %v10025_v46 = vmul.f32 %v9993_v34, %v9897_v17  ;;  %10055 = vst.msk [vmem:[#allocation2 + $0x139] sm:$0xff] %vm224_vm0, %v10023_v23  ;;  %v20818_v24 = vpack.c.bf16 %v10133_v48, %v10132_v4  ;;  %v10135_v19 = vld [vmem:[#allocation2 + $0xe1] sm:$0xff]  ;;  %v10065_v55 = vld [vmem:[#allocation2 + $0x18] sm:$0xff]  ;;  %v10067_v37 = vld [vmem:[#allocation2 + $0x30] sm:$0xff] }
 0xb75   : > { %v17481_v38 = vpop.eup %17480  ;;  %v9997_v44 = vadd.f32 1.0, %v17479_v3  ;;  %v10026_v33 = vmul.f32 %v9994_v60, %v9898_v26  ;;  %10056 = vst.msk [vmem:[#allocation2 + $0x141] sm:$0xff] %vm224_vm0, %v10024_v22  ;;  %v10136_v59 = vld [vmem:[#allocation2 + $0xf1] sm:$0xff]  ;;  %v20824_v63 = vpack.c.bf16 %v10135_v19, %v10134_v32  ;;  %v10064_v50 = vld [vmem:[#allocation2 + $0x8] sm:$0xff]  ;;  %v10066_v54 = vld [vmem:[#allocation2 + $0x20] sm:$0xff] }
 0xb76   : > { %v9998_v31 = vadd.f32 1.0, %v17481_v38  ;;  %v10027_v51 = vmul.f32 %v9995_v58, %v9899_v39  ;;  %10057 = vst.msk [vmem:[#allocation2 + $0x151] sm:$0xff] %vm224_vm0, %v10025_v46  ;;  %v10137_v15 = vld [vmem:[#allocation2 + $0xf9] sm:$0xff]  ;;  %v10095_v21 = vpack.c.bf16 %v10064_v50, %v10063_v61  ;;  %v20853_v34 = vpack.c.bf16 %v10066_v54, %v10065_v55  ;;  %v10069_v49 = vld [vmem:[#allocation2 + $0x48] sm:$0xff]  ;;  %v10070_v26 = vld [vmem:[#allocation2 + $0x50] sm:$0xff] }
 0xb77   : > { %v10029_v29 = vmul.f32 %v9997_v44, %v9901_v47  ;;  %10058 = vst.msk [vmem:[#allocation2 + $0x159] sm:$0xff] %vm224_vm0, %v10026_v33  ;;  %15835 = vmatmul.mubr.msk.bf16.gmra.mrb[40].mxu1 %vm224_vm0, %v20802_v30  ;;  %v20826_v20 = vpack.c.bf16 %v10137_v15, %v10136_v59  ;;  %v10138_v35 = vld [vmem:[#allocation2 + $0x109] sm:$0xff]  ;;  %v10068_v17 = vld [vmem:[#allocation2 + $0x38] sm:$0xff]  ;;  %v20868_v11 = vld [vmem:[%s21844_s1 + $0x1e0] sm:$0xff]   ;;  %v20870_v8 = vpack.c.bf16 %v10070_v26, %v10069_v49 }
 0xb78   : > { %v10030_v0 = vmul.f32 %v9998_v31, %v9902_v14  ;;  %10059 = vst.msk [vmem:[#allocation2 + $0x169] sm:$0xff] %vm224_vm0, %v10027_v51  ;;  %15838 = vmatprep.mubr.msk.bf16.mxu1 %vm224_vm0, %v20806_v45  ;;  %v10139_v36 = vld [vmem:[#allocation2 + $0x111] sm:$0xff]  ;;  %v20858_v16 = vpack.c.bf16 %v10068_v17, %v10067_v37  ;;  %v10071_v60 = vld [vmem:[#allocation2 + $0x60] sm:$0xff]  ;;  %v10072_v22 = vld [vmem:[#allocation2 + $0x68] sm:$0xff] }
 0xb79   : > { %10061 = vst.msk [vmem:[#allocation2 + $0x181] sm:$0xff] %vm224_vm0, %v10029_v29  ;;  %v10140_v41 = vld [vmem:[#allocation2 + $0x121] sm:$0xff]  ;;  %v20832_v18 = vpack.c.bf16 %v10139_v36, %v10138_v35  ;;  %v17271_v23 = vld [vmem:[%s21844_s1 + $0x1d8] sm:$0xff]   ;;  %v20873_v10 = vpack.c.bf16 %v10072_v22, %v10071_v60  ;;  %v10075_v39 = vld [vmem:[#allocation2 + $0x90] sm:$0xff] }
 0xb7a   : > { %10062 = vst.msk [vmem:[#allocation2 + $0x189] sm:$0xff] %vm224_vm0, %v10030_v0  ;;  %v10141_v13 = vld [vmem:[#allocation2 + $0x129] sm:$0xff]  ;;  %v10074_v3 = vld [vmem:[#allocation2 + $0x80] sm:$0xff]  ;;  %v10076_v58 = vld [vmem:[#allocation2 + $0x98] sm:$0xff] }
 0xb7b   : > { %v20834_v5 = vpack.c.bf16 %v10141_v13, %v10140_v41  ;;  %v10142_v27 = vld [vmem:[#allocation2 + $0x139] sm:$0xff]  ;;  %v20881_v38 = vpack.c.bf16 %v10076_v58, %v10075_v39  ;;  %v10077_v47 = vld [vmem:[#allocation2 + $0xa8] sm:$0xff]  ;;  %v10078_v44 = vld [vmem:[#allocation2 + $0xb0] sm:$0xff] }
 0xb7c   : > { %v10143_v9 = vld [vmem:[#allocation2 + $0x141] sm:$0xff]  ;;  %v20887_v31 = vpack.c.bf16 %v10078_v44, %v10077_v47  ;;  %v10081_v29 = vld [vmem:[#allocation2 + $0xd8] sm:$0xff]  ;;  %v10083_v57 = vld [vmem:[#allocation2 + $0xf0] sm:$0xff] }
 0xb7d   : > { %v10144_v2 = vld [vmem:[#allocation2 + $0x151] sm:$0xff]  ;;  %v20840_v28 = vpack.c.bf16 %v10143_v9, %v10142_v27  ;;  %v10079_v33 = vld [vmem:[#allocation2 + $0xc0] sm:$0xff]  ;;  %v10080_v14 = vld [vmem:[#allocation2 + $0xc8] sm:$0xff] }
 0xb7e   : > { %v10145_v7 = vld [vmem:[#allocation2 + $0x159] sm:$0xff]  ;;  %v20889_v51 = vpack.c.bf16 %v10080_v14, %v10079_v33  ;;  %v10085_v32 = vld [vmem:[#allocation2 + $0x108] sm:$0xff]  ;;  %v10086_v19 = vld [vmem:[#allocation2 + $0x110] sm:$0xff] }
 0xb7f   : > { %15839 = vmatmul.mubr.msk.bf16.gmra.mrb[44].mxu1 %vm224_vm0, %v20816_v6  ;;  %v20842_v56 = vpack.c.bf16 %v10145_v7, %v10144_v2  ;;  %v10146_v42 = vld [vmem:[#allocation2 + $0x169] sm:$0xff]  ;;  %v10082_v0 = vld [vmem:[#allocation2 + $0xe0] sm:$0xff]  ;;  %v10084_v12 = vld [vmem:[#allocation2 + $0xf8] sm:$0xff]  ;;  %v20903_v35 = vpack.c.bf16 %v10086_v19, %v10085_v32 }
 0xb80   : > { %15842 = vmatprep.mubr.msk.bf16.mxu1 %vm224_vm0, %v20818_v24  ;;  %v20848_v25 = vpack.c.bf16 %v10147_v43, %v10146_v42  ;;  %v20895_v4 = vpack.c.bf16 %v10082_v0, %v10081_v29  ;;  %v20897_v48 = vpack.c.bf16 %v10084_v12, %v10083_v57  ;;  %v10087_v59 = vld [vmem:[#allocation2 + $0x120] sm:$0xff]  ;;  %v10088_v15 = vld [vmem:[#allocation2 + $0x128] sm:$0xff]  ;;  %v10089_v41 = vld [vmem:[#allocation2 + $0x138] sm:$0xff] }
 0xb81   : > { %v20905_v36 = vpack.c.bf16 %v10088_v15, %v10087_v59  ;;  %v10090_v13 = vld [vmem:[#allocation2 + $0x140] sm:$0xff]  ;;  %v10091_v27 = vld [vmem:[#allocation2 + $0x150] sm:$0xff]  ;;  %v10092_v9 = vld [vmem:[#allocation2 + $0x158] sm:$0xff] }
 0xb82   : > { %v20911_v2 = vpack.c.bf16 %v10090_v13, %v10089_v41  ;;  %v20913_v7 = vpack.c.bf16 %v10092_v9, %v10091_v27  ;;  %v10611_v61 = vld [vmem:[#allocation2 + $0x2] sm:$0xff]  ;;  %v10612_v50 = vld [vmem:[#allocation2 + $0xa] sm:$0xff]  ;;  %v10613_v54 = vld [vmem:[#allocation2 + $0x1a] sm:$0xff] }
 0xb83   : > { %v10093_v42 = vld [vmem:[#allocation2 + $0x168] sm:$0xff]  ;;  %v10094_v43 = vld [vmem:[#allocation2 + $0x170] sm:$0xff]  ;;  %v10624_v29 = vld [vmem:[#allocation2 + $0x9a] sm:$0xff] }
 0xb84   : > { %v20919_v55 = vpack.c.bf16 %v10094_v43, %v10093_v42  ;;  %v10614_v37 = vld [vmem:[#allocation2 + $0x22] sm:$0xff]  ;;  %v10615_v17 = vld [vmem:[#allocation2 + $0x32] sm:$0xff]  ;;  %v10620_v58 = vld [vmem:[#allocation2 + $0x6a] sm:$0xff] }
 0xb85   : > { %v20924_v49 = vpack.c.bf16 %v10614_v37, %v10613_v54  ;;  %v17273_v26 = vld [vmem:[%s21844_s1 + $0x1e8] sm:$0xff]   ;;  %v17274_v22 = vld [vmem:[%s21844_s1 + $0x1f0] sm:$0xff]   ;;  %v10629_v13 = vld [vmem:[#allocation2 + $0xda] sm:$0xff] }
 0xb86   : > { %v10619_v39 = vld [vmem:[#allocation2 + $0x62] sm:$0xff]  ;;  %v10623_v14 = vld [vmem:[#allocation2 + $0x92] sm:$0xff]  ;;  %v10625_v12 = vld [vmem:[#allocation2 + $0xaa] sm:$0xff] }
 0xb87   : > { %15843 = vmatmul.mubr.msk.bf16.gmra.mrb[48].mxu1 %vm224_vm0, %v20824_v63  ;;  %v20941_v44 = vpack.c.bf16 %v10620_v58, %v10619_v39  ;;  %v10622_v33 = vld [vmem:[#allocation2 + $0x82] sm:$0xff]  ;;  %v20949_v57 = vpack.c.bf16 %v10624_v29, %v10623_v14  ;;  %v10626_v32 = vld [vmem:[#allocation2 + $0xb2] sm:$0xff]  ;;  %v10628_v59 = vld [vmem:[#allocation2 + $0xca] sm:$0xff] }
 0xb88   : > { %15846 = vmatprep.mubr.msk.bf16.mxu1 %vm224_vm0, %v20826_v20  ;;  %v10627_v19 = vld [vmem:[#allocation2 + $0xc2] sm:$0xff]  ;;  %v20955_v15 = vpack.c.bf16 %v10626_v32, %v10625_v12  ;;  %v10631_v9 = vld [vmem:[#allocation2 + $0xf2] sm:$0xff]  ;;  %v10633_v43 = vld [vmem:[#allocation2 + $0x10a] sm:$0xff] }
 0xb89   : > { %v20957_v41 = vpack.c.bf16 %v10628_v59, %v10627_v19  ;;  %v10630_v27 = vld [vmem:[#allocation2 + $0xe2] sm:$0xff]  ;;  %v10636_v37 = vld [vmem:[#allocation2 + $0x12a] sm:$0xff]  ;;  %v10640_v39 = vld [vmem:[#allocation2 + $0x15a] sm:$0xff] }
 0xb8a   : > { %v10635_v54 = vld [vmem:[#allocation2 + $0x122] sm:$0xff]  ;;  %v10642_v14 = vld [vmem:[#allocation2 + $0x172] sm:$0xff] }
 0xb8b   : > { %v17275_v12 = vld [vmem:[%s21844_s1 + $0x1f8] sm:$0xff]   ;;  %v17276_v32 = vld [vmem:[%s21844_s1 + $0x200] sm:$0xff]   ;;  %v17277_v59 = vld [vmem:[%s21844_s1 + $0x208] sm:$0xff]  }
 0xb8f   : > { %15847 = vmatmul.mubr.msk.bf16.gmra.mrb[52].mxu1 %vm224_vm0, %v20832_v18 }
 0xb90   : > { %15850 = vmatprep.mubr.msk.bf16.mxu1 %vm224_vm0, %v20834_v5 }
 0xb97   : > { %15851 = vmatmul.mubr.msk.bf16.gmra.mrb[56].mxu1 %vm224_vm0, %v20840_v28 }
 0xb98   : > { %15854 = vmatprep.mubr.msk.bf16.mxu1 %vm224_vm0, %v20842_v56 }
 0xb9f   : > { %15855 = vmatmul.mubr.msk.bf16.gmra.mrb[60].mxu1 %vm224_vm0, %v20848_v25 }
 0xba0   : > { %15862 = vmatprep.mubr.msk.bf16.mxu1 %vm224_vm0, %v10095_v21  ;;  %v10643_v21 = vpack.c.bf16 %v10612_v50, %v10611_v61  ;;  %v10632_v61 = vld [vmem:[#allocation2 + $0xfa] sm:$0xff]  ;;  %v20963_v50 = vpack.c.bf16 %v10630_v27, %v10629_v13  ;;  %v17278_v13 = vld [vmem:[%s21844_s1 + $0x210] sm:$0xff]  }
 0xba1   : > { %v20965_v42 = vpack.c.bf16 %v10632_v61, %v10631_v9  ;;  %v11254_v27 = vld [vmem:[#allocation2 + $0x189] sm:$0xff]  ;;  %v17279_v61 = vld [vmem:[%s21844_s1 + $0x218] sm:$0xff]  }
 0xba7   : > { %15863 = vmatmul.mubr.msk.bf16.vlgmr.msra.gmra.mrb[32].mxu1 %vm224_vm0, %v20853_v34 }
 0xba8   : > { %15895 = vmatpush3.bf16.msra.mxu1 %v20767_v53  ;;  %15866 = vmatprep.mubr.msk.bf16.mxu1 %vm224_vm0, %v20858_v16  ;;  %v10073_v53 = vld [vmem:[#allocation2 + $0x78] sm:$0xff] }
 0xba9   : > { %15896 = vmatprep.subr.bf16.mxu1 %v17271_v23  ;;  %v20879_v46 = vpack.c.bf16 %v10074_v3, %v10073_v53  ;;  %v10617_v53 = vld [vmem:[#allocation2 + $0x4a] sm:$0xff]  ;;  %v10618_v3 = vld [vmem:[#allocation2 + $0x52] sm:$0xff] }
 0xbaa   : > { %v20939_v47 = vpack.c.bf16 %v10618_v3, %v10617_v53  ;;  %v10638_v53 = vld [vmem:[#allocation2 + $0x142] sm:$0xff]  ;;  %v10639_v3 = vld [vmem:[#allocation2 + $0x152] sm:$0xff] }
 0xbac   : > { %15897 = vmatpush3.bf16.msra.mxu1 %v17271_v23  ;;  %v10616_v23 = vld [vmem:[#allocation2 + $0x3a] sm:$0xff] }
 0xbad   : > { %15930 = vmatprep.subr.bf16.mxu1 %v20868_v11  ;;  %v20929_v60 = vpack.c.bf16 %v10616_v23, %v10615_v17  ;;  %v20973_v23 = vpack.c.bf16 %v10636_v37, %v10635_v54  ;;  %v17281_v37 = vld [vmem:[%s21844_s1 + $0x228] sm:$0xff]  }
 0xbaf   : > { %15867 = vmatmul.mubr.msk.bf16.gmra.mrb[36].mxu1 %vm224_vm0, %v20870_v8 }
 0xbb0   : > { %15870 = vmatprep.mubr.msk.bf16.mxu1 %vm224_vm0, %v20873_v10 }
 0xbb7   : > { %15871 = vmatmul.mubr.msk.bf16.gmra.mrb[40].mxu1 %vm224_vm0, %v20879_v46 }
 0xbb8   : > { %15874 = vmatprep.mubr.msk.bf16.mxu1 %vm224_vm0, %v20881_v38 }
 0xbbf   : > { %15875 = vmatmul.mubr.msk.bf16.gmra.mrb[44].mxu1 %vm224_vm0, %v20887_v31 }
 0xbc0   : > { %15878 = vmatprep.mubr.msk.bf16.mxu1 %vm224_vm0, %v20889_v51 }
 0xbc7   : > { %15879 = vmatmul.mubr.msk.bf16.gmra.mrb[48].mxu1 %vm224_vm0, %v20895_v4 }
 0xbc8   : > { %15882 = vmatprep.mubr.msk.bf16.mxu1 %vm224_vm0, %v20897_v48 }
 0xbcf   : > { %15883 = vmatmul.mubr.msk.bf16.gmra.mrb[52].mxu1 %vm224_vm0, %v20903_v35 }
 0xbd0   : > { %15886 = vmatprep.mubr.msk.bf16.mxu1 %vm224_vm0, %v20905_v36 }
 0xbd7   : > { %15887 = vmatmul.mubr.msk.bf16.gmra.mrb[56].mxu1 %vm224_vm0, %v20911_v2 }
 0xbd8   : > { %15890 = vmatprep.mubr.msk.bf16.mxu1 %vm224_vm0, %v20913_v7 }
 0xbdf   : > { %15891 = vmatmul.mubr.msk.bf16.gmra.mrb[60].mxu1 %vm224_vm0, %v20919_v55 }
 0xbe0   : > { %15898 = vmatprep.mubr.msk.bf16.mxu1 %vm224_vm0, %v10643_v21  ;;  %v10634_v21 = vld [vmem:[#allocation2 + $0x112] sm:$0xff] }
 0xbe1   : > { %v20971_v17 = vpack.c.bf16 %v10634_v21, %v10633_v43  ;;  %v17280_v43 = vld [vmem:[%s21844_s1 + $0x220] sm:$0xff]   ;;  %v11560_v21 = vld [vmem:[#allocation2 + $0x18a] sm:$0xff] }
 0xbe7   : > { %15899 = vmatmul.mubr.msk.bf16.vlgmr.msra.gmra.mrb[32].mxu1 %vm224_vm0, %v20924_v49 }
 0xbe8   : > { %15931 = vmatpush3.bf16.msra.mxu1 %v20868_v11  ;;  %15902 = vmatprep.mubr.msk.bf16.mxu1 %vm224_vm0, %v20929_v60  ;;  %v10621_v11 = vld [vmem:[#allocation2 + $0x7a] sm:$0xff] }
 0xbe9   : > { %15932 = vmatprep.subr.bf16.mxu1 %v17273_v26  ;;  %v20947_v0 = vpack.c.bf16 %v10622_v33, %v10621_v11  ;;  %v20981_v11 = vpack.c.bf16 %v10640_v39, %v10639_v3  ;;  %v10641_v33 = vld [vmem:[#allocation2 + $0x16a] sm:$0xff] }
 0xbea   : > { %v20987_v29 = vpack.c.bf16 %v10642_v14, %v10641_v33 }
 0xbec   : > { %15933 = vmatpush3.bf16.msra.mxu1 %v17273_v26  ;;  %v10637_v26 = vld [vmem:[#allocation2 + $0x13a] sm:$0xff] }
 0xbed   : > { %15966 = vmatprep.subr.bf16.mxu1 %v17274_v22  ;;  %v20979_v58 = vpack.c.bf16 %v10638_v53, %v10637_v26  ;;  %v17282_v26 = vld [vmem:[%s21844_s1 + $0x230] sm:$0xff]  }
 0xbef   : > { %15903 = vmatmul.mubr.msk.bf16.gmra.mrb[36].mxu1 %vm224_vm0, %v20939_v47 }
 0xbf0   : > { %15906 = vmatprep.mubr.msk.bf16.mxu1 %vm224_vm0, %v20941_v44 }
 0xbf7   : > { %15907 = vmatmul.mubr.msk.bf16.gmra.mrb[40].mxu1 %vm224_vm0, %v20947_v0 }
 0xbf8   : > { %15910 = vmatprep.mubr.msk.bf16.mxu1 %vm224_vm0, %v20949_v57 }
 0xbff   : > { %15911 = vmatmul.mubr.msk.bf16.gmra.mrb[44].mxu1 %vm224_vm0, %v20955_v15 }
 0xc00   : > { %15914 = vmatprep.mubr.msk.bf16.mxu1 %vm224_vm0, %v20957_v41 }
 0xc07   : > { %15915 = vmatmul.mubr.msk.bf16.gmra.mrb[48].mxu1 %vm224_vm0, %v20963_v50 }
 0xc08   : > { %15918 = vmatprep.mubr.msk.bf16.mxu1 %vm224_vm0, %v20965_v42 }
 0xc0f   : > { %15919 = vmatmul.mubr.msk.bf16.gmra.mrb[52].mxu1 %vm224_vm0, %v20971_v17 }
 0xc10   : > { %15922 = vmatprep.mubr.msk.bf16.mxu1 %vm224_vm0, %v20973_v23 }
 0xc17   : > { %15923 = vmatmul.mubr.msk.bf16.gmra.mrb[56].mxu1 %vm224_vm0, %v20979_v58 }
 0xc18   : > { %15926 = vmatprep.mubr.msk.bf16.mxu1 %vm224_vm0, %v20981_v11 }
 0xc1f   : > { %15927 = vmatmul.mubr.msk.bf16.gmra.mrb[60].mxu1 %vm224_vm0, %v20987_v29 }
 0xc20   : > { %15934 = vmatprep.mubr.msk.bf16.mxu1 %vm224_vm0, %v20853_v34  ;;  %v10947_v34 = vld [vmem:[#allocation2 + $0x180] sm:$0xff] }
 0xc27   : > { %15935 = vmatmul.mubr.msk.bf16.vlgmr.msra.gmra.mrb[32].mxu1 %vm224_vm0, %v20858_v16 }
 0xc28   : > { %15967 = vmatpush3.bf16.msra.mxu1 %v17274_v22  ;;  %15938 = vmatprep.mubr.msk.bf16.mxu1 %vm224_vm0, %v20870_v8  ;;  %v10948_v22 = vld [vmem:[#allocation2 + $0x188] sm:$0xff] }
 0xc29   : > { %15968 = vmatprep.subr.bf16.mxu1 %v17275_v12  ;;  %v21027_v19 = vpack.c.bf16 %v10948_v22, %v10947_v34 }
 0xc2c   : > { %15969 = vmatpush3.bf16.msra.mxu1 %v17275_v12 }
 0xc2d   : > { %16002 = vmatprep.subr.bf16.mxu1 %v17276_v32 }
 0xc2f   : > { %15939 = vmatmul.mubr.msk.bf16.gmra.mrb[36].mxu1 %vm224_vm0, %v20873_v10 }
 0xc30   : > { %15942 = vmatprep.mubr.msk.bf16.mxu1 %vm224_vm0, %v20879_v46 }
 0xc37   : > { %15943 = vmatmul.mubr.msk.bf16.gmra.mrb[40].mxu1 %vm224_vm0, %v20881_v38 }
 0xc38   : > { %15946 = vmatprep.mubr.msk.bf16.mxu1 %vm224_vm0, %v20887_v31 }
 0xc3f   : > { %15947 = vmatmul.mubr.msk.bf16.gmra.mrb[44].mxu1 %vm224_vm0, %v20889_v51 }
 0xc40   : > { %15950 = vmatprep.mubr.msk.bf16.mxu1 %vm224_vm0, %v20895_v4 }
 0xc47   : > { %15951 = vmatmul.mubr.msk.bf16.gmra.mrb[48].mxu1 %vm224_vm0, %v20897_v48 }
 0xc48   : > { %15954 = vmatprep.mubr.msk.bf16.mxu1 %vm224_vm0, %v20903_v35 }
 0xc4f   : > { %15955 = vmatmul.mubr.msk.bf16.gmra.mrb[52].mxu1 %vm224_vm0, %v20905_v36 }
 0xc50   : > { %15958 = vmatprep.mubr.msk.bf16.mxu1 %vm224_vm0, %v20911_v2 }
 0xc57   : > { %15959 = vmatmul.mubr.msk.bf16.gmra.mrb[56].mxu1 %vm224_vm0, %v20913_v7 }
 0xc58   : > { %15962 = vmatprep.mubr.msk.bf16.mxu1 %vm224_vm0, %v20919_v55 }
 0xc5f   : > { %15963 = vmatmul.mubr.msk.bf16.gmra.mrb[60].mxu1 %vm224_vm0, %v21027_v19 }
 0xc60   : > { %15970 = vmatprep.mubr.msk.bf16.mxu1 %vm224_vm0, %v20741_v40  ;;  %v11253_v40 = vld [vmem:[#allocation2 + $0x181] sm:$0xff] }
 0xc61   : > { %v21067_v9 = vpack.c.bf16 %v11254_v27, %v11253_v40 }
 0xc67   : > { %15971 = vmatmul.mubr.msk.bf16.vlgmr.msra.gmra.mrb[32].mxu1 %vm224_vm0, %v20753_v52 }
 0xc68   : > { %16003 = vmatpush3.bf16.msra.mxu1 %v17276_v32  ;;  %15974 = vmatprep.mubr.msk.bf16.mxu1 %vm224_vm0, %v20777_v62 }
 0xc69   : > { %16004 = vmatprep.subr.bf16.mxu1 %v17277_v59 }
 0xc6c   : > { %16005 = vmatpush3.bf16.msra.mxu1 %v17277_v59 }
 0xc6d   : > { %16038 = vmatprep.subr.bf16.mxu1 %v17278_v13 }
 0xc6f   : > { %15975 = vmatmul.mubr.msk.bf16.gmra.mrb[36].mxu1 %vm224_vm0, %v20782_v1 }
 0xc70   : > { %15978 = vmatprep.mubr.msk.bf16.mxu1 %vm224_vm0, %v20802_v30 }
 0xc77   : > { %15979 = vmatmul.mubr.msk.bf16.gmra.mrb[40].mxu1 %vm224_vm0, %v20806_v45 }
 0xc78   : > { %15982 = vmatprep.mubr.msk.bf16.mxu1 %vm224_vm0, %v20816_v6 }
 0xc7f   : > { %15983 = vmatmul.mubr.msk.bf16.gmra.mrb[44].mxu1 %vm224_vm0, %v20818_v24 }
 0xc80   : > { %15986 = vmatprep.mubr.msk.bf16.mxu1 %vm224_vm0, %v20824_v63 }
 0xc87   : > { %15987 = vmatmul.mubr.msk.bf16.gmra.mrb[48].mxu1 %vm224_vm0, %v20826_v20 }
 0xc88   : > { %15990 = vmatprep.mubr.msk.bf16.mxu1 %vm224_vm0, %v20832_v18 }
 0xc8f   : > { %15991 = vmatmul.mubr.msk.bf16.gmra.mrb[52].mxu1 %vm224_vm0, %v20834_v5 }
 0xc90   : > { %15994 = vmatprep.mubr.msk.bf16.mxu1 %vm224_vm0, %v20840_v28 }
 0xc97   : > { %15995 = vmatmul.mubr.msk.bf16.gmra.mrb[56].mxu1 %vm224_vm0, %v20842_v56 }
 0xc98   : > { %15998 = vmatprep.mubr.msk.bf16.mxu1 %vm224_vm0, %v20848_v25 }
 0xc9f   : > { %15999 = vmatmul.mubr.msk.bf16.gmra.mrb[60].mxu1 %vm224_vm0, %v21067_v9 }
 0xca0   : > { %16006 = vmatprep.mubr.msk.bf16.mxu1 %vm224_vm0, %v20924_v49  ;;  %v11559_v49 = vld [vmem:[#allocation2 + $0x182] sm:$0xff] }
 0xca1   : > { %v21107_v54 = vpack.c.bf16 %v11560_v21, %v11559_v49 }
 0xca7   : > { %16007 = vmatmul.mubr.msk.bf16.vlgmr.msra.gmra.mrb[32].mxu1 %vm224_vm0, %v20929_v60 }
 0xca8   : > { %16039 = vmatpush3.bf16.msra.mxu1 %v17278_v13  ;;  %16010 = vmatprep.mubr.msk.bf16.mxu1 %vm224_vm0, %v20939_v47 }
 0xca9   : > { %16040 = vmatprep.subr.bf16.mxu1 %v17279_v61 }
 0xcac   : > { %16041 = vmatpush3.bf16.msra.mxu1 %v17279_v61 }
 0xcad   : > { %16074 = vmatprep.subr.bf16.mxu1 %v17280_v43 }
 0xcaf   : > { %16011 = vmatmul.mubr.msk.bf16.gmra.mrb[36].mxu1 %vm224_vm0, %v20941_v44 }
 0xcb0   : > { %16014 = vmatprep.mubr.msk.bf16.mxu1 %vm224_vm0, %v20947_v0 }
 0xcb7   : > { %16015 = vmatmul.mubr.msk.bf16.gmra.mrb[40].mxu1 %vm224_vm0, %v20949_v57 }
 0xcb8   : > { %16018 = vmatprep.mubr.msk.bf16.mxu1 %vm224_vm0, %v20955_v15 }
 0xcbf   : > { %16019 = vmatmul.mubr.msk.bf16.gmra.mrb[44].mxu1 %vm224_vm0, %v20957_v41 }
 0xcc0   : > { %16022 = vmatprep.mubr.msk.bf16.mxu1 %vm224_vm0, %v20963_v50 }
 0xcc7   : > { %16023 = vmatmul.mubr.msk.bf16.gmra.mrb[48].mxu1 %vm224_vm0, %v20965_v42 }
 0xcc8   : > { %16026 = vmatprep.mubr.msk.bf16.mxu1 %vm224_vm0, %v20971_v17 }
 0xccf   : > { %16027 = vmatmul.mubr.msk.bf16.gmra.mrb[52].mxu1 %vm224_vm0, %v20973_v23 }
 0xcd0   : > { %16030 = vmatprep.mubr.msk.bf16.mxu1 %vm224_vm0, %v20979_v58 }
 0xcd7   : > { %16031 = vmatmul.mubr.msk.bf16.gmra.mrb[56].mxu1 %vm224_vm0, %v20981_v11 }
 0xcd8   : > { %16034 = vmatprep.mubr.msk.bf16.mxu1 %vm224_vm0, %v20987_v29 }
 0xcdf   : > { %16035 = vmatmul.mubr.msk.bf16.gmra.mrb[60].mxu1 %vm224_vm0, %v21107_v54 }
 0xce0   : > { %16042 = vmatprep.mubr.msk.bf16.mxu1 %vm224_vm0, %v20858_v16  ;;  %v11865_v16 = vld [vmem:[#allocation2 + $0x198] sm:$0xff] }
 0xce7   : > { %16043 = vmatmul.mubr.msk.bf16.vlgmr.msra.gmra.mrb[32].mxu1 %vm224_vm0, %v20870_v8  ;;  %v11866_v8 = vld [vmem:[#allocation2 + $0x1a0] sm:$0xff] }
 0xce8   : > { %16075 = vmatpush3.bf16.msra.mxu1 %v17280_v43  ;;  %16046 = vmatprep.mubr.msk.bf16.mxu1 %vm224_vm0, %v20873_v10  ;;  %v11882_v10 = vpack.c.bf16 %v11866_v8, %v11865_v16 }
 0xce9   : > { %16076 = vmatprep.subr.bf16.mxu1 %v17281_v37 }
 0xcec   : > { %16077 = vmatpush3.bf16.msra.mxu1 %v17281_v37 }
 0xced   : > { %16110 = vmatprep.subr.bf16.mxu1 %v17282_v26 }
 0xcef   : > { %16047 = vmatmul.mubr.msk.bf16.gmra.mrb[36].mxu1 %vm224_vm0, %v20879_v46  ;;  %v17283_v46 = vld [vmem:[%s21844_s1 + $0x238] sm:$0xff]  }
 0xcf0   : > { %16050 = vmatprep.mubr.msk.bf16.mxu1 %vm224_vm0, %v20881_v38 }
 0xcf7   : > { %16051 = vmatmul.mubr.msk.bf16.gmra.mrb[40].mxu1 %vm224_vm0, %v20887_v31 }
 0xcf8   : > { %16054 = vmatprep.mubr.msk.bf16.mxu1 %vm224_vm0, %v20889_v51 }
 0xcff   : > { %16055 = vmatmul.mubr.msk.bf16.gmra.mrb[44].mxu1 %vm224_vm0, %v20895_v4 }
 0xd00   : > { %16058 = vmatprep.mubr.msk.bf16.mxu1 %vm224_vm0, %v20897_v48 }
 0xd07   : > { %16059 = vmatmul.mubr.msk.bf16.gmra.mrb[48].mxu1 %vm224_vm0, %v20903_v35 }
 0xd08   : > { %16062 = vmatprep.mubr.msk.bf16.mxu1 %vm224_vm0, %v20905_v36 }
 0xd0f   : > { %16063 = vmatmul.mubr.msk.bf16.gmra.mrb[52].mxu1 %vm224_vm0, %v20911_v2 }
 0xd10   : > { %16066 = vmatprep.mubr.msk.bf16.mxu1 %vm224_vm0, %v20913_v7 }
 0xd17   : > { %16067 = vmatmul.mubr.msk.bf16.gmra.mrb[56].mxu1 %vm224_vm0, %v20919_v55 }
 0xd18   : > { %16070 = vmatprep.mubr.msk.bf16.mxu1 %vm224_vm0, %v21027_v19 }
 0xd1f   : > { %16071 = vmatmul.mubr.msk.bf16.gmra.mrb[60].mxu1 %vm224_vm0, %v11882_v10 }
 0xd20   : > { %16078 = vmatprep.mubr.msk.bf16.mxu1 %vm224_vm0, %v20753_v52  ;;  %v12171_v52 = vld [vmem:[#allocation2 + $0x199] sm:$0xff] }
 0xd27   : > { %16079 = vmatmul.mubr.msk.bf16.vlgmr.msra.gmra.mrb[32].mxu1 %vm224_vm0, %v20777_v62  ;;  %v12172_v62 = vld [vmem:[#allocation2 + $0x1a1] sm:$0xff] }
 0xd28   : > { %16111 = vmatpush3.bf16.msra.mxu1 %v17282_v26  ;;  %16082 = vmatprep.mubr.msk.bf16.mxu1 %vm224_vm0, %v20782_v1  ;;  %v12188_v1 = vpack.c.bf16 %v12172_v62, %v12171_v52 }
 0xd29   : > { %16112 = vmatprep.subr.bf16.mxu1 %v17283_v46 }
 0xd2c   : > { %16113 = vmatpush3.bf16.msra.mxu1 %v17283_v46 }
 0xd2f   : > { %16083 = vmatmul.mubr.msk.bf16.gmra.mrb[36].mxu1 %vm224_vm0, %v20802_v30  ;;  %v12477_v30 = vld [vmem:[#allocation2 + $0x19a] sm:$0xff] }
 0xd30   : > { %16086 = vmatprep.mubr.msk.bf16.mxu1 %vm224_vm0, %v20806_v45  ;;  %v12478_v45 = vld [vmem:[#allocation2 + $0x1a2] sm:$0xff] }
 0xd37   : > { %16087 = vmatmul.mubr.msk.bf16.gmra.mrb[40].mxu1 %vm224_vm0, %v20816_v6  ;;  %v12494_v6 = vpack.c.bf16 %v12478_v45, %v12477_v30 }
 0xd38   : > { %16090 = vmatprep.mubr.msk.bf16.mxu1 %vm224_vm0, %v20818_v24  ;;  %v21216_v24 = vld [vmem:[%s21845_s2 + $0x3] ss:$0 sm:$0xff] }
 0xd3f   : > { %16091 = vmatmul.mubr.msk.bf16.gmra.mrb[44].mxu1 %vm224_vm0, %v20824_v63 }
 0xd40   : > { %16094 = vmatprep.mubr.msk.bf16.mxu1 %vm224_vm0, %v20826_v20 }
 0xd47   : > { %16095 = vmatmul.mubr.msk.bf16.gmra.mrb[48].mxu1 %vm224_vm0, %v20832_v18 }
 0xd48   : > { %16098 = vmatprep.mubr.msk.bf16.mxu1 %vm224_vm0, %v20834_v5 }
 0xd4f   : > { %16099 = vmatmul.mubr.msk.bf16.gmra.mrb[52].mxu1 %vm224_vm0, %v20840_v28 }
 0xd50   : > { %16102 = vmatprep.mubr.msk.bf16.mxu1 %vm224_vm0, %v20842_v56 }
 0xd57   : > { %16103 = vmatmul.mubr.msk.bf16.gmra.mrb[56].mxu1 %vm224_vm0, %v20848_v25 }
 0xd58   : > { %16106 = vmatprep.mubr.msk.bf16.mxu1 %vm224_vm0, %v21067_v9 }
 0xd5f   : > { %16107 = vmatmul.mubr.msk.bf16.gmra.mrb[60].mxu1 %vm224_vm0, %v12188_v1 }
 0xd60   : > { %16114 = vmatprep.mubr.msk.bf16.mxu1 %vm224_vm0, %v20929_v60 }
 0xd67   : > { %16115 = vmatmul.mubr.msk.bf16.vlgmr.msra.gmra.mrb[32].mxu1 %vm224_vm0, %v20939_v47 }
 0xd68   : > { %16118 = vmatprep.mubr.msk.bf16.mxu1 %vm224_vm0, %v20941_v44 }
 0xd6f   : > { %16119 = vmatmul.mubr.msk.bf16.gmra.mrb[36].mxu1 %vm224_vm0, %v20947_v0 }
 0xd70   : > { %16122 = vmatprep.mubr.msk.bf16.mxu1 %vm224_vm0, %v20949_v57 }
 0xd77   : > { %16123 = vmatmul.mubr.msk.bf16.gmra.mrb[40].mxu1 %vm224_vm0, %v20955_v15 }
 0xd78   : > { %16126 = vmatprep.mubr.msk.bf16.mxu1 %vm224_vm0, %v20957_v41 }
 0xd7f   : > { %16127 = vmatmul.mubr.msk.bf16.gmra.mrb[44].mxu1 %vm224_vm0, %v20963_v50 }
 0xd80   : > { %16130 = vmatprep.mubr.msk.bf16.mxu1 %vm224_vm0, %v20965_v42 }
 0xd87   : > { %16131 = vmatmul.mubr.msk.bf16.gmra.mrb[48].mxu1 %vm224_vm0, %v20971_v17 }
 0xd88   : > { %16134 = vmatprep.mubr.msk.bf16.mxu1 %vm224_vm0, %v20973_v23 }
 0xd8f   : > { %16135 = vmatmul.mubr.msk.bf16.gmra.mrb[52].mxu1 %vm224_vm0, %v20979_v58 }
 0xd90   : > { %16138 = vmatprep.mubr.msk.bf16.mxu1 %vm224_vm0, %v20981_v11 }
 0xd97   : > { %16139 = vmatmul.mubr.msk.bf16.gmra.mrb[56].mxu1 %vm224_vm0, %v20987_v29 }
 0xd98   : > { %16142 = vmatprep.mubr.msk.bf16.mxu1 %vm224_vm0, %v21107_v54 }
 0xd9f   : > { %16143 = vmatmul.mubr.msk.bf16.gmra.mrb[60].mxu1 %vm224_vm0, %v12494_v6 }
 0xe3a   : > { %v16116_v63 = vpop.f32.mrb[32].mxu1 }
 0xe3b   : > { %v12594_v20 = vpop.f32.mrb[33].mxu1  ;;  %v21222_v56 = vadd.f32 %v16116_v63, %v21216_v24 }
 0xe3c   : > { %v21219_v18 = vadd.f32 %v21216_v24, %v12594_v20  ;;  %v16117_v5 = vpop.f32.mrb[34].mxu1 }
 0xe3d   : > { %v12597_v28 = vpop.f32.mrb[35].mxu1  ;;  %v21230_v31 = vadd.f32 %v16117_v5, %v21216_v24  ;;  %v12796_v48 = vsel %vm224_vm0, %v21222_v56, 0.0 }
 0xe3e   : > { %v21225_v25 = vadd.f32 %v21216_v24, %v12597_v28  ;;  %v12793_v38 = vsel %vm224_vm0, %v21219_v18, 0.0 }
 0xe3f   : > { %v12798_v7 = vsel %vm224_vm0, %v21230_v31, 0.0 }
 0xe40   : > { %v12794_v51 = vsel %vm224_vm0, %v21225_v25, 0.0 }
 0xe41   : > { %v12795_v4 = vadd.f32 %v12794_v51, %v12793_v38 }
 0xe42   : > { %v16120_v35 = vpop.f32.mrb[36].mxu1 }
 0xe43   : > { %v12797_v36 = vadd.f32 %v12796_v48, %v12795_v4  ;;  %v12610_v2 = vpop.f32.mrb[37].mxu1  ;;  %v21242_v0 = vadd.f32 %v16120_v35, %v21216_v24 }
 0xe44   : > { %v21239_v55 = vadd.f32 %v21216_v24, %v12610_v2  ;;  %v16121_v60 = vpop.f32.mrb[38].mxu1 }
 0xe45   : > { %v12799_v47 = vadd.f32 %v12798_v7, %v12797_v36  ;;  %v12613_v44 = vpop.f32.mrb[39].mxu1  ;;  %v21250_v50 = vadd.f32 %v16121_v60, %v21216_v24  ;;  %v12804_v23 = vsel %vm224_vm0, %v21242_v0, 0.0 }
 0xe46   : > { %v12800_v57 = vsel %vm224_vm0, %v21239_v55, 0.0  ;;  %v21247_v15 = vadd.f32 %v21216_v24, %v12613_v44 }
 0xe47   : > { %v12801_v41 = vadd.f32 %v12800_v57, %v12799_v47  ;;  %v12806_v58 = vsel %vm224_vm0, %v21250_v50, 0.0 }
 0xe48   : > { %v12802_v42 = vsel %vm224_vm0, %v21247_v15, 0.0 }
 0xe49   : > { %v12803_v17 = vadd.f32 %v12802_v42, %v12801_v41 }
 0xe4a   : > { %v16124_v53 = vpop.f32.mrb[40].mxu1 }
 0xe4b   : > { %v12805_v3 = vadd.f32 %v12804_v23, %v12803_v17  ;;  %v12626_v39 = vpop.f32.mrb[41].mxu1  ;;  %v21262_v12 = vadd.f32 %v16124_v53, %v21216_v24 }
 0xe4c   : > { %v21259_v11 = vadd.f32 %v21216_v24, %v12626_v39  ;;  %v16125_v33 = vpop.f32.mrb[42].mxu1 }
 0xe4d   : > { %v12807_v14 = vadd.f32 %v12806_v58, %v12805_v3  ;;  %v12629_v29 = vpop.f32.mrb[43].mxu1  ;;  %v21270_v19 = vadd.f32 %v16125_v33, %v21216_v24  ;;  %v12812_v40 = vsel %vm224_vm0, %v21262_v12, 0.0 }
 0xe4e   : > { %v12808_v32 = vsel %vm224_vm0, %v21259_v11, 0.0  ;;  %v21267_v34 = vadd.f32 %v21216_v24, %v12629_v29 }
 0xe4f   : > { %v12809_v22 = vadd.f32 %v12808_v32, %v12807_v14  ;;  %v12814_v43 = vsel %vm224_vm0, %v21270_v19, 0.0 }
 0xe50   : > { %v12810_v59 = vsel %vm224_vm0, %v21267_v34, 0.0 }
 0xe51   : > { %v12811_v13 = vadd.f32 %v12810_v59, %v12809_v22 }
 0xe52   : > { %v16128_v27 = vpop.f32.mrb[44].mxu1 }
 0xe53   : > { %v12813_v9 = vadd.f32 %v12812_v40, %v12811_v13  ;;  %v12642_v61 = vpop.f32.mrb[45].mxu1  ;;  %v21282_v26 = vadd.f32 %v16128_v27, %v21216_v24 }
 0xe54   : > { %v21279_v49 = vadd.f32 %v21216_v24, %v12642_v61  ;;  %v16129_v21 = vpop.f32.mrb[46].mxu1 }
 0xe55   : > { %v12815_v54 = vadd.f32 %v12814_v43, %v12813_v9  ;;  %v12645_v37 = vpop.f32.mrb[47].mxu1  ;;  %v21290_v46 = vadd.f32 %v16129_v21, %v21216_v24  ;;  %v12820_v1 = vsel %vm224_vm0, %v21282_v26, 0.0 }
 0xe56   : > { %v12816_v16 = vsel %vm224_vm0, %v21279_v49, 0.0  ;;  %v21287_v8 = vadd.f32 %v21216_v24, %v12645_v37 }
 0xe57   : > { %v12817_v10 = vadd.f32 %v12816_v16, %v12815_v54  ;;  %v12822_v63 = vsel %vm224_vm0, %v21290_v46, 0.0 }
 0xe58   : > { %v12818_v52 = vsel %vm224_vm0, %v21287_v8, 0.0 }
 0xe59   : > { %v12819_v62 = vadd.f32 %v12818_v52, %v12817_v10 }
 0xe5a   : > { %v16132_v30 = vpop.f32.mrb[48].mxu1 }
 0xe5b   : > { %v12821_v45 = vadd.f32 %v12820_v1, %v12819_v62  ;;  %v12658_v6 = vpop.f32.mrb[49].mxu1  ;;  %v21302_v51 = vadd.f32 %v16132_v30, %v21216_v24 }
 0xe5c   : > { %v21299_v20 = vadd.f32 %v21216_v24, %v12658_v6  ;;  %v16133_v5 = vpop.f32.mrb[50].mxu1 }
 0xe5d   : > { %v12823_v28 = vadd.f32 %v12822_v63, %v12821_v45  ;;  %v12661_v38 = vpop.f32.mrb[51].mxu1  ;;  %v21310_v36 = vadd.f32 %v16133_v5, %v21216_v24  ;;  %v12828_v60 = vsel %vm224_vm0, %v21302_v51, 0.0 }
 0xe5e   : > { %v12824_v4 = vsel %vm224_vm0, %v21299_v20, 0.0  ;;  %v21307_v48 = vadd.f32 %v21216_v24, %v12661_v38 }
 0xe5f   : > { %v12825_v35 = vadd.f32 %v12824_v4, %v12823_v28  ;;  %v12830_v41 = vsel %vm224_vm0, %v21310_v36, 0.0 }
 0xe60   : > { %v12826_v2 = vsel %vm224_vm0, %v21307_v48, 0.0 }
 0xe61   : > { %v12827_v7 = vadd.f32 %v12826_v2, %v12825_v35 }
 0xe62   : > { %v16136_v47 = vpop.f32.mrb[52].mxu1 }
 0xe63   : > { %v12829_v44 = vadd.f32 %v12828_v60, %v12827_v7  ;;  %v12674_v57 = vpop.f32.mrb[53].mxu1  ;;  %v12783_v3 = vadd.f32 %v16136_v47, %v21216_v24 }
 0xe64   : > { %v21319_v42 = vadd.f32 %v21216_v24, %v12674_v57  ;;  %v16137_v17 = vpop.f32.mrb[54].mxu1 }
 0xe65   : > { %v12831_v23 = vadd.f32 %v12830_v41, %v12829_v44  ;;  %v12677_v53 = vpop.f32.mrb[55].mxu1  ;;  %v12784_v14 = vadd.f32 %v16137_v17, %v21216_v24  ;;  %v12836_v22 = vsel %vm224_vm0, %v12783_v3, 0.0 }
 0xe66   : > { %v12832_v39 = vsel %vm224_vm0, %v21319_v42, 0.0  ;;  %v12782_v58 = vadd.f32 %v21216_v24, %v12677_v53 }
 0xe67   : > { %v12833_v33 = vadd.f32 %v12832_v39, %v12831_v23  ;;  %v12838_v27 = vsel %vm224_vm0, %v12784_v14, 0.0 }
 0xe68   : > { %v12834_v29 = vsel %vm224_vm0, %v12782_v58, 0.0 }
 0xe69   : > { %v12835_v32 = vadd.f32 %v12834_v29, %v12833_v33 }
 0xe6a   : > { %v16140_v59 = vpop.f32.mrb[56].mxu1 }
 0xe6b   : > { %v12837_v13 = vadd.f32 %v12836_v22, %v12835_v32  ;;  %v12690_v40 = vpop.f32.mrb[57].mxu1  ;;  %v12787_v54 = vadd.f32 %v16140_v59, %v21216_v24 }
 0xe6c   : > { %v12785_v9 = vadd.f32 %v21216_v24, %v12690_v40  ;;  %v16141_v61 = vpop.f32.mrb[58].mxu1 }
 0xe6d   : > { %v12839_v43 = vadd.f32 %v12838_v27, %v12837_v13  ;;  %v12693_v21 = vpop.f32.mrb[59].mxu1  ;;  %v12788_v52 = vadd.f32 %v16141_v61, %v21216_v24  ;;  %v12844_v30 = vsel %vm224_vm0, %v12787_v54, 0.0 }
 0xe6e   : > { %v12840_v37 = vsel %vm224_vm0, %v12785_v9, 0.0  ;;  %v12786_v16 = vadd.f32 %v21216_v24, %v12693_v21 }
 0xe6f   : > { %v12841_v10 = vadd.f32 %v12840_v37, %v12839_v43  ;;  %v12846_v5 = vsel %vm224_vm0, %v12788_v52, 0.0 }
 0xe70   : > { %v12842_v62 = vsel %vm224_vm0, %v12786_v16, 0.0 }
 0xe71   : > { %v12843_v1 = vadd.f32 %v12842_v62, %v12841_v10 }
 0xe72   : > { %v16144_v45 = vpop.f32.mrb[60].mxu1 }
 0xe73   : > { %v12845_v6 = vadd.f32 %v12844_v30, %v12843_v1  ;;  %v12706_v63 = vpop.f32.mrb[61].mxu1  ;;  %v12791_v2 = vadd.f32 %v16144_v45, %v21216_v24 }
 0xe74   : > { %v12789_v28 = vadd.f32 %v21216_v24, %v12706_v63  ;;  %v16145_v38 = vpop.f32.mrb[62].mxu1 }
 0xe75   : > { %v12847_v4 = vadd.f32 %v12846_v5, %v12845_v6  ;;  %v12709_v35 = vpop.f32.mrb[63].mxu1  ;;  %v12792_v44 = vadd.f32 %v16145_v38, %v21216_v24  ;;  %v12852_v17 = vsel %vm224_vm0, %v12791_v2, 0.0 }
 0xe76   : > { %v12848_v7 = vsel %vm224_vm0, %v12789_v28, 0.0  ;;  %v12790_v60 = vadd.f32 %v21216_v24, %v12709_v35 }
 0xe77   : > { %v12849_v47 = vadd.f32 %v12848_v7, %v12847_v4  ;;  %v12854_v53 = vsel %vm224_vm0, %v12792_v44, 0.0 }
 0xe78   : > { %v12850_v57 = vsel %vm224_vm0, %v12790_v60, 0.0 }
 0xe79   : > { %v12851_v41 = vadd.f32 %v12850_v57, %v12849_v47 }
 0xe7b   : > { %v12853_v23 = vadd.f32 %v12852_v17, %v12851_v41 }
 0xe7d   : > { %v12855_v39 = vadd.f32 %v12854_v53, %v12853_v23 }
 0xe7f   : > { %v12856_v33 = vrot.slane %v12855_v39, 4 }
 0xe81   : > { %v12857_v29 = vadd.f32 %v12856_v33, %v12855_v39 }
 0xe83   : > { %v12858_v32 = vrot.slane %v12857_v29, 2 }
 0xe85   : > { %v12859_v22 = vadd.f32 %v12858_v32, %v12857_v29 }
 0xe87   : > { %v12860_v59 = vrot.slane %v12859_v22, 1 }
 0xe89   : > { %v12861_v13 = vadd.f32 %v12860_v59, %v12859_v22 }
 0xe8b   : > { %v12862_v40 = vmul.f32 0.00390625, %v12861_v13 }
 0xe8d   : > { %v21346_v27 = vsub.f32 %v21267_v34, %v12862_v40  ;;  %v21349_v24 = vsub.f32 %v21270_v19, %v12862_v40  ;;  %v21352_v61 = vsub.f32 %v21279_v49, %v12862_v40  ;;  %v21355_v43 = vsub.f32 %v21287_v8, %v12862_v40 }
 0xe8e   : > { %v21358_v21 = vsub.f32 %v21282_v26, %v12862_v40  ;;  %v21361_v37 = vsub.f32 %v21290_v46, %v12862_v40  ;;  %v21364_v10 = vsub.f32 %v21299_v20, %v12862_v40  ;;  %v21367_v34 = vsub.f32 %v21307_v48, %v12862_v40 }
 0xe8f   : > { %v21370_v19 = vsub.f32 %v21302_v51, %v12862_v40  ;;  %v21373_v49 = vsub.f32 %v21310_v36, %v12862_v40  ;;  %v21376_v8 = vsub.f32 %v21319_v42, %v12862_v40  ;;  %v21378_v26 = vsub.f32 %v12782_v58, %v12862_v40 }
 0xe90   : > { %v21380_v62 = vsub.f32 %v12783_v3, %v12862_v40  ;;  %v21382_v46 = vsub.f32 %v12784_v14, %v12862_v40  ;;  %v21384_v20 = vsub.f32 %v12785_v9, %v12862_v40  ;;  %v21386_v1 = vsub.f32 %v12786_v16, %v12862_v40 }
 0xe91   : > { %v21388_v48 = vsub.f32 %v12787_v54, %v12862_v40  ;;  %v21390_v51 = vsub.f32 %v12788_v52, %v12862_v40  ;;  %v21392_v30 = vsub.f32 %v12789_v28, %v12862_v40  ;;  %v21394_v36 = vsub.f32 %v12790_v60, %v12862_v40 }
 0xe92   : > { %v21396_v42 = vsub.f32 %v12791_v2, %v12862_v40  ;;  %v21398_v58 = vsub.f32 %v12792_v44, %v12862_v40  ;;  %v21401_v3 = vsub.f32 %v21219_v18, %v12862_v40  ;;  %v21404_v14 = vsub.f32 %v21225_v25, %v12862_v40 }
 0xe93   : > { %v21407_v9 = vsub.f32 %v21222_v56, %v12862_v40  ;;  %v21410_v54 = vsub.f32 %v21230_v31, %v12862_v40  ;;  %v21417_v45 = vsub.f32 %v21239_v55, %v12862_v40  ;;  %v21422_v25 = vsub.f32 %v21247_v15, %v12862_v40 }
 0xe94   : > { %v12895_v16 = vmul.f32 %v21401_v3, %v21401_v3  ;;  %v12896_v52 = vmul.f32 %v21404_v14, %v21404_v14  ;;  %v21429_v5 = vsub.f32 %v21242_v0, %v12862_v40  ;;  %v21435_v15 = vsub.f32 %v21250_v50, %v12862_v40 }
 0xe95   : > { %v12897_v18 = vmul.f32 %v21407_v9, %v21407_v9  ;;  %v12898_v56 = vmul.f32 %v21410_v54, %v21410_v54  ;;  %v12899_v55 = vmul.f32 %v21417_v45, %v21417_v45  ;;  %v12900_v4 = vmul.f32 %v21422_v25, %v21422_v25 }
 0xe96   : > { %v12927_v31 = vsel %vm224_vm0, %v12895_v16, 0.0  ;;  %v12928_v6 = vsel %vm224_vm0, %v12896_v52, 0.0  ;;  %v21441_v7 = vsub.f32 %v21259_v11, %v12862_v40  ;;  %v12901_v0 = vmul.f32 %v21429_v5, %v21429_v5 }
 0xe97   : > { %v12929_v63 = vadd.f32 %v12928_v6, %v12927_v31  ;;  %v12930_v28 = vsel %vm224_vm0, %v12897_v18, 0.0  ;;  %v12932_v35 = vsel %vm224_vm0, %v12898_v56, 0.0  ;;  %v12934_v60 = vsel %vm224_vm0, %v12899_v55, 0.0 }
 0xe98   : > { %v12902_v44 = vmul.f32 %v21435_v15, %v21435_v15  ;;  %v12936_v50 = vsel %vm224_vm0, %v12900_v4, 0.0  ;;  %v21450_v41 = vsub.f32 %v21262_v12, %v12862_v40  ;;  %v12903_v17 = vmul.f32 %v21441_v7, %v21441_v7 }
 0xe99   : > { %v12931_v38 = vadd.f32 %v12930_v28, %v12929_v63  ;;  %v12938_v11 = vsel %vm224_vm0, %v12901_v0, 0.0  ;;  %v12904_v53 = vmul.f32 %v21346_v27, %v21346_v27  ;;  %v12906_v12 = vmul.f32 %v21349_v24, %v21349_v24 }
 0xe9a   : > { %v12940_v39 = vsel %vm224_vm0, %v12902_v44, 0.0  ;;  %v12905_v29 = vmul.f32 %v21450_v41, %v21450_v41  ;;  %v12942_v32 = vsel %vm224_vm0, %v12903_v17, 0.0  ;;  %v12907_v40 = vmul.f32 %v21352_v61, %v21352_v61 }
 0xe9b   : > { %v12933_v2 = vadd.f32 %v12932_v35, %v12931_v38  ;;  %v12944_v59 = vsel %vm224_vm0, %v12904_v53, 0.0  ;;  %v12908_v18 = vmul.f32 %v21355_v43, %v21355_v43  ;;  %v12948_v56 = vsel %vm224_vm0, %v12906_v12, 0.0 }
 0xe9c   : > { %v12946_v16 = vsel %vm224_vm0, %v12905_v29, 0.0  ;;  %v12909_v6 = vmul.f32 %v21358_v21, %v21358_v21  ;;  %v12950_v63 = vsel %vm224_vm0, %v12907_v40, 0.0  ;;  %v12910_v28 = vmul.f32 %v21361_v37, %v21361_v37 }
 0xe9d   : > { %v12935_v47 = vadd.f32 %v12934_v60, %v12933_v2  ;;  %v12952_v38 = vsel %vm224_vm0, %v12908_v18, 0.0  ;;  %v12911_v35 = vmul.f32 %v21364_v10, %v21364_v10  ;;  %v12912_v60 = vmul.f32 %v21367_v34, %v21367_v34 }
 0xe9e   : > { %v12954_v2 = vsel %vm224_vm0, %v12909_v6, 0.0 }
 0xe9f   : > { %v12937_v57 = vadd.f32 %v12936_v50, %v12935_v47  ;;  %v12956_v47 = vsel %vm224_vm0, %v12910_v28, 0.0  ;;  %v12913_v50 = vmul.f32 %v21370_v19, %v21370_v19 }
 0xea1   : > { %v12939_v23 = vadd.f32 %v12938_v11, %v12937_v57  ;;  %v12958_v57 = vsel %vm224_vm0, %v12911_v35, 0.0  ;;  %v12914_v11 = vmul.f32 %v21373_v49, %v21373_v49 }
 0xea3   : > { %v12941_v33 = vadd.f32 %v12940_v39, %v12939_v23  ;;  %v12960_v23 = vsel %vm224_vm0, %v12912_v60, 0.0  ;;  %v12915_v39 = vmul.f32 %v21376_v8, %v21376_v8 }
 0xea5   : > { %v12943_v22 = vadd.f32 %v12942_v32, %v12941_v33  ;;  %v12962_v33 = vsel %vm224_vm0, %v12913_v50, 0.0  ;;  %v12916_v32 = vmul.f32 %v21378_v26, %v21378_v26 }
 0xea7   : > { %v12945_v13 = vadd.f32 %v12944_v59, %v12943_v22  ;;  %v12964_v22 = vsel %vm224_vm0, %v12914_v11, 0.0  ;;  %v12917_v59 = vmul.f32 %v21380_v62, %v21380_v62 }
 0xea9   : > { %v12947_v52 = vadd.f32 %v12946_v16, %v12945_v13  ;;  %v12966_v13 = vsel %vm224_vm0, %v12915_v39, 0.0  ;;  %v12918_v16 = vmul.f32 %v21382_v46, %v21382_v46 }
 0xeab   : > { %v12949_v31 = vadd.f32 %v12948_v56, %v12947_v52  ;;  %v12968_v52 = vsel %vm224_vm0, %v12916_v32, 0.0  ;;  %v12919_v56 = vmul.f32 %v21384_v20, %v21384_v20 }
 0xead   : > { %v12951_v55 = vadd.f32 %v12950_v63, %v12949_v31  ;;  %v12970_v31 = vsel %vm224_vm0, %v12917_v59, 0.0  ;;  %v12920_v63 = vmul.f32 %v21386_v1, %v21386_v1 }
 0xeaf   : > { %v12953_v4 = vadd.f32 %v12952_v38, %v12951_v55  ;;  %v12972_v55 = vsel %vm224_vm0, %v12918_v16, 0.0  ;;  %v12921_v38 = vmul.f32 %v21388_v48, %v21388_v48 }
 0xeb1   : > { %v12955_v0 = vadd.f32 %v12954_v2, %v12953_v4  ;;  %v12974_v4 = vsel %vm224_vm0, %v12919_v56, 0.0  ;;  %v12922_v2 = vmul.f32 %v21390_v51, %v21390_v51 }
 0xeb3   : > { %v12957_v44 = vadd.f32 %v12956_v47, %v12955_v0  ;;  %v12976_v0 = vsel %vm224_vm0, %v12920_v63, 0.0  ;;  %v12923_v47 = vmul.f32 %v21392_v30, %v21392_v30 }
 0xeb5   : > { %v12959_v17 = vadd.f32 %v12958_v57, %v12957_v44  ;;  %v12978_v44 = vsel %vm224_vm0, %v12921_v38, 0.0  ;;  %v12924_v57 = vmul.f32 %v21394_v36, %v21394_v36 }
 0xeb7   : > { %v12961_v53 = vadd.f32 %v12960_v23, %v12959_v17  ;;  %v12980_v17 = vsel %vm224_vm0, %v12922_v2, 0.0  ;;  %v12925_v23 = vmul.f32 %v21396_v42, %v21396_v42 }
 0xeb9   : > { %v12963_v29 = vadd.f32 %v12962_v33, %v12961_v53  ;;  %v12982_v53 = vsel %vm224_vm0, %v12923_v47, 0.0  ;;  %v12926_v33 = vmul.f32 %v21398_v58, %v21398_v58 }
 0xebb   : > { %v12965_v12 = vadd.f32 %v12964_v22, %v12963_v29  ;;  %v12984_v29 = vsel %vm224_vm0, %v12924_v57, 0.0  ;;  %v12986_v22 = vsel %vm224_vm0, %v12925_v23, 0.0  ;;  %v12988_v59 = vsel %vm224_vm0, %v12926_v33, 0.0 }
 0xebd   : > { %v12967_v40 = vadd.f32 %v12966_v13, %v12965_v12 }
 0xebf   : > { %v12969_v18 = vadd.f32 %v12968_v52, %v12967_v40 }
 0xec1   : > { %v12971_v6 = vadd.f32 %v12970_v31, %v12969_v18 }
 0xec3   : > { %v12973_v28 = vadd.f32 %v12972_v55, %v12971_v6 }
 0xec5   : > { %v12975_v35 = vadd.f32 %v12974_v4, %v12973_v28  ;;  %v21529_v28 = vld [vmem:[%s21846_s3 + $0x3] ss:$0 sm:$0xff] }
 0xec6   : > { %v21535_v4 = vld [vmem:[%s21847_s4 + $0x3] ss:$0 sm:$0xff] }
 0xec7   : > { %v12977_v60 = vadd.f32 %v12976_v0, %v12975_v35 }
 0xec9   : > { %v12979_v50 = vadd.f32 %v12978_v44, %v12977_v60 }
 0xecb   : > { %v12981_v11 = vadd.f32 %v12980_v17, %v12979_v50 }
 0xecd   : > { %v12983_v39 = vadd.f32 %v12982_v53, %v12981_v11 }
 0xecf   : > { %v12985_v32 = vadd.f32 %v12984_v29, %v12983_v39 }
 0xed1   : > { %v12987_v12 = vadd.f32 %v12986_v22, %v12985_v32 }
 0xed3   : > { %v12989_v13 = vadd.f32 %v12988_v59, %v12987_v12 }
 0xed5   : > { %v12990_v40 = vrot.slane %v12989_v13, 4 }
 0xed7   : > { %v12991_v16 = vadd.f32 %v12990_v40, %v12989_v13 }
 0xed9   : > { %v12992_v52 = vrot.slane %v12991_v16, 2 }
 0xedb   : > { %v12993_v18 = vadd.f32 %v12992_v52, %v12991_v16 }
 0xedd   : > { %v12994_v56 = vrot.slane %v12993_v18, 1 }
 0xedf   : > { %v12995_v31 = vadd.f32 %v12994_v56, %v12993_v18 }
 0xee1   : > { %v12996_v6 = vmul.f32 0.00390625, %v12995_v31 }
 0xee3   : > { %v12997_v63 = vadd.f32 1e-05, %v12996_v6 }
 0xee5   : > { %17482 = vrsqrt.f32 %v12997_v63 }
 0xeef   : > { %v17483_v55 = vpop.eup %17482 }
 0xef0   : > { %v13028_v38 = vmul.f32 %v17483_v55, %v21394_v36  ;;  %v12999_v60 = vmul.f32 %v17483_v55, %v21401_v3  ;;  %v13000_v47 = vmul.f32 %v17483_v55, %v21404_v14  ;;  %v13001_v44 = vmul.f32 %v17483_v55, %v21407_v9 }
 0xef1   : > { %v13002_v50 = vmul.f32 %v17483_v55, %v21410_v54  ;;  %v13003_v36 = vmul.f32 %v17483_v55, %v21417_v45  ;;  %v13004_v57 = vmul.f32 %v17483_v55, %v21422_v25  ;;  %v13005_v17 = vmul.f32 %v17483_v55, %v21429_v5 }
 0xef2   : > { %v13068_v35 = vmul.f32 %v21529_v28, %v13028_v38  ;;  %v13006_v11 = vmul.f32 %v17483_v55, %v21435_v15  ;;  %v13007_v23 = vmul.f32 %v17483_v55, %v21441_v7  ;;  %v13008_v3 = vmul.f32 %v17483_v55, %v21346_v27 }
 0xef3   : > { %v13009_v14 = vmul.f32 %v17483_v55, %v21450_v41  ;;  %v13010_v9 = vmul.f32 %v17483_v55, %v21349_v24  ;;  %v13011_v54 = vmul.f32 %v17483_v55, %v21352_v61  ;;  %v13012_v45 = vmul.f32 %v17483_v55, %v21355_v43 }
 0xef4   : > { %v13108_v2 = vadd.f32 %v21535_v4, %v13068_v35  ;;  %v13013_v25 = vmul.f32 %v17483_v55, %v21358_v21  ;;  %v13014_v53 = vmul.f32 %v17483_v55, %v21361_v37  ;;  %v13015_v5 = vmul.f32 %v17483_v55, %v21364_v10 }
 0xef5   : > { %v13016_v15 = vmul.f32 %v17483_v55, %v21367_v34  ;;  %v13017_v7 = vmul.f32 %v17483_v55, %v21370_v19  ;;  %v13018_v27 = vmul.f32 %v17483_v55, %v21373_v49  ;;  %v13019_v24 = vmul.f32 %v17483_v55, %v21376_v8 }
 0xef6   : > { %v13172_v0 = vmul.f32 0.70710677, %v13108_v2  ;;  %v13140_v41 = vmul.f32 0.5, %v13108_v2  ;;  %v13020_v61 = vmul.f32 %v17483_v55, %v21378_v26  ;;  %v13021_v43 = vmul.f32 %v17483_v55, %v21380_v62 }
 0xef7   : > { %v13022_v37 = vmul.f32 %v17483_v55, %v21382_v46  ;;  %v13023_v10 = vmul.f32 %v17483_v55, %v21384_v20  ;;  %v13024_v34 = vmul.f32 %v17483_v55, %v21386_v1  ;;  %v13025_v19 = vmul.f32 %v17483_v55, %v21388_v48 }
 0xef8   : > { %17484 = verf.f32 %v13172_v0  ;;  %v13026_v49 = vmul.f32 %v17483_v55, %v21390_v51  ;;  %v13027_v33 = vmul.f32 %v17483_v55, %v21392_v30  ;;  %v13029_v8 = vmul.f32 %v17483_v55, %v21396_v42 }
 0xef9   : > { %v13030_v26 = vmul.f32 %v17483_v55, %v21398_v58  ;;  %v13039_v62 = vmul.f32 %v21529_v28, %v12999_v60  ;;  %v13040_v29 = vmul.f32 %v21529_v28, %v13000_v47  ;;  %v13041_v46 = vmul.f32 %v21529_v28, %v13001_v44 }
 0xefa   : > { %v13042_v1 = vmul.f32 %v21529_v28, %v13002_v50  ;;  %v13043_v48 = vmul.f32 %v21529_v28, %v13003_v36  ;;  %v13044_v32 = vmul.f32 %v21529_v28, %v13004_v57  ;;  %v13045_v51 = vmul.f32 %v21529_v28, %v13005_v17 }
 0xefb   : > { %v13046_v30 = vmul.f32 %v21529_v28, %v13006_v11  ;;  %v13047_v42 = vmul.f32 %v21529_v28, %v13007_v23  ;;  %v13048_v58 = vmul.f32 %v21529_v28, %v13008_v3  ;;  %v13049_v22 = vmul.f32 %v21529_v28, %v13009_v14 }
 0xefc   : > { %v13050_v12 = vmul.f32 %v21529_v28, %v13010_v9  ;;  %v13051_v59 = vmul.f32 %v21529_v28, %v13011_v54  ;;  %v13052_v13 = vmul.f32 %v21529_v28, %v13012_v45  ;;  %v13053_v40 = vmul.f32 %v21529_v28, %v13013_v25 }
 0xefd   : > { %v13054_v16 = vmul.f32 %v21529_v28, %v13014_v53  ;;  %v13055_v52 = vmul.f32 %v21529_v28, %v13015_v5  ;;  %v13056_v18 = vmul.f32 %v21529_v28, %v13016_v15  ;;  %v13057_v56 = vmul.f32 %v21529_v28, %v13017_v7 }
 0xefe   : > { %v13058_v31 = vmul.f32 %v21529_v28, %v13018_v27  ;;  %v13059_v6 = vmul.f32 %v21529_v28, %v13019_v24  ;;  %v13060_v63 = vmul.f32 %v21529_v28, %v13020_v61  ;;  %v13061_v55 = vmul.f32 %v21529_v28, %v13021_v43 }
 0xeff   : > { %v13062_v38 = vmul.f32 %v21529_v28, %v13022_v37  ;;  %v13063_v35 = vmul.f32 %v21529_v28, %v13023_v10  ;;  %v13064_v2 = vmul.f32 %v21529_v28, %v13024_v34  ;;  %v13065_v0 = vmul.f32 %v21529_v28, %v13025_v19 }
 0xf00   : > { %v13066_v60 = vmul.f32 %v21529_v28, %v13026_v49  ;;  %v13067_v47 = vmul.f32 %v21529_v28, %v13027_v33  ;;  %v13069_v44 = vmul.f32 %v21529_v28, %v13029_v8  ;;  %v13070_v50 = vmul.f32 %v21529_v28, %v13030_v26 }
 0xf01   : > { %v13079_v36 = vadd.f32 %v21535_v4, %v13039_v62  ;;  %v13080_v57 = vadd.f32 %v21535_v4, %v13040_v29  ;;  %v13081_v17 = vadd.f32 %v21535_v4, %v13041_v46  ;;  %v13082_v11 = vadd.f32 %v21535_v4, %v13042_v1 }
 0xf02   : > { %v17485_v21 = vpop.eup %17484  ;;  %v13083_v23 = vadd.f32 %v21535_v4, %v13043_v48  ;;  %v13084_v3 = vadd.f32 %v21535_v4, %v13044_v32  ;;  %v13085_v14 = vadd.f32 %v21535_v4, %v13045_v51  ;;  %v13086_v9 = vadd.f32 %v21535_v4, %v13046_v30 }
 0xf03   : > { %v13236_v39 = vadd.f32 1.0, %v17485_v21  ;;  %v13087_v54 = vadd.f32 %v21535_v4, %v13047_v42  ;;  %v13088_v28 = vadd.f32 %v21535_v4, %v13048_v58  ;;  %v13089_v45 = vadd.f32 %v21535_v4, %v13049_v22 }
 0xf04   : > { %v13090_v25 = vadd.f32 %v21535_v4, %v13050_v12  ;;  %v13091_v53 = vadd.f32 %v21535_v4, %v13051_v59  ;;  %v13092_v5 = vadd.f32 %v21535_v4, %v13052_v13  ;;  %v13093_v15 = vadd.f32 %v21535_v4, %v13053_v40 }
 0xf05   : > { %v13268_v20 = vmul.f32 %v13236_v39, %v13140_v41  ;;  %v13094_v7 = vadd.f32 %v21535_v4, %v13054_v16  ;;  %v21625_v27 = vadd.f32 %v21535_v4, %v13055_v52  ;;  %v21628_v41 = vadd.f32 %v21535_v4, %v13056_v18 }
 0xf06   : > { %v21631_v24 = vadd.f32 %v21535_v4, %v13057_v56  ;;  %v21634_v61 = vadd.f32 %v21535_v4, %v13058_v31  ;;  %v13143_v43 = vmul.f32 0.70710677, %v13079_v36  ;;  %v13144_v21 = vmul.f32 0.70710677, %v13080_v57 }
 0xf07   : > { %13300 = vst.msk [vmem:[%s21583_s26 + $0xe8] sm:$0xff] %vm224_vm0, %v13268_v20  ;;  %v13145_v37 = vmul.f32 0.70710677, %v13081_v17  ;;  %v21637_v10 = vadd.f32 %v21535_v4, %v13059_v6  ;;  %v21640_v34 = vadd.f32 %v21535_v4, %v13060_v63  ;;  %v21643_v19 = vadd.f32 %v21535_v4, %v13061_v55 }
 0xf08   : > { %v13146_v39 = vmul.f32 0.70710677, %v13082_v11  ;;  %v21646_v49 = vadd.f32 %v21535_v4, %v13062_v38  ;;  %v21649_v33 = vadd.f32 %v21535_v4, %v13063_v35  ;;  %v13147_v8 = vmul.f32 0.70710677, %v13083_v23 }
 0xf09   : > { %17486 = verf.f32 %v13143_v43  ;;  %v21652_v26 = vadd.f32 %v21535_v4, %v13064_v2  ;;  %v21655_v62 = vadd.f32 %v21535_v4, %v13065_v0  ;;  %v13148_v29 = vmul.f32 0.70710677, %v13084_v3 }
 0xf0a   : > { %17488 = verf.f32 %v13144_v21  ;;  %v21658_v46 = vadd.f32 %v21535_v4, %v13066_v60  ;;  %v21661_v20 = vadd.f32 %v21535_v4, %v13067_v47  ;;  %v13149_v1 = vmul.f32 0.70710677, %v13085_v14 }
 0xf0b   : > { %17490 = verf.f32 %v13145_v37  ;;  %v21664_v48 = vadd.f32 %v21535_v4, %v13069_v44  ;;  %v21667_v32 = vadd.f32 %v21535_v4, %v13070_v50  ;;  %v13150_v51 = vmul.f32 0.70710677, %v13086_v9 }
 0xf0c   : > { %17492 = verf.f32 %v13146_v39  ;;  %v13111_v30 = vmul.f32 0.5, %v13079_v36  ;;  %v13112_v42 = vmul.f32 0.5, %v13080_v57  ;;  %v13151_v58 = vmul.f32 0.70710677, %v13087_v54 }
 0xf0d   : > { %17494 = verf.f32 %v13147_v8  ;;  %v13113_v22 = vmul.f32 0.5, %v13081_v17  ;;  %v13114_v12 = vmul.f32 0.5, %v13082_v11  ;;  %v13152_v59 = vmul.f32 0.70710677, %v13088_v28 }
 0xf0e   : > { %17496 = verf.f32 %v13148_v29  ;;  %v13115_v13 = vmul.f32 0.5, %v13083_v23  ;;  %v13116_v40 = vmul.f32 0.5, %v13084_v3  ;;  %v13153_v16 = vmul.f32 0.70710677, %v13089_v45 }
 0xf0f   : > { %17498 = verf.f32 %v13149_v1  ;;  %v21669_v52 = vmul.f32 0.5, %v13085_v14  ;;  %v21671_v18 = vmul.f32 0.5, %v13086_v9  ;;  %v13154_v4 = vmul.f32 0.70710677, %v13090_v25 }
 0xf10   : > { %17500 = verf.f32 %v13150_v51  ;;  %v21673_v56 = vmul.f32 0.5, %v13087_v54  ;;  %v21675_v31 = vmul.f32 0.5, %v13088_v28  ;;  %v13155_v6 = vmul.f32 0.70710677, %v13091_v53 }
 0xf11   : > { %17502 = verf.f32 %v13151_v58  ;;  %v21677_v63 = vmul.f32 0.5, %v13089_v45  ;;  %v21679_v55 = vmul.f32 0.5, %v13090_v25  ;;  %v13156_v38 = vmul.f32 0.70710677, %v13092_v5 }
 0xf12   : > { %17504 = verf.f32 %v13152_v59  ;;  %v21681_v2 = vmul.f32 0.5, %v13091_v53  ;;  %v21683_v0 = vmul.f32 0.5, %v13092_v5  ;;  %v13157_v60 = vmul.f32 0.70710677, %v13093_v15 }
 0xf13   : > { %v17487_v35 = vpop.eup %17486  ;;  %17506 = verf.f32 %v13153_v16  ;;  %v21685_v44 = vmul.f32 0.5, %v13093_v15  ;;  %v13158_v50 = vmul.f32 0.70710677, %v13094_v7  ;;  %v21687_v17 = vmul.f32 0.5, %v13094_v7 }
 0xf14   : > { %v17489_v47 = vpop.eup %17488  ;;  %17508 = verf.f32 %v13154_v4  ;;  %v13207_v36 = vadd.f32 1.0, %v17487_v35  ;;  %v13159_v11 = vmul.f32 0.70710677, %v21625_v27  ;;  %v13160_v14 = vmul.f32 0.70710677, %v21628_v41 }
 0xf15   : > { %v17491_v57 = vpop.eup %17490  ;;  %17510 = verf.f32 %v13155_v6  ;;  %v13208_v23 = vadd.f32 1.0, %v17489_v47  ;;  %v13161_v45 = vmul.f32 0.70710677, %v21631_v24  ;;  %v13162_v15 = vmul.f32 0.70710677, %v21634_v61 }
 0xf16   : > { %v17493_v3 = vpop.eup %17492  ;;  %17512 = verf.f32 %v13156_v38  ;;  %v13209_v9 = vadd.f32 1.0, %v17491_v57  ;;  %v13239_v54 = vmul.f32 %v13207_v36, %v13111_v30  ;;  %v13163_v37 = vmul.f32 0.70710677, %v21637_v10 }
 0xf17   : > { %v17495_v28 = vpop.eup %17494  ;;  %17514 = verf.f32 %v13157_v60  ;;  %v13210_v25 = vadd.f32 1.0, %v17493_v3  ;;  %v13240_v53 = vmul.f32 %v13208_v23, %v13112_v42  ;;  %v13164_v1 = vmul.f32 0.70710677, %v21640_v34 }
 0xf18   : > { %v17497_v5 = vpop.eup %17496  ;;  %17516 = verf.f32 %v13158_v50  ;;  %v13211_v7 = vadd.f32 1.0, %v17495_v28  ;;  %v13241_v43 = vmul.f32 %v13209_v9, %v13113_v22  ;;  %13271 = vst.msk [vmem:[%s21583_s26] sm:$0xff] %vm224_vm0, %v13239_v54  ;;  %v13165_v58 = vmul.f32 0.70710677, %v21643_v19 }
 0xf19   : > { %v17499_v21 = vpop.eup %17498  ;;  %17518 = verf.f32 %v13159_v11  ;;  %v13212_v39 = vadd.f32 1.0, %v17497_v5  ;;  %v13242_v8 = vmul.f32 %v13210_v25, %v13114_v12  ;;  %13272 = vst.msk [vmem:[%s21583_s26 + $0x8] sm:$0xff] %vm224_vm0, %v13240_v53  ;;  %v13166_v16 = vmul.f32 0.70710677, %v21646_v49 }
 0xf1a   : > { %v17501_v29 = vpop.eup %17500  ;;  %17520 = verf.f32 %v13160_v14  ;;  %v13213_v51 = vadd.f32 1.0, %v17499_v21  ;;  %v13243_v30 = vmul.f32 %v13211_v7, %v13115_v13  ;;  %13273 = vst.msk [vmem:[%s21583_s26 + $0x10] sm:$0xff] %vm224_vm0, %v13241_v43  ;;  %v13167_v38 = vmul.f32 0.70710677, %v21649_v33 }
 0xf1b   : > { %v17503_v42 = vpop.eup %17502  ;;  %17522 = verf.f32 %v13161_v45  ;;  %v13214_v22 = vadd.f32 1.0, %v17501_v29  ;;  %v13244_v59 = vmul.f32 %v13212_v39, %v13116_v40  ;;  %13274 = vst.msk [vmem:[%s21583_s26 + $0x18] sm:$0xff] %vm224_vm0, %v13242_v8  ;;  %v13168_v47 = vmul.f32 0.70710677, %v21652_v26 }
 0xf1c   : > { %v17505_v12 = vpop.eup %17504  ;;  %17524 = verf.f32 %v13162_v15  ;;  %v13215_v4 = vadd.f32 1.0, %v17503_v42  ;;  %v13245_v6 = vmul.f32 %v13213_v51, %v21669_v52  ;;  %13275 = vst.msk [vmem:[%s21583_s26 + $0x20] sm:$0xff] %vm224_vm0, %v13243_v30  ;;  %v13169_v57 = vmul.f32 0.70710677, %v21655_v62 }
 0xf1d   : > { %v17507_v13 = vpop.eup %17506  ;;  %17526 = verf.f32 %v13163_v37  ;;  %v13216_v35 = vadd.f32 1.0, %v17505_v12  ;;  %v13246_v40 = vmul.f32 %v13214_v22, %v21671_v18  ;;  %13276 = vst.msk [vmem:[%s21583_s26 + $0x28] sm:$0xff] %vm224_vm0, %v13244_v59  ;;  %v13170_v3 = vmul.f32 0.70710677, %v21658_v46 }
 0xf1e   : > { %v17509_v60 = vpop.eup %17508  ;;  %17528 = verf.f32 %v13164_v1  ;;  %v13217_v50 = vadd.f32 1.0, %v17507_v13  ;;  %v13247_v52 = vmul.f32 %v13215_v4, %v21673_v56  ;;  %13277 = vst.msk [vmem:[%s21583_s26 + $0x30] sm:$0xff] %vm224_vm0, %v13245_v6  ;;  %v13171_v54 = vmul.f32 0.70710677, %v21661_v20 }
 0xf1f   : > { %v17511_v36 = vpop.eup %17510  ;;  %17530 = verf.f32 %v13165_v58  ;;  %v13218_v11 = vadd.f32 1.0, %v17509_v60  ;;  %v13248_v18 = vmul.f32 %v13216_v35, %v21675_v31  ;;  %13278 = vst.msk [vmem:[%s21583_s26 + $0x38] sm:$0xff] %vm224_vm0, %v13246_v40  ;;  %v13173_v25 = vmul.f32 0.70710677, %v21664_v48 }
 0xf20   : > { %v17513_v23 = vpop.eup %17512  ;;  %17532 = verf.f32 %v13166_v16  ;;  %v13219_v14 = vadd.f32 1.0, %v17511_v36  ;;  %v13249_v56 = vmul.f32 %v13217_v50, %v21677_v63  ;;  %13279 = vst.msk [vmem:[%s21583_s26 + $0x40] sm:$0xff] %vm224_vm0, %v13247_v52  ;;  %v13174_v15 = vmul.f32 0.70710677, %v21667_v32 }
 0xf21   : > { %v17515_v9 = vpop.eup %17514  ;;  %17534 = verf.f32 %v13167_v38  ;;  %v13220_v28 = vadd.f32 1.0, %v17513_v23  ;;  %v13250_v31 = vmul.f32 %v13218_v11, %v21679_v55  ;;  %13280 = vst.msk [vmem:[%s21583_s26 + $0x48] sm:$0xff] %vm224_vm0, %v13248_v18  ;;  %v13127_v21 = vmul.f32 0.5, %v21625_v27 }
 0xf22   : > { %v17517_v45 = vpop.eup %17516  ;;  %17536 = verf.f32 %v13168_v47  ;;  %v13221_v53 = vadd.f32 1.0, %v17515_v9  ;;  %v13251_v63 = vmul.f32 %v13219_v14, %v21681_v2  ;;  %13281 = vst.msk [vmem:[%s21583_s26 + $0x50] sm:$0xff] %vm224_vm0, %v13249_v56  ;;  %v13128_v8 = vmul.f32 0.5, %v21628_v41 }
 0xf23   : > { %v17519_v5 = vpop.eup %17518  ;;  %17538 = verf.f32 %v13169_v57  ;;  %v13222_v7 = vadd.f32 1.0, %v17517_v45  ;;  %v13252_v55 = vmul.f32 %v13220_v28, %v21683_v0  ;;  %13282 = vst.msk [vmem:[%s21583_s26 + $0x58] sm:$0xff] %vm224_vm0, %v13250_v31  ;;  %v13129_v27 = vmul.f32 0.5, %v21631_v24 }
 0xf24   : > { %v17521_v43 = vpop.eup %17520  ;;  %17540 = verf.f32 %v13170_v3  ;;  %v13223_v37 = vadd.f32 1.0, %v17519_v5  ;;  %v13253_v2 = vmul.f32 %v13221_v53, %v21685_v44  ;;  %13283 = vst.msk [vmem:[%s21583_s26 + $0x60] sm:$0xff] %vm224_vm0, %v13251_v63  ;;  %v13130_v41 = vmul.f32 0.5, %v21634_v61 }
 0xf25   : > { %v17523_v39 = vpop.eup %17522  ;;  %17542 = verf.f32 %v13171_v54  ;;  %v13224_v29 = vadd.f32 1.0, %v17521_v43  ;;  %v13254_v0 = vmul.f32 %v13222_v7, %v21687_v17  ;;  %13284 = vst.msk [vmem:[%s21583_s26 + $0x68] sm:$0xff] %vm224_vm0, %v13252_v55  ;;  %v13131_v22 = vmul.f32 0.5, %v21637_v10 }
 0xf26   : > { %v17525_v1 = vpop.eup %17524  ;;  %17544 = verf.f32 %v13173_v25  ;;  %v13225_v51 = vadd.f32 1.0, %v17523_v39  ;;  %v13255_v30 = vmul.f32 %v13223_v37, %v13127_v21  ;;  %13285 = vst.msk [vmem:[%s21583_s26 + $0x70] sm:$0xff] %vm224_vm0, %v13253_v2  ;;  %v13132_v16 = vmul.f32 0.5, %v21640_v34 }
 0xf27   : > { %v17527_v44 = vpop.eup %17526  ;;  %17546 = verf.f32 %v13174_v15  ;;  %v13226_v42 = vadd.f32 1.0, %v17525_v1  ;;  %v13256_v58 = vmul.f32 %v13224_v29, %v13128_v8  ;;  %13286 = vst.msk [vmem:[%s21583_s26 + $0x78] sm:$0xff] %vm224_vm0, %v13254_v0  ;;  %v13133_v13 = vmul.f32 0.5, %v21643_v19 }
 0xf28   : > { %v17529_v17 = vpop.eup %17528  ;;  %v13227_v59 = vadd.f32 1.0, %v17527_v44  ;;  %v13257_v24 = vmul.f32 %v13225_v51, %v13129_v27  ;;  %13287 = vst.msk [vmem:[%s21583_s26 + $0x80] sm:$0xff] %vm224_vm0, %v13255_v30  ;;  %v13134_v40 = vmul.f32 0.5, %v21646_v49  ;;  %v13135_v50 = vmul.f32 0.5, %v21649_v33 }
 0xf29   : > { %v17531_v12 = vpop.eup %17530  ;;  %v13228_v4 = vadd.f32 1.0, %v17529_v17  ;;  %v13258_v6 = vmul.f32 %v13226_v42, %v13130_v41  ;;  %13288 = vst.msk [vmem:[%s21583_s26 + $0x88] sm:$0xff] %vm224_vm0, %v13256_v58  ;;  %v13136_v57 = vmul.f32 0.5, %v21652_v26  ;;  %v13137_v23 = vmul.f32 0.5, %v21655_v62 }
 0xf2a   : > { %v17533_v61 = vpop.eup %17532  ;;  %v13229_v38 = vadd.f32 1.0, %v17531_v12  ;;  %v13259_v35 = vmul.f32 %v13227_v59, %v13131_v22  ;;  %13289 = vst.msk [vmem:[%s21583_s26 + $0x90] sm:$0xff] %vm224_vm0, %v13257_v24  ;;  %v13138_v56 = vmul.f32 0.5, %v21658_v46  ;;  %v13139_v28 = vmul.f32 0.5, %v21661_v20 }
 0xf2b   : > { %v17535_v10 = vpop.eup %17534  ;;  %v13230_v60 = vadd.f32 1.0, %v17533_v61  ;;  %v13260_v47 = vmul.f32 %v13228_v4, %v13132_v16  ;;  %13290 = vst.msk [vmem:[%s21583_s26 + $0x98] sm:$0xff] %vm224_vm0, %v13258_v6  ;;  %v13141_v46 = vmul.f32 0.5, %v21664_v48  ;;  %v13142_v20 = vmul.f32 0.5, %v21667_v32 }
 0xf2c   : > { %v17537_v34 = vpop.eup %17536  ;;  %v13231_v52 = vadd.f32 1.0, %v17535_v10  ;;  %v13261_v36 = vmul.f32 %v13229_v38, %v13133_v13  ;;  %13291 = vst.msk [vmem:[%s21583_s26 + $0xa0] sm:$0xff] %vm224_vm0, %v13259_v35 }
 0xf2d   : > { %v17539_v19 = vpop.eup %17538  ;;  %v13232_v11 = vadd.f32 1.0, %v17537_v34  ;;  %v13262_v18 = vmul.f32 %v13230_v60, %v13134_v40  ;;  %13292 = vst.msk [vmem:[%s21583_s26 + $0xa8] sm:$0xff] %vm224_vm0, %v13260_v47 }
 0xf2e   : > { %v17541_v49 = vpop.eup %17540  ;;  %v13233_v3 = vadd.f32 1.0, %v17539_v19  ;;  %v13263_v33 = vmul.f32 %v13231_v52, %v13135_v50  ;;  %13293 = vst.msk [vmem:[%s21583_s26 + $0xb0] sm:$0xff] %vm224_vm0, %v13261_v36 }
 0xf2f   : > { %v17543_v14 = vpop.eup %17542  ;;  %v13234_v9 = vadd.f32 1.0, %v17541_v49  ;;  %v13264_v26 = vmul.f32 %v13232_v11, %v13136_v57  ;;  %13294 = vst.msk [vmem:[%s21583_s26 + $0xb8] sm:$0xff] %vm224_vm0, %v13262_v18 }
 0xf30   : > { %v17545_v54 = vpop.eup %17544  ;;  %v13235_v31 = vadd.f32 1.0, %v17543_v14  ;;  %v13265_v45 = vmul.f32 %v13233_v3, %v13137_v23  ;;  %13295 = vst.msk [vmem:[%s21583_s26 + $0xc0] sm:$0xff] %vm224_vm0, %v13263_v33 }
 0xf31   : > { %v17547_v62 = vpop.eup %17546  ;;  %v13237_v25 = vadd.f32 1.0, %v17545_v54  ;;  %v13266_v53 = vmul.f32 %v13234_v9, %v13138_v56  ;;  %13296 = vst.msk [vmem:[%s21583_s26 + $0xc8] sm:$0xff] %vm224_vm0, %v13264_v26 }
 0xf32   : > { %v13238_v63 = vadd.f32 1.0, %v17547_v62  ;;  %v13267_v5 = vmul.f32 %v13235_v31, %v13139_v28  ;;  %13297 = vst.msk [vmem:[%s21583_s26 + $0xd0] sm:$0xff] %vm224_vm0, %v13265_v45 }
 0xf33   : > { %v13269_v15 = vmul.f32 %v13237_v25, %v13141_v46  ;;  %13298 = vst.msk [vmem:[%s21583_s26 + $0xd8] sm:$0xff] %vm224_vm0, %v13266_v53 }
 0xf34   : > { %v13270_v48 = vmul.f32 %v13238_v63, %v13142_v20  ;;  %13299 = vst.msk [vmem:[%s21583_s26 + $0xe0] sm:$0xff] %vm224_vm0, %v13267_v5 }
 0xf35   : > { %13301 = vst.msk [vmem:[%s21583_s26 + $0xf0] sm:$0xff] %vm224_vm0, %v13269_v15 }
 0xf36   : > { %13302 = vst.msk [vmem:[%s21583_s26 + $0xf8] sm:$0xff] %vm224_vm0, %v13270_v48 }
 0xf37   : > { %17561 = shalt.err (!%p17558_p3)
}
 0xf38   : > { %s17562_s14 = scalar_lea.hbm %s21790_s8, 4096  ;;  %s17566_s17 = scalar_lea.hbm %s21848_s5, 8192 }
 0xf39   : > { %p17563_p4 = scmp.ne.s32.totalorder %s21790_s8, %s17562_s14  ;;  %p17567_p9 = scmp.lt.u32.totalorder %s21790_s8, %s21848_s5 }
 0xf3a   : > { %p17568_p10 = scmp.lt.u32.totalorder %s17566_s17, %s17562_s14  ;;  %p17570_p12 = scmp.lt.u32.totalorder %s17562_s14, %s21790_s8 }
 0xf3b   : > { %p17564_p7 = pnand %p17563_p4, %p17684_p5 }
 0xf3c   : > { %p17569_p11 = por %p17568_p10, %p17567_p9 }
 0xf3d   : > { %p17565_p8 = pneg %p17564_p7 }
 0xf3e   : > { %p17571_p13 = por %p17570_p12, %p17569_p11 }
 0xf40   : > { %p17572_p0 = pnand %p17571_p13, %p17565_p8 }
 0xf42   : > { %17575 = shalt.err (!%p17572_p0)
}
 0xf43   : > { %s17614_s26 = smov 128   ;;  %s17615_s30 = smov 8  }
 0xf44   : > { %17170 = dma.vmem_to_hbm [thread:$0]  (%p17684_p5), %s21792_s6, 4096, %s21790_s8, %s21802_s9, %s17614_s26, %s17614_s26, %s17615_s30  }
 0xf45 PF: > { %p17176_p1 = scmp.ge.s32.totalorder %s17610_s21, 2  ;;  %s13332_s22 = sand.u32 1, %s17598_s18  }
 0xf46   : > { %s13333_s7 = scalar_lea.sflag [#allocation4], %s13332_s22 }
 0xf47   : > { %p17173_p2 = pnand %p17176_p1, %p17688_p6 }
 0xf49   : > { %17593 = dma.done.wait (!%p17173_p2), %s13333_s7, 4096  }
 0xf4a   : > { %17595 = vsyncadd (!%p17173_p2), %s13333_s7, 4294963200  ;;  %p15_p3 = scmp.ge.s32.totalorder %s17671_s24, 4   ;;  %s21851_s18 = smov %s17602_s19 }
 0xf4b   : > { %s21852_s19 = smov %s17606_s20  ;;  %s21853_s20 = smov %s17682_s27 }
 0xf4c   : > { %s21854_s21 = smov %s17671_s24  ;;  %17 = sbr.rel (!%p15_p3) target bundleno = 3 (0x3), region = 121 }
 0xf53   :  { %13338 = vsyncpa [#allocation4], 1 }
 0xf54   :  { %13340 = vsyncpa [#allocation4 + $0x1], 1 }

</bundles_post_ra>
